<compile_context>
chip_gen: v6e
topology: v6e:2x2x1
jax: 0.10.0
libtpu: 0.0.40
codegen_flags: <defaults>
</compile_context>

<pallas_src>
import functools

import jax
import jax.numpy as jnp
from jax.experimental import pallas as pl
from jax.experimental.pallas import tpu as pltpu


# ------------------------------ fused kernel ---------------------------------
def seq2seq_kernel(xe_ref, xd_ref,
                   wih_f_ref, whh_f_ref, bih_f_ref, bhh_f_ref,
                   wih_b_ref, whh_b_ref, bih_b_ref, bhh_b_ref,
                   wih_d_ref, whh_d_ref, bih_d_ref, bhh_d_ref,
                   wa1_ref, wa2_ref, ba_ref, wfc_ref, bfc_ref,
                   logits_ref, hid_ref):
    Te, Bp, _ = xe_ref.shape
    Td = xd_ref.shape[0]
    HP = whh_f_ref.shape[0]            # lane-aligned (128-padded) hidden width
    f32 = jnp.float32

    def run_gru(x_ref, T, wih_ref, whh_ref, bih_ref, bhh_ref, h0, reverse):
        # Hoisted input projection: one large MXU call for all timesteps,
        # removed from the serial h-dependency chain.
        x2 = x_ref[...].reshape(T * Bp, -1)
        gi = jnp.dot(x2, wih_ref[...], preferred_element_type=f32) + bih_ref[...]
        gi = gi.reshape(T, Bp, 3 * HP)
        whh = whh_ref[...]
        bhh = bhh_ref[...]
        outs = [None] * T
        h = h0
        # T is small & static: fully unroll so the scheduler can overlap the
        # VPU gate math of step t with the MXU push of step t+1.
        for s in range(T):
            t = (T - 1 - s) if reverse else s
            g = gi[t]                                              # (Bp, 3*HP)
            gh = jnp.dot(h, whh, preferred_element_type=f32) + bhh  # fused gates
            r = jax.nn.sigmoid(g[:, 0:HP] + gh[:, 0:HP])
            z = jax.nn.sigmoid(g[:, HP:2 * HP] + gh[:, HP:2 * HP])
            n = jnp.tanh(g[:, 2 * HP:3 * HP] + r * gh[:, 2 * HP:3 * HP])
            h = (1.0 - z) * n + z * h
            outs[t] = h
        return outs, h

    zeros_h = jnp.zeros((Bp, HP), f32)
    # Bidirectional encoder. The backward direction's weights are packed at a
    # lane offset of H, so its hidden state lives in lanes [H:2H] and the
    # PyTorch feature-concat of (fwd, bwd) is just an elementwise add.
    out_f, h_f = run_gru(xe_ref, Te, wih_f_ref, whh_f_ref, bih_f_ref, bhh_f_ref,
                         zeros_h, reverse=False)
    out_b, h_b = run_gru(xe_ref, Te, wih_b_ref, whh_b_ref, bih_b_ref, bhh_b_ref,
                         zeros_h, reverse=True)
    enc_list = [out_f[t] + out_b[t] for t in range(Te)]   # (Bp, HP) each
    h0_dec = h_f + h_b                                    # cat(h_fwd, h_bwd)

    out_d, h_d = run_gru(xd_ref, Td, wih_d_ref, whh_d_ref, bih_d_ref, bhh_d_ref,
                         h0_dec, reverse=False)
    hid_ref[...] = h_d

    # ---- attention + tanh(Linear) + Linear on VMEM-resident intermediates ----
    enc = jnp.stack(enc_list, axis=1)         # (Bp, Te, HP)
    dec = jnp.stack(out_d, axis=1)            # (Bp, Td, HP)
    a = jnp.einsum('bed,btd->bet', enc, dec, preferred_element_type=f32)
    a = a - jnp.max(a, axis=1, keepdims=True)
    ea = jnp.exp(a)
    sa = ea / jnp.sum(ea, axis=1, keepdims=True)          # softmax over enc time
    c = jnp.einsum('bet,bed->btd', sa, enc, preferred_element_type=f32)
    # concat([dec, c]) @ W_attn^T  ==  dec @ W1 + c @ W2   (no in-kernel concat)
    h_att = jnp.tanh(
        jnp.einsum('btd,do->bto', dec, wa1_ref[...], preferred_element_type=f32)
        + jnp.einsum('btd,do->bto', c, wa2_ref[...], preferred_element_type=f32)
        + ba_ref[...])
    logits_ref[...] = (jnp.einsum('bto,ov->btv', h_att, wfc_ref[...],
                                  preferred_element_type=f32) + bfc_ref[...])


# --------------------------- one-time weight packing --------------------------
def _pack_gru(w_ih, w_hh, b_ih, b_hh, h_real, off, EP, HP):
    """PyTorch GRU params (3H, E)/(3H, H)/(3H,) -> lane-padded, pre-transposed,
    gate-fused (EP, 3*HP)/(HP, 3*HP)/(1, 3*HP) with the real block at lane
    offset `off` inside each 128-wide gate slot."""
    e = w_ih.shape[1]
    wih = jnp.zeros((EP, 3 * HP), jnp.float32)
    whh = jnp.zeros((HP, 3 * HP), jnp.float32)
    bih = jnp.zeros((1, 3 * HP), jnp.float32)
    bhh = jnp.zeros((1, 3 * HP), jnp.float32)
    for g in range(3):
        c0 = g * HP + off
        wih = wih.at[:e, c0:c0 + h_real].set(w_ih[g * h_real:(g + 1) * h_real, :].T)
        whh = whh.at[off:off + h_real, c0:c0 + h_real].set(
            w_hh[g * h_real:(g + 1) * h_real, :].T)
        bih = bih.at[0, c0:c0 + h_real].set(b_ih[g * h_real:(g + 1) * h_real])
        bhh = bhh.at[0, c0:c0 + h_real].set(b_hh[g * h_real:(g + 1) * h_real])
    return wih, whh, bih, bhh


def pack_params(params, H):
    LANE = 128
    EP = LANE
    H2 = 2 * H
    HP = ((H2 + LANE - 1) // LANE) * LANE
    V = params['fc_w'].shape[0]
    VP = ((V + LANE - 1) // LANE) * LANE
    assert params['enc_emb'].shape[1] <= EP and H2 <= HP

    def pad_table(t):
        return jnp.zeros((t.shape[0], EP), jnp.float32).at[:, :t.shape[1]].set(t)

    packed = {'enc_emb': pad_table(params['enc_emb']),
              'dec_emb': pad_table(params['dec_emb'])}
    (packed['wih_f'], packed['whh_f'], packed['bih_f'], packed['bhh_f']) = _pack_gru(
        params['enc_wih_f'], params['enc_whh_f'], params['enc_bih_f'],
        params['enc_bhh_f'], H, 0, EP, HP)
    (packed['wih_b'], packed['whh_b'], packed['bih_b'], packed['bhh_b']) = _pack_gru(
        params['enc_wih_b'], params['enc_whh_b'], params['enc_bih_b'],
        params['enc_bhh_b'], H, H, EP, HP)      # backward dir at lane offset H
    (packed['wih_d'], packed['whh_d'], packed['bih_d'], packed['bhh_d']) = _pack_gru(
        params['dec_wih'], params['dec_whh'], params['dec_bih'],
        params['dec_bhh'], H2, 0, EP, HP)
    waT = params['attn_fc_w'].T                                   # (4H, 2H)
    packed['wa1'] = jnp.zeros((HP, HP), jnp.float32).at[:H2, :H2].set(waT[:H2])
    packed['wa2'] = jnp.zeros((HP, HP), jnp.float32).at[:H2, :H2].set(waT[H2:])
    packed['ba'] = jnp.zeros((1, HP), jnp.float32).at[0, :H2].set(params['attn_fc_b'])
    packed['wfc'] = jnp.zeros((HP, VP), jnp.float32).at[:H2, :V].set(params['fc_w'].T)
    packed['bfc'] = jnp.zeros((1, VP), jnp.float32).at[0, :V].set(params['fc_b'])
    return packed


# ----------------------------- model forward ----------------------------------
@functools.partial(jax.jit, static_argnames=('H', 'V'))
def seq2seq_forward(packed, e_tok, d_tok, *, H, V):
    B, Te = e_tok.shape
    Td = d_tok.shape[1]
    BP = ((B + 7) // 8) * 8                      # sublane-dense batch
    EP = packed['wih_f'].shape[0]
    HP = packed['whh_f'].shape[0]
    VP = packed['bfc'].shape[1]

    # TODO(synk): embedding gather stays in plain JAX glue (data-dependent
    # gather at tiny vocab size; no clean tile-based Pallas equivalent needed).
    emb_e = jnp.take(packed['enc_emb'], e_tok, axis=0)       # (B, Te, EP)
    emb_d = jnp.take(packed['dec_emb'], d_tok, axis=0)       # (B, Td, EP)
    xe = jnp.zeros((Te, BP, EP), jnp.float32).at[:, :B, :].set(
        jnp.transpose(emb_e, (1, 0, 2)))
    xd = jnp.zeros((Td, BP, EP), jnp.float32).at[:, :B, :].set(
        jnp.transpose(emb_d, (1, 0, 2)))

    vmem = pl.BlockSpec(memory_space=pltpu.MemorySpace.VMEM)
    logits_p, hid_p = pl.pallas_call(
        seq2seq_kernel,
        out_shape=(jax.ShapeDtypeStruct((BP, Td, VP), jnp.float32),
                   jax.ShapeDtypeStruct((BP, HP), jnp.float32)),
        in_specs=[vmem] * 19,
        out_specs=(vmem, vmem),
    )(xe, xd,
      packed['wih_f'], packed['whh_f'], packed['bih_f'], packed['bhh_f'],
      packed['wih_b'], packed['whh_b'], packed['bih_b'], packed['bhh_b'],
      packed['wih_d'], packed['whh_d'], packed['bih_d'], packed['bhh_d'],
      packed['wa1'], packed['wa2'], packed['ba'], packed['wfc'], packed['bfc'])

    logits = logits_p[:B, :, :V]                 # drop lane/sublane padding
    hidden = hid_p[:B, :2 * H][None]             # (1, B, 2H) like nn.GRU hidden
    return logits, hidden


# ----------------------------- pure-JAX reference ------------------------------
def _ref_gru(x_tm, h0, w_ih, w_hh, b_ih, b_hh):
    def step(h, x_t):
        gi = x_t @ w_ih.T + b_ih
        gh = h @ w_hh.T + b_hh
        i_r, i_z, i_n = jnp.split(gi, 3, -1)
        h_r, h_z, h_n = jnp.split(gh, 3, -1)
        r = jax.nn.sigmoid(i_r + h_r)
        z = jax.nn.sigmoid(i_z + h_z)
        n = jnp.tanh(i_n + r * h_n)
        hn = (1.0 - z) * n + z * h
        return hn, hn
    hT, outs = jax.lax.scan(step, h0, x_tm)
    return outs, hT


def ref_forward(params, e_tok, d_tok, H):
    B = e_tok.shape[0]
    x = jnp.transpose(params['enc_emb'][e_tok], (1, 0, 2))
    h0 = jnp.zeros((B, H), jnp.float32)
    out_f, h_f = _ref_gru(x, h0, params['enc_wih_f'], params['enc_whh_f'],
                          params['enc_bih_f'], params['enc_bhh_f'])
    out_b_r, h_b = _ref_gru(jnp.flip(x, 0), h0, params['enc_wih_b'],
                            params['enc_whh_b'], params['enc_bih_b'],
                            params['enc_bhh_b'])
    out_e = jnp.transpose(jnp.concatenate([out_f, jnp.flip(out_b_r, 0)], -1), (1, 0, 2))
    hidden_e = jnp.concatenate([h_f, h_b], -1)
    xd = jnp.transpose(params['dec_emb'][d_tok], (1, 0, 2))
    out_d_tm, hidden_d = _ref_gru(xd, hidden_e, params['dec_wih'], params['dec_whh'],
                                  params['dec_bih'], params['dec_bhh'])
    out_d = jnp.transpose(out_d_tm, (1, 0, 2))
    a = jnp.einsum('bed,btd->bet', out_e, out_d)
    sa = jax.nn.softmax(a, axis=1)
    c = jnp.einsum('bet,bed->btd', sa, out_e)
    cat = jnp.concatenate([out_d, c], -1)
    h = jnp.tanh(cat @ params['attn_fc_w'].T + params['attn_fc_b'])
    logits = h @ params['fc_w'].T + params['fc_b']
    return logits, hidden_d[None]


# ----------------------------- params -----------------------------------------
def init_params(key, input_e, input_d, emb, H):
    ks = jax.random.split(key, 18)
    def rnd(k, shape, s=0.1):
        return (jax.random.normal(k, shape) * s).astype(jnp.float32)
    H2 = 2 * H
    return {
        'enc_emb':   rnd(ks[0], (input_e, emb)),
        'enc_wih_f': rnd(ks[1], (3 * H, emb)), 'enc_whh_f': rnd(ks[2], (3 * H, H)),
        'enc_bih_f': rnd(ks[3], (3 * H,)),     'enc_bhh_f': rnd(ks[4], (3 * H,)),
        'enc_wih_b': rnd(ks[5], (3 * H, emb)), 'enc_whh_b': rnd(ks[6], (3 * H, H)),
        'enc_bih_b': rnd(ks[7], (3 * H,)),     'enc_bhh_b': rnd(ks[8], (3 * H,)),
        'dec_emb':   rnd(ks[9], (input_d, emb)),
        'dec_wih':   rnd(ks[10], (3 * H2, emb)), 'dec_whh': rnd(ks[11], (3 * H2, H2)),
        'dec_bih':   rnd(ks[12], (3 * H2,)),     'dec_bhh': rnd(ks[13], (3 * H2,)),
        'attn_fc_w': rnd(ks[14], (H2, 4 * H)),   'attn_fc_b': rnd(ks[15], (H2,)),
        'fc_w':      rnd(ks[16], (input_d, H2)), 'fc_b':      rnd(ks[17], (input_d,)),
    }


if __name__ == "__main__":
    INPUT_E, INPUT_D, EMB, H = 11, 13, 8, 16
    B, Te, Td = 2, 6, 5

    key = jax.random.PRNGKey(0)
    pkey, ekey, dkey = jax.random.split(key, 3)
    params = init_params(pkey, INPUT_E, INPUT_D, EMB, H)
    e_tok = jax.random.randint(ekey, (B, Te), 0, INPUT_E, dtype=jnp.int32)
    d_tok = jax.random.randint(dkey, (B, Td), 0, INPUT_D, dtype=jnp.int32)

    packed = pack_params(params, H)                 # one-time weight packing
    out_d, hidden_d = seq2seq_forward(packed, e_tok, d_tok, H=H, V=INPUT_D)
    out_d = jax.block_until_ready(out_d)
    hidden_d = jax.block_until_ready(hidden_d)

    ref_out, ref_hid = ref_forward(params, e_tok, d_tok, H)

    assert out_d.shape == (B, Td, INPUT_D), out_d.shape
    assert hidden_d.shape == (1, B, 2 * H), hidden_d.shape
    assert jnp.allclose(out_d, ref_out, atol=1e-4, rtol=1e-4)
    assert jnp.allclose(hidden_d, ref_hid, atol=1e-4, rtol=1e-4)
    print("KERNEL_OK")
</pallas_src>

<mosaic_0001>
module attributes {stable_mosaic.version = 11 : i64} {
  func.func @seq2seq_kernel(%arg0: memref<6x8x128xf32, #tpu.memory_space<vmem>>, %arg1: memref<5x8x128xf32, #tpu.memory_space<vmem>>, %arg2: memref<128x384xf32, #tpu.memory_space<vmem>>, %arg3: memref<128x384xf32, #tpu.memory_space<vmem>>, %arg4: memref<1x384xf32, #tpu.memory_space<vmem>>, %arg5: memref<1x384xf32, #tpu.memory_space<vmem>>, %arg6: memref<128x384xf32, #tpu.memory_space<vmem>>, %arg7: memref<128x384xf32, #tpu.memory_space<vmem>>, %arg8: memref<1x384xf32, #tpu.memory_space<vmem>>, %arg9: memref<1x384xf32, #tpu.memory_space<vmem>>, %arg10: memref<128x384xf32, #tpu.memory_space<vmem>>, %arg11: memref<128x384xf32, #tpu.memory_space<vmem>>, %arg12: memref<1x384xf32, #tpu.memory_space<vmem>>, %arg13: memref<1x384xf32, #tpu.memory_space<vmem>>, %arg14: memref<128x128xf32, #tpu.memory_space<vmem>>, %arg15: memref<128x128xf32, #tpu.memory_space<vmem>>, %arg16: memref<1x128xf32, #tpu.memory_space<vmem>>, %arg17: memref<128x128xf32, #tpu.memory_space<vmem>>, %arg18: memref<1x128xf32, #tpu.memory_space<vmem>>, %arg19: memref<8x5x128xf32, #tpu.memory_space<vmem>>, %arg20: memref<8x128xf32, #tpu.memory_space<vmem>>) attributes {dimension_semantics = [], scalar_prefetch = 0 : i64, scratch_operands = 0 : i64, tpu.core_type = #tpu.core_type<tc>} {
    %cst = arith.constant 0.000000e+00 : f32
    %0 = vector.broadcast %cst : f32 to vector<8x128xf32>
    %c0 = arith.constant 0 : index
    %c0_0 = arith.constant 0 : index
    %c0_1 = arith.constant 0 : index
    %1 = vector.load %arg0[%c0, %c0_0, %c0_1] : memref<6x8x128xf32, #tpu.memory_space<vmem>>, vector<6x8x128xf32>
    %2 = vector.shape_cast %1 : vector<6x8x128xf32> to vector<48x128xf32>
    %c0_2 = arith.constant 0 : index
    %c0_3 = arith.constant 0 : index
    %3 = vector.load %arg2[%c0_2, %c0_3] : memref<128x384xf32, #tpu.memory_space<vmem>>, vector<128x384xf32>
    %cst_4 = arith.constant dense<0.000000e+00> : vector<48x384xf32>
    %4 = tpu.matmul %2, %3, %cst_4 {dimension_numbers = #tpu.dot_dimension_numbers<[1], [0], [0], [1], [0, 0, 1, 1], [], []>} : vector<48x128xf32>, vector<128x384xf32>, vector<48x384xf32> -> vector<48x384xf32>
    %c0_5 = arith.constant 0 : index
    %c0_6 = arith.constant 0 : index
    %5 = vector.load %arg4[%c0_5, %c0_6] : memref<1x384xf32, #tpu.memory_space<vmem>>, vector<1x384xf32>
    %6 = vector.broadcast %5 : vector<1x384xf32> to vector<48x384xf32>
    %7 = arith.addf %4, %6 : vector<48x384xf32>
    %8 = vector.shape_cast %7 : vector<48x384xf32> to vector<6x8x384xf32>
    %c0_7 = arith.constant 0 : index
    %c0_8 = arith.constant 0 : index
    %9 = vector.load %arg3[%c0_7, %c0_8] : memref<128x384xf32, #tpu.memory_space<vmem>>, vector<128x384xf32>
    %c0_9 = arith.constant 0 : index
    %c0_10 = arith.constant 0 : index
    %10 = vector.load %arg5[%c0_9, %c0_10] : memref<1x384xf32, #tpu.memory_space<vmem>>, vector<1x384xf32>
    %11 = vector.extract_strided_slice %8 {offsets = [0, 0, 0], sizes = [1, 8, 384], strides = [1, 1, 1]} : vector<6x8x384xf32> to vector<1x8x384xf32>
    %12 = vector.shape_cast %11 : vector<1x8x384xf32> to vector<8x384xf32>
    %cst_11 = arith.constant dense<0.000000e+00> : vector<8x384xf32>
    %13 = tpu.matmul %0, %9, %cst_11 {dimension_numbers = #tpu.dot_dimension_numbers<[1], [0], [0], [1], [0, 0, 1, 1], [], []>} : vector<8x128xf32>, vector<128x384xf32>, vector<8x384xf32> -> vector<8x384xf32>
    %14 = vector.broadcast %10 : vector<1x384xf32> to vector<8x384xf32>
    %15 = arith.addf %13, %14 : vector<8x384xf32>
    %16 = vector.extract_strided_slice %12 {offsets = [0, 0], sizes = [8, 128], strides = [1, 1]} : vector<8x384xf32> to vector<8x128xf32>
    %17 = vector.extract_strided_slice %15 {offsets = [0, 0], sizes = [8, 128], strides = [1, 1]} : vector<8x384xf32> to vector<8x128xf32>
    %18 = arith.addf %16, %17 : vector<8x128xf32>
    %19 = arith.negf %18 : vector<8x128xf32>
    %20 = math.exp %19 : vector<8x128xf32>
    %cst_12 = arith.constant 1.000000e+00 : f32
    %21 = vector.broadcast %cst_12 : f32 to vector<8x128xf32>
    %22 = arith.addf %21, %20 : vector<8x128xf32>
    %23 = arith.divf %21, %22 : vector<8x128xf32>
    %24 = vector.extract_strided_slice %12 {offsets = [0, 128], sizes = [8, 128], strides = [1, 1]} : vector<8x384xf32> to vector<8x128xf32>
    %25 = vector.extract_strided_slice %15 {offsets = [0, 128], sizes = [8, 128], strides = [1, 1]} : vector<8x384xf32> to vector<8x128xf32>
    %26 = arith.addf %24, %25 : vector<8x128xf32>
    %27 = arith.negf %26 : vector<8x128xf32>
    %28 = math.exp %27 : vector<8x128xf32>
    %cst_13 = arith.constant 1.000000e+00 : f32
    %29 = vector.broadcast %cst_13 : f32 to vector<8x128xf32>
    %30 = arith.addf %29, %28 : vector<8x128xf32>
    %31 = arith.divf %29, %30 : vector<8x128xf32>
    %32 = vector.extract_strided_slice %12 {offsets = [0, 256], sizes = [8, 128], strides = [1, 1]} : vector<8x384xf32> to vector<8x128xf32>
    %33 = vector.extract_strided_slice %15 {offsets = [0, 256], sizes = [8, 128], strides = [1, 1]} : vector<8x384xf32> to vector<8x128xf32>
    %34 = arith.mulf %23, %33 : vector<8x128xf32>
    %35 = arith.addf %32, %34 : vector<8x128xf32>
    %36 = math.tanh %35 : vector<8x128xf32>
    %cst_14 = arith.constant 1.000000e+00 : f32
    %37 = vector.broadcast %cst_14 : f32 to vector<8x128xf32>
    %38 = arith.subf %37, %31 : vector<8x128xf32>
    %39 = arith.mulf %38, %36 : vector<8x128xf32>
    %40 = arith.mulf %31, %0 : vector<8x128xf32>
    %41 = arith.addf %39, %40 : vector<8x128xf32>
    %42 = vector.extract_strided_slice %8 {offsets = [1, 0, 0], sizes = [1, 8, 384], strides = [1, 1, 1]} : vector<6x8x384xf32> to vector<1x8x384xf32>
    %43 = vector.shape_cast %42 : vector<1x8x384xf32> to vector<8x384xf32>
    %cst_15 = arith.constant dense<0.000000e+00> : vector<8x384xf32>
    %44 = tpu.matmul %41, %9, %cst_15 {dimension_numbers = #tpu.dot_dimension_numbers<[1], [0], [0], [1], [0, 0, 1, 1], [], []>} : vector<8x128xf32>, vector<128x384xf32>, vector<8x384xf32> -> vector<8x384xf32>
    %45 = vector.broadcast %10 : vector<1x384xf32> to vector<8x384xf32>
    %46 = arith.addf %44, %45 : vector<8x384xf32>
    %47 = vector.extract_strided_slice %43 {offsets = [0, 0], sizes = [8, 128], strides = [1, 1]} : vector<8x384xf32> to vector<8x128xf32>
    %48 = vector.extract_strided_slice %46 {offsets = [0, 0], sizes = [8, 128], strides = [1, 1]} : vector<8x384xf32> to vector<8x128xf32>
    %49 = arith.addf %47, %48 : vector<8x128xf32>
    %50 = arith.negf %49 : vector<8x128xf32>
    %51 = math.exp %50 : vector<8x128xf32>
    %cst_16 = arith.constant 1.000000e+00 : f32
    %52 = vector.broadcast %cst_16 : f32 to vector<8x128xf32>
    %53 = arith.addf %52, %51 : vector<8x128xf32>
    %54 = arith.divf %52, %53 : vector<8x128xf32>
    %55 = vector.extract_strided_slice %43 {offsets = [0, 128], sizes = [8, 128], strides = [1, 1]} : vector<8x384xf32> to vector<8x128xf32>
    %56 = vector.extract_strided_slice %46 {offsets = [0, 128], sizes = [8, 128], strides = [1, 1]} : vector<8x384xf32> to vector<8x128xf32>
    %57 = arith.addf %55, %56 : vector<8x128xf32>
    %58 = arith.negf %57 : vector<8x128xf32>
    %59 = math.exp %58 : vector<8x128xf32>
    %cst_17 = arith.constant 1.000000e+00 : f32
    %60 = vector.broadcast %cst_17 : f32 to vector<8x128xf32>
    %61 = arith.addf %60, %59 : vector<8x128xf32>
    %62 = arith.divf %60, %61 : vector<8x128xf32>
    %63 = vector.extract_strided_slice %43 {offsets = [0, 256], sizes = [8, 128], strides = [1, 1]} : vector<8x384xf32> to vector<8x128xf32>
    %64 = vector.extract_strided_slice %46 {offsets = [0, 256], sizes = [8, 128], strides = [1, 1]} : vector<8x384xf32> to vector<8x128xf32>
    %65 = arith.mulf %54, %64 : vector<8x128xf32>
    %66 = arith.addf %63, %65 : vector<8x128xf32>
    %67 = math.tanh %66 : vector<8x128xf32>
    %cst_18 = arith.constant 1.000000e+00 : f32
    %68 = vector.broadcast %cst_18 : f32 to vector<8x128xf32>
    %69 = arith.subf %68, %62 : vector<8x128xf32>
    %70 = arith.mulf %69, %67 : vector<8x128xf32>
    %71 = arith.mulf %62, %41 : vector<8x128xf32>
    %72 = arith.addf %70, %71 : vector<8x128xf32>
    %73 = vector.extract_strided_slice %8 {offsets = [2, 0, 0], sizes = [1, 8, 384], strides = [1, 1, 1]} : vector<6x8x384xf32> to vector<1x8x384xf32>
    %74 = vector.shape_cast %73 : vector<1x8x384xf32> to vector<8x384xf32>
    %cst_19 = arith.constant dense<0.000000e+00> : vector<8x384xf32>
    %75 = tpu.matmul %72, %9, %cst_19 {dimension_numbers = #tpu.dot_dimension_numbers<[1], [0], [0], [1], [0, 0, 1, 1], [], []>} : vector<8x128xf32>, vector<128x384xf32>, vector<8x384xf32> -> vector<8x384xf32>
    %76 = vector.broadcast %10 : vector<1x384xf32> to vector<8x384xf32>
    %77 = arith.addf %75, %76 : vector<8x384xf32>
    %78 = vector.extract_strided_slice %74 {offsets = [0, 0], sizes = [8, 128], strides = [1, 1]} : vector<8x384xf32> to vector<8x128xf32>
    %79 = vector.extract_strided_slice %77 {offsets = [0, 0], sizes = [8, 128], strides = [1, 1]} : vector<8x384xf32> to vector<8x128xf32>
    %80 = arith.addf %78, %79 : vector<8x128xf32>
    %81 = arith.negf %80 : vector<8x128xf32>
    %82 = math.exp %81 : vector<8x128xf32>
    %cst_20 = arith.constant 1.000000e+00 : f32
    %83 = vector.broadcast %cst_20 : f32 to vector<8x128xf32>
    %84 = arith.addf %83, %82 : vector<8x128xf32>
    %85 = arith.divf %83, %84 : vector<8x128xf32>
    %86 = vector.extract_strided_slice %74 {offsets = [0, 128], sizes = [8, 128], strides = [1, 1]} : vector<8x384xf32> to vector<8x128xf32>
    %87 = vector.extract_strided_slice %77 {offsets = [0, 128], sizes = [8, 128], strides = [1, 1]} : vector<8x384xf32> to vector<8x128xf32>
    %88 = arith.addf %86, %87 : vector<8x128xf32>
    %89 = arith.negf %88 : vector<8x128xf32>
    %90 = math.exp %89 : vector<8x128xf32>
    %cst_21 = arith.constant 1.000000e+00 : f32
    %91 = vector.broadcast %cst_21 : f32 to vector<8x128xf32>
    %92 = arith.addf %91, %90 : vector<8x128xf32>
    %93 = arith.divf %91, %92 : vector<8x128xf32>
    %94 = vector.extract_strided_slice %74 {offsets = [0, 256], sizes = [8, 128], strides = [1, 1]} : vector<8x384xf32> to vector<8x128xf32>
    %95 = vector.extract_strided_slice %77 {offsets = [0, 256], sizes = [8, 128], strides = [1, 1]} : vector<8x384xf32> to vector<8x128xf32>
    %96 = arith.mulf %85, %95 : vector<8x128xf32>
    %97 = arith.addf %94, %96 : vector<8x128xf32>
    %98 = math.tanh %97 : vector<8x128xf32>
    %cst_22 = arith.constant 1.000000e+00 : f32
    %99 = vector.broadcast %cst_22 : f32 to vector<8x128xf32>
    %100 = arith.subf %99, %93 : vector<8x128xf32>
    %101 = arith.mulf %100, %98 : vector<8x128xf32>
    %102 = arith.mulf %93, %72 : vector<8x128xf32>
    %103 = arith.addf %101, %102 : vector<8x128xf32>
    %104 = vector.extract_strided_slice %8 {offsets = [3, 0, 0], sizes = [1, 8, 384], strides = [1, 1, 1]} : vector<6x8x384xf32> to vector<1x8x384xf32>
    %105 = vector.shape_cast %104 : vector<1x8x384xf32> to vector<8x384xf32>
    %cst_23 = arith.constant dense<0.000000e+00> : vector<8x384xf32>
    %106 = tpu.matmul %103, %9, %cst_23 {dimension_numbers = #tpu.dot_dimension_numbers<[1], [0], [0], [1], [0, 0, 1, 1], [], []>} : vector<8x128xf32>, vector<128x384xf32>, vector<8x384xf32> -> vector<8x384xf32>
    %107 = vector.broadcast %10 : vector<1x384xf32> to vector<8x384xf32>
    %108 = arith.addf %106, %107 : vector<8x384xf32>
    %109 = vector.extract_strided_slice %105 {offsets = [0, 0], sizes = [8, 128], strides = [1, 1]} : vector<8x384xf32> to vector<8x128xf32>
    %110 = vector.extract_strided_slice %108 {offsets = [0, 0], sizes = [8, 128], strides = [1, 1]} : vector<8x384xf32> to vector<8x128xf32>
    %111 = arith.addf %109, %110 : vector<8x128xf32>
    %112 = arith.negf %111 : vector<8x128xf32>
    %113 = math.exp %112 : vector<8x128xf32>
    %cst_24 = arith.constant 1.000000e+00 : f32
    %114 = vector.broadcast %cst_24 : f32 to vector<8x128xf32>
    %115 = arith.addf %114, %113 : vector<8x128xf32>
    %116 = arith.divf %114, %115 : vector<8x128xf32>
    %117 = vector.extract_strided_slice %105 {offsets = [0, 128], sizes = [8, 128], strides = [1, 1]} : vector<8x384xf32> to vector<8x128xf32>
    %118 = vector.extract_strided_slice %108 {offsets = [0, 128], sizes = [8, 128], strides = [1, 1]} : vector<8x384xf32> to vector<8x128xf32>
    %119 = arith.addf %117, %118 : vector<8x128xf32>
    %120 = arith.negf %119 : vector<8x128xf32>
    %121 = math.exp %120 : vector<8x128xf32>
    %cst_25 = arith.constant 1.000000e+00 : f32
    %122 = vector.broadcast %cst_25 : f32 to vector<8x128xf32>
    %123 = arith.addf %122, %121 : vector<8x128xf32>
    %124 = arith.divf %122, %123 : vector<8x128xf32>
    %125 = vector.extract_strided_slice %105 {offsets = [0, 256], sizes = [8, 128], strides = [1, 1]} : vector<8x384xf32> to vector<8x128xf32>
    %126 = vector.extract_strided_slice %108 {offsets = [0, 256], sizes = [8, 128], strides = [1, 1]} : vector<8x384xf32> to vector<8x128xf32>
    %127 = arith.mulf %116, %126 : vector<8x128xf32>
    %128 = arith.addf %125, %127 : vector<8x128xf32>
    %129 = math.tanh %128 : vector<8x128xf32>
    %cst_26 = arith.constant 1.000000e+00 : f32
    %130 = vector.broadcast %cst_26 : f32 to vector<8x128xf32>
    %131 = arith.subf %130, %124 : vector<8x128xf32>
    %132 = arith.mulf %131, %129 : vector<8x128xf32>
    %133 = arith.mulf %124, %103 : vector<8x128xf32>
    %134 = arith.addf %132, %133 : vector<8x128xf32>
    %135 = vector.extract_strided_slice %8 {offsets = [4, 0, 0], sizes = [1, 8, 384], strides = [1, 1, 1]} : vector<6x8x384xf32> to vector<1x8x384xf32>
    %136 = vector.shape_cast %135 : vector<1x8x384xf32> to vector<8x384xf32>
    %cst_27 = arith.constant dense<0.000000e+00> : vector<8x384xf32>
    %137 = tpu.matmul %134, %9, %cst_27 {dimension_numbers = #tpu.dot_dimension_numbers<[1], [0], [0], [1], [0, 0, 1, 1], [], []>} : vector<8x128xf32>, vector<128x384xf32>, vector<8x384xf32> -> vector<8x384xf32>
    %138 = vector.broadcast %10 : vector<1x384xf32> to vector<8x384xf32>
    %139 = arith.addf %137, %138 : vector<8x384xf32>
    %140 = vector.extract_strided_slice %136 {offsets = [0, 0], sizes = [8, 128], strides = [1, 1]} : vector<8x384xf32> to vector<8x128xf32>
    %141 = vector.extract_strided_slice %139 {offsets = [0, 0], sizes = [8, 128], strides = [1, 1]} : vector<8x384xf32> to vector<8x128xf32>
    %142 = arith.addf %140, %141 : vector<8x128xf32>
    %143 = arith.negf %142 : vector<8x128xf32>
    %144 = math.exp %143 : vector<8x128xf32>
    %cst_28 = arith.constant 1.000000e+00 : f32
    %145 = vector.broadcast %cst_28 : f32 to vector<8x128xf32>
    %146 = arith.addf %145, %144 : vector<8x128xf32>
    %147 = arith.divf %145, %146 : vector<8x128xf32>
    %148 = vector.extract_strided_slice %136 {offsets = [0, 128], sizes = [8, 128], strides = [1, 1]} : vector<8x384xf32> to vector<8x128xf32>
    %149 = vector.extract_strided_slice %139 {offsets = [0, 128], sizes = [8, 128], strides = [1, 1]} : vector<8x384xf32> to vector<8x128xf32>
    %150 = arith.addf %148, %149 : vector<8x128xf32>
    %151 = arith.negf %150 : vector<8x128xf32>
    %152 = math.exp %151 : vector<8x128xf32>
    %cst_29 = arith.constant 1.000000e+00 : f32
    %153 = vector.broadcast %cst_29 : f32 to vector<8x128xf32>
    %154 = arith.addf %153, %152 : vector<8x128xf32>
    %155 = arith.divf %153, %154 : vector<8x128xf32>
    %156 = vector.extract_strided_slice %136 {offsets = [0, 256], sizes = [8, 128], strides = [1, 1]} : vector<8x384xf32> to vector<8x128xf32>
    %157 = vector.extract_strided_slice %139 {offsets = [0, 256], sizes = [8, 128], strides = [1, 1]} : vector<8x384xf32> to vector<8x128xf32>
    %158 = arith.mulf %147, %157 : vector<8x128xf32>
    %159 = arith.addf %156, %158 : vector<8x128xf32>
    %160 = math.tanh %159 : vector<8x128xf32>
    %cst_30 = arith.constant 1.000000e+00 : f32
    %161 = vector.broadcast %cst_30 : f32 to vector<8x128xf32>
    %162 = arith.subf %161, %155 : vector<8x128xf32>
    %163 = arith.mulf %162, %160 : vector<8x128xf32>
    %164 = arith.mulf %155, %134 : vector<8x128xf32>
    %165 = arith.addf %163, %164 : vector<8x128xf32>
    %166 = vector.extract_strided_slice %8 {offsets = [5, 0, 0], sizes = [1, 8, 384], strides = [1, 1, 1]} : vector<6x8x384xf32> to vector<1x8x384xf32>
    %167 = vector.shape_cast %166 : vector<1x8x384xf32> to vector<8x384xf32>
    %cst_31 = arith.constant dense<0.000000e+00> : vector<8x384xf32>
    %168 = tpu.matmul %165, %9, %cst_31 {dimension_numbers = #tpu.dot_dimension_numbers<[1], [0], [0], [1], [0, 0, 1, 1], [], []>} : vector<8x128xf32>, vector<128x384xf32>, vector<8x384xf32> -> vector<8x384xf32>
    %169 = vector.broadcast %10 : vector<1x384xf32> to vector<8x384xf32>
    %170 = arith.addf %168, %169 : vector<8x384xf32>
    %171 = vector.extract_strided_slice %167 {offsets = [0, 0], sizes = [8, 128], strides = [1, 1]} : vector<8x384xf32> to vector<8x128xf32>
    %172 = vector.extract_strided_slice %170 {offsets = [0, 0], sizes = [8, 128], strides = [1, 1]} : vector<8x384xf32> to vector<8x128xf32>
    %173 = arith.addf %171, %172 : vector<8x128xf32>
    %174 = arith.negf %173 : vector<8x128xf32>
    %175 = math.exp %174 : vector<8x128xf32>
    %cst_32 = arith.constant 1.000000e+00 : f32
    %176 = vector.broadcast %cst_32 : f32 to vector<8x128xf32>
    %177 = arith.addf %176, %175 : vector<8x128xf32>
    %178 = arith.divf %176, %177 : vector<8x128xf32>
    %179 = vector.extract_strided_slice %167 {offsets = [0, 128], sizes = [8, 128], strides = [1, 1]} : vector<8x384xf32> to vector<8x128xf32>
    %180 = vector.extract_strided_slice %170 {offsets = [0, 128], sizes = [8, 128], strides = [1, 1]} : vector<8x384xf32> to vector<8x128xf32>
    %181 = arith.addf %179, %180 : vector<8x128xf32>
    %182 = arith.negf %181 : vector<8x128xf32>
    %183 = math.exp %182 : vector<8x128xf32>
    %cst_33 = arith.constant 1.000000e+00 : f32
    %184 = vector.broadcast %cst_33 : f32 to vector<8x128xf32>
    %185 = arith.addf %184, %183 : vector<8x128xf32>
    %186 = arith.divf %184, %185 : vector<8x128xf32>
    %187 = vector.extract_strided_slice %167 {offsets = [0, 256], sizes = [8, 128], strides = [1, 1]} : vector<8x384xf32> to vector<8x128xf32>
    %188 = vector.extract_strided_slice %170 {offsets = [0, 256], sizes = [8, 128], strides = [1, 1]} : vector<8x384xf32> to vector<8x128xf32>
    %189 = arith.mulf %178, %188 : vector<8x128xf32>
    %190 = arith.addf %187, %189 : vector<8x128xf32>
    %191 = math.tanh %190 : vector<8x128xf32>
    %cst_34 = arith.constant 1.000000e+00 : f32
    %192 = vector.broadcast %cst_34 : f32 to vector<8x128xf32>
    %193 = arith.subf %192, %186 : vector<8x128xf32>
    %194 = arith.mulf %193, %191 : vector<8x128xf32>
    %195 = arith.mulf %186, %165 : vector<8x128xf32>
    %196 = arith.addf %194, %195 : vector<8x128xf32>
    %c0_35 = arith.constant 0 : index
    %c0_36 = arith.constant 0 : index
    %c0_37 = arith.constant 0 : index
    %197 = vector.load %arg0[%c0_35, %c0_36, %c0_37] : memref<6x8x128xf32, #tpu.memory_space<vmem>>, vector<6x8x128xf32>
    %198 = vector.shape_cast %197 : vector<6x8x128xf32> to vector<48x128xf32>
    %c0_38 = arith.constant 0 : index
    %c0_39 = arith.constant 0 : index
    %199 = vector.load %arg6[%c0_38, %c0_39] : memref<128x384xf32, #tpu.memory_space<vmem>>, vector<128x384xf32>
    %cst_40 = arith.constant dense<0.000000e+00> : vector<48x384xf32>
    %200 = tpu.matmul %198, %199, %cst_40 {dimension_numbers = #tpu.dot_dimension_numbers<[1], [0], [0], [1], [0, 0, 1, 1], [], []>} : vector<48x128xf32>, vector<128x384xf32>, vector<48x384xf32> -> vector<48x384xf32>
    %c0_41 = arith.constant 0 : index
    %c0_42 = arith.constant 0 : index
    %201 = vector.load %arg8[%c0_41, %c0_42] : memref<1x384xf32, #tpu.memory_space<vmem>>, vector<1x384xf32>
    %202 = vector.broadcast %201 : vector<1x384xf32> to vector<48x384xf32>
    %203 = arith.addf %200, %202 : vector<48x384xf32>
    %204 = vector.shape_cast %203 : vector<48x384xf32> to vector<6x8x384xf32>
    %c0_43 = arith.constant 0 : index
    %c0_44 = arith.constant 0 : index
    %205 = vector.load %arg7[%c0_43, %c0_44] : memref<128x384xf32, #tpu.memory_space<vmem>>, vector<128x384xf32>
    %c0_45 = arith.constant 0 : index
    %c0_46 = arith.constant 0 : index
    %206 = vector.load %arg9[%c0_45, %c0_46] : memref<1x384xf32, #tpu.memory_space<vmem>>, vector<1x384xf32>
    %207 = vector.extract_strided_slice %204 {offsets = [5, 0, 0], sizes = [1, 8, 384], strides = [1, 1, 1]} : vector<6x8x384xf32> to vector<1x8x384xf32>
    %208 = vector.shape_cast %207 : vector<1x8x384xf32> to vector<8x384xf32>
    %cst_47 = arith.constant dense<0.000000e+00> : vector<8x384xf32>
    %209 = tpu.matmul %0, %205, %cst_47 {dimension_numbers = #tpu.dot_dimension_numbers<[1], [0], [0], [1], [0, 0, 1, 1], [], []>} : vector<8x128xf32>, vector<128x384xf32>, vector<8x384xf32> -> vector<8x384xf32>
    %210 = vector.broadcast %206 : vector<1x384xf32> to vector<8x384xf32>
    %211 = arith.addf %209, %210 : vector<8x384xf32>
    %212 = vector.extract_strided_slice %208 {offsets = [0, 0], sizes = [8, 128], strides = [1, 1]} : vector<8x384xf32> to vector<8x128xf32>
    %213 = vector.extract_strided_slice %211 {offsets = [0, 0], sizes = [8, 128], strides = [1, 1]} : vector<8x384xf32> to vector<8x128xf32>
    %214 = arith.addf %212, %213 : vector<8x128xf32>
    %215 = arith.negf %214 : vector<8x128xf32>
    %216 = math.exp %215 : vector<8x128xf32>
    %cst_48 = arith.constant 1.000000e+00 : f32
    %217 = vector.broadcast %cst_48 : f32 to vector<8x128xf32>
    %218 = arith.addf %217, %216 : vector<8x128xf32>
    %219 = arith.divf %217, %218 : vector<8x128xf32>
    %220 = vector.extract_strided_slice %208 {offsets = [0, 128], sizes = [8, 128], strides = [1, 1]} : vector<8x384xf32> to vector<8x128xf32>
    %221 = vector.extract_strided_slice %211 {offsets = [0, 128], sizes = [8, 128], strides = [1, 1]} : vector<8x384xf32> to vector<8x128xf32>
    %222 = arith.addf %220, %221 : vector<8x128xf32>
    %223 = arith.negf %222 : vector<8x128xf32>
    %224 = math.exp %223 : vector<8x128xf32>
    %cst_49 = arith.constant 1.000000e+00 : f32
    %225 = vector.broadcast %cst_49 : f32 to vector<8x128xf32>
    %226 = arith.addf %225, %224 : vector<8x128xf32>
    %227 = arith.divf %225, %226 : vector<8x128xf32>
    %228 = vector.extract_strided_slice %208 {offsets = [0, 256], sizes = [8, 128], strides = [1, 1]} : vector<8x384xf32> to vector<8x128xf32>
    %229 = vector.extract_strided_slice %211 {offsets = [0, 256], sizes = [8, 128], strides = [1, 1]} : vector<8x384xf32> to vector<8x128xf32>
    %230 = arith.mulf %219, %229 : vector<8x128xf32>
    %231 = arith.addf %228, %230 : vector<8x128xf32>
    %232 = math.tanh %231 : vector<8x128xf32>
    %cst_50 = arith.constant 1.000000e+00 : f32
    %233 = vector.broadcast %cst_50 : f32 to vector<8x128xf32>
    %234 = arith.subf %233, %227 : vector<8x128xf32>
    %235 = arith.mulf %234, %232 : vector<8x128xf32>
    %236 = arith.mulf %227, %0 : vector<8x128xf32>
    %237 = arith.addf %235, %236 : vector<8x128xf32>
    %238 = vector.extract_strided_slice %204 {offsets = [4, 0, 0], sizes = [1, 8, 384], strides = [1, 1, 1]} : vector<6x8x384xf32> to vector<1x8x384xf32>
    %239 = vector.shape_cast %238 : vector<1x8x384xf32> to vector<8x384xf32>
    %cst_51 = arith.constant dense<0.000000e+00> : vector<8x384xf32>
    %240 = tpu.matmul %237, %205, %cst_51 {dimension_numbers = #tpu.dot_dimension_numbers<[1], [0], [0], [1], [0, 0, 1, 1], [], []>} : vector<8x128xf32>, vector<128x384xf32>, vector<8x384xf32> -> vector<8x384xf32>
    %241 = vector.broadcast %206 : vector<1x384xf32> to vector<8x384xf32>
    %242 = arith.addf %240, %241 : vector<8x384xf32>
    %243 = vector.extract_strided_slice %239 {offsets = [0, 0], sizes = [8, 128], strides = [1, 1]} : vector<8x384xf32> to vector<8x128xf32>
    %244 = vector.extract_strided_slice %242 {offsets = [0, 0], sizes = [8, 128], strides = [1, 1]} : vector<8x384xf32> to vector<8x128xf32>
    %245 = arith.addf %243, %244 : vector<8x128xf32>
    %246 = arith.negf %245 : vector<8x128xf32>
    %247 = math.exp %246 : vector<8x128xf32>
    %cst_52 = arith.constant 1.000000e+00 : f32
    %248 = vector.broadcast %cst_52 : f32 to vector<8x128xf32>
    %249 = arith.addf %248, %247 : vector<8x128xf32>
    %250 = arith.divf %248, %249 : vector<8x128xf32>
    %251 = vector.extract_strided_slice %239 {offsets = [0, 128], sizes = [8, 128], strides = [1, 1]} : vector<8x384xf32> to vector<8x128xf32>
    %252 = vector.extract_strided_slice %242 {offsets = [0, 128], sizes = [8, 128], strides = [1, 1]} : vector<8x384xf32> to vector<8x128xf32>
    %253 = arith.addf %251, %252 : vector<8x128xf32>
    %254 = arith.negf %253 : vector<8x128xf32>
    %255 = math.exp %254 : vector<8x128xf32>
    %cst_53 = arith.constant 1.000000e+00 : f32
    %256 = vector.broadcast %cst_53 : f32 to vector<8x128xf32>
    %257 = arith.addf %256, %255 : vector<8x128xf32>
    %258 = arith.divf %256, %257 : vector<8x128xf32>
    %259 = vector.extract_strided_slice %239 {offsets = [0, 256], sizes = [8, 128], strides = [1, 1]} : vector<8x384xf32> to vector<8x128xf32>
    %260 = vector.extract_strided_slice %242 {offsets = [0, 256], sizes = [8, 128], strides = [1, 1]} : vector<8x384xf32> to vector<8x128xf32>
    %261 = arith.mulf %250, %260 : vector<8x128xf32>
    %262 = arith.addf %259, %261 : vector<8x128xf32>
    %263 = math.tanh %262 : vector<8x128xf32>
    %cst_54 = arith.constant 1.000000e+00 : f32
    %264 = vector.broadcast %cst_54 : f32 to vector<8x128xf32>
    %265 = arith.subf %264, %258 : vector<8x128xf32>
    %266 = arith.mulf %265, %263 : vector<8x128xf32>
    %267 = arith.mulf %258, %237 : vector<8x128xf32>
    %268 = arith.addf %266, %267 : vector<8x128xf32>
    %269 = vector.extract_strided_slice %204 {offsets = [3, 0, 0], sizes = [1, 8, 384], strides = [1, 1, 1]} : vector<6x8x384xf32> to vector<1x8x384xf32>
    %270 = vector.shape_cast %269 : vector<1x8x384xf32> to vector<8x384xf32>
    %cst_55 = arith.constant dense<0.000000e+00> : vector<8x384xf32>
    %271 = tpu.matmul %268, %205, %cst_55 {dimension_numbers = #tpu.dot_dimension_numbers<[1], [0], [0], [1], [0, 0, 1, 1], [], []>} : vector<8x128xf32>, vector<128x384xf32>, vector<8x384xf32> -> vector<8x384xf32>
    %272 = vector.broadcast %206 : vector<1x384xf32> to vector<8x384xf32>
    %273 = arith.addf %271, %272 : vector<8x384xf32>
    %274 = vector.extract_strided_slice %270 {offsets = [0, 0], sizes = [8, 128], strides = [1, 1]} : vector<8x384xf32> to vector<8x128xf32>
    %275 = vector.extract_strided_slice %273 {offsets = [0, 0], sizes = [8, 128], strides = [1, 1]} : vector<8x384xf32> to vector<8x128xf32>
    %276 = arith.addf %274, %275 : vector<8x128xf32>
    %277 = arith.negf %276 : vector<8x128xf32>
    %278 = math.exp %277 : vector<8x128xf32>
    %cst_56 = arith.constant 1.000000e+00 : f32
    %279 = vector.broadcast %cst_56 : f32 to vector<8x128xf32>
    %280 = arith.addf %279, %278 : vector<8x128xf32>
    %281 = arith.divf %279, %280 : vector<8x128xf32>
    %282 = vector.extract_strided_slice %270 {offsets = [0, 128], sizes = [8, 128], strides = [1, 1]} : vector<8x384xf32> to vector<8x128xf32>
    %283 = vector.extract_strided_slice %273 {offsets = [0, 128], sizes = [8, 128], strides = [1, 1]} : vector<8x384xf32> to vector<8x128xf32>
    %284 = arith.addf %282, %283 : vector<8x128xf32>
    %285 = arith.negf %284 : vector<8x128xf32>
    %286 = math.exp %285 : vector<8x128xf32>
    %cst_57 = arith.constant 1.000000e+00 : f32
    %287 = vector.broadcast %cst_57 : f32 to vector<8x128xf32>
    %288 = arith.addf %287, %286 : vector<8x128xf32>
    %289 = arith.divf %287, %288 : vector<8x128xf32>
    %290 = vector.extract_strided_slice %270 {offsets = [0, 256], sizes = [8, 128], strides = [1, 1]} : vector<8x384xf32> to vector<8x128xf32>
    %291 = vector.extract_strided_slice %273 {offsets = [0, 256], sizes = [8, 128], strides = [1, 1]} : vector<8x384xf32> to vector<8x128xf32>
    %292 = arith.mulf %281, %291 : vector<8x128xf32>
    %293 = arith.addf %290, %292 : vector<8x128xf32>
    %294 = math.tanh %293 : vector<8x128xf32>
    %cst_58 = arith.constant 1.000000e+00 : f32
    %295 = vector.broadcast %cst_58 : f32 to vector<8x128xf32>
    %296 = arith.subf %295, %289 : vector<8x128xf32>
    %297 = arith.mulf %296, %294 : vector<8x128xf32>
    %298 = arith.mulf %289, %268 : vector<8x128xf32>
    %299 = arith.addf %297, %298 : vector<8x128xf32>
    %300 = vector.extract_strided_slice %204 {offsets = [2, 0, 0], sizes = [1, 8, 384], strides = [1, 1, 1]} : vector<6x8x384xf32> to vector<1x8x384xf32>
    %301 = vector.shape_cast %300 : vector<1x8x384xf32> to vector<8x384xf32>
    %cst_59 = arith.constant dense<0.000000e+00> : vector<8x384xf32>
    %302 = tpu.matmul %299, %205, %cst_59 {dimension_numbers = #tpu.dot_dimension_numbers<[1], [0], [0], [1], [0, 0, 1, 1], [], []>} : vector<8x128xf32>, vector<128x384xf32>, vector<8x384xf32> -> vector<8x384xf32>
    %303 = vector.broadcast %206 : vector<1x384xf32> to vector<8x384xf32>
    %304 = arith.addf %302, %303 : vector<8x384xf32>
    %305 = vector.extract_strided_slice %301 {offsets = [0, 0], sizes = [8, 128], strides = [1, 1]} : vector<8x384xf32> to vector<8x128xf32>
    %306 = vector.extract_strided_slice %304 {offsets = [0, 0], sizes = [8, 128], strides = [1, 1]} : vector<8x384xf32> to vector<8x128xf32>
    %307 = arith.addf %305, %306 : vector<8x128xf32>
    %308 = arith.negf %307 : vector<8x128xf32>
    %309 = math.exp %308 : vector<8x128xf32>
    %cst_60 = arith.constant 1.000000e+00 : f32
    %310 = vector.broadcast %cst_60 : f32 to vector<8x128xf32>
    %311 = arith.addf %310, %309 : vector<8x128xf32>
    %312 = arith.divf %310, %311 : vector<8x128xf32>
    %313 = vector.extract_strided_slice %301 {offsets = [0, 128], sizes = [8, 128], strides = [1, 1]} : vector<8x384xf32> to vector<8x128xf32>
    %314 = vector.extract_strided_slice %304 {offsets = [0, 128], sizes = [8, 128], strides = [1, 1]} : vector<8x384xf32> to vector<8x128xf32>
    %315 = arith.addf %313, %314 : vector<8x128xf32>
    %316 = arith.negf %315 : vector<8x128xf32>
    %317 = math.exp %316 : vector<8x128xf32>
    %cst_61 = arith.constant 1.000000e+00 : f32
    %318 = vector.broadcast %cst_61 : f32 to vector<8x128xf32>
    %319 = arith.addf %318, %317 : vector<8x128xf32>
    %320 = arith.divf %318, %319 : vector<8x128xf32>
    %321 = vector.extract_strided_slice %301 {offsets = [0, 256], sizes = [8, 128], strides = [1, 1]} : vector<8x384xf32> to vector<8x128xf32>
    %322 = vector.extract_strided_slice %304 {offsets = [0, 256], sizes = [8, 128], strides = [1, 1]} : vector<8x384xf32> to vector<8x128xf32>
    %323 = arith.mulf %312, %322 : vector<8x128xf32>
    %324 = arith.addf %321, %323 : vector<8x128xf32>
    %325 = math.tanh %324 : vector<8x128xf32>
    %cst_62 = arith.constant 1.000000e+00 : f32
    %326 = vector.broadcast %cst_62 : f32 to vector<8x128xf32>
    %327 = arith.subf %326, %320 : vector<8x128xf32>
    %328 = arith.mulf %327, %325 : vector<8x128xf32>
    %329 = arith.mulf %320, %299 : vector<8x128xf32>
    %330 = arith.addf %328, %329 : vector<8x128xf32>
    %331 = vector.extract_strided_slice %204 {offsets = [1, 0, 0], sizes = [1, 8, 384], strides = [1, 1, 1]} : vector<6x8x384xf32> to vector<1x8x384xf32>
    %332 = vector.shape_cast %331 : vector<1x8x384xf32> to vector<8x384xf32>
    %cst_63 = arith.constant dense<0.000000e+00> : vector<8x384xf32>
    %333 = tpu.matmul %330, %205, %cst_63 {dimension_numbers = #tpu.dot_dimension_numbers<[1], [0], [0], [1], [0, 0, 1, 1], [], []>} : vector<8x128xf32>, vector<128x384xf32>, vector<8x384xf32> -> vector<8x384xf32>
    %334 = vector.broadcast %206 : vector<1x384xf32> to vector<8x384xf32>
    %335 = arith.addf %333, %334 : vector<8x384xf32>
    %336 = vector.extract_strided_slice %332 {offsets = [0, 0], sizes = [8, 128], strides = [1, 1]} : vector<8x384xf32> to vector<8x128xf32>
    %337 = vector.extract_strided_slice %335 {offsets = [0, 0], sizes = [8, 128], strides = [1, 1]} : vector<8x384xf32> to vector<8x128xf32>
    %338 = arith.addf %336, %337 : vector<8x128xf32>
    %339 = arith.negf %338 : vector<8x128xf32>
    %340 = math.exp %339 : vector<8x128xf32>
    %cst_64 = arith.constant 1.000000e+00 : f32
    %341 = vector.broadcast %cst_64 : f32 to vector<8x128xf32>
    %342 = arith.addf %341, %340 : vector<8x128xf32>
    %343 = arith.divf %341, %342 : vector<8x128xf32>
    %344 = vector.extract_strided_slice %332 {offsets = [0, 128], sizes = [8, 128], strides = [1, 1]} : vector<8x384xf32> to vector<8x128xf32>
    %345 = vector.extract_strided_slice %335 {offsets = [0, 128], sizes = [8, 128], strides = [1, 1]} : vector<8x384xf32> to vector<8x128xf32>
    %346 = arith.addf %344, %345 : vector<8x128xf32>
    %347 = arith.negf %346 : vector<8x128xf32>
    %348 = math.exp %347 : vector<8x128xf32>
    %cst_65 = arith.constant 1.000000e+00 : f32
    %349 = vector.broadcast %cst_65 : f32 to vector<8x128xf32>
    %350 = arith.addf %349, %348 : vector<8x128xf32>
    %351 = arith.divf %349, %350 : vector<8x128xf32>
    %352 = vector.extract_strided_slice %332 {offsets = [0, 256], sizes = [8, 128], strides = [1, 1]} : vector<8x384xf32> to vector<8x128xf32>
    %353 = vector.extract_strided_slice %335 {offsets = [0, 256], sizes = [8, 128], strides = [1, 1]} : vector<8x384xf32> to vector<8x128xf32>
    %354 = arith.mulf %343, %353 : vector<8x128xf32>
    %355 = arith.addf %352, %354 : vector<8x128xf32>
    %356 = math.tanh %355 : vector<8x128xf32>
    %cst_66 = arith.constant 1.000000e+00 : f32
    %357 = vector.broadcast %cst_66 : f32 to vector<8x128xf32>
    %358 = arith.subf %357, %351 : vector<8x128xf32>
    %359 = arith.mulf %358, %356 : vector<8x128xf32>
    %360 = arith.mulf %351, %330 : vector<8x128xf32>
    %361 = arith.addf %359, %360 : vector<8x128xf32>
    %362 = vector.extract_strided_slice %204 {offsets = [0, 0, 0], sizes = [1, 8, 384], strides = [1, 1, 1]} : vector<6x8x384xf32> to vector<1x8x384xf32>
    %363 = vector.shape_cast %362 : vector<1x8x384xf32> to vector<8x384xf32>
    %cst_67 = arith.constant dense<0.000000e+00> : vector<8x384xf32>
    %364 = tpu.matmul %361, %205, %cst_67 {dimension_numbers = #tpu.dot_dimension_numbers<[1], [0], [0], [1], [0, 0, 1, 1], [], []>} : vector<8x128xf32>, vector<128x384xf32>, vector<8x384xf32> -> vector<8x384xf32>
    %365 = vector.broadcast %206 : vector<1x384xf32> to vector<8x384xf32>
    %366 = arith.addf %364, %365 : vector<8x384xf32>
    %367 = vector.extract_strided_slice %363 {offsets = [0, 0], sizes = [8, 128], strides = [1, 1]} : vector<8x384xf32> to vector<8x128xf32>
    %368 = vector.extract_strided_slice %366 {offsets = [0, 0], sizes = [8, 128], strides = [1, 1]} : vector<8x384xf32> to vector<8x128xf32>
    %369 = arith.addf %367, %368 : vector<8x128xf32>
    %370 = arith.negf %369 : vector<8x128xf32>
    %371 = math.exp %370 : vector<8x128xf32>
    %cst_68 = arith.constant 1.000000e+00 : f32
    %372 = vector.broadcast %cst_68 : f32 to vector<8x128xf32>
    %373 = arith.addf %372, %371 : vector<8x128xf32>
    %374 = arith.divf %372, %373 : vector<8x128xf32>
    %375 = vector.extract_strided_slice %363 {offsets = [0, 128], sizes = [8, 128], strides = [1, 1]} : vector<8x384xf32> to vector<8x128xf32>
    %376 = vector.extract_strided_slice %366 {offsets = [0, 128], sizes = [8, 128], strides = [1, 1]} : vector<8x384xf32> to vector<8x128xf32>
    %377 = arith.addf %375, %376 : vector<8x128xf32>
    %378 = arith.negf %377 : vector<8x128xf32>
    %379 = math.exp %378 : vector<8x128xf32>
    %cst_69 = arith.constant 1.000000e+00 : f32
    %380 = vector.broadcast %cst_69 : f32 to vector<8x128xf32>
    %381 = arith.addf %380, %379 : vector<8x128xf32>
    %382 = arith.divf %380, %381 : vector<8x128xf32>
    %383 = vector.extract_strided_slice %363 {offsets = [0, 256], sizes = [8, 128], strides = [1, 1]} : vector<8x384xf32> to vector<8x128xf32>
    %384 = vector.extract_strided_slice %366 {offsets = [0, 256], sizes = [8, 128], strides = [1, 1]} : vector<8x384xf32> to vector<8x128xf32>
    %385 = arith.mulf %374, %384 : vector<8x128xf32>
    %386 = arith.addf %383, %385 : vector<8x128xf32>
    %387 = math.tanh %386 : vector<8x128xf32>
    %cst_70 = arith.constant 1.000000e+00 : f32
    %388 = vector.broadcast %cst_70 : f32 to vector<8x128xf32>
    %389 = arith.subf %388, %382 : vector<8x128xf32>
    %390 = arith.mulf %389, %387 : vector<8x128xf32>
    %391 = arith.mulf %382, %361 : vector<8x128xf32>
    %392 = arith.addf %390, %391 : vector<8x128xf32>
    %393 = arith.addf %41, %392 : vector<8x128xf32>
    %394 = arith.addf %72, %361 : vector<8x128xf32>
    %395 = arith.addf %103, %330 : vector<8x128xf32>
    %396 = arith.addf %134, %299 : vector<8x128xf32>
    %397 = arith.addf %165, %268 : vector<8x128xf32>
    %398 = arith.addf %196, %237 : vector<8x128xf32>
    %399 = arith.addf %196, %392 : vector<8x128xf32>
    %c0_71 = arith.constant 0 : index
    %c0_72 = arith.constant 0 : index
    %c0_73 = arith.constant 0 : index
    %400 = vector.load %arg1[%c0_71, %c0_72, %c0_73] : memref<5x8x128xf32, #tpu.memory_space<vmem>>, vector<5x8x128xf32>
    %401 = vector.shape_cast %400 : vector<5x8x128xf32> to vector<40x128xf32>
    %c0_74 = arith.constant 0 : index
    %c0_75 = arith.constant 0 : index
    %402 = vector.load %arg10[%c0_74, %c0_75] : memref<128x384xf32, #tpu.memory_space<vmem>>, vector<128x384xf32>
    %cst_76 = arith.constant dense<0.000000e+00> : vector<40x384xf32>
    %403 = tpu.matmul %401, %402, %cst_76 {dimension_numbers = #tpu.dot_dimension_numbers<[1], [0], [0], [1], [0, 0, 1, 1], [], []>} : vector<40x128xf32>, vector<128x384xf32>, vector<40x384xf32> -> vector<40x384xf32>
    %c0_77 = arith.constant 0 : index
    %c0_78 = arith.constant 0 : index
    %404 = vector.load %arg12[%c0_77, %c0_78] : memref<1x384xf32, #tpu.memory_space<vmem>>, vector<1x384xf32>
    %405 = vector.broadcast %404 : vector<1x384xf32> to vector<40x384xf32>
    %406 = arith.addf %403, %405 : vector<40x384xf32>
    %407 = vector.shape_cast %406 : vector<40x384xf32> to vector<5x8x384xf32>
    %c0_79 = arith.constant 0 : index
    %c0_80 = arith.constant 0 : index
    %408 = vector.load %arg11[%c0_79, %c0_80] : memref<128x384xf32, #tpu.memory_space<vmem>>, vector<128x384xf32>
    %c0_81 = arith.constant 0 : index
    %c0_82 = arith.constant 0 : index
    %409 = vector.load %arg13[%c0_81, %c0_82] : memref<1x384xf32, #tpu.memory_space<vmem>>, vector<1x384xf32>
    %410 = vector.extract_strided_slice %407 {offsets = [0, 0, 0], sizes = [1, 8, 384], strides = [1, 1, 1]} : vector<5x8x384xf32> to vector<1x8x384xf32>
    %411 = vector.shape_cast %410 : vector<1x8x384xf32> to vector<8x384xf32>
    %cst_83 = arith.constant dense<0.000000e+00> : vector<8x384xf32>
    %412 = tpu.matmul %399, %408, %cst_83 {dimension_numbers = #tpu.dot_dimension_numbers<[1], [0], [0], [1], [0, 0, 1, 1], [], []>} : vector<8x128xf32>, vector<128x384xf32>, vector<8x384xf32> -> vector<8x384xf32>
    %413 = vector.broadcast %409 : vector<1x384xf32> to vector<8x384xf32>
    %414 = arith.addf %412, %413 : vector<8x384xf32>
    %415 = vector.extract_strided_slice %411 {offsets = [0, 0], sizes = [8, 128], strides = [1, 1]} : vector<8x384xf32> to vector<8x128xf32>
    %416 = vector.extract_strided_slice %414 {offsets = [0, 0], sizes = [8, 128], strides = [1, 1]} : vector<8x384xf32> to vector<8x128xf32>
    %417 = arith.addf %415, %416 : vector<8x128xf32>
    %418 = arith.negf %417 : vector<8x128xf32>
    %419 = math.exp %418 : vector<8x128xf32>
    %cst_84 = arith.constant 1.000000e+00 : f32
    %420 = vector.broadcast %cst_84 : f32 to vector<8x128xf32>
    %421 = arith.addf %420, %419 : vector<8x128xf32>
    %422 = arith.divf %420, %421 : vector<8x128xf32>
    %423 = vector.extract_strided_slice %411 {offsets = [0, 128], sizes = [8, 128], strides = [1, 1]} : vector<8x384xf32> to vector<8x128xf32>
    %424 = vector.extract_strided_slice %414 {offsets = [0, 128], sizes = [8, 128], strides = [1, 1]} : vector<8x384xf32> to vector<8x128xf32>
    %425 = arith.addf %423, %424 : vector<8x128xf32>
    %426 = arith.negf %425 : vector<8x128xf32>
    %427 = math.exp %426 : vector<8x128xf32>
    %cst_85 = arith.constant 1.000000e+00 : f32
    %428 = vector.broadcast %cst_85 : f32 to vector<8x128xf32>
    %429 = arith.addf %428, %427 : vector<8x128xf32>
    %430 = arith.divf %428, %429 : vector<8x128xf32>
    %431 = vector.extract_strided_slice %411 {offsets = [0, 256], sizes = [8, 128], strides = [1, 1]} : vector<8x384xf32> to vector<8x128xf32>
    %432 = vector.extract_strided_slice %414 {offsets = [0, 256], sizes = [8, 128], strides = [1, 1]} : vector<8x384xf32> to vector<8x128xf32>
    %433 = arith.mulf %422, %432 : vector<8x128xf32>
    %434 = arith.addf %431, %433 : vector<8x128xf32>
    %435 = math.tanh %434 : vector<8x128xf32>
    %cst_86 = arith.constant 1.000000e+00 : f32
    %436 = vector.broadcast %cst_86 : f32 to vector<8x128xf32>
    %437 = arith.subf %436, %430 : vector<8x128xf32>
    %438 = arith.mulf %437, %435 : vector<8x128xf32>
    %439 = arith.mulf %430, %399 : vector<8x128xf32>
    %440 = arith.addf %438, %439 : vector<8x128xf32>
    %441 = vector.extract_strided_slice %407 {offsets = [1, 0, 0], sizes = [1, 8, 384], strides = [1, 1, 1]} : vector<5x8x384xf32> to vector<1x8x384xf32>
    %442 = vector.shape_cast %441 : vector<1x8x384xf32> to vector<8x384xf32>
    %cst_87 = arith.constant dense<0.000000e+00> : vector<8x384xf32>
    %443 = tpu.matmul %440, %408, %cst_87 {dimension_numbers = #tpu.dot_dimension_numbers<[1], [0], [0], [1], [0, 0, 1, 1], [], []>} : vector<8x128xf32>, vector<128x384xf32>, vector<8x384xf32> -> vector<8x384xf32>
    %444 = vector.broadcast %409 : vector<1x384xf32> to vector<8x384xf32>
    %445 = arith.addf %443, %444 : vector<8x384xf32>
    %446 = vector.extract_strided_slice %442 {offsets = [0, 0], sizes = [8, 128], strides = [1, 1]} : vector<8x384xf32> to vector<8x128xf32>
    %447 = vector.extract_strided_slice %445 {offsets = [0, 0], sizes = [8, 128], strides = [1, 1]} : vector<8x384xf32> to vector<8x128xf32>
    %448 = arith.addf %446, %447 : vector<8x128xf32>
    %449 = arith.negf %448 : vector<8x128xf32>
    %450 = math.exp %449 : vector<8x128xf32>
    %cst_88 = arith.constant 1.000000e+00 : f32
    %451 = vector.broadcast %cst_88 : f32 to vector<8x128xf32>
    %452 = arith.addf %451, %450 : vector<8x128xf32>
    %453 = arith.divf %451, %452 : vector<8x128xf32>
    %454 = vector.extract_strided_slice %442 {offsets = [0, 128], sizes = [8, 128], strides = [1, 1]} : vector<8x384xf32> to vector<8x128xf32>
    %455 = vector.extract_strided_slice %445 {offsets = [0, 128], sizes = [8, 128], strides = [1, 1]} : vector<8x384xf32> to vector<8x128xf32>
    %456 = arith.addf %454, %455 : vector<8x128xf32>
    %457 = arith.negf %456 : vector<8x128xf32>
    %458 = math.exp %457 : vector<8x128xf32>
    %cst_89 = arith.constant 1.000000e+00 : f32
    %459 = vector.broadcast %cst_89 : f32 to vector<8x128xf32>
    %460 = arith.addf %459, %458 : vector<8x128xf32>
    %461 = arith.divf %459, %460 : vector<8x128xf32>
    %462 = vector.extract_strided_slice %442 {offsets = [0, 256], sizes = [8, 128], strides = [1, 1]} : vector<8x384xf32> to vector<8x128xf32>
    %463 = vector.extract_strided_slice %445 {offsets = [0, 256], sizes = [8, 128], strides = [1, 1]} : vector<8x384xf32> to vector<8x128xf32>
    %464 = arith.mulf %453, %463 : vector<8x128xf32>
    %465 = arith.addf %462, %464 : vector<8x128xf32>
    %466 = math.tanh %465 : vector<8x128xf32>
    %cst_90 = arith.constant 1.000000e+00 : f32
    %467 = vector.broadcast %cst_90 : f32 to vector<8x128xf32>
    %468 = arith.subf %467, %461 : vector<8x128xf32>
    %469 = arith.mulf %468, %466 : vector<8x128xf32>
    %470 = arith.mulf %461, %440 : vector<8x128xf32>
    %471 = arith.addf %469, %470 : vector<8x128xf32>
    %472 = vector.extract_strided_slice %407 {offsets = [2, 0, 0], sizes = [1, 8, 384], strides = [1, 1, 1]} : vector<5x8x384xf32> to vector<1x8x384xf32>
    %473 = vector.shape_cast %472 : vector<1x8x384xf32> to vector<8x384xf32>
    %cst_91 = arith.constant dense<0.000000e+00> : vector<8x384xf32>
    %474 = tpu.matmul %471, %408, %cst_91 {dimension_numbers = #tpu.dot_dimension_numbers<[1], [0], [0], [1], [0, 0, 1, 1], [], []>} : vector<8x128xf32>, vector<128x384xf32>, vector<8x384xf32> -> vector<8x384xf32>
    %475 = vector.broadcast %409 : vector<1x384xf32> to vector<8x384xf32>
    %476 = arith.addf %474, %475 : vector<8x384xf32>
    %477 = vector.extract_strided_slice %473 {offsets = [0, 0], sizes = [8, 128], strides = [1, 1]} : vector<8x384xf32> to vector<8x128xf32>
    %478 = vector.extract_strided_slice %476 {offsets = [0, 0], sizes = [8, 128], strides = [1, 1]} : vector<8x384xf32> to vector<8x128xf32>
    %479 = arith.addf %477, %478 : vector<8x128xf32>
    %480 = arith.negf %479 : vector<8x128xf32>
    %481 = math.exp %480 : vector<8x128xf32>
    %cst_92 = arith.constant 1.000000e+00 : f32
    %482 = vector.broadcast %cst_92 : f32 to vector<8x128xf32>
    %483 = arith.addf %482, %481 : vector<8x128xf32>
    %484 = arith.divf %482, %483 : vector<8x128xf32>
    %485 = vector.extract_strided_slice %473 {offsets = [0, 128], sizes = [8, 128], strides = [1, 1]} : vector<8x384xf32> to vector<8x128xf32>
    %486 = vector.extract_strided_slice %476 {offsets = [0, 128], sizes = [8, 128], strides = [1, 1]} : vector<8x384xf32> to vector<8x128xf32>
    %487 = arith.addf %485, %486 : vector<8x128xf32>
    %488 = arith.negf %487 : vector<8x128xf32>
    %489 = math.exp %488 : vector<8x128xf32>
    %cst_93 = arith.constant 1.000000e+00 : f32
    %490 = vector.broadcast %cst_93 : f32 to vector<8x128xf32>
    %491 = arith.addf %490, %489 : vector<8x128xf32>
    %492 = arith.divf %490, %491 : vector<8x128xf32>
    %493 = vector.extract_strided_slice %473 {offsets = [0, 256], sizes = [8, 128], strides = [1, 1]} : vector<8x384xf32> to vector<8x128xf32>
    %494 = vector.extract_strided_slice %476 {offsets = [0, 256], sizes = [8, 128], strides = [1, 1]} : vector<8x384xf32> to vector<8x128xf32>
    %495 = arith.mulf %484, %494 : vector<8x128xf32>
    %496 = arith.addf %493, %495 : vector<8x128xf32>
    %497 = math.tanh %496 : vector<8x128xf32>
    %cst_94 = arith.constant 1.000000e+00 : f32
    %498 = vector.broadcast %cst_94 : f32 to vector<8x128xf32>
    %499 = arith.subf %498, %492 : vector<8x128xf32>
    %500 = arith.mulf %499, %497 : vector<8x128xf32>
    %501 = arith.mulf %492, %471 : vector<8x128xf32>
    %502 = arith.addf %500, %501 : vector<8x128xf32>
    %503 = vector.extract_strided_slice %407 {offsets = [3, 0, 0], sizes = [1, 8, 384], strides = [1, 1, 1]} : vector<5x8x384xf32> to vector<1x8x384xf32>
    %504 = vector.shape_cast %503 : vector<1x8x384xf32> to vector<8x384xf32>
    %cst_95 = arith.constant dense<0.000000e+00> : vector<8x384xf32>
    %505 = tpu.matmul %502, %408, %cst_95 {dimension_numbers = #tpu.dot_dimension_numbers<[1], [0], [0], [1], [0, 0, 1, 1], [], []>} : vector<8x128xf32>, vector<128x384xf32>, vector<8x384xf32> -> vector<8x384xf32>
    %506 = vector.broadcast %409 : vector<1x384xf32> to vector<8x384xf32>
    %507 = arith.addf %505, %506 : vector<8x384xf32>
    %508 = vector.extract_strided_slice %504 {offsets = [0, 0], sizes = [8, 128], strides = [1, 1]} : vector<8x384xf32> to vector<8x128xf32>
    %509 = vector.extract_strided_slice %507 {offsets = [0, 0], sizes = [8, 128], strides = [1, 1]} : vector<8x384xf32> to vector<8x128xf32>
    %510 = arith.addf %508, %509 : vector<8x128xf32>
    %511 = arith.negf %510 : vector<8x128xf32>
    %512 = math.exp %511 : vector<8x128xf32>
    %cst_96 = arith.constant 1.000000e+00 : f32
    %513 = vector.broadcast %cst_96 : f32 to vector<8x128xf32>
    %514 = arith.addf %513, %512 : vector<8x128xf32>
    %515 = arith.divf %513, %514 : vector<8x128xf32>
    %516 = vector.extract_strided_slice %504 {offsets = [0, 128], sizes = [8, 128], strides = [1, 1]} : vector<8x384xf32> to vector<8x128xf32>
    %517 = vector.extract_strided_slice %507 {offsets = [0, 128], sizes = [8, 128], strides = [1, 1]} : vector<8x384xf32> to vector<8x128xf32>
    %518 = arith.addf %516, %517 : vector<8x128xf32>
    %519 = arith.negf %518 : vector<8x128xf32>
    %520 = math.exp %519 : vector<8x128xf32>
    %cst_97 = arith.constant 1.000000e+00 : f32
    %521 = vector.broadcast %cst_97 : f32 to vector<8x128xf32>
    %522 = arith.addf %521, %520 : vector<8x128xf32>
    %523 = arith.divf %521, %522 : vector<8x128xf32>
    %524 = vector.extract_strided_slice %504 {offsets = [0, 256], sizes = [8, 128], strides = [1, 1]} : vector<8x384xf32> to vector<8x128xf32>
    %525 = vector.extract_strided_slice %507 {offsets = [0, 256], sizes = [8, 128], strides = [1, 1]} : vector<8x384xf32> to vector<8x128xf32>
    %526 = arith.mulf %515, %525 : vector<8x128xf32>
    %527 = arith.addf %524, %526 : vector<8x128xf32>
    %528 = math.tanh %527 : vector<8x128xf32>
    %cst_98 = arith.constant 1.000000e+00 : f32
    %529 = vector.broadcast %cst_98 : f32 to vector<8x128xf32>
    %530 = arith.subf %529, %523 : vector<8x128xf32>
    %531 = arith.mulf %530, %528 : vector<8x128xf32>
    %532 = arith.mulf %523, %502 : vector<8x128xf32>
    %533 = arith.addf %531, %532 : vector<8x128xf32>
    %534 = vector.extract_strided_slice %407 {offsets = [4, 0, 0], sizes = [1, 8, 384], strides = [1, 1, 1]} : vector<5x8x384xf32> to vector<1x8x384xf32>
    %535 = vector.shape_cast %534 : vector<1x8x384xf32> to vector<8x384xf32>
    %cst_99 = arith.constant dense<0.000000e+00> : vector<8x384xf32>
    %536 = tpu.matmul %533, %408, %cst_99 {dimension_numbers = #tpu.dot_dimension_numbers<[1], [0], [0], [1], [0, 0, 1, 1], [], []>} : vector<8x128xf32>, vector<128x384xf32>, vector<8x384xf32> -> vector<8x384xf32>
    %537 = vector.broadcast %409 : vector<1x384xf32> to vector<8x384xf32>
    %538 = arith.addf %536, %537 : vector<8x384xf32>
    %539 = vector.extract_strided_slice %535 {offsets = [0, 0], sizes = [8, 128], strides = [1, 1]} : vector<8x384xf32> to vector<8x128xf32>
    %540 = vector.extract_strided_slice %538 {offsets = [0, 0], sizes = [8, 128], strides = [1, 1]} : vector<8x384xf32> to vector<8x128xf32>
    %541 = arith.addf %539, %540 : vector<8x128xf32>
    %542 = arith.negf %541 : vector<8x128xf32>
    %543 = math.exp %542 : vector<8x128xf32>
    %cst_100 = arith.constant 1.000000e+00 : f32
    %544 = vector.broadcast %cst_100 : f32 to vector<8x128xf32>
    %545 = arith.addf %544, %543 : vector<8x128xf32>
    %546 = arith.divf %544, %545 : vector<8x128xf32>
    %547 = vector.extract_strided_slice %535 {offsets = [0, 128], sizes = [8, 128], strides = [1, 1]} : vector<8x384xf32> to vector<8x128xf32>
    %548 = vector.extract_strided_slice %538 {offsets = [0, 128], sizes = [8, 128], strides = [1, 1]} : vector<8x384xf32> to vector<8x128xf32>
    %549 = arith.addf %547, %548 : vector<8x128xf32>
    %550 = arith.negf %549 : vector<8x128xf32>
    %551 = math.exp %550 : vector<8x128xf32>
    %cst_101 = arith.constant 1.000000e+00 : f32
    %552 = vector.broadcast %cst_101 : f32 to vector<8x128xf32>
    %553 = arith.addf %552, %551 : vector<8x128xf32>
    %554 = arith.divf %552, %553 : vector<8x128xf32>
    %555 = vector.extract_strided_slice %535 {offsets = [0, 256], sizes = [8, 128], strides = [1, 1]} : vector<8x384xf32> to vector<8x128xf32>
    %556 = vector.extract_strided_slice %538 {offsets = [0, 256], sizes = [8, 128], strides = [1, 1]} : vector<8x384xf32> to vector<8x128xf32>
    %557 = arith.mulf %546, %556 : vector<8x128xf32>
    %558 = arith.addf %555, %557 : vector<8x128xf32>
    %559 = math.tanh %558 : vector<8x128xf32>
    %cst_102 = arith.constant 1.000000e+00 : f32
    %560 = vector.broadcast %cst_102 : f32 to vector<8x128xf32>
    %561 = arith.subf %560, %554 : vector<8x128xf32>
    %562 = arith.mulf %561, %559 : vector<8x128xf32>
    %563 = arith.mulf %554, %533 : vector<8x128xf32>
    %564 = arith.addf %562, %563 : vector<8x128xf32>
    %c0_103 = arith.constant 0 : index
    %c0_104 = arith.constant 0 : index
    %565 = vector.load %arg20[%c0_103, %c0_104] : memref<8x128xf32, #tpu.memory_space<vmem>>, vector<8x128xf32>
    tpu.vector_store %arg20[%c0_103, %c0_104], %564 {strides = array<i32>} : memref<8x128xf32, #tpu.memory_space<vmem>>, vector<8x128xf32>,
    %566 = vector.shape_cast %393 : vector<8x128xf32> to vector<8x1x128xf32>
    %567 = vector.shape_cast %394 : vector<8x128xf32> to vector<8x1x128xf32>
    %568 = vector.shape_cast %395 : vector<8x128xf32> to vector<8x1x128xf32>
    %569 = vector.shape_cast %396 : vector<8x128xf32> to vector<8x1x128xf32>
    %570 = vector.shape_cast %397 : vector<8x128xf32> to vector<8x1x128xf32>
    %571 = vector.shape_cast %398 : vector<8x128xf32> to vector<8x1x128xf32>
    %572 = tpu.concatenate %566, %567, %568, %569, %570, %571 in 1 : vector<8x1x128xf32>, vector<8x1x128xf32>, vector<8x1x128xf32>, vector<8x1x128xf32>, vector<8x1x128xf32>, vector<8x1x128xf32> -> vector<8x6x128xf32>
    %573 = vector.shape_cast %440 : vector<8x128xf32> to vector<8x1x128xf32>
    %574 = vector.shape_cast %471 : vector<8x128xf32> to vector<8x1x128xf32>
    %575 = vector.shape_cast %502 : vector<8x128xf32> to vector<8x1x128xf32>
    %576 = vector.shape_cast %533 : vector<8x128xf32> to vector<8x1x128xf32>
    %577 = vector.shape_cast %564 : vector<8x128xf32> to vector<8x1x128xf32>
    %578 = tpu.concatenate %573, %574, %575, %576, %577 in 1 : vector<8x1x128xf32>, vector<8x1x128xf32>, vector<8x1x128xf32>, vector<8x1x128xf32>, vector<8x1x128xf32> -> vector<8x5x128xf32>
    "tpu.trace_start"() <{level = 10 : i32, message = "bed,btd->bet"}> : () -> ()
    %cst_105 = arith.constant dense<0.000000e+00> : vector<8x6x5xf32>
    %579 = tpu.matmul %572, %578, %cst_105 {dimension_numbers = #tpu.dot_dimension_numbers<[2], [2], [1], [1], [0, 0, 0, 1, 1, 1], [0], [0]>} : vector<8x6x128xf32>, vector<8x5x128xf32>, vector<8x6x5xf32> -> vector<8x6x5xf32>
    "tpu.trace_stop"() : () -> ()
    %cst_106 = arith.constant dense<0xFF800000> : vector<8x5xf32>
    %580 = vector.multi_reduction <maximumf>, %579, %cst_106 [1] : vector<8x6x5xf32> to vector<8x5xf32>
    %581 = vector.shape_cast %580 : vector<8x5xf32> to vector<8x1x5xf32>
    %582 = vector.broadcast %581 : vector<8x1x5xf32> to vector<8x6x5xf32>
    %583 = arith.subf %579, %582 : vector<8x6x5xf32>
    %584 = math.exp %583 : vector<8x6x5xf32>
    %cst_107 = arith.constant dense<0.000000e+00> : vector<8x5xf32>
    %585 = vector.multi_reduction <add>, %584, %cst_107 [1] : vector<8x6x5xf32> to vector<8x5xf32>
    %586 = vector.shape_cast %585 : vector<8x5xf32> to vector<8x1x5xf32>
    %587 = vector.broadcast %586 : vector<8x1x5xf32> to vector<8x6x5xf32>
    %588 = arith.divf %584, %587 : vector<8x6x5xf32>
    "tpu.trace_start"() <{level = 10 : i32, message = "bet,bed->btd"}> : () -> ()
    %cst_108 = arith.constant dense<0.000000e+00> : vector<8x5x128xf32>
    %589 = tpu.matmul %588, %572, %cst_108 {dimension_numbers = #tpu.dot_dimension_numbers<[1], [1], [2], [2], [0, 0, 0, 2, 1, 2], [0], [0]>} : vector<8x6x5xf32>, vector<8x6x128xf32>, vector<8x5x128xf32> -> vector<8x5x128xf32>
    "tpu.trace_stop"() : () -> ()
    %c0_109 = arith.constant 0 : index
    %c0_110 = arith.constant 0 : index
    %590 = vector.load %arg14[%c0_109, %c0_110] : memref<128x128xf32, #tpu.memory_space<vmem>>, vector<128x128xf32>
    "tpu.trace_start"() <{level = 10 : i32, message = "btd,do->bto"}> : () -> ()
    %cst_111 = arith.constant dense<0.000000e+00> : vector<8x5x128xf32>
    %591 = tpu.matmul %578, %590, %cst_111 {dimension_numbers = #tpu.dot_dimension_numbers<[2], [0], [0, 1], [1], [0, 0, 0, 1, 1, 1], [], []>} : vector<8x5x128xf32>, vector<128x128xf32>, vector<8x5x128xf32> -> vector<8x5x128xf32>
    "tpu.trace_stop"() : () -> ()
    %c0_112 = arith.constant 0 : index
    %c0_113 = arith.constant 0 : index
    %592 = vector.load %arg15[%c0_112, %c0_113] : memref<128x128xf32, #tpu.memory_space<vmem>>, vector<128x128xf32>
    "tpu.trace_start"() <{level = 10 : i32, message = "btd,do->bto"}> : () -> ()
    %cst_114 = arith.constant dense<0.000000e+00> : vector<8x5x128xf32>
    %593 = tpu.matmul %589, %592, %cst_114 {dimension_numbers = #tpu.dot_dimension_numbers<[2], [0], [0, 1], [1], [0, 0, 0, 1, 1, 1], [], []>} : vector<8x5x128xf32>, vector<128x128xf32>, vector<8x5x128xf32> -> vector<8x5x128xf32>
    "tpu.trace_stop"() : () -> ()
    %594 = arith.addf %591, %593 : vector<8x5x128xf32>
    %c0_115 = arith.constant 0 : index
    %c0_116 = arith.constant 0 : index
    %595 = vector.load %arg16[%c0_115, %c0_116] : memref<1x128xf32, #tpu.memory_space<vmem>>, vector<1x128xf32>
    %596 = vector.shape_cast %595 : vector<1x128xf32> to vector<1x1x128xf32>
    %597 = vector.broadcast %596 : vector<1x1x128xf32> to vector<8x5x128xf32>
    %598 = arith.addf %594, %597 : vector<8x5x128xf32>
    %599 = math.tanh %598 : vector<8x5x128xf32>
    %c0_117 = arith.constant 0 : index
    %c0_118 = arith.constant 0 : index
    %600 = vector.load %arg17[%c0_117, %c0_118] : memref<128x128xf32, #tpu.memory_space<vmem>>, vector<128x128xf32>
    "tpu.trace_start"() <{level = 10 : i32, message = "bto,ov->btv"}> : () -> ()
    %cst_119 = arith.constant dense<0.000000e+00> : vector<8x5x128xf32>
    %601 = tpu.matmul %599, %600, %cst_119 {dimension_numbers = #tpu.dot_dimension_numbers<[2], [0], [0, 1], [1], [0, 0, 0, 1, 1, 1], [], []>} : vector<8x5x128xf32>, vector<128x128xf32>, vector<8x5x128xf32> -> vector<8x5x128xf32>
    "tpu.trace_stop"() : () -> ()
    %c0_120 = arith.constant 0 : index
    %c0_121 = arith.constant 0 : index
    %602 = vector.load %arg18[%c0_120, %c0_121] : memref<1x128xf32, #tpu.memory_space<vmem>>, vector<1x128xf32>
    %603 = vector.shape_cast %602 : vector<1x128xf32> to vector<1x1x128xf32>
    %604 = vector.broadcast %603 : vector<1x1x128xf32> to vector<8x5x128xf32>
    %605 = arith.addf %601, %604 : vector<8x5x128xf32>
    %c0_122 = arith.constant 0 : index
    %c0_123 = arith.constant 0 : index
    %c0_124 = arith.constant 0 : index
    %606 = vector.load %arg19[%c0_122, %c0_123, %c0_124] : memref<8x5x128xf32, #tpu.memory_space<vmem>>, vector<8x5x128xf32>
    tpu.vector_store %arg19[%c0_122, %c0_123, %c0_124], %605 {strides = array<i32>} : memref<8x5x128xf32, #tpu.memory_space<vmem>>, vector<8x5x128xf32>,
    return
  }
}

</mosaic_0001>

<bundles_post_ra>
// kernel: seq2seq_forward.1
= control target key start
LH: loop header
LB: loop body
LE: loop exit
PB: predicated region body
PF: predicated region fallthrough
CT: control target
= control target key end

     0   :  { %s14633_s0 = inlined_call_operand.vmem [shape: f32[6,8,128], index: 0, kind: input, shape index: {}]   ;;  %s14634_s1 = inlined_call_operand.vmem [shape: f32[5,8,128], index: 1, kind: input, shape index: {}]   ;;  %s14635_s2 = inlined_call_operand.hbm [shape: f32[128,384], index: 2, kind: input, shape index: {}]   ;;  %s14636_s3 = inlined_call_operand.hbm [shape: f32[128,384], index: 3, kind: input, shape index: {}]   ;;  %s14637_s4 = inlined_call_operand.vmem [shape: f32[1,384], index: 4, kind: input, shape index: {}]   ;;  %s14638_s5 = inlined_call_operand.vmem [shape: f32[1,384], index: 5, kind: input, shape index: {}]   ;;  %s14639_s6 = inlined_call_operand.hbm [shape: f32[128,384], index: 6, kind: input, shape index: {}]   ;;  %s14640_s7 = inlined_call_operand.hbm [shape: f32[128,384], index: 7, kind: input, shape index: {}]   ;;  %s14641_s8 = inlined_call_operand.vmem [shape: f32[1,384], index: 8, kind: input, shape index: {}]   ;;  %s14642_s9 = inlined_call_operand.vmem [shape: f32[1,384], index: 9, kind: input, shape index: {}]   ;;  %s14643_s10 = inlined_call_operand.hbm [shape: f32[128,384], index: 10, kind: input, shape index: {}]   ;;  %s14644_s11 = inlined_call_operand.hbm [shape: f32[128,384], index: 11, kind: input, shape index: {}]   ;;  %s14645_s12 = inlined_call_operand.vmem [shape: f32[1,384], index: 12, kind: input, shape index: {}]   ;;  %s14646_s13 = inlined_call_operand.vmem [shape: f32[1,384], index: 13, kind: input, shape index: {}]   ;;  %s14647_s14 = inlined_call_operand.vmem [shape: f32[128,128], index: 14, kind: input, shape index: {}]   ;;  %s14648_s15 = inlined_call_operand.vmem [shape: f32[128,128], index: 15, kind: input, shape index: {}]   ;;  %s14649_s16 = inlined_call_operand.vmem [shape: f32[1,128], index: 16, kind: input, shape index: {}]   ;;  %s14650_s17 = inlined_call_operand.vmem [shape: f32[128,128], index: 17, kind: input, shape index: {}]   ;;  %s14651_s18 = inlined_call_operand.vmem [shape: f32[1,128], index: 18, kind: input, shape index: {}]   ;;  %s14652_s19 = inlined_call_operand.vmem [shape: f32[8,5,128], index: 19, kind: output, shape index: {0}]   ;;  %s14653_s20 = inlined_call_operand.vmem [shape: f32[8,128], index: 20, kind: output, shape index: {1}]  }
   0x1   :  { %14746 = sst [smem:[#allocation56_spill]] %s14633_s0 }
   0x2   :  { %14747 = sst [smem:[#allocation57_spill]] %s14634_s1 }
   0x3   :  { %14748 = sst [smem:[#allocation58_spill]] %s14635_s2 }
   0x4   :  { %14749 = sst [smem:[#allocation59_spill]] %s14636_s3 }
   0x5   :  { %14750 = sst [smem:[#allocation60_spill]] %s14637_s4 }
   0x6   :  { %26 = vsyncpa [#allocation3], 0 }
   0x7   :  { %27 = vsyncpa [#allocation5], 0 }
   0x8   :  { %28 = vsyncpa [#allocation8], 0 }
   0x9   :  { %29 = vsyncpa [#allocation11], 0  ;;  %s11360_s1 = smov [#allocation4]   ;;  %s11361_s23 = smov [#allocation7]  }
   0xa   :  { %s51_s22 = sshll.u32 %s11360_s1, 4  ;;  %s79_s24 = sshll.u32 %s11361_s23, 4  ;;  %s52_s22 = int_to_ptr.vmem [resolvable:$true] %s51_s22  ;;  %s80_s24 = int_to_ptr.vmem [resolvable:$true] %s79_s24 }
   0xb   :  { %s11240_s2 = scalar_lea.vmem %s52_s22, 6144  ;;  %p11245_p1 = scmp.lt.s32.totalorder %s52_s22, %s52_s22 }
   0xc   :  { %p11241_p0 = scmp.ne.s32.totalorder %s52_s22, %s11240_s2  ;;  %p11246_p2 = scmp.lt.s32.totalorder %s11240_s2, %s11240_s2 }
   0xe   :  { %p11247_p3 = por %p11246_p2, %p11245_p1 }
  0x10   :  { %p11248_p4 = pnand %p11247_p3, %p11241_p0 }
  0x12   :  { %11251 = shalt.err (!%p11248_p4)
}
  0x13   :  { %s11362_s25 = smov 384   ;;  %s11363_s3 = smov 24  }
  0x14   :  { %s14751_s28 = sld [smem:[#allocation59_spill]]  ;;  %s11260_s4 = scalar_lea.vmem %s80_s24, 6144 }
  0x15   :  { %p11261_p5 = scmp.ne.s32.totalorder %s80_s24, %s11260_s4  ;;  %p11265_p6 = scmp.lt.s32.totalorder %s80_s24, %s80_s24 }
  0x16   :  { %p11266_p7 = scmp.lt.s32.totalorder %s11260_s4, %s11260_s4 }
  0x18   :  { %p11267_p8 = por %p11266_p7, %p11265_p6 }
  0x1a   :  { %57 = dma.hbm_to_vmem [thread:$0]  %s14751_s28, 6144, %s52_s22, [#allocation5], %s11362_s25, %s11362_s25, %s11363_s3  }
  0x1b   :  { %p11268_p9 = pnand %p11267_p8, %p11261_p5 }
  0x1d   :  { %11271 = shalt.err (!%p11268_p9)
}
  0x1e   :  { %85 = dma.hbm_to_vmem [thread:$0]  %s14640_s7, 6144, %s80_s24, [#allocation8], %s11362_s25, %s11362_s25, %s11363_s3  }
  0x1f   :  { %s11364_s0 = smov [#allocation2]   ;;  %s11365_s1 = smov [#allocation6]  }
  0x20   :  { %s39_s21 = sshll.u32 %s11364_s0, 4  ;;  %s67_s23 = sshll.u32 %s11365_s1, 4  ;;  %s40_s21 = int_to_ptr.vmem [resolvable:$true] %s39_s21  ;;  %s68_s23 = int_to_ptr.vmem [resolvable:$true] %s67_s23 }
  0x21   :  { %s11280_s22 = scalar_lea.vmem %s40_s21, 6144  ;;  %p11285_p11 = scmp.lt.s32.totalorder %s40_s21, %s40_s21 }
  0x22   :  { %p11281_p10 = scmp.ne.s32.totalorder %s40_s21, %s11280_s22  ;;  %p11286_p12 = scmp.lt.s32.totalorder %s11280_s22, %s11280_s22 }
  0x24   :  { %p11287_p13 = por %p11286_p12, %p11285_p11 }
  0x26   :  { %p11288_p0 = pnand %p11287_p13, %p11281_p10 }
  0x28   :  { %11291 = shalt.err (!%p11288_p0)
}
  0x29   :  { %s14752_s27 = sld [smem:[#allocation58_spill]]  ;;  %s11300_s7 = scalar_lea.vmem %s68_s23, 6144 }
  0x2a   :  { %p11301_p1 = scmp.ne.s32.totalorder %s68_s23, %s11300_s7  ;;  %p11305_p2 = scmp.lt.s32.totalorder %s68_s23, %s68_s23 }
  0x2b   :  { %p11306_p3 = scmp.lt.s32.totalorder %s11300_s7, %s11300_s7 }
  0x2d   :  { %p11307_p4 = por %p11306_p3, %p11305_p2 }
  0x2f   :  { %45 = dma.hbm_to_vmem [thread:$0]  %s14752_s27, 6144, %s40_s21, [#allocation3], %s11362_s25, %s11362_s25, %s11363_s3  }
  0x30   :  { %p11308_p5 = pnand %p11307_p4, %p11301_p1 }
  0x32   :  { %11311 = shalt.err (!%p11308_p5)
}
  0x33   :  { %73 = dma.hbm_to_vmem [thread:$0]  %s14639_s6, 6144, %s68_s23, [#allocation5], %s11362_s25, %s11362_s25, %s11363_s3  }
  0x34   :  { %s11366_s4 = smov [#allocation9]   ;;  %s11367_s30 = smov [#allocation10]  }
  0x35   :  { %s95_s29 = sshll.u32 %s11366_s4, 4  ;;  %s107_s0 = sshll.u32 %s11367_s30, 4  ;;  %s96_s29 = int_to_ptr.vmem [resolvable:$true] %s95_s29  ;;  %s108_s0 = int_to_ptr.vmem [resolvable:$true] %s107_s0 }
  0x36   :  { %s11320_s21 = scalar_lea.vmem %s96_s29, 6144  ;;  %p11325_p7 = scmp.lt.s32.totalorder %s96_s29, %s96_s29 }
  0x37   :  { %p11321_p6 = scmp.ne.s32.totalorder %s96_s29, %s11320_s21  ;;  %p11326_p8 = scmp.lt.s32.totalorder %s11320_s21, %s11320_s21 }
  0x39   :  { %p11327_p9 = por %p11326_p8, %p11325_p7 }
  0x3b   :  { %p11328_p10 = pnand %p11327_p9, %p11321_p6 }
  0x3d   :  { %11331 = shalt.err (!%p11328_p10)
}
  0x3e   :  { %101 = dma.hbm_to_vmem [thread:$0]  %s14643_s10, 6144, %s96_s29, [#allocation8], %s11362_s25, %s11362_s25, %s11363_s3  }
  0x3f   :  { %s11340_s6 = scalar_lea.vmem %s108_s0, 6144  ;;  %p11345_p12 = scmp.lt.s32.totalorder %s108_s0, %s108_s0 }
  0x40   :  { %p11341_p11 = scmp.ne.s32.totalorder %s108_s0, %s11340_s6  ;;  %p11346_p13 = scmp.lt.s32.totalorder %s11340_s6, %s11340_s6 }
  0x42   :  { %p11347_p0 = por %p11346_p13, %p11345_p12 }
  0x44   :  { %p11348_p1 = pnand %p11347_p0, %p11341_p11 }
  0x46   :  { %11351 = shalt.err (!%p11348_p1)
}
  0x47   :  { %113 = dma.hbm_to_vmem [thread:$0]  %s14644_s11, 6144, %s108_s0, [#allocation11], %s11362_s25, %s11362_s25, %s11363_s3  }
  0x48   :  { %11352 = dma.done.wait [#allocation3], 6144  }
  0x49   :  { %11353 = vsyncadd [#allocation3], 4294961152 }
  0x4a   :  { %11354 = dma.done.wait [#allocation5], 12288  }
  0x4b   :  { %11355 = vsyncadd [#allocation5], 4294955008 }
  0x4c   :  { %11356 = dma.done.wait [#allocation8], 12288  }
  0x4d   :  { %11357 = vsyncadd [#allocation8], 4294955008 }
  0x4e   :  { %11358 = dma.done.wait [#allocation11], 6144  }
  0x4f   :  { %11359 = vsyncadd [#allocation11], 4294961152  ;;  %v14656_v0 = vmov 0.0   ;;  %v198_v1 = vld [vmem:[#allocation2 + $0x170] sm:$0xff]  ;;  %v197_v2 = vld [vmem:[#allocation2 + $0x168] sm:$0xff]  ;;  %s14753_s25 = sld [smem:[#allocation56_spill]] }
  0x50   :  { %281 = vmatprep.mubr.f32.mxu0 %v14656_v0  ;;  %v195_v3 = vld [vmem:[#allocation2 + $0x158] sm:$0xff]  ;;  %217 = vmatprep.subr.mxu0 %v198_v1  ;;  %v194_v4 = vld [vmem:[#allocation2 + $0x150] sm:$0xff]  ;;  %v192_v5 = vld [vmem:[#allocation2 + $0x140] sm:$0xff]  ;;  %vm11369_vm0 = vmmov 0   ;;  %s14764_s22 = sld [smem:[#allocation60_spill]]  ;;  %vm4394_vm1 = vcmask 1040384  }
  0x51   :  { %218 = vmatpush1.msra.mxu0 %v197_v2  ;;  %v191_v6 = vld [vmem:[#allocation2 + $0x138] sm:$0xff]  ;;  %v189_v7 = vld [vmem:[#allocation2 + $0x128] sm:$0xff]  ;;  %v188_v8 = vld [vmem:[#allocation2 + $0x120] sm:$0xff]  ;;  %s14889_s1 = sld [smem:[#allocation57_spill]]  ;;  %vm4403_vm2 = vcmask 1041408   ;;  %vm4412_vm3 = vcmask 1042432  }
  0x52   :  { %219 = vmatprep.subr.mxu0 %v195_v3  ;;  %v186_v9 = vld [vmem:[#allocation2 + $0x110] sm:$0xff]  ;;  %v185_v10 = vld [vmem:[#allocation2 + $0x108] sm:$0xff]  ;;  %v183_v11 = vld [vmem:[#allocation2 + $0xf8] sm:$0xff]  ;;  %vm4421_vm4 = vcmask 1043456   ;;  %vm4430_vm5 = vcmask 1044480   ;;  %vm5638_vm6 = vcmask 1045504  }
  0x53   :  { %220 = vmatpush1.msra.mxu0 %v194_v4  ;;  %v182_v12 = vld [vmem:[#allocation2 + $0xf0] sm:$0xff]  ;;  %v180_v13 = vld [vmem:[#allocation2 + $0xe0] sm:$0xff]  ;;  %v179_v15 = vld [vmem:[#allocation2 + $0xd8] sm:$0xff]  ;;  %vm5449_vm7 = vcmask 37888   ;;  %vm5634_vm8 = vcmask 48128  }
  0x54   :  { %221 = vmatprep.subr.mxu0 %v192_v5  ;;  %v199_v16 = vld [vmem:[#allocation2 + $0x178] sm:$0xff]  ;;  %v177_v17 = vld [vmem:[#allocation2 + $0xc8] sm:$0xff]  ;;  %v196_v18 = vld [vmem:[#allocation2 + $0x160] sm:$0xff] }
  0x55   :  { %222 = vmatpush1.msra.mxu0 %v191_v6  ;;  %v11516_v14 = vld [vmem:[%s14753_s25] sm:$0xff]  ;;  %9875 = vmatprep.subr.mxu1 %v199_v16  ;;  %v193_v20 = vld [vmem:[#allocation2 + $0x148] sm:$0xff]  ;;  %v174_v21 = vld [vmem:[#allocation2 + $0xb0] sm:$0xff] }
  0x56   :  { %223 = vmatprep.subr.mxu0 %v189_v7  ;;  %9907 = vmatprep.mubr.f32.mxu1 %v11516_v14  ;;  %v176_v19 = vld [vmem:[#allocation2 + $0xc0] sm:$0xff]  ;;  %v173_v22 = vld [vmem:[#allocation2 + $0xa8] sm:$0xff]  ;;  %v190_v23 = vld [vmem:[#allocation2 + $0x130] sm:$0xff] }
  0x57   :  { %224 = vmatpush1.msra.mxu0 %v188_v8  ;;  %9876 = vmatpush3.msra.mxu1 %v199_v16  ;;  %v171_v24 = vld [vmem:[#allocation2 + $0x98] sm:$0xff]  ;;  %v170_v25 = vld [vmem:[#allocation2 + $0x90] sm:$0xff]  ;;  %v168_v27 = vld [vmem:[#allocation2 + $0x80] sm:$0xff] }
  0x58   :  { %225 = vmatprep.subr.mxu0 %v186_v9  ;;  %9877 = vmatprep.subr.mxu1 %v196_v18  ;;  %v187_v26 = vld [vmem:[#allocation2 + $0x118] sm:$0xff]  ;;  %v184_v29 = vld [vmem:[#allocation2 + $0x100] sm:$0xff]  ;;  %v165_v30 = vld [vmem:[#allocation2 + $0x68] sm:$0xff] }
  0x59   :  { %226 = vmatpush1.msra.mxu0 %v185_v10  ;;  %9878 = vmatpush3.msra.mxu1 %v196_v18  ;;  %v167_v28 = vld [vmem:[#allocation2 + $0x78] sm:$0xff]  ;;  %v164_v31 = vld [vmem:[#allocation2 + $0x60] sm:$0xff]  ;;  %v181_v32 = vld [vmem:[#allocation2 + $0xe8] sm:$0xff] }
  0x5a   :  { %227 = vmatprep.subr.mxu0 %v183_v11  ;;  %9879 = vmatprep.subr.mxu1 %v193_v20  ;;  %v162_v33 = vld [vmem:[#allocation2 + $0x50] sm:$0xff]  ;;  %v161_v34 = vld [vmem:[#allocation2 + $0x48] sm:$0xff]  ;;  %v159_v36 = vld [vmem:[#allocation2 + $0x38] sm:$0xff] }
  0x5b   :  { %228 = vmatpush1.msra.mxu0 %v182_v12  ;;  %9880 = vmatpush3.msra.mxu1 %v193_v20  ;;  %v178_v35 = vld [vmem:[#allocation2 + $0xd0] sm:$0xff]  ;;  %v175_v38 = vld [vmem:[#allocation2 + $0xb8] sm:$0xff]  ;;  %v156_v39 = vld [vmem:[#allocation2 + $0x20] sm:$0xff] }
  0x5c   :  { %229 = vmatprep.subr.mxu0 %v180_v13  ;;  %9881 = vmatprep.subr.mxu1 %v190_v23  ;;  %v158_v37 = vld [vmem:[#allocation2 + $0x30] sm:$0xff]  ;;  %v155_v40 = vld [vmem:[#allocation2 + $0x18] sm:$0xff]  ;;  %v172_v41 = vld [vmem:[#allocation2 + $0xa0] sm:$0xff] }
  0x5d   :  { %230 = vmatpush1.msra.mxu0 %v179_v15  ;;  %9882 = vmatpush3.msra.mxu1 %v190_v23  ;;  %v153_v42 = vld [vmem:[#allocation2 + $0x8] sm:$0xff]  ;;  %v152_v43 = vld [vmem:[#allocation2] sm:$0xff]  ;;  %v11519_v45 = vld [vmem:[#allocation4 + $0x170] sm:$0xff] }
  0x5e   :  { %231 = vmatprep.subr.mxu0 %v177_v17  ;;  %9883 = vmatprep.subr.mxu1 %v187_v26  ;;  %v169_v44 = vld [vmem:[#allocation2 + $0x88] sm:$0xff]  ;;  %14754 = vst [vmem:[#allocation16_spill] sm:$0xff] %v11519_v45  ;;  %v11523_v47 = vld [vmem:[#allocation4 + $0x158] sm:$0xff]  ;;  %v11527_v48 = vld [vmem:[#allocation4 + $0x150] sm:$0xff] }
  0x5f   :  { %232 = vmatpush1.msra.mxu0 %v176_v19  ;;  %9884 = vmatpush3.msra.mxu1 %v187_v26  ;;  %v11521_v46 = vld [vmem:[#allocation4 + $0x168] sm:$0xff]  ;;  %v166_v49 = vld [vmem:[#allocation2 + $0x70] sm:$0xff]  ;;  %v11530_v50 = vld [vmem:[#allocation4 + $0x140] sm:$0xff] }
  0x60   :  { %233 = vmatprep.subr.mxu0 %v174_v21  ;;  %9885 = vmatprep.subr.mxu1 %v184_v29  ;;  %v11536_v51 = vld [vmem:[%s14753_s25 + $0x8] sm:$0xff]  ;;  %v11539_v52 = vld [vmem:[#allocation4 + $0x138] sm:$0xff]  ;;  %v11545_v54 = vld [vmem:[#allocation4 + $0x120] sm:$0xff] }
  0x61   :  { %234 = vmatpush1.msra.mxu0 %v173_v22  ;;  %9886 = vmatpush3.msra.mxu1 %v184_v29  ;;  %v11542_v53 = vld [vmem:[#allocation4 + $0x128] sm:$0xff]  ;;  %v163_v55 = vld [vmem:[#allocation2 + $0x58] sm:$0xff]  ;;  %v11549_v56 = vld [vmem:[#allocation4 + $0x110] sm:$0xff] }
  0x62   :  { %235 = vmatprep.subr.mxu0 %v171_v24  ;;  %9887 = vmatprep.subr.mxu1 %v181_v32  ;;  %v11555_v57 = vld [vmem:[%s14753_s25 + $0x10] sm:$0xff]  ;;  %v11558_v58 = vld [vmem:[#allocation4 + $0x108] sm:$0xff]  ;;  %v11561_v59 = vld [vmem:[#allocation4 + $0xf8] sm:$0xff] }
  0x63   :  { %236 = vmatpush1.msra.mxu0 %v170_v25  ;;  %9888 = vmatpush3.msra.mxu1 %v181_v32  ;;  %v11564_v60 = vld [vmem:[#allocation4 + $0xf0] sm:$0xff]  ;;  %v160_v61 = vld [vmem:[#allocation2 + $0x40] sm:$0xff]  ;;  %v11574_v63 = vld [vmem:[%s14753_s25 + $0x18] sm:$0xff] }
  0x64   :  { %237 = vmatprep.subr.mxu0 %v168_v27  ;;  %9889 = vmatprep.subr.mxu1 %v178_v35  ;;  %v11568_v62 = vld [vmem:[#allocation4 + $0xe0] sm:$0xff]  ;;  %v11577_v1 = vld [vmem:[#allocation4 + $0xd8] sm:$0xff]  ;;  %v11580_v2 = vld [vmem:[#allocation4 + $0xc8] sm:$0xff] }
  0x65   :  { %238 = vmatpush1.msra.mxu0 %v167_v28  ;;  %9890 = vmatpush3.msra.mxu1 %v178_v35  ;;  %v11583_v3 = vld [vmem:[#allocation4 + $0xc0] sm:$0xff]  ;;  %v157_v4 = vld [vmem:[#allocation2 + $0x28] sm:$0xff]  ;;  %v11587_v5 = vld [vmem:[#allocation4 + $0xb0] sm:$0xff] }
  0x66   :  { %239 = vmatprep.subr.mxu0 %v165_v30  ;;  %9891 = vmatprep.subr.mxu1 %v175_v38  ;;  %v11593_v6 = vld [vmem:[%s14753_s25 + $0x20] sm:$0xff]  ;;  %v11596_v7 = vld [vmem:[#allocation4 + $0xa8] sm:$0xff]  ;;  %v11599_v8 = vld [vmem:[#allocation4 + $0x98] sm:$0xff] }
  0x67   :  { %240 = vmatpush1.msra.mxu0 %v164_v31  ;;  %9892 = vmatpush3.msra.mxu1 %v175_v38  ;;  %v11602_v9 = vld [vmem:[#allocation4 + $0x90] sm:$0xff]  ;;  %v11606_v11 = vld [vmem:[#allocation4 + $0x80] sm:$0xff]  ;;  %v151_v12 = vld [vmem:[%s14753_s25 + $0x28] sm:$0xff] }
  0x68   :  { %241 = vmatprep.subr.mxu0 %v162_v33  ;;  %9893 = vmatprep.subr.mxu1 %v172_v41  ;;  %v154_v10 = vld [vmem:[#allocation2 + $0x10] sm:$0xff]  ;;  %v11613_v13 = vld [vmem:[#allocation4 + $0x78] sm:$0xff]  ;;  %v11619_v15 = vld [vmem:[#allocation4 + $0x60] sm:$0xff] }
  0x69   :  { %242 = vmatpush1.msra.mxu0 %v161_v34  ;;  %9894 = vmatpush3.msra.mxu1 %v172_v41  ;;  %v11622_v16 = vld [vmem:[#allocation4 + $0x50] sm:$0xff]  ;;  %v11625_v17 = vld [vmem:[#allocation4 + $0x48] sm:$0xff]  ;;  %v11628_v18 = vld [vmem:[#allocation4 + $0x178] sm:$0xff] }
  0x6a   :  { %243 = vmatprep.subr.mxu0 %v159_v36  ;;  %9895 = vmatprep.subr.mxu1 %v169_v44  ;;  %v11631_v19 = vld [vmem:[#allocation4 + $0x38] sm:$0xff]  ;;  %v11635_v20 = vld [vmem:[#allocation4 + $0x30] sm:$0xff]  ;;  %v11638_v21 = vld [vmem:[#allocation4 + $0x160] sm:$0xff] }
  0x6b   :  { %244 = vmatpush1.msra.mxu0 %v158_v37  ;;  %9896 = vmatpush3.msra.mxu1 %v169_v44  ;;  %v11641_v22 = vld [vmem:[#allocation4 + $0x20] sm:$0xff]  ;;  %v11645_v23 = vld [vmem:[#allocation4 + $0x18] sm:$0xff]  ;;  %v11648_v24 = vld [vmem:[#allocation4 + $0x148] sm:$0xff] }
  0x6c   :  { %245 = vmatprep.subr.mxu0 %v156_v39  ;;  %9897 = vmatprep.subr.mxu1 %v166_v49  ;;  %14755 = vst [vmem:[#allocation17_spill] sm:$0xff] %v11641_v22  ;;  %14756 = vst [vmem:[#allocation18_spill] sm:$0xff] %v11645_v23  ;;  %v11651_v25 = vld [vmem:[#allocation4 + $0x8] sm:$0xff]  ;;  %v11655_v26 = vld [vmem:[#allocation4] sm:$0xff] }
  0x6d   :  { %246 = vmatpush1.msra.mxu0 %v155_v40  ;;  %9898 = vmatpush3.msra.mxu1 %v166_v49  ;;  %14757 = vst [vmem:[#allocation19_spill] sm:$0xff] %v11651_v25  ;;  %14758 = vst [vmem:[#allocation20_spill] sm:$0xff] %v11655_v26  ;;  %v11658_v27 = vld [vmem:[#allocation4 + $0x130] sm:$0xff]  ;;  %v11664_v28 = vld [vmem:[#allocation4 + $0x118] sm:$0xff]  ;;  %v202_v40 = vlaneseq }
  0x6e   :  { %247 = vmatprep.subr.mxu0 %v153_v42  ;;  %9899 = vmatprep.subr.mxu1 %v163_v55  ;;  %v11670_v29 = vld [vmem:[#allocation4 + $0x100] sm:$0xff]  ;;  %v11675_v30 = vld [vmem:[#allocation4 + $0xe8] sm:$0xff]  ;;  %v11681_v31 = vld [vmem:[#allocation4 + $0xd0] sm:$0xff] }
  0x6f   :  { %248 = vmatpush1.msra.mxu0 %v152_v43  ;;  %9900 = vmatpush3.msra.mxu1 %v163_v55  ;;  %v11687_v32 = vld [vmem:[#allocation4 + $0xb8] sm:$0xff]  ;;  %v11693_v33 = vld [vmem:[#allocation4 + $0xa0] sm:$0xff]  ;;  %v11699_v34 = vld [vmem:[#allocation4 + $0x88] sm:$0xff]  ;;  %v11790_v41 = vshrl.u32 %v202_v40, 7 }
  0x70   :  { %282 = vmatmul.mubr.f32.vlgmr.msra.gmra.mxu0 %v11516_v14  ;;  %478 = vmatprep.subr.mxu0 %v11519_v45  ;;  %v11616_v14 = vld [vmem:[#allocation4 + $0x68] sm:$0xff]  ;;  %v11705_v35 = vld [vmem:[#allocation4 + $0x70] sm:$0xff]  ;;  %v11711_v36 = vld [vmem:[#allocation4 + $0x58] sm:$0xff] }
  0x71   :  { %479 = vmatpush1.msra.mxu0 %v11521_v46  ;;  %287 = vmatprep.mubr.f32.mxu0 %v14656_v0  ;;  %v11717_v37 = vld [vmem:[#allocation4 + $0x40] sm:$0xff]  ;;  %v11723_v38 = vld [vmem:[#allocation4 + $0x28] sm:$0xff]  ;;  %v11729_v39 = vld [vmem:[#allocation4 + $0x10] sm:$0xff]  ;;  %14762 = vst [vmem:[#allocation24_spill] sm:$0xff] %v11790_v41  ;;  %v11793_v42 = vsub.s32 0, %v11790_v41  ;;  %v11799_v49 = vsub.s32 1, %v11790_v41 }
  0x72   :  { %480 = vmatprep.subr.mxu0 %v11523_v47  ;;  %9901 = vmatprep.subr.mxu1 %v160_v61  ;;  %14759 = vst [vmem:[#allocation21_spill] sm:$0xff] %v11717_v37  ;;  %14760 = vst [vmem:[#allocation22_spill] sm:$0xff] %v11723_v38  ;;  %v200_v43 = vld [vmem:[%s14764_s22] sm:$0x7] }
  0x73   :  { %481 = vmatpush1.msra.mxu0 %v11527_v48  ;;  %9902 = vmatpush3.msra.mxu1 %v160_v61  ;;  %14761 = vst [vmem:[#allocation23_spill] sm:$0xff] %v11729_v39  ;;  %14763 = vst [vmem:[#allocation25_spill] sm:$0xff] %v11793_v42  ;;  %v205_v55 = vrot.slane %v200_v43, %v11793_v42  ;;  %v209_v61 = vrot.slane %v200_v43, %v11799_v49 }
  0x74   :  { %482 = vmatprep.subr.mxu0 %v11530_v50  ;;  %288 = vmatmul.mubr.f32.gmra.mxu0 %v11536_v51  ;;  %14765 = vst [vmem:[#allocation26_spill] sm:$0xff] %v11799_v49 }
  0x75   :  { %483 = vmatpush1.msra.mxu0 %v11539_v52  ;;  %293 = vmatprep.mubr.f32.mxu0 %v14656_v0 }
  0x76   :  { %484 = vmatprep.subr.mxu0 %v11542_v53  ;;  %9903 = vmatprep.subr.mxu1 %v157_v4 }
  0x77   :  { %485 = vmatpush1.msra.mxu0 %v11545_v54  ;;  %9904 = vmatpush3.msra.mxu1 %v157_v4 }
  0x78   :  { %486 = vmatprep.subr.mxu0 %v11549_v56  ;;  %294 = vmatmul.mubr.f32.gmra.mxu0 %v11555_v57 }
  0x79   :  { %487 = vmatpush1.msra.mxu0 %v11558_v58  ;;  %299 = vmatprep.mubr.f32.mxu0 %v14656_v0 }
  0x7a   :  { %488 = vmatprep.subr.mxu0 %v11561_v59  ;;  %9905 = vmatprep.subr.mxu1 %v154_v10 }
  0x7b   :  { %489 = vmatpush1.msra.mxu0 %v11564_v60  ;;  %9906 = vmatpush3.msra.mxu1 %v154_v10 }
  0x7c   :  { %490 = vmatprep.subr.mxu0 %v11568_v62  ;;  %300 = vmatmul.mubr.f32.gmra.mxu0 %v11574_v63 }
  0x7d   :  { %491 = vmatpush1.msra.mxu0 %v11577_v1  ;;  %305 = vmatprep.mubr.f32.mxu0 %v14656_v0 }
  0x7e   :  { %492 = vmatprep.subr.mxu0 %v11580_v2  ;;  %9916 = vmatprep.subr.mxu1 %v14656_v0 }
  0x7f   :  { %493 = vmatpush1.msra.mxu0 %v11583_v3  ;;  %9908 = vmatmul.mubr.f32.vlgmr.msra.gmra.mxu1 %v11536_v51 }
  0x80   :  { %494 = vmatprep.subr.mxu0 %v11587_v5  ;;  %306 = vmatmul.mubr.f32.gmra.mxu0 %v11593_v6 }
  0x81   :  { %495 = vmatpush1.msra.mxu0 %v11596_v7  ;;  %311 = vmatprep.mubr.f32.mxu0 %v14656_v0 }
  0x82   :  { %496 = vmatprep.subr.mxu0 %v11599_v8  ;;  %9917 = vmatpush3.msra.mxu1 %v11628_v18 }
  0x83   :  { %497 = vmatpush1.msra.mxu0 %v11602_v9  ;;  %9918 = vmatprep.subr.mxu1 %v14656_v0 }
  0x84   :  { %498 = vmatprep.subr.mxu0 %v11606_v11  ;;  %312 = vmatmul.mubr.f32.gmra.mxu0 %v151_v12 }
  0x85   :  { %499 = vmatpush1.msra.mxu0 %v11613_v13  ;;  %542 = vmatprep.mubr.f32.mxu0 %v14656_v0 }
  0x86   :  { %500 = vmatprep.subr.mxu0 %v11616_v14  ;;  %9919 = vmatpush3.msra.mxu1 %v11638_v21 }
  0x87   :  { %501 = vmatpush1.msra.mxu0 %v11619_v15  ;;  %9920 = vmatprep.subr.mxu1 %v14656_v0 }
  0x88   :  { %502 = vmatprep.subr.mxu0 %v11622_v16  ;;  %9921 = vmatpush3.msra.mxu1 %v11648_v24 }
  0x89   :  { %503 = vmatpush1.msra.mxu0 %v11625_v17  ;;  %9922 = vmatprep.subr.mxu1 %v14656_v0 }
  0x8a   :  { %504 = vmatprep.subr.mxu0 %v11631_v19  ;;  %9923 = vmatpush3.msra.mxu1 %v11658_v27 }
  0x8b   :  { %505 = vmatpush1.msra.mxu0 %v11635_v20  ;;  %9924 = vmatprep.subr.mxu1 %v14656_v0 }
  0x8c   :  { %506 = vmatprep.subr.mxu0 %v11641_v22  ;;  %9925 = vmatpush3.msra.mxu1 %v11664_v28 }
  0x8d   :  { %507 = vmatpush1.msra.mxu0 %v11645_v23  ;;  %9910 = vmatprep.mubr.f32.mxu1 %v11555_v57 }
  0x8e   :  { %508 = vmatprep.subr.mxu0 %v11651_v25  ;;  %9926 = vmatprep.subr.mxu1 %v14656_v0 }
  0x8f   :  { %509 = vmatpush1.msra.mxu0 %v11655_v26  ;;  %9911 = vmatmul.mubr.f32.gmra.mxu1 %v11574_v63 }
  0x90   :  { %543 = vmatmul.mubr.f32.vlgmr.msra.gmra.mxu0 %v14656_v0  ;;  %9927 = vmatpush3.msra.mxu1 %v11670_v29 }
  0x91   :  { %9913 = vmatprep.mubr.f32.mxu1 %v11593_v6  ;;  %9928 = vmatprep.subr.mxu1 %v14656_v0 }
  0x92   :  { %640 = vmatprep.subr.mxu0 %v11519_v45  ;;  %9929 = vmatpush3.msra.mxu1 %v11675_v30 }
  0x93   :  { %641 = vmatpush1.msra.mxu0 %v11521_v46  ;;  %9930 = vmatprep.subr.mxu1 %v14656_v0 }
  0x94   :  { %9914 = vmatmul.mubr.f32.gmra.mxu1 %v151_v12  ;;  %642 = vmatprep.subr.mxu0 %v11523_v47 }
  0x95   :  { %9931 = vmatpush3.msra.mxu1 %v11681_v31  ;;  %9948 = vmatprep.mubr.msk.f32.mxu1 %vm11369_vm0, %v14656_v0 }
  0x96   :  { %9932 = vmatprep.subr.mxu1 %v14656_v0  ;;  %643 = vmatpush1.msra.mxu0 %v11527_v48 }
  0x97   :  { %9933 = vmatpush3.msra.mxu1 %v11687_v32  ;;  %644 = vmatprep.subr.mxu0 %v11530_v50 }
  0x98   :  { %9934 = vmatprep.subr.mxu1 %v14656_v0  ;;  %645 = vmatpush1.msra.mxu0 %v11539_v52 }
  0x99   :  { %9935 = vmatpush3.msra.mxu1 %v11693_v33  ;;  %646 = vmatprep.subr.mxu0 %v11542_v53 }
  0x9a   :  { %9936 = vmatprep.subr.mxu1 %v14656_v0  ;;  %647 = vmatpush1.msra.mxu0 %v11545_v54 }
  0x9b   :  { %9937 = vmatpush3.msra.mxu1 %v11699_v34  ;;  %648 = vmatprep.subr.mxu0 %v11549_v56 }
  0x9c   :  { %9938 = vmatprep.subr.mxu1 %v14656_v0  ;;  %649 = vmatpush1.msra.mxu0 %v11558_v58 }
  0x9d   :  { %9939 = vmatpush3.msra.mxu1 %v11705_v35  ;;  %650 = vmatprep.subr.mxu0 %v11561_v59 }
  0x9e   :  { %9940 = vmatprep.subr.mxu1 %v14656_v0  ;;  %651 = vmatpush1.msra.mxu0 %v11564_v60 }
  0x9f   :  { %9941 = vmatpush3.msra.mxu1 %v11711_v36  ;;  %652 = vmatprep.subr.mxu0 %v11568_v62 }
  0xa0   :  { %9942 = vmatprep.subr.mxu1 %v14656_v0  ;;  %653 = vmatpush1.msra.mxu0 %v11577_v1 }
  0xa1   :  { %9943 = vmatpush3.msra.mxu1 %v11717_v37  ;;  %654 = vmatprep.subr.mxu0 %v11580_v2 }
  0xa2   :  { %9944 = vmatprep.subr.mxu1 %v14656_v0  ;;  %655 = vmatpush1.msra.mxu0 %v11583_v3 }
  0xa3   :  { %9945 = vmatpush3.msra.mxu1 %v11723_v38  ;;  %656 = vmatprep.subr.mxu0 %v11587_v5 }
  0xa4   :  { %9946 = vmatprep.subr.mxu1 %v14656_v0  ;;  %657 = vmatpush1.msra.mxu0 %v11596_v7 }
  0xa5   :  { %9947 = vmatpush3.msra.mxu1 %v11729_v39  ;;  %658 = vmatprep.subr.mxu0 %v11599_v8 }
  0xa6   :  { %9949 = vmatmul.mubr.f32.vlgmr.msra.gmra.mxu1 %v14656_v0  ;;  %9951 = vmatprep.subr.mxu1 %v14656_v0 }
  0xa7   :  { %9952 = vmatpush3.msra.mxu1 %v11628_v18  ;;  %659 = vmatpush1.msra.mxu0 %v11602_v9 }
  0xa8   :  { %9953 = vmatprep.subr.mxu1 %v14656_v0  ;;  %660 = vmatprep.subr.mxu0 %v11606_v11 }
  0xa9   :  { %9954 = vmatpush3.msra.mxu1 %v11638_v21  ;;  %661 = vmatpush1.msra.mxu0 %v11613_v13 }
  0xaa   :  { %9955 = vmatprep.subr.mxu1 %v14656_v0  ;;  %662 = vmatprep.subr.mxu0 %v11616_v14 }
  0xab   :  { %9956 = vmatpush3.msra.mxu1 %v11648_v24  ;;  %663 = vmatpush1.msra.mxu0 %v11619_v15 }
  0xac   :  { %9957 = vmatprep.subr.mxu1 %v14656_v0  ;;  %664 = vmatprep.subr.mxu0 %v11622_v16 }
  0xad   :  { %9958 = vmatpush3.msra.mxu1 %v11658_v27  ;;  %665 = vmatpush1.msra.mxu0 %v11625_v17 }
  0xae   :  { %9959 = vmatprep.subr.mxu1 %v14656_v0  ;;  %666 = vmatprep.subr.mxu0 %v11631_v19 }
  0xaf   :  { %9960 = vmatpush3.msra.mxu1 %v11664_v28  ;;  %667 = vmatpush1.msra.mxu0 %v11635_v20 }
  0xb0   :  { %9961 = vmatprep.subr.mxu1 %v14656_v0  ;;  %668 = vmatprep.subr.mxu0 %v11641_v22 }
  0xb1   :  { %9962 = vmatpush3.msra.mxu1 %v11670_v29  ;;  %669 = vmatpush1.msra.mxu0 %v11645_v23 }
  0xb2   :  { %9963 = vmatprep.subr.mxu1 %v14656_v0  ;;  %670 = vmatprep.subr.mxu0 %v11651_v25 }
  0xb3   :  { %9964 = vmatpush3.msra.mxu1 %v11675_v30  ;;  %671 = vmatpush1.msra.mxu0 %v11655_v26 }
  0xb4   :  { %9965 = vmatprep.subr.mxu1 %v14656_v0  ;;  %704 = vmatprep.mubr.f32.mxu0 %v14656_v0 }
  0xb5   :  { %9966 = vmatpush3.msra.mxu1 %v11681_v31  ;;  %9983 = vmatprep.mubr.msk.f32.mxu1 %vm11369_vm0, %v14656_v0 }
  0xb6   :  { %9967 = vmatprep.subr.mxu1 %v14656_v0  ;;  %802 = vmatprep.subr.mxu0 %v11519_v45 }
  0xb7   :  { %9968 = vmatpush3.msra.mxu1 %v11687_v32 }
  0xb8   :  { %9969 = vmatprep.subr.mxu1 %v14656_v0 }
  0xb9   :  { %9970 = vmatpush3.msra.mxu1 %v11693_v33 }
  0xba   :  { %9971 = vmatprep.subr.mxu1 %v14656_v0 }
  0xbb   :  { %9972 = vmatpush3.msra.mxu1 %v11699_v34 }
  0xbc   :  { %9973 = vmatprep.subr.mxu1 %v14656_v0 }
  0xbd   :  { %9974 = vmatpush3.msra.mxu1 %v11705_v35 }
  0xbe   :  { %9975 = vmatprep.subr.mxu1 %v14656_v0 }
  0xbf   :  { %9976 = vmatpush3.msra.mxu1 %v11711_v36 }
  0xc0   :  { %9977 = vmatprep.subr.mxu1 %v14656_v0 }
  0xc1   :  { %9978 = vmatpush3.msra.mxu1 %v11717_v37 }
  0xc2   :  { %9979 = vmatprep.subr.mxu1 %v14656_v0 }
  0xc3   :  { %9980 = vmatpush3.msra.mxu1 %v11723_v38 }
  0xc4   :  { %9981 = vmatprep.subr.mxu1 %v14656_v0 }
  0xc5   :  { %9982 = vmatpush3.msra.mxu1 %v11729_v39 }
  0xc6   :  { %9986 = vmatprep.subr.mxu1 %v14656_v0 }
 0x130   :  { %v283_v44 = vpop.f32.mrf.mxu0 }
 0x132   :  { %v285_v51 = vpop.f32.mrf.mxu0 }
 0x133   :  { %v286_v37 = vadd.f32 %v285_v51, %v209_v61 }
 0x134   :  { %v289_v57 = vpop.f32.mrf.mxu0 }
 0x135   :  { %v11803_v63 = vadd.f32 %v289_v57, %v205_v55  ;;  %v11818_v57 = vsub.s32 2, %v11790_v41 }
 0x136   :  { %v291_v4 = vpop.f32.mrf.mxu0 }
 0x137   :  { %14766 = vst [vmem:[#allocation27_spill] sm:$0xff] %v11803_v63  ;;  %v11805_v6 = vadd.f32 %v291_v4, %v209_v61  ;;  %14773 = vst [vmem:[#allocation34_spill] sm:$0xff] %v11818_v57 }
 0x138   :  { %v295_v10 = vpop.f32.mrf.mxu0 }
 0x139   :  { %14767 = vst [vmem:[#allocation28_spill] sm:$0xff] %v11805_v6  ;;  %v11807_v12 = vadd.f32 %v295_v10, %v205_v55 }
 0x13a   :  { %v297_v40 = vpop.f32.mrf.mxu0 }
 0x13b   :  { %14768 = vst [vmem:[#allocation29_spill] sm:$0xff] %v11807_v12  ;;  %v11809_v0 = vadd.f32 %v297_v40, %v209_v61  ;;  %v213_v40 = vrot.slane %v200_v43, %v11818_v57 }
 0x13c   :  { %v301_v45 = vpop.f32.mrf.mxu0 }
 0x13d   :  { %14769 = vst [vmem:[#allocation30_spill] sm:$0xff] %v11809_v0  ;;  %v11811_v39 = vadd.f32 %v301_v45, %v205_v55 }
 0x13e   :  { %v303_v26 = vpop.f32.mrf.mxu0 }
 0x13f   :  { %14770 = vst [vmem:[#allocation31_spill] sm:$0xff] %v11811_v39  ;;  %v11813_v25 = vadd.f32 %v303_v26, %v209_v61  ;;  %v9909_v39 = vpop.f32.mrf.mxu1 }
 0x140   :  { %v307_v38 = vpop.f32.mrf.mxu0  ;;  %v11827_v26 = vadd.f32 %v9909_v39, %v213_v40 }
 0x141   :  { %14771 = vst [vmem:[#allocation32_spill] sm:$0xff] %v11813_v25  ;;  %v11815_v23 = vadd.f32 %v307_v38, %v205_v55  ;;  %v461_v38 = vld [vmem:[%s14638_s5] sm:$0x7] }
 0x142   :  { %v309_v4 = vpop.f32.mrf.mxu0  ;;  %14777 = vst [vmem:[#allocation38_spill] sm:$0xff] %v11827_v26  ;;  %v11833_v41 = vrot.slane %v461_v38, %v11793_v42  ;;  %v11837_v43 = vrot.slane %v461_v38, %v11799_v49 }
 0x143   :  { %14772 = vst [vmem:[#allocation33_spill] sm:$0xff] %v11815_v23  ;;  %v11820_v6 = vadd.f32 %v309_v4, %v209_v61  ;;  %v284_v23 = vadd.f32 %v283_v44, %v205_v55 }
 0x144   :  { %v313_v10 = vpop.f32.mrf.mxu0  ;;  %14778 = vst [vmem:[#allocation39_spill] sm:$0xff] %v11833_v41 }
 0x145   :  { %14774 = vst [vmem:[#allocation35_spill] sm:$0xff] %v11820_v6  ;;  %v11822_v12 = vadd.f32 %v313_v10, %v205_v55  ;;  %v384_v6 = vpop.f32.mrf.mxu1 }
 0x146   :  { %v315_v0 = vpop.f32.mrf.mxu0 }
 0x147   :  { %14775 = vst [vmem:[#allocation36_spill] sm:$0xff] %v11822_v12  ;;  %v11825_v45 = vadd.f32 %v315_v0, %v209_v61  ;;  %v385_v61 = vadd.f32 %v384_v6, %v213_v40  ;;  %v14784_v6 = vmov 0.0  }
 0x149   :  { %14776 = vst [vmem:[#allocation37_spill] sm:$0xff] %v11825_v45 }
 0x14f   :  { %v9912_v45 = vpop.f32.mrf.mxu1 }
 0x150   :  { %v544_v4 = vpop.f32.mrf.mxu0  ;;  %v11839_v39 = vadd.f32 %v9912_v45, %v213_v40 }
 0x151   :  { %v545_v10 = vadd.f32 %v544_v4, %v11833_v41  ;;  %v394_v25 = vpop.f32.mrf.mxu1 }
 0x152   :  { %v546_v0 = vpop.f32.mrf.mxu0  ;;  %14779 = vst [vmem:[#allocation40_spill] sm:$0xff] %v11839_v39  ;;  %v11842_v22 = vadd.f32 %v394_v25, %v213_v40 }
 0x153   :  { %v619_v12 = vadd.f32 %v545_v10, %v284_v23  ;;  %v547_v63 = vadd.f32 %v546_v0, %v11837_v43  ;;  %v11849_v0 = vrot.slane %v461_v38, %v11818_v57  ;;  %v14786_v38 = vld [vmem:[#allocation17_spill] sm:$0xff] }
 0x154   :  { %14780 = vst [vmem:[#allocation41_spill] sm:$0xff] %v11842_v22  ;;  %v9915_v42 = vpop.f32.mrf.mxu1 }
 0x155   :  { %v9361_v26 = vmul.f32 -1.442695, %v619_v12  ;;  %v11844_v44 = vadd.f32 %v9915_v42, %v213_v40  ;;  %v626_v4 = vadd.f32 %v547_v63, %v286_v37 }
 0x156   :  { %v404_v55 = vpop.f32.mrf.mxu1 }
 0x157   :  { %10863 = vpow2.f32 %v9361_v26  ;;  %14781 = vst [vmem:[#allocation42_spill] sm:$0xff] %v11844_v44  ;;  %v11846_v49 = vadd.f32 %v404_v55, %v213_v40  ;;  %v9362_v41 = vmul.f32 -1.442695, %v626_v4  ;;  %v14785_v40 = vld [vmem:[#allocation21_spill] sm:$0xff] }
 0x159   :  { %14782 = vst [vmem:[#allocation43_spill] sm:$0xff] %v11846_v49  ;;  %10865 = vpow2.f32 %v9362_v41  ;;  %v14795_v49 = vld [vmem:[#allocation28_spill] sm:$0xff] }
 0x164   :  { %v10864_v23 = vpop.eup %10863 }
 0x165   :  { %v623_v45 = vadd.f32 1.0, %v10864_v23 }
 0x166   :  { %v615_v10 = vpop.f32.mrf.mxu1  ;;  %v10866_v25 = vpop.eup %10865 }
 0x167   :  { %10867 = vrcp.f32 %v623_v45  ;;  %v630_v39 = vadd.f32 1.0, %v10866_v25  ;;  %v616_v51 = vadd.f32 %v615_v10, %v11849_v0  ;;  %v14788_v10 = vld [vmem:[#allocation22_spill] sm:$0xff]  ;;  %v14790_v25 = vld [vmem:[#allocation20_spill] sm:$0xff] }
 0x168   :  { %v9950_v12 = vpop.f32.mrf.mxu1 }
 0x169   :  { %10869 = vrcp.f32 %v630_v39  ;;  %v14787_v39 = vld [vmem:[#allocation18_spill] sm:$0xff]  ;;  %v14789_v12 = vld [vmem:[#allocation19_spill] sm:$0xff] }
 0x174   :  { %v10868_v42 = vpop.eup %10867 }
 0x175   :  { %v633_v37 = vmul.f32 %v10868_v42, %v616_v51  ;;  %v14791_v51 = vld [vmem:[#allocation23_spill] sm:$0xff]  ;;  %v14792_v42 = vld [vmem:[#allocation16_spill] sm:$0xff] }
 0x176   :  { %v10870_v26 = vpop.eup %10869 }
 0x177   :  { %v634_v63 = vadd.f32 %v633_v37, %v385_v61  ;;  %v636_v41 = vsub.f32 1.0, %v10870_v26  ;;  %v638_v23 = vmul.f32 0.0, %v10870_v26 }
 0x179   :  { %10871 = vtanh.f32 %v634_v63  ;;  %v14793_v63 = vld [vmem:[#allocation39_spill] sm:$0xff] }
 0x186   :  { %v10872_v55 = vpop.eup %10871 }
 0x187   :  { %v637_v4 = vmul.f32 %v10872_v55, %v636_v41 }
 0x189   :  { %v11852_v45 = vadd.f32 %v638_v23, %v637_v4  ;;  %v14794_v4 = vld [vmem:[#allocation27_spill] sm:$0xff] }
 0x18b   :  { %14783 = vst [vmem:[#allocation44_spill] sm:$0xff] %v11852_v45  ;;  %705 = vmatmul.mubr.f32.vlgmr.msra.gmra.mxu0 %v11852_v45  ;;  %9984 = vmatmul.mubr.f32.vlgmr.msra.gmra.mxu1 %v11852_v45 }
 0x18c   :  { %803 = vmatpush1.msra.mxu0 %v11521_v46  ;;  %9987 = vmatpush3.msra.mxu1 %v11628_v18 }
 0x18d   :  { %804 = vmatprep.subr.mxu0 %v11523_v47  ;;  %9988 = vmatprep.subr.mxu1 %v14784_v6 }
 0x18e   :  { %805 = vmatpush1.msra.mxu0 %v11527_v48  ;;  %9989 = vmatpush3.msra.mxu1 %v11638_v21 }
 0x18f   :  { %806 = vmatprep.subr.mxu0 %v11530_v50  ;;  %9990 = vmatprep.subr.mxu1 %v14784_v6 }
 0x190   :  { %807 = vmatpush1.msra.mxu0 %v11539_v52  ;;  %9991 = vmatpush3.msra.mxu1 %v11648_v24 }
 0x191   :  { %808 = vmatprep.subr.mxu0 %v11542_v53  ;;  %9992 = vmatprep.subr.mxu1 %v14784_v6 }
 0x192   :  { %809 = vmatpush1.msra.mxu0 %v11545_v54  ;;  %9993 = vmatpush3.msra.mxu1 %v11658_v27 }
 0x193   :  { %810 = vmatprep.subr.mxu0 %v11549_v56  ;;  %9994 = vmatprep.subr.mxu1 %v14784_v6 }
 0x194   :  { %811 = vmatpush1.msra.mxu0 %v11558_v58  ;;  %9995 = vmatpush3.msra.mxu1 %v11664_v28 }
 0x195   :  { %812 = vmatprep.subr.mxu0 %v11561_v59  ;;  %9996 = vmatprep.subr.mxu1 %v14784_v6 }
 0x196   :  { %813 = vmatpush1.msra.mxu0 %v11564_v60  ;;  %9997 = vmatpush3.msra.mxu1 %v11670_v29 }
 0x197   :  { %814 = vmatprep.subr.mxu0 %v11568_v62  ;;  %9998 = vmatprep.subr.mxu1 %v14784_v6 }
 0x198   :  { %815 = vmatpush1.msra.mxu0 %v11577_v1  ;;  %9999 = vmatpush3.msra.mxu1 %v11675_v30 }
 0x199   :  { %816 = vmatprep.subr.mxu0 %v11580_v2  ;;  %10000 = vmatprep.subr.mxu1 %v14784_v6 }
 0x19a   :  { %817 = vmatpush1.msra.mxu0 %v11583_v3  ;;  %10001 = vmatpush3.msra.mxu1 %v11681_v31 }
 0x19b   :  { %818 = vmatprep.subr.mxu0 %v11587_v5  ;;  %10002 = vmatprep.subr.mxu1 %v14784_v6 }
 0x19c   :  { %819 = vmatpush1.msra.mxu0 %v11596_v7  ;;  %10003 = vmatpush3.msra.mxu1 %v11687_v32 }
 0x19d   :  { %820 = vmatprep.subr.mxu0 %v11599_v8  ;;  %10004 = vmatprep.subr.mxu1 %v14784_v6 }
 0x19e   :  { %821 = vmatpush1.msra.mxu0 %v11602_v9  ;;  %10005 = vmatpush3.msra.mxu1 %v11693_v33 }
 0x19f   :  { %822 = vmatprep.subr.mxu0 %v11606_v11  ;;  %10006 = vmatprep.subr.mxu1 %v14784_v6 }
 0x1a0   :  { %823 = vmatpush1.msra.mxu0 %v11613_v13  ;;  %10007 = vmatpush3.msra.mxu1 %v11699_v34 }
 0x1a1   :  { %824 = vmatprep.subr.mxu0 %v11616_v14  ;;  %10008 = vmatprep.subr.mxu1 %v14784_v6 }
 0x1a2   :  { %825 = vmatpush1.msra.mxu0 %v11619_v15  ;;  %10009 = vmatpush3.msra.mxu1 %v11705_v35 }
 0x1a3   :  { %826 = vmatprep.subr.mxu0 %v11622_v16  ;;  %10010 = vmatprep.subr.mxu1 %v14784_v6 }
 0x1a4   :  { %827 = vmatpush1.msra.mxu0 %v11625_v17  ;;  %10011 = vmatpush3.msra.mxu1 %v11711_v36 }
 0x1a5   :  { %828 = vmatprep.subr.mxu0 %v11631_v19  ;;  %10012 = vmatprep.subr.mxu1 %v14784_v6 }
 0x1a6   :  { %829 = vmatpush1.msra.mxu0 %v11635_v20  ;;  %10013 = vmatpush3.msra.mxu1 %v14785_v40 }
 0x1a7   :  { %830 = vmatprep.subr.mxu0 %v14786_v38  ;;  %10014 = vmatprep.subr.mxu1 %v14784_v6 }
 0x1a8   :  { %831 = vmatpush1.msra.mxu0 %v14787_v39  ;;  %10015 = vmatpush3.msra.mxu1 %v14788_v10 }
 0x1a9   :  { %832 = vmatprep.subr.mxu0 %v14789_v12  ;;  %10016 = vmatprep.subr.mxu1 %v14784_v6 }
 0x1aa   :  { %833 = vmatpush1.msra.mxu0 %v14790_v25  ;;  %866 = vmatprep.mubr.f32.mxu0 %v14784_v6 }
 0x1ab   :  { %10017 = vmatpush3.msra.mxu1 %v14791_v51  ;;  %10018 = vmatprep.mubr.msk.f32.mxu1 %vm11369_vm0, %v14784_v6 }
 0x1ac   :  { %964 = vmatprep.subr.mxu0 %v14792_v42  ;;  %10021 = vmatprep.subr.mxu1 %v14784_v6 }
 0x24b   :  { %v706_v61 = vpop.f32.mrf.mxu0  ;;  %v777_v37 = vpop.f32.mrf.mxu1 }
 0x24c   :  { %v707_v26 = vadd.f32 %v706_v61, %v14793_v63  ;;  %v778_v39 = vadd.f32 %v777_v37, %v11849_v0 }
 0x24d   :  { %v708_v41 = vpop.f32.mrf.mxu0  ;;  %v9985_v55 = vpop.f32.mrf.mxu1 }
 0x24e   :  { %v781_v23 = vadd.f32 %v707_v26, %v14794_v4  ;;  %v709_v57 = vadd.f32 %v708_v41, %v11837_v43  ;;  %v14796_v55 = vld [vmem:[#allocation38_spill] sm:$0xff] }
 0x250   :  { %v9363_v44 = vmul.f32 -1.442695, %v781_v23  ;;  %v788_v22 = vadd.f32 %v709_v57, %v14795_v49  ;;  %v14798_v57 = vld [vmem:[#allocation18_spill] sm:$0xff] }
 0x252   :  { %10873 = vpow2.f32 %v9363_v44  ;;  %v9364_v51 = vmul.f32 -1.442695, %v788_v22 }
 0x254   :  { %10875 = vpow2.f32 %v9364_v51  ;;  %v14803_v51 = vld [vmem:[#allocation16_spill] sm:$0xff] }
 0x25f   :  { %v10874_v25 = vpop.eup %10873 }
 0x260   :  { %v785_v42 = vadd.f32 1.0, %v10874_v25  ;;  %v14802_v25 = vld [vmem:[#allocation23_spill] sm:$0xff] }
 0x261   :  { %v10876_v12 = vpop.eup %10875 }
 0x262   :  { %10877 = vrcp.f32 %v785_v42  ;;  %v792_v10 = vadd.f32 1.0, %v10876_v12  ;;  %v14801_v12 = vld [vmem:[#allocation20_spill] sm:$0xff] }
 0x264   :  { %10879 = vrcp.f32 %v792_v10  ;;  %v14800_v10 = vld [vmem:[#allocation19_spill] sm:$0xff] }
 0x26f   :  { %v10878_v61 = vpop.eup %10877 }
 0x270   :  { %v795_v63 = vmul.f32 %v10878_v61, %v778_v39  ;;  %v14799_v39 = vld [vmem:[#allocation22_spill] sm:$0xff] }
 0x271   :  { %v10880_v4 = vpop.eup %10879 }
 0x272   :  { %v796_v26 = vadd.f32 %v795_v63, %v14796_v55  ;;  %v798_v41 = vsub.f32 1.0, %v10880_v4  ;;  %v800_v22 = vmul.f32 %v10880_v4, %v11852_v45  ;;  %v14804_v63 = vld [vmem:[#allocation39_spill] sm:$0xff]  ;;  %v14805_v4 = vld [vmem:[#allocation29_spill] sm:$0xff] }
 0x274   :  { %10881 = vtanh.f32 %v796_v26 }
 0x281   :  { %v10882_v44 = vpop.eup %10881 }
 0x282   :  { %v799_v23 = vmul.f32 %v10882_v44, %v798_v41 }
 0x284   :  { %v11930_v49 = vadd.f32 %v800_v22, %v799_v23  ;;  %v14806_v22 = vld [vmem:[#allocation30_spill] sm:$0xff] }
 0x286   :  { %14797 = vst [vmem:[#allocation21_spill] sm:$0xff] %v11930_v49  ;;  %867 = vmatmul.mubr.f32.vlgmr.msra.gmra.mxu0 %v11930_v49  ;;  %10019 = vmatmul.mubr.f32.vlgmr.msra.gmra.mxu1 %v11930_v49 }
 0x287   :  { %965 = vmatpush1.msra.mxu0 %v11521_v46  ;;  %10022 = vmatpush3.msra.mxu1 %v11628_v18 }
 0x288   :  { %966 = vmatprep.subr.mxu0 %v11523_v47  ;;  %10023 = vmatprep.subr.mxu1 %v14784_v6 }
 0x289   :  { %967 = vmatpush1.msra.mxu0 %v11527_v48  ;;  %10024 = vmatpush3.msra.mxu1 %v11638_v21 }
 0x28a   :  { %968 = vmatprep.subr.mxu0 %v11530_v50  ;;  %10025 = vmatprep.subr.mxu1 %v14784_v6 }
 0x28b   :  { %969 = vmatpush1.msra.mxu0 %v11539_v52  ;;  %10026 = vmatpush3.msra.mxu1 %v11648_v24 }
 0x28c   :  { %970 = vmatprep.subr.mxu0 %v11542_v53  ;;  %10027 = vmatprep.subr.mxu1 %v14784_v6 }
 0x28d   :  { %971 = vmatpush1.msra.mxu0 %v11545_v54  ;;  %10028 = vmatpush3.msra.mxu1 %v11658_v27 }
 0x28e   :  { %972 = vmatprep.subr.mxu0 %v11549_v56  ;;  %10029 = vmatprep.subr.mxu1 %v14784_v6 }
 0x28f   :  { %973 = vmatpush1.msra.mxu0 %v11558_v58  ;;  %10030 = vmatpush3.msra.mxu1 %v11664_v28 }
 0x290   :  { %974 = vmatprep.subr.mxu0 %v11561_v59  ;;  %10031 = vmatprep.subr.mxu1 %v14784_v6 }
 0x291   :  { %975 = vmatpush1.msra.mxu0 %v11564_v60  ;;  %10032 = vmatpush3.msra.mxu1 %v11670_v29 }
 0x292   :  { %976 = vmatprep.subr.mxu0 %v11568_v62  ;;  %10033 = vmatprep.subr.mxu1 %v14784_v6 }
 0x293   :  { %977 = vmatpush1.msra.mxu0 %v11577_v1  ;;  %10034 = vmatpush3.msra.mxu1 %v11675_v30 }
 0x294   :  { %978 = vmatprep.subr.mxu0 %v11580_v2  ;;  %10035 = vmatprep.subr.mxu1 %v14784_v6 }
 0x295   :  { %979 = vmatpush1.msra.mxu0 %v11583_v3  ;;  %10036 = vmatpush3.msra.mxu1 %v11681_v31 }
 0x296   :  { %980 = vmatprep.subr.mxu0 %v11587_v5  ;;  %10037 = vmatprep.subr.mxu1 %v14784_v6 }
 0x297   :  { %981 = vmatpush1.msra.mxu0 %v11596_v7  ;;  %10038 = vmatpush3.msra.mxu1 %v11687_v32 }
 0x298   :  { %982 = vmatprep.subr.mxu0 %v11599_v8  ;;  %10039 = vmatprep.subr.mxu1 %v14784_v6 }
 0x299   :  { %983 = vmatpush1.msra.mxu0 %v11602_v9  ;;  %10040 = vmatpush3.msra.mxu1 %v11693_v33 }
 0x29a   :  { %984 = vmatprep.subr.mxu0 %v11606_v11  ;;  %10041 = vmatprep.subr.mxu1 %v14784_v6 }
 0x29b   :  { %985 = vmatpush1.msra.mxu0 %v11613_v13  ;;  %10042 = vmatpush3.msra.mxu1 %v11699_v34 }
 0x29c   :  { %986 = vmatprep.subr.mxu0 %v11616_v14  ;;  %10043 = vmatprep.subr.mxu1 %v14784_v6 }
 0x29d   :  { %987 = vmatpush1.msra.mxu0 %v11619_v15  ;;  %10044 = vmatpush3.msra.mxu1 %v11705_v35 }
 0x29e   :  { %988 = vmatprep.subr.mxu0 %v11622_v16  ;;  %10045 = vmatprep.subr.mxu1 %v14784_v6 }
 0x29f   :  { %989 = vmatpush1.msra.mxu0 %v11625_v17  ;;  %10046 = vmatpush3.msra.mxu1 %v11711_v36 }
 0x2a0   :  { %990 = vmatprep.subr.mxu0 %v11631_v19  ;;  %10047 = vmatprep.subr.mxu1 %v14784_v6 }
 0x2a1   :  { %991 = vmatpush1.msra.mxu0 %v11635_v20  ;;  %10048 = vmatpush3.msra.mxu1 %v14785_v40 }
 0x2a2   :  { %992 = vmatprep.subr.mxu0 %v14786_v38  ;;  %10049 = vmatprep.subr.mxu1 %v14784_v6 }
 0x2a3   :  { %993 = vmatpush1.msra.mxu0 %v14798_v57  ;;  %10050 = vmatpush3.msra.mxu1 %v14799_v39 }
 0x2a4   :  { %994 = vmatprep.subr.mxu0 %v14800_v10  ;;  %10051 = vmatprep.subr.mxu1 %v14784_v6 }
 0x2a5   :  { %995 = vmatpush1.msra.mxu0 %v14801_v12  ;;  %1028 = vmatprep.mubr.f32.mxu0 %v14784_v6 }
 0x2a6   :  { %10052 = vmatpush3.msra.mxu1 %v14802_v25  ;;  %10053 = vmatprep.mubr.msk.f32.mxu1 %vm11369_vm0, %v14784_v6 }
 0x2a7   :  { %1126 = vmatprep.subr.mxu0 %v14803_v51  ;;  %10056 = vmatprep.subr.mxu1 %v14784_v6 }
 0x346   :  { %v868_v42 = vpop.f32.mrf.mxu0  ;;  %v939_v37 = vpop.f32.mrf.mxu1 }
 0x347   :  { %v869_v61 = vadd.f32 %v868_v42, %v14804_v63  ;;  %v940_v57 = vadd.f32 %v939_v37, %v11849_v0 }
 0x348   :  { %v870_v55 = vpop.f32.mrf.mxu0  ;;  %v10020_v26 = vpop.f32.mrf.mxu1 }
 0x349   :  { %v943_v41 = vadd.f32 %v869_v61, %v14805_v4  ;;  %v871_v23 = vadd.f32 %v870_v55, %v11837_v43  ;;  %v14807_v26 = vld [vmem:[#allocation41_spill] sm:$0xff] }
 0x34b   :  { %v9365_v44 = vmul.f32 -1.442695, %v943_v41  ;;  %v950_v45 = vadd.f32 %v871_v23, %v14806_v22  ;;  %v11147_v23 = vld [vmem:[#allocation4 + $0x178] sm:$0xff] }
 0x34c   :  { %v11148_v22 = vld [vmem:[#allocation4 + $0x158] sm:$0xff] }
 0x34d   :  { %10883 = vpow2.f32 %v9365_v44  ;;  %v9366_v25 = vmul.f32 -1.442695, %v950_v45 }
 0x34f   :  { %10885 = vpow2.f32 %v9366_v25 }
 0x35a   :  { %v10884_v12 = vpop.eup %10883 }
 0x35b   :  { %v947_v51 = vadd.f32 1.0, %v10884_v12 }
 0x35c   :  { %v10886_v10 = vpop.eup %10885 }
 0x35d   :  { %10887 = vrcp.f32 %v947_v51  ;;  %v954_v39 = vadd.f32 1.0, %v10886_v10  ;;  %v11149_v51 = vld [vmem:[#allocation4 + $0x150] sm:$0xff] }
 0x35f   :  { %10889 = vrcp.f32 %v954_v39 }
 0x36a   :  { %v10888_v42 = vpop.eup %10887 }
 0x36b   :  { %v957_v63 = vmul.f32 %v10888_v42, %v940_v57  ;;  %v11150_v42 = vld [vmem:[#allocation4 + $0x140] sm:$0xff] }
 0x36c   :  { %v10890_v4 = vpop.eup %10889 }
 0x36d   :  { %v958_v61 = vadd.f32 %v957_v63, %v14807_v26  ;;  %v960_v55 = vsub.f32 1.0, %v10890_v4  ;;  %v962_v45 = vmul.f32 %v10890_v4, %v11930_v49  ;;  %v11146_v63 = vld [vmem:[#allocation4 + $0x168] sm:$0xff]  ;;  %v11151_v26 = vld [vmem:[#allocation4 + $0x138] sm:$0xff]  ;;  %v11153_v4 = vld [vmem:[#allocation4 + $0x120] sm:$0xff] }
 0x36f   :  { %10891 = vtanh.f32 %v958_v61  ;;  %v11152_v61 = vld [vmem:[#allocation4 + $0x128] sm:$0xff] }
 0x37c   :  { %v10892_v41 = vpop.eup %10891 }
 0x37d   :  { %v961_v44 = vmul.f32 %v10892_v41, %v960_v55  ;;  %v11154_v55 = vld [vmem:[#allocation4 + $0x110] sm:$0xff]  ;;  %v11156_v41 = vld [vmem:[#allocation4 + $0xf8] sm:$0xff] }
 0x37f   :  { %v12008_v25 = vadd.f32 %v962_v45, %v961_v44  ;;  %v11158_v44 = vld [vmem:[#allocation4 + $0xe0] sm:$0xff]  ;;  %v11160_v45 = vld [vmem:[#allocation4 + $0xc8] sm:$0xff] }
 0x381   :  { %14808 = vst [vmem:[#allocation17_spill] sm:$0xff] %v12008_v25  ;;  %1029 = vmatmul.mubr.f32.vlgmr.msra.gmra.mxu0 %v12008_v25  ;;  %10054 = vmatmul.mubr.f32.vlgmr.msra.gmra.mxu1 %v12008_v25 }
 0x382   :  { %1127 = vmatpush1.msra.mxu0 %v11521_v46  ;;  %10057 = vmatpush3.msra.mxu1 %v11628_v18  ;;  %v14809_v46 = vld [vmem:[#allocation18_spill] sm:$0xff] }
 0x383   :  { %1128 = vmatprep.subr.mxu0 %v11523_v47  ;;  %10058 = vmatprep.subr.mxu1 %v14784_v6  ;;  %v14810_v47 = vld [vmem:[#allocation22_spill] sm:$0xff] }
 0x384   :  { %1129 = vmatpush1.msra.mxu0 %v11527_v48  ;;  %10059 = vmatpush3.msra.mxu1 %v11638_v21  ;;  %v14811_v48 = vld [vmem:[#allocation19_spill] sm:$0xff] }
 0x385   :  { %1130 = vmatprep.subr.mxu0 %v11530_v50  ;;  %10060 = vmatprep.subr.mxu1 %v14784_v6  ;;  %v14812_v50 = vld [vmem:[#allocation20_spill] sm:$0xff] }
 0x386   :  { %1131 = vmatpush1.msra.mxu0 %v11539_v52  ;;  %10061 = vmatpush3.msra.mxu1 %v11648_v24  ;;  %v14813_v52 = vld [vmem:[#allocation23_spill] sm:$0xff] }
 0x387   :  { %1132 = vmatprep.subr.mxu0 %v11542_v53  ;;  %10062 = vmatprep.subr.mxu1 %v14784_v6  ;;  %v11145_v53 = vld [vmem:[#allocation4 + $0x170] sm:$0xff] }
 0x388   :  { %1133 = vmatpush1.msra.mxu0 %v11545_v54  ;;  %10063 = vmatpush3.msra.mxu1 %v11658_v27 }
 0x389   :  { %1134 = vmatprep.subr.mxu0 %v11549_v56  ;;  %10064 = vmatprep.subr.mxu1 %v14784_v6 }
 0x38a   :  { %1135 = vmatpush1.msra.mxu0 %v11558_v58  ;;  %10065 = vmatpush3.msra.mxu1 %v11664_v28  ;;  %v14814_v58 = vld [vmem:[#allocation39_spill] sm:$0xff] }
 0x38b   :  { %1136 = vmatprep.subr.mxu0 %v11561_v59  ;;  %10066 = vmatprep.subr.mxu1 %v14784_v6 }
 0x38c   :  { %1137 = vmatpush1.msra.mxu0 %v11564_v60  ;;  %10067 = vmatpush3.msra.mxu1 %v11670_v29 }
 0x38d   :  { %1138 = vmatprep.subr.mxu0 %v11568_v62  ;;  %10068 = vmatprep.subr.mxu1 %v14784_v6 }
 0x38e   :  { %1139 = vmatpush1.msra.mxu0 %v11577_v1  ;;  %10069 = vmatpush3.msra.mxu1 %v11675_v30  ;;  %v14815_v1 = vld [vmem:[#allocation31_spill] sm:$0xff] }
 0x38f   :  { %1140 = vmatprep.subr.mxu0 %v11580_v2  ;;  %10070 = vmatprep.subr.mxu1 %v14784_v6 }
 0x390   :  { %1141 = vmatpush1.msra.mxu0 %v11583_v3  ;;  %10071 = vmatpush3.msra.mxu1 %v11681_v31 }
 0x391   :  { %1142 = vmatprep.subr.mxu0 %v11587_v5  ;;  %10072 = vmatprep.subr.mxu1 %v14784_v6 }
 0x392   :  { %1143 = vmatpush1.msra.mxu0 %v11596_v7  ;;  %10073 = vmatpush3.msra.mxu1 %v11687_v32  ;;  %v14816_v7 = vld [vmem:[#allocation32_spill] sm:$0xff] }
 0x393   :  { %1144 = vmatprep.subr.mxu0 %v11599_v8  ;;  %10074 = vmatprep.subr.mxu1 %v14784_v6 }
 0x394   :  { %1145 = vmatpush1.msra.mxu0 %v11602_v9  ;;  %10075 = vmatpush3.msra.mxu1 %v11693_v33 }
 0x395   :  { %1146 = vmatprep.subr.mxu0 %v11606_v11  ;;  %10076 = vmatprep.subr.mxu1 %v14784_v6 }
 0x396   :  { %1147 = vmatpush1.msra.mxu0 %v11613_v13  ;;  %10077 = vmatpush3.msra.mxu1 %v11699_v34 }
 0x397   :  { %1148 = vmatprep.subr.mxu0 %v11616_v14  ;;  %10078 = vmatprep.subr.mxu1 %v14784_v6 }
 0x398   :  { %1149 = vmatpush1.msra.mxu0 %v11619_v15  ;;  %10079 = vmatpush3.msra.mxu1 %v11705_v35 }
 0x399   :  { %1150 = vmatprep.subr.mxu0 %v11622_v16  ;;  %10080 = vmatprep.subr.mxu1 %v14784_v6 }
 0x39a   :  { %1151 = vmatpush1.msra.mxu0 %v11625_v17  ;;  %10081 = vmatpush3.msra.mxu1 %v11711_v36 }
 0x39b   :  { %1152 = vmatprep.subr.mxu0 %v11631_v19  ;;  %10082 = vmatprep.subr.mxu1 %v14784_v6  ;;  %v14817_v19 = vld [vmem:[#allocation40_spill] sm:$0xff] }
 0x39c   :  { %1153 = vmatpush1.msra.mxu0 %v11635_v20  ;;  %10083 = vmatpush3.msra.mxu1 %v14785_v40 }
 0x39d   :  { %1154 = vmatprep.subr.mxu0 %v14786_v38  ;;  %10084 = vmatprep.subr.mxu1 %v14784_v6 }
 0x39e   :  { %1155 = vmatpush1.msra.mxu0 %v14809_v46  ;;  %10085 = vmatpush3.msra.mxu1 %v14810_v47  ;;  %v11162_v46 = vld [vmem:[#allocation4 + $0xb0] sm:$0xff] }
 0x39f   :  { %1156 = vmatprep.subr.mxu0 %v14811_v48  ;;  %10086 = vmatprep.subr.mxu1 %v14784_v6  ;;  %v11164_v48 = vld [vmem:[#allocation4 + $0x98] sm:$0xff] }
 0x3a0   :  { %1157 = vmatpush1.msra.mxu0 %v14812_v50  ;;  %1190 = vmatprep.mubr.f32.mxu0 %v14784_v6  ;;  %v11166_v50 = vld [vmem:[#allocation4 + $0x80] sm:$0xff] }
 0x3a1   :  { %10087 = vmatpush3.msra.mxu1 %v14813_v52  ;;  %10088 = vmatprep.mubr.msk.f32.mxu1 %vm11369_vm0, %v14784_v6 }
 0x3a2   :  { %1288 = vmatprep.subr.mxu0 %v11145_v53  ;;  %10091 = vmatprep.subr.mxu1 %v14784_v6  ;;  %v11168_v53 = vld [vmem:[#allocation4 + $0x68] sm:$0xff] }
 0x441   :  { %v1030_v54 = vpop.f32.mrf.mxu0  ;;  %v1101_v56 = vpop.f32.mrf.mxu1 }
 0x442   :  { %v1031_v59 = vadd.f32 %v1030_v54, %v14814_v58  ;;  %v1102_v16 = vadd.f32 %v1101_v56, %v11849_v0  ;;  %v11170_v54 = vld [vmem:[#allocation4 + $0x50] sm:$0xff]  ;;  %v11172_v56 = vld [vmem:[#allocation4 + $0x38] sm:$0xff] }
 0x443   :  { %v1032_v60 = vpop.f32.mrf.mxu0  ;;  %v10055_v62 = vpop.f32.mrf.mxu1 }
 0x444   :  { %v1105_v2 = vadd.f32 %v1031_v59, %v14815_v1  ;;  %v1033_v5 = vadd.f32 %v1032_v60, %v11837_v43  ;;  %v11174_v59 = vld [vmem:[#allocation4 + $0x20] sm:$0xff]  ;;  %v11176_v60 = vld [vmem:[#allocation4 + $0x8] sm:$0xff]  ;;  %v1497_v62 = vld [vmem:[#allocation6 + $0x178] sm:$0xff] }
 0x446   :  { %v9367_v3 = vmul.f32 -1.442695, %v1105_v2  ;;  %v1112_v8 = vadd.f32 %v1033_v5, %v14816_v7  ;;  %v14819_v7 = vld [vmem:[#allocation33_spill] sm:$0xff] }
 0x448   :  { %10893 = vpow2.f32 %v9367_v3  ;;  %v9368_v9 = vmul.f32 -1.442695, %v1112_v8 }
 0x44a   :  { %10895 = vpow2.f32 %v9368_v9 }
 0x455   :  { %v10894_v11 = vpop.eup %10893 }
 0x456   :  { %v1109_v13 = vadd.f32 1.0, %v10894_v11 }
 0x457   :  { %v10896_v14 = vpop.eup %10895 }
 0x458   :  { %10897 = vrcp.f32 %v1109_v13  ;;  %v1116_v15 = vadd.f32 1.0, %v10896_v14 }
 0x45a   :  { %10899 = vrcp.f32 %v1116_v15 }
 0x465   :  { %v10898_v17 = vpop.eup %10897 }
 0x466   :  { %v1119_v18 = vmul.f32 %v10898_v17, %v1102_v16 }
 0x467   :  { %v10900_v38 = vpop.eup %10899 }
 0x468   :  { %v1120_v20 = vadd.f32 %v1119_v18, %v14817_v19  ;;  %v1122_v57 = vsub.f32 1.0, %v10900_v38  ;;  %v1124_v12 = vmul.f32 %v10900_v38, %v12008_v25  ;;  %v14833_v25 = vld [vmem:[#allocation37_spill] sm:$0xff] }
 0x46a   :  { %10901 = vtanh.f32 %v1120_v20 }
 0x477   :  { %v10902_v39 = vpop.eup %10901 }
 0x478   :  { %v1123_v10 = vmul.f32 %v10902_v39, %v1122_v57  ;;  %v14821_v57 = vld [vmem:[#allocation43_spill] sm:$0xff] }
 0x47a   :  { %v12085_v37 = vadd.f32 %v1124_v12, %v1123_v10 }
 0x47c   :  { %14818 = vst [vmem:[#allocation27_spill] sm:$0xff] %v12085_v37  ;;  %1191 = vmatmul.mubr.f32.vlgmr.msra.gmra.mxu0 %v12085_v37  ;;  %10089 = vmatmul.mubr.f32.vlgmr.msra.gmra.mxu1 %v12085_v37 }
 0x47d   :  { %1289 = vmatpush1.msra.mxu0 %v11146_v63  ;;  %10092 = vmatpush3.msra.mxu1 %v11147_v23 }
 0x47e   :  { %1290 = vmatprep.subr.mxu0 %v11148_v22  ;;  %10093 = vmatprep.subr.mxu1 %v14784_v6 }
 0x47f   :  { %1291 = vmatpush1.msra.mxu0 %v11149_v51  ;;  %10094 = vmatpush3.msra.mxu1 %v11638_v21  ;;  %v11155_v21 = vld [vmem:[#allocation4 + $0x108] sm:$0xff] }
 0x480   :  { %1292 = vmatprep.subr.mxu0 %v11150_v42  ;;  %10095 = vmatprep.subr.mxu1 %v14784_v6  ;;  %v1495_v42 = vld [vmem:[#allocation6 + $0x168] sm:$0xff] }
 0x481   :  { %1293 = vmatpush1.msra.mxu0 %v11151_v26  ;;  %10096 = vmatpush3.msra.mxu1 %v11648_v24  ;;  %v11157_v24 = vld [vmem:[#allocation4 + $0xf0] sm:$0xff]  ;;  %v1493_v26 = vld [vmem:[#allocation6 + $0x158] sm:$0xff] }
 0x482   :  { %1294 = vmatprep.subr.mxu0 %v11152_v61  ;;  %10097 = vmatprep.subr.mxu1 %v14784_v6  ;;  %v1492_v61 = vld [vmem:[#allocation6 + $0x150] sm:$0xff] }
 0x483   :  { %1295 = vmatpush1.msra.mxu0 %v11153_v4  ;;  %10098 = vmatpush3.msra.mxu1 %v11658_v27  ;;  %v11159_v27 = vld [vmem:[#allocation4 + $0xd8] sm:$0xff]  ;;  %v1494_v4 = vld [vmem:[#allocation6 + $0x160] sm:$0xff] }
 0x484   :  { %1296 = vmatprep.subr.mxu0 %v11154_v55  ;;  %10099 = vmatprep.subr.mxu1 %v14784_v6  ;;  %v1490_v55 = vld [vmem:[#allocation6 + $0x140] sm:$0xff] }
 0x485   :  { %1297 = vmatpush1.msra.mxu0 %v11155_v21  ;;  %10100 = vmatpush3.msra.mxu1 %v11664_v28  ;;  %v11161_v28 = vld [vmem:[#allocation4 + $0xc0] sm:$0xff]  ;;  %v1489_v21 = vld [vmem:[#allocation6 + $0x138] sm:$0xff] }
 0x486   :  { %1298 = vmatprep.subr.mxu0 %v11156_v41  ;;  %10101 = vmatprep.subr.mxu1 %v14784_v6  ;;  %v1491_v41 = vld [vmem:[#allocation6 + $0x148] sm:$0xff] }
 0x487   :  { %1299 = vmatpush1.msra.mxu0 %v11157_v24  ;;  %10102 = vmatpush3.msra.mxu1 %v11670_v29  ;;  %v11163_v29 = vld [vmem:[#allocation4 + $0xa8] sm:$0xff] }
 0x488   :  { %1300 = vmatprep.subr.mxu0 %v11158_v44  ;;  %10103 = vmatprep.subr.mxu1 %v14784_v6  ;;  %v1487_v24 = vld [vmem:[#allocation6 + $0x128] sm:$0xff]  ;;  %v1486_v44 = vld [vmem:[#allocation6 + $0x120] sm:$0xff] }
 0x489   :  { %1301 = vmatpush1.msra.mxu0 %v11159_v27  ;;  %10104 = vmatpush3.msra.mxu1 %v11675_v30  ;;  %v11165_v30 = vld [vmem:[#allocation4 + $0x90] sm:$0xff] }
 0x48a   :  { %1302 = vmatprep.subr.mxu0 %v11160_v45  ;;  %10105 = vmatprep.subr.mxu1 %v14784_v6  ;;  %v1488_v27 = vld [vmem:[#allocation6 + $0x130] sm:$0xff] }
 0x48b   :  { %1303 = vmatpush1.msra.mxu0 %v11161_v28  ;;  %10106 = vmatpush3.msra.mxu1 %v11681_v31  ;;  %v11167_v31 = vld [vmem:[#allocation4 + $0x78] sm:$0xff]  ;;  %v1484_v45 = vld [vmem:[#allocation6 + $0x110] sm:$0xff]  ;;  %v1483_v28 = vld [vmem:[#allocation6 + $0x108] sm:$0xff] }
 0x48c   :  { %1304 = vmatprep.subr.mxu0 %v11162_v46  ;;  %10107 = vmatprep.subr.mxu1 %v14784_v6  ;;  %v1485_v46 = vld [vmem:[#allocation6 + $0x118] sm:$0xff] }
 0x48d   :  { %1305 = vmatpush1.msra.mxu0 %v11163_v29  ;;  %10108 = vmatpush3.msra.mxu1 %v11687_v32  ;;  %v11169_v32 = vld [vmem:[#allocation4 + $0x60] sm:$0xff]  ;;  %v1481_v29 = vld [vmem:[#allocation6 + $0xf8] sm:$0xff] }
 0x48e   :  { %1306 = vmatprep.subr.mxu0 %v11164_v48  ;;  %10109 = vmatprep.subr.mxu1 %v14784_v6  ;;  %v1480_v48 = vld [vmem:[#allocation6 + $0xf0] sm:$0xff] }
 0x48f   :  { %1307 = vmatpush1.msra.mxu0 %v11165_v30  ;;  %10110 = vmatpush3.msra.mxu1 %v11693_v33  ;;  %v11171_v33 = vld [vmem:[#allocation4 + $0x48] sm:$0xff]  ;;  %v1482_v30 = vld [vmem:[#allocation6 + $0x100] sm:$0xff] }
 0x490   :  { %1308 = vmatprep.subr.mxu0 %v11166_v50  ;;  %10111 = vmatprep.subr.mxu1 %v14784_v6  ;;  %v1478_v50 = vld [vmem:[#allocation6 + $0xe0] sm:$0xff] }
 0x491   :  { %1309 = vmatpush1.msra.mxu0 %v11167_v31  ;;  %10112 = vmatpush3.msra.mxu1 %v11699_v34  ;;  %v11173_v34 = vld [vmem:[#allocation4 + $0x30] sm:$0xff]  ;;  %v1477_v31 = vld [vmem:[#allocation6 + $0xd8] sm:$0xff] }
 0x492   :  { %1310 = vmatprep.subr.mxu0 %v11168_v53  ;;  %10113 = vmatprep.subr.mxu1 %v14784_v6  ;;  %v1479_v53 = vld [vmem:[#allocation6 + $0xe8] sm:$0xff] }
 0x493   :  { %1311 = vmatpush1.msra.mxu0 %v11169_v32  ;;  %10114 = vmatpush3.msra.mxu1 %v11705_v35  ;;  %v11175_v35 = vld [vmem:[#allocation4 + $0x18] sm:$0xff]  ;;  %v1475_v32 = vld [vmem:[#allocation6 + $0xc8] sm:$0xff] }
 0x494   :  { %1312 = vmatprep.subr.mxu0 %v11170_v54  ;;  %10115 = vmatprep.subr.mxu1 %v14784_v6  ;;  %v1474_v54 = vld [vmem:[#allocation6 + $0xc0] sm:$0xff] }
 0x495   :  { %1313 = vmatpush1.msra.mxu0 %v11171_v33  ;;  %10116 = vmatpush3.msra.mxu1 %v11711_v36  ;;  %v11177_v36 = vld [vmem:[#allocation4] sm:$0xff]  ;;  %v1476_v33 = vld [vmem:[#allocation6 + $0xd0] sm:$0xff] }
 0x496   :  { %1314 = vmatprep.subr.mxu0 %v11172_v56  ;;  %10117 = vmatprep.subr.mxu1 %v14784_v6  ;;  %v1472_v56 = vld [vmem:[#allocation6 + $0xb0] sm:$0xff] }
 0x497   :  { %1315 = vmatpush1.msra.mxu0 %v11173_v34  ;;  %10118 = vmatpush3.msra.mxu1 %v14785_v40  ;;  %v1496_v40 = vld [vmem:[#allocation6 + $0x170] sm:$0xff]  ;;  %v1471_v34 = vld [vmem:[#allocation6 + $0xa8] sm:$0xff] }
 0x498   :  { %1316 = vmatprep.subr.mxu0 %v11174_v59  ;;  %10119 = vmatprep.subr.mxu1 %v14784_v6  ;;  %v1473_v59 = vld [vmem:[#allocation6 + $0xb8] sm:$0xff] }
 0x499   :  { %1317 = vmatpush1.msra.mxu0 %v11175_v35  ;;  %10120 = vmatpush3.msra.mxu1 %v14810_v47  ;;  %v1469_v35 = vld [vmem:[#allocation6 + $0x98] sm:$0xff] }
 0x49a   :  { %1318 = vmatprep.subr.mxu0 %v11176_v60  ;;  %10121 = vmatprep.subr.mxu1 %v14784_v6  ;;  %v1468_v60 = vld [vmem:[#allocation6 + $0x90] sm:$0xff] }
 0x49b   :  { %1319 = vmatpush1.msra.mxu0 %v11177_v36  ;;  %1352 = vmatprep.mubr.f32.mxu0 %v14784_v6  ;;  %v1470_v36 = vld [vmem:[#allocation6 + $0xa0] sm:$0xff] }
 0x49c   :  { %10122 = vmatpush3.msra.mxu1 %v14813_v52  ;;  %10123 = vmatprep.mubr.msk.f32.mxu1 %vm11369_vm0, %v14784_v6  ;;  %v14820_v52 = vld [vmem:[#allocation35_spill] sm:$0xff] }
 0x49d   :  { %1515 = vmatprep.subr.mxu0 %v1496_v40  ;;  %10126 = vmatprep.subr.mxu1 %v1497_v62  ;;  %v1466_v40 = vld [vmem:[#allocation6 + $0x80] sm:$0xff] }
 0x53c   :  { %v1192_v1 = vpop.f32.mrf.mxu0  ;;  %v1263_v2 = vpop.f32.mrf.mxu1 }
 0x53d   :  { %v1193_v47 = vadd.f32 %v1192_v1, %v14814_v58  ;;  %v1264_v19 = vadd.f32 %v1263_v2, %v11849_v0  ;;  %v1467_v1 = vld [vmem:[#allocation6 + $0x88] sm:$0xff] }
 0x53e   :  { %v1194_v3 = vpop.f32.mrf.mxu0  ;;  %v10090_v5 = vpop.f32.mrf.mxu1  ;;  %v1463_v2 = vld [vmem:[#allocation6 + $0x68] sm:$0xff] }
 0x53f   :  { %v1267_v8 = vadd.f32 %v1193_v47, %v14819_v7  ;;  %v1195_v11 = vadd.f32 %v1194_v3, %v11837_v43  ;;  %v1462_v47 = vld [vmem:[#allocation6 + $0x60] sm:$0xff]  ;;  %v1464_v3 = vld [vmem:[#allocation6 + $0x70] sm:$0xff]  ;;  %v1459_v7 = vld [vmem:[#allocation6 + $0x48] sm:$0xff] }
 0x540   :  { %v1460_v5 = vld [vmem:[#allocation6 + $0x50] sm:$0xff] }
 0x541   :  { %v9369_v9 = vmul.f32 -1.442695, %v1267_v8  ;;  %v1274_v13 = vadd.f32 %v1195_v11, %v14820_v52  ;;  %v1461_v8 = vld [vmem:[#allocation6 + $0x58] sm:$0xff]  ;;  %v1456_v11 = vld [vmem:[#allocation6 + $0x30] sm:$0xff]  ;;  %v1458_v52 = vld [vmem:[#allocation6 + $0x40] sm:$0xff] }
 0x543   :  { %10903 = vpow2.f32 %v9369_v9  ;;  %v9370_v14 = vmul.f32 -1.442695, %v1274_v13  ;;  %v1457_v9 = vld [vmem:[#allocation6 + $0x38] sm:$0xff]  ;;  %v1454_v13 = vld [vmem:[#allocation6 + $0x20] sm:$0xff] }
 0x545   :  { %10905 = vpow2.f32 %v9370_v14  ;;  %v1453_v14 = vld [vmem:[#allocation6 + $0x18] sm:$0xff] }
 0x550   :  { %v10904_v15 = vpop.eup %10903 }
 0x551   :  { %v1271_v16 = vadd.f32 1.0, %v10904_v15  ;;  %v1455_v15 = vld [vmem:[#allocation6 + $0x28] sm:$0xff] }
 0x552   :  { %v10906_v17 = vpop.eup %10905 }
 0x553   :  { %10907 = vrcp.f32 %v1271_v16  ;;  %v1278_v18 = vadd.f32 1.0, %v10906_v17  ;;  %v1451_v16 = vld [vmem:[#allocation6 + $0x8] sm:$0xff]  ;;  %v1450_v17 = vld [vmem:[#allocation6] sm:$0xff] }
 0x555   :  { %10909 = vrcp.f32 %v1278_v18  ;;  %v1452_v18 = vld [vmem:[#allocation6 + $0x10] sm:$0xff] }
 0x560   :  { %v10908_v20 = vpop.eup %10907 }
 0x561   :  { %v1281_v38 = vmul.f32 %v10908_v20, %v1264_v19  ;;  %v12134_v19 = vld [vmem:[#allocation7 + $0x170] sm:$0xff]  ;;  %v12136_v20 = vld [vmem:[#allocation7 + $0x168] sm:$0xff] }
 0x562   :  { %v10910_v10 = vpop.eup %10909  ;;  %14823 = vst [vmem:[#allocation38_spill] sm:$0xff] %v12134_v19 }
 0x563   :  { %v1282_v39 = vadd.f32 %v1281_v38, %v14821_v57  ;;  %v1284_v12 = vsub.f32 1.0, %v10910_v10  ;;  %v1286_v22 = vmul.f32 %v10910_v10, %v12085_v37  ;;  %v12138_v38 = vld [vmem:[#allocation7 + $0x158] sm:$0xff]  ;;  %v11178_v57 = vld [vmem:[%s14753_s25] sm:$0xff] }
 0x564   :  { %v12147_v10 = vld [vmem:[#allocation7 + $0x140] sm:$0xff] }
 0x565   :  { %10911 = vtanh.f32 %v1282_v39  ;;  %v12144_v39 = vld [vmem:[#allocation7 + $0x150] sm:$0xff] }
 0x572   :  { %v10912_v63 = vpop.eup %10911 }
 0x573   :  { %v1285_v23 = vmul.f32 %v10912_v63, %v1284_v12  ;;  %v12151_v12 = vld [vmem:[#allocation7 + $0x138] sm:$0xff]  ;;  %v12154_v63 = vld [vmem:[#allocation7 + $0x128] sm:$0xff] }
 0x575   :  { %v12129_v51 = vadd.f32 %v1286_v22, %v1285_v23  ;;  %v12157_v23 = vld [vmem:[#allocation7 + $0x120] sm:$0xff]  ;;  %v11179_v22 = vld [vmem:[%s14753_s25 + $0x8] sm:$0xff] }
 0x577   :  { %14822 = vst [vmem:[#allocation28_spill] sm:$0xff] %v12129_v51  ;;  %1353 = vmatmul.mubr.f32.vlgmr.msra.gmra.mxu0 %v12129_v51  ;;  %10124 = vmatmul.mubr.f32.vlgmr.msra.gmra.mxu1 %v12129_v51 }
 0x578   :  { %1516 = vmatpush1.msra.mxu0 %v1495_v42  ;;  %1579 = vmatprep.mubr.f32.mxu0 %v14784_v6  ;;  %v12163_v42 = vld [vmem:[#allocation7 + $0x110] sm:$0xff] }
 0x579   :  { %1517 = vmatprep.subr.mxu0 %v1493_v26  ;;  %10127 = vmatpush3.msra.mxu1 %v1497_v62  ;;  %v1465_v62 = vld [vmem:[#allocation6 + $0x78] sm:$0xff]  ;;  %v12167_v26 = vld [vmem:[#allocation7 + $0x108] sm:$0xff] }
 0x57a   :  { %1518 = vmatpush1.msra.mxu0 %v1492_v61  ;;  %10128 = vmatprep.subr.mxu1 %v1494_v4  ;;  %v12171_v61 = vld [vmem:[#allocation7 + $0xf8] sm:$0xff] }
 0x57b   :  { %1519 = vmatprep.subr.mxu0 %v1490_v55  ;;  %10129 = vmatpush3.msra.mxu1 %v1494_v4  ;;  %v12173_v4 = vld [vmem:[#allocation7 + $0x178] sm:$0xff]  ;;  %v12176_v55 = vld [vmem:[#allocation7 + $0xf0] sm:$0xff] }
 0x57c   :  { %1520 = vmatpush1.msra.mxu0 %v1489_v21  ;;  %10130 = vmatprep.subr.mxu1 %v1491_v41  ;;  %v12181_v21 = vld [vmem:[%s14753_s25 + $0x10] sm:$0xff] }
 0x57d   :  { %1521 = vmatprep.subr.mxu0 %v1487_v24  ;;  %10131 = vmatpush3.msra.mxu1 %v1491_v41  ;;  %v12185_v41 = vld [vmem:[#allocation7 + $0xe0] sm:$0xff]  ;;  %v12189_v24 = vld [vmem:[#allocation7 + $0xd8] sm:$0xff] }
 0x57e   :  { %1522 = vmatpush1.msra.mxu0 %v1486_v44  ;;  %10132 = vmatprep.subr.mxu1 %v1488_v27  ;;  %v12193_v44 = vld [vmem:[#allocation7 + $0xc8] sm:$0xff] }
 0x57f   :  { %1523 = vmatprep.subr.mxu0 %v1484_v45  ;;  %10133 = vmatpush3.msra.mxu1 %v1488_v27  ;;  %v12196_v27 = vld [vmem:[#allocation7 + $0x160] sm:$0xff] }
 0x580   :  { %1524 = vmatpush1.msra.mxu0 %v1483_v28  ;;  %10134 = vmatprep.subr.mxu1 %v1485_v46  ;;  %v12199_v45 = vld [vmem:[#allocation7 + $0xc0] sm:$0xff]  ;;  %v12204_v28 = vld [vmem:[%s14753_s25 + $0x18] sm:$0xff] }
 0x581   :  { %1525 = vmatprep.subr.mxu0 %v1481_v29  ;;  %10135 = vmatpush3.msra.mxu1 %v1485_v46  ;;  %v12208_v46 = vld [vmem:[#allocation7 + $0xb0] sm:$0xff]  ;;  %v12212_v29 = vld [vmem:[#allocation7 + $0xa8] sm:$0xff] }
 0x582   :  { %1526 = vmatpush1.msra.mxu0 %v1480_v48  ;;  %10136 = vmatprep.subr.mxu1 %v1482_v30  ;;  %v12216_v48 = vld [vmem:[#allocation7 + $0x98] sm:$0xff] }
 0x583   :  { %1527 = vmatprep.subr.mxu0 %v1478_v50  ;;  %10137 = vmatpush3.msra.mxu1 %v1482_v30  ;;  %v12219_v30 = vld [vmem:[#allocation7 + $0x148] sm:$0xff]  ;;  %v12222_v50 = vld [vmem:[#allocation7 + $0x90] sm:$0xff] }
 0x584   :  { %1528 = vmatpush1.msra.mxu0 %v1477_v31  ;;  %10138 = vmatprep.subr.mxu1 %v1479_v53  ;;  %v11182_v31 = vld [vmem:[%s14753_s25 + $0x20] sm:$0xff] }
 0x585   :  { %1529 = vmatprep.subr.mxu0 %v1475_v32  ;;  %10139 = vmatpush3.msra.mxu1 %v1479_v53  ;;  %v12228_v53 = vld [vmem:[#allocation7 + $0x80] sm:$0xff]  ;;  %v12232_v32 = vld [vmem:[#allocation7 + $0x78] sm:$0xff] }
 0x586   :  { %1530 = vmatpush1.msra.mxu0 %v1474_v54  ;;  %10140 = vmatprep.subr.mxu1 %v1476_v33  ;;  %v12236_v54 = vld [vmem:[#allocation7 + $0x68] sm:$0xff] }
 0x587   :  { %1531 = vmatprep.subr.mxu0 %v1472_v56  ;;  %10141 = vmatpush3.msra.mxu1 %v1476_v33  ;;  %v12239_v33 = vld [vmem:[#allocation7 + $0x130] sm:$0xff]  ;;  %v12242_v56 = vld [vmem:[#allocation7 + $0x60] sm:$0xff] }
 0x588   :  { %1532 = vmatpush1.msra.mxu0 %v1471_v34  ;;  %10142 = vmatprep.subr.mxu1 %v1473_v59  ;;  %v11183_v34 = vld [vmem:[%s14753_s25 + $0x28] sm:$0xff] }
 0x589   :  { %1533 = vmatprep.subr.mxu0 %v1469_v35  ;;  %10143 = vmatpush3.msra.mxu1 %v1473_v59  ;;  %v12248_v59 = vld [vmem:[#allocation7 + $0x50] sm:$0xff]  ;;  %v12251_v35 = vld [vmem:[#allocation7 + $0x118] sm:$0xff] }
 0x58a   :  { %1534 = vmatpush1.msra.mxu0 %v1468_v60  ;;  %10144 = vmatprep.subr.mxu1 %v1470_v36  ;;  %v12254_v60 = vld [vmem:[#allocation7 + $0x48] sm:$0xff] }
 0x58b   :  { %1535 = vmatprep.subr.mxu0 %v1466_v40  ;;  %10145 = vmatpush3.msra.mxu1 %v1470_v36  ;;  %v12258_v36 = vld [vmem:[#allocation7 + $0x38] sm:$0xff]  ;;  %v12261_v40 = vld [vmem:[#allocation7 + $0x100] sm:$0xff] }
 0x58c   :  { %1536 = vmatpush1.msra.mxu0 %v1465_v62  ;;  %10146 = vmatprep.subr.mxu1 %v1467_v1  ;;  %v12264_v62 = vld [vmem:[#allocation7 + $0x30] sm:$0xff] }
 0x58d   :  { %1537 = vmatprep.subr.mxu0 %v1463_v2  ;;  %10147 = vmatpush3.msra.mxu1 %v1467_v1  ;;  %14824 = vst [vmem:[#allocation16_spill] sm:$0xff] %v12264_v62  ;;  %v12268_v1 = vld [vmem:[#allocation7 + $0x20] sm:$0xff]  ;;  %v12271_v2 = vld [vmem:[#allocation7 + $0xe8] sm:$0xff] }
 0x58e   :  { %1538 = vmatpush1.msra.mxu0 %v1462_v47  ;;  %10148 = vmatprep.subr.mxu1 %v1464_v3  ;;  %14825 = vst [vmem:[#allocation29_spill] sm:$0xff] %v12268_v1  ;;  %v12274_v47 = vld [vmem:[#allocation7 + $0x18] sm:$0xff] }
 0x58f   :  { %1539 = vmatprep.subr.mxu0 %v1460_v5  ;;  %10149 = vmatpush3.msra.mxu1 %v1464_v3  ;;  %14826 = vst [vmem:[#allocation30_spill] sm:$0xff] %v12274_v47  ;;  %v12278_v3 = vld [vmem:[#allocation7 + $0x8] sm:$0xff]  ;;  %v12281_v5 = vld [vmem:[#allocation7 + $0xd0] sm:$0xff] }
 0x590   :  { %1540 = vmatpush1.msra.mxu0 %v1459_v7  ;;  %10150 = vmatprep.subr.mxu1 %v1461_v8  ;;  %14827 = vst [vmem:[#allocation41_spill] sm:$0xff] %v12278_v3  ;;  %v12284_v7 = vld [vmem:[#allocation7] sm:$0xff] }
 0x591   :  { %1541 = vmatprep.subr.mxu0 %v1457_v9  ;;  %10151 = vmatpush3.msra.mxu1 %v1461_v8  ;;  %14828 = vst [vmem:[#allocation18_spill] sm:$0xff] %v12284_v7  ;;  %v12289_v8 = vld [vmem:[#allocation7 + $0xb8] sm:$0xff]  ;;  %v12295_v9 = vld [vmem:[#allocation7 + $0xa0] sm:$0xff] }
 0x592   :  { %1542 = vmatpush1.msra.mxu0 %v1456_v11  ;;  %10152 = vmatprep.subr.mxu1 %v1458_v52  ;;  %v12300_v11 = vld [vmem:[#allocation7 + $0x88] sm:$0xff] }
 0x593   :  { %1543 = vmatprep.subr.mxu0 %v1454_v13  ;;  %10153 = vmatpush3.msra.mxu1 %v1458_v52  ;;  %v12306_v52 = vld [vmem:[#allocation7 + $0x70] sm:$0xff]  ;;  %v12311_v13 = vld [vmem:[#allocation7 + $0x58] sm:$0xff] }
 0x594   :  { %1544 = vmatpush1.msra.mxu0 %v1453_v14  ;;  %10154 = vmatprep.subr.mxu1 %v1455_v15  ;;  %v12317_v14 = vld [vmem:[#allocation7 + $0x40] sm:$0xff] }
 0x595   :  { %1545 = vmatprep.subr.mxu0 %v1451_v16  ;;  %10155 = vmatpush3.msra.mxu1 %v1455_v15  ;;  %14829 = vst [vmem:[#allocation22_spill] sm:$0xff] %v12317_v14  ;;  %v12323_v15 = vld [vmem:[#allocation7 + $0x28] sm:$0xff]  ;;  %v12329_v16 = vld [vmem:[#allocation7 + $0x10] sm:$0xff] }
 0x596   :  { %1546 = vmatpush1.msra.mxu0 %v1450_v17  ;;  %10156 = vmatprep.subr.mxu1 %v1452_v18  ;;  %14830 = vst [vmem:[#allocation19_spill] sm:$0xff] %v12323_v15  ;;  %14831 = vst [vmem:[#allocation20_spill] sm:$0xff] %v12329_v16 }
 0x597   :  { %1580 = vmatmul.mubr.f32.vlgmr.msra.gmra.mxu0 %v11178_v57  ;;  %1776 = vmatprep.subr.mxu0 %v12134_v19 }
 0x598   :  { %1777 = vmatpush1.msra.mxu0 %v12136_v20  ;;  %1585 = vmatprep.mubr.f32.mxu0 %v14784_v6 }
 0x599   :  { %1778 = vmatprep.subr.mxu0 %v12138_v38  ;;  %10157 = vmatpush3.msra.mxu1 %v1452_v18 }
 0x59a   :  { %1779 = vmatpush1.msra.mxu0 %v12144_v39  ;;  %10158 = vmatprep.mubr.f32.mxu1 %v11178_v57 }
 0x59b   :  { %1780 = vmatprep.subr.mxu0 %v12147_v10  ;;  %1586 = vmatmul.mubr.f32.gmra.mxu0 %v11179_v22 }
 0x59c   :  { %1781 = vmatpush1.msra.mxu0 %v12151_v12  ;;  %1591 = vmatprep.mubr.f32.mxu0 %v14784_v6 }
 0x59d   :  { %1782 = vmatprep.subr.mxu0 %v12154_v63  ;;  %10167 = vmatprep.subr.mxu1 %v14784_v6 }
 0x59e   :  { %1783 = vmatpush1.msra.mxu0 %v12157_v23  ;;  %10159 = vmatmul.mubr.f32.vlgmr.msra.gmra.mxu1 %v11179_v22 }
 0x59f   :  { %1784 = vmatprep.subr.mxu0 %v12163_v42  ;;  %1592 = vmatmul.mubr.f32.gmra.mxu0 %v12181_v21 }
 0x5a0   :  { %1785 = vmatpush1.msra.mxu0 %v12167_v26  ;;  %1597 = vmatprep.mubr.f32.mxu0 %v14784_v6 }
 0x5a1   :  { %1786 = vmatprep.subr.mxu0 %v12171_v61  ;;  %10168 = vmatpush3.msra.mxu1 %v12173_v4 }
 0x5a2   :  { %1787 = vmatpush1.msra.mxu0 %v12176_v55  ;;  %10169 = vmatprep.subr.mxu1 %v14784_v6 }
 0x5a3   :  { %1788 = vmatprep.subr.mxu0 %v12185_v41  ;;  %1598 = vmatmul.mubr.f32.gmra.mxu0 %v12204_v28 }
 0x5a4   :  { %1789 = vmatpush1.msra.mxu0 %v12189_v24  ;;  %1603 = vmatprep.mubr.f32.mxu0 %v14784_v6 }
 0x5a5   :  { %1790 = vmatprep.subr.mxu0 %v12193_v44  ;;  %10170 = vmatpush3.msra.mxu1 %v12196_v27 }
 0x5a6   :  { %1791 = vmatpush1.msra.mxu0 %v12199_v45  ;;  %10171 = vmatprep.subr.mxu1 %v14784_v6 }
 0x5a7   :  { %1792 = vmatprep.subr.mxu0 %v12208_v46  ;;  %1604 = vmatmul.mubr.f32.gmra.mxu0 %v11182_v31 }
 0x5a8   :  { %1793 = vmatpush1.msra.mxu0 %v12212_v29  ;;  %1609 = vmatprep.mubr.f32.mxu0 %v14784_v6 }
 0x5a9   :  { %1794 = vmatprep.subr.mxu0 %v12216_v48  ;;  %10172 = vmatpush3.msra.mxu1 %v12219_v30 }
 0x5aa   :  { %1795 = vmatpush1.msra.mxu0 %v12222_v50  ;;  %10173 = vmatprep.subr.mxu1 %v14784_v6 }
 0x5ab   :  { %1796 = vmatprep.subr.mxu0 %v12228_v53  ;;  %1610 = vmatmul.mubr.f32.gmra.mxu0 %v11183_v34 }
 0x5ac   :  { %1797 = vmatpush1.msra.mxu0 %v12232_v32  ;;  %1840 = vmatprep.mubr.f32.mxu0 %v14784_v6 }
 0x5ad   :  { %1798 = vmatprep.subr.mxu0 %v12236_v54  ;;  %10174 = vmatpush3.msra.mxu1 %v12239_v33 }
 0x5ae   :  { %1799 = vmatpush1.msra.mxu0 %v12242_v56  ;;  %10175 = vmatprep.subr.mxu1 %v14784_v6 }
 0x5af   :  { %1800 = vmatprep.subr.mxu0 %v12248_v59  ;;  %10176 = vmatpush3.msra.mxu1 %v12251_v35 }
 0x5b0   :  { %1801 = vmatpush1.msra.mxu0 %v12254_v60  ;;  %10177 = vmatprep.subr.mxu1 %v14784_v6 }
 0x5b1   :  { %1802 = vmatprep.subr.mxu0 %v12258_v36  ;;  %10178 = vmatpush3.msra.mxu1 %v12261_v40 }
 0x5b2   :  { %1803 = vmatpush1.msra.mxu0 %v12264_v62  ;;  %10179 = vmatprep.subr.mxu1 %v14784_v6 }
 0x5b3   :  { %1804 = vmatprep.subr.mxu0 %v12268_v1  ;;  %10180 = vmatpush3.msra.mxu1 %v12271_v2 }
 0x5b4   :  { %1805 = vmatpush1.msra.mxu0 %v12274_v47  ;;  %10181 = vmatprep.subr.mxu1 %v14784_v6 }
 0x5b5   :  { %1806 = vmatprep.subr.mxu0 %v12278_v3  ;;  %10182 = vmatpush3.msra.mxu1 %v12281_v5 }
 0x5b6   :  { %1807 = vmatpush1.msra.mxu0 %v12284_v7  ;;  %10183 = vmatprep.subr.mxu1 %v14784_v6 }
 0x5b7   :  { %1841 = vmatmul.mubr.f32.vlgmr.msra.gmra.mxu0 %v14784_v6  ;;  %10184 = vmatpush3.msra.mxu1 %v12289_v8 }
 0x5b8   :  { %10185 = vmatprep.subr.mxu1 %v14784_v6  ;;  %10161 = vmatprep.mubr.f32.mxu1 %v12181_v21 }
 0x5b9   :  { %10186 = vmatpush3.msra.mxu1 %v12295_v9  ;;  %1938 = vmatprep.subr.mxu0 %v12134_v19 }
 0x5ba   :  { %10187 = vmatprep.subr.mxu1 %v14784_v6  ;;  %10162 = vmatmul.mubr.f32.gmra.mxu1 %v12204_v28  ;;  %v14832_v28 = vld [vmem:[#allocation36_spill] sm:$0xff] }
 0x5bb   :  { %10188 = vmatpush3.msra.mxu1 %v12300_v11  ;;  %10164 = vmatprep.mubr.f32.mxu1 %v11182_v31 }
 0x5bc   :  { %10189 = vmatprep.subr.mxu1 %v14784_v6  ;;  %1939 = vmatpush1.msra.mxu0 %v12136_v20 }
 0x5bd   :  { %10190 = vmatpush3.msra.mxu1 %v12306_v52  ;;  %1940 = vmatprep.subr.mxu0 %v12138_v38 }
 0x5be   :  { %10191 = vmatprep.subr.mxu1 %v14784_v6  ;;  %10165 = vmatmul.mubr.f32.gmra.mxu1 %v11183_v34 }
 0x5bf   :  { %10192 = vmatpush3.msra.mxu1 %v12311_v13  ;;  %10199 = vmatprep.mubr.msk.f32.mxu1 %vm11369_vm0, %v14784_v6 }
 0x5c0   :  { %10193 = vmatprep.subr.mxu1 %v14784_v6  ;;  %1941 = vmatpush1.msra.mxu0 %v12144_v39 }
 0x5c1   :  { %10194 = vmatpush3.msra.mxu1 %v12317_v14  ;;  %1942 = vmatprep.subr.mxu0 %v12147_v10 }
 0x5c2   :  { %10195 = vmatprep.subr.mxu1 %v14784_v6  ;;  %1943 = vmatpush1.msra.mxu0 %v12151_v12 }
 0x5c3   :  { %10196 = vmatpush3.msra.mxu1 %v12323_v15  ;;  %1944 = vmatprep.subr.mxu0 %v12154_v63 }
 0x5c4   :  { %10197 = vmatprep.subr.mxu1 %v14784_v6  ;;  %1945 = vmatpush1.msra.mxu0 %v12157_v23 }
 0x5c5   :  { %10198 = vmatpush3.msra.mxu1 %v12329_v16  ;;  %1946 = vmatprep.subr.mxu0 %v12163_v42 }
 0x5c6   :  { %10200 = vmatmul.mubr.f32.vlgmr.msra.gmra.mxu1 %v14784_v6  ;;  %10202 = vmatprep.subr.mxu1 %v14784_v6 }
 0x5c7   :  { %10203 = vmatpush3.msra.mxu1 %v12173_v4  ;;  %1947 = vmatpush1.msra.mxu0 %v12167_v26 }
 0x5c8   :  { %10204 = vmatprep.subr.mxu1 %v14784_v6  ;;  %1948 = vmatprep.subr.mxu0 %v12171_v61 }
 0x5c9   :  { %10205 = vmatpush3.msra.mxu1 %v12196_v27  ;;  %1949 = vmatpush1.msra.mxu0 %v12176_v55 }
 0x5ca   :  { %10206 = vmatprep.subr.mxu1 %v14784_v6  ;;  %1950 = vmatprep.subr.mxu0 %v12185_v41 }
 0x5cb   :  { %10207 = vmatpush3.msra.mxu1 %v12219_v30  ;;  %1951 = vmatpush1.msra.mxu0 %v12189_v24 }
 0x5cc   :  { %10208 = vmatprep.subr.mxu1 %v14784_v6  ;;  %1952 = vmatprep.subr.mxu0 %v12193_v44 }
 0x5cd   :  { %10209 = vmatpush3.msra.mxu1 %v12239_v33  ;;  %1953 = vmatpush1.msra.mxu0 %v12199_v45 }
 0x5ce   :  { %10210 = vmatprep.subr.mxu1 %v14784_v6  ;;  %1954 = vmatprep.subr.mxu0 %v12208_v46 }
 0x5cf   :  { %10211 = vmatpush3.msra.mxu1 %v12251_v35  ;;  %1955 = vmatpush1.msra.mxu0 %v12212_v29 }
 0x5d0   :  { %10212 = vmatprep.subr.mxu1 %v14784_v6  ;;  %1956 = vmatprep.subr.mxu0 %v12216_v48 }
 0x5d1   :  { %10213 = vmatpush3.msra.mxu1 %v12261_v40  ;;  %1957 = vmatpush1.msra.mxu0 %v12222_v50 }
 0x5d2   :  { %10214 = vmatprep.subr.mxu1 %v14784_v6  ;;  %1958 = vmatprep.subr.mxu0 %v12228_v53 }
 0x5d3   :  { %10215 = vmatpush3.msra.mxu1 %v12271_v2  ;;  %1959 = vmatpush1.msra.mxu0 %v12232_v32 }
 0x5d4   :  { %10216 = vmatprep.subr.mxu1 %v14784_v6  ;;  %1960 = vmatprep.subr.mxu0 %v12236_v54 }
 0x5d5   :  { %10217 = vmatpush3.msra.mxu1 %v12281_v5  ;;  %1961 = vmatpush1.msra.mxu0 %v12242_v56 }
 0x5d6   :  { %10218 = vmatprep.subr.mxu1 %v14784_v6  ;;  %1962 = vmatprep.subr.mxu0 %v12248_v59 }
 0x5d7   :  { %10219 = vmatpush3.msra.mxu1 %v12289_v8  ;;  %1963 = vmatpush1.msra.mxu0 %v12254_v60 }
 0x5d8   :  { %10220 = vmatprep.subr.mxu1 %v14784_v6  ;;  %1964 = vmatprep.subr.mxu0 %v12258_v36 }
 0x5d9   :  { %10221 = vmatpush3.msra.mxu1 %v12295_v9  ;;  %1965 = vmatpush1.msra.mxu0 %v12264_v62 }
 0x5da   :  { %10222 = vmatprep.subr.mxu1 %v14784_v6  ;;  %1966 = vmatprep.subr.mxu0 %v12268_v1 }
 0x5db   :  { %10223 = vmatpush3.msra.mxu1 %v12300_v11  ;;  %1967 = vmatpush1.msra.mxu0 %v12274_v47 }
 0x5dc   :  { %10224 = vmatprep.subr.mxu1 %v14784_v6  ;;  %1968 = vmatprep.subr.mxu0 %v12278_v3  ;;  %v1498_v3 = vld [vmem:[%s14641_s8] sm:$0x7] }
 0x5dd   :  { %10225 = vmatpush3.msra.mxu1 %v12306_v52  ;;  %1969 = vmatpush1.msra.mxu0 %v12284_v7 }
 0x5de   :  { %10226 = vmatprep.subr.mxu1 %v14784_v6  ;;  %2002 = vmatprep.mubr.f32.mxu0 %v14784_v6 }
 0x5df   :  { %10227 = vmatpush3.msra.mxu1 %v12311_v13  ;;  %10234 = vmatprep.mubr.msk.f32.mxu1 %vm11369_vm0, %v14784_v6 }
 0x5e0   :  { %10228 = vmatprep.subr.mxu1 %v14784_v6  ;;  %2100 = vmatprep.subr.mxu0 %v12134_v19 }
 0x5e1   :  { %10229 = vmatpush3.msra.mxu1 %v12317_v14  ;;  %v14840_v14 = vld [vmem:[#allocation42_spill] sm:$0xff] }
 0x5e2   :  { %10230 = vmatprep.subr.mxu1 %v14784_v6 }
 0x5e3   :  { %10231 = vmatpush3.msra.mxu1 %v12323_v15  ;;  %v14835_v15 = vld [vmem:[#allocation26_spill] sm:$0xff] }
 0x5e4   :  { %10232 = vmatprep.subr.mxu1 %v14784_v6 }
 0x5e5   :  { %10233 = vmatpush3.msra.mxu1 %v12329_v16 }
 0x5e6   :  { %10237 = vmatprep.subr.mxu1 %v14784_v6 }
 0x637   :  { %v1354_v17 = vpop.f32.mrf.mxu0  ;;  %v1425_v18 = vpop.f32.mrf.mxu1 }
 0x638   :  { %v1355_v57 = vadd.f32 %v1354_v17, %v14814_v58  ;;  %v14834_v58 = vld [vmem:[#allocation25_spill] sm:$0xff] }
 0x639   :  { %v1356_v22 = vpop.f32.mrf.mxu0  ;;  %v10125_v21 = vpop.f32.mrf.mxu1  ;;  %v1503_v17 = vrot.slane %v1498_v3, %v14834_v58 }
 0x63a   :  { %v1429_v31 = vadd.f32 %v1355_v57, %v14832_v28  ;;  %v1357_v34 = vadd.f32 %v1356_v22, %v11837_v43  ;;  %v1507_v57 = vrot.slane %v1498_v3, %v14835_v15 }
 0x63c   :  { %v9371_v49 = vmul.f32 -1.442695, %v1429_v31  ;;  %v1436_v37 = vadd.f32 %v1357_v34, %v14833_v25 }
 0x63e   :  { %10913 = vpow2.f32 %v9371_v49  ;;  %v9372_v19 = vmul.f32 -1.442695, %v1436_v37  ;;  %v1426_v49 = vadd.f32 %v1425_v18, %v11849_v0 }
 0x640   :  { %10915 = vpow2.f32 %v9372_v19 }
 0x64b   :  { %v10914_v7 = vpop.eup %10913 }
 0x64c   :  { %v1433_v16 = vadd.f32 1.0, %v10914_v7 }
 0x64d   :  { %v10916_v21 = vpop.eup %10915 }
 0x64e   :  { %10917 = vrcp.f32 %v1433_v16  ;;  %v1440_v43 = vadd.f32 1.0, %v10916_v21  ;;  %v14838_v16 = vld [vmem:[#allocation34_spill] sm:$0xff] }
 0x64f   :  { %v12414_v31 = vrot.slane %v1498_v3, %v14838_v16 }
 0x650   :  { %10919 = vrcp.f32 %v1440_v43 }
 0x657   :  { %v1581_v28 = vpop.f32.mrf.mxu0 }
 0x658   :  { %v12408_v22 = vadd.f32 %v1581_v28, %v1503_v17 }
 0x659   :  { %v1583_v25 = vpop.f32.mrf.mxu0 }
 0x65a   :  { %14836 = vst [vmem:[#allocation23_spill] sm:$0xff] %v12408_v22  ;;  %v12411_v37 = vadd.f32 %v1583_v25, %v1507_v57 }
 0x65b   :  { %v10918_v19 = vpop.eup %10917  ;;  %v1587_v7 = vpop.f32.mrf.mxu0 }
 0x65c   :  { %14837 = vst [vmem:[#allocation39_spill] sm:$0xff] %v12411_v37  ;;  %v1443_v34 = vmul.f32 %v10918_v19, %v1426_v49  ;;  %v12416_v47 = vadd.f32 %v1587_v7, %v1503_v17 }
 0x65d   :  { %v1589_v1 = vpop.f32.mrf.mxu0 }
 0x65e   :  { %14839 = vst [vmem:[#allocation31_spill] sm:$0xff] %v12416_v47  ;;  %v1444_v62 = vadd.f32 %v1443_v34, %v14840_v14  ;;  %v12419_v21 = vadd.f32 %v1589_v1, %v1507_v57  ;;  %v10160_v28 = vpop.f32.mrf.mxu1 }
 0x65f   :  { %v1593_v22 = vpop.f32.mrf.mxu0  ;;  %v12422_v0 = vadd.f32 %v10160_v28, %v12414_v31  ;;  %v10920_v28 = vpop.eup %10919 }
 0x660   :  { %14841 = vst [vmem:[#allocation32_spill] sm:$0xff] %v12419_v21  ;;  %10921 = vtanh.f32 %v1444_v62  ;;  %v12424_v18 = vadd.f32 %v1593_v22, %v1503_v17  ;;  %v1682_v25 = vpop.f32.mrf.mxu1 }
 0x661   :  { %14842 = vst [vmem:[#allocation40_spill] sm:$0xff] %v12422_v0  ;;  %v1595_v3 = vpop.f32.mrf.mxu0  ;;  %v12427_v49 = vadd.f32 %v1682_v25, %v12414_v31  ;;  %v1446_v0 = vsub.f32 1.0, %v10920_v28  ;;  %v1448_v25 = vmul.f32 %v10920_v28, %v12129_v51 }
 0x662   :  { %14843 = vst [vmem:[#allocation33_spill] sm:$0xff] %v12424_v18  ;;  %v12429_v43 = vadd.f32 %v1595_v3, %v1507_v57 }
 0x663   :  { %14844 = vst [vmem:[#allocation35_spill] sm:$0xff] %v12427_v49  ;;  %v1599_v19 = vpop.f32.mrf.mxu0 }
 0x664   :  { %14845 = vst [vmem:[#allocation43_spill] sm:$0xff] %v12429_v43  ;;  %v12431_v7 = vadd.f32 %v1599_v19, %v1503_v17  ;;  %v1759_v19 = vld [vmem:[%s14642_s9] sm:$0x7] }
 0x665   :  { %v1601_v1 = vpop.f32.mrf.mxu0 }
 0x666   :  { %14846 = vst [vmem:[#allocation36_spill] sm:$0xff] %v12431_v7  ;;  %v12433_v14 = vadd.f32 %v1601_v1, %v1507_v57  ;;  %v12446_v1 = vrot.slane %v1759_v19, %v14834_v58 }
 0x667   :  { %v1605_v34 = vpop.f32.mrf.mxu0 }
 0x668   :  { %14847 = vst [vmem:[#allocation37_spill] sm:$0xff] %v12433_v14  ;;  %v12435_v37 = vadd.f32 %v1605_v34, %v1503_v17  ;;  %14849 = vst [vmem:[#allocation45_spill] sm:$0xff] %v12446_v1  ;;  %v12450_v14 = vrot.slane %v1759_v19, %v14835_v15 }
 0x669   :  { %v1607_v62 = vpop.f32.mrf.mxu0 }
 0x66a   :  { %v12437_v22 = vadd.f32 %v1607_v62, %v1507_v57 }
 0x66b   :  { %v1611_v49 = vpop.f32.mrf.mxu0 }
 0x66c   :  { %v1612_v18 = vadd.f32 %v1611_v49, %v1503_v17 }
 0x66d   :  { %v10922_v21 = vpop.eup %10921  ;;  %v1613_v34 = vpop.f32.mrf.mxu0 }
 0x66e   :  { %v1447_v47 = vmul.f32 %v10922_v21, %v1446_v0  ;;  %v1614_v7 = vadd.f32 %v1613_v34, %v1507_v57 }
 0x670   :  { %v12440_v3 = vadd.f32 %v1448_v25, %v1447_v47 }
 0x672   :  { %14848 = vst [vmem:[#allocation42_spill] sm:$0xff] %v12440_v3 }
 0x677   :  { %v1842_v43 = vpop.f32.mrf.mxu0 }
 0x678   :  { %v1843_v62 = vadd.f32 %v1842_v43, %v12446_v1 }
 0x679   :  { %v1844_v21 = vpop.f32.mrf.mxu0 }
 0x67a   :  { %v1917_v0 = vadd.f32 %v1843_v62, %v1612_v18  ;;  %v10163_v47 = vpop.f32.mrf.mxu1  ;;  %v1845_v51 = vadd.f32 %v1844_v21, %v12450_v14  ;;  %v12463_v21 = vrot.slane %v1759_v19, %v14838_v16  ;;  %v14855_v19 = vld [vmem:[#allocation29_spill] sm:$0xff] }
 0x67b   :  { %v12453_v28 = vadd.f32 %v10163_v47, %v12414_v31 }
 0x67c   :  { %v9373_v25 = vmul.f32 -1.442695, %v1917_v0  ;;  %v1692_v3 = vpop.f32.mrf.mxu1  ;;  %v1924_v49 = vadd.f32 %v1845_v51, %v1614_v7 }
 0x67d   :  { %14850 = vst [vmem:[#allocation46_spill] sm:$0xff] %v12453_v28  ;;  %v12457_v58 = vadd.f32 %v1692_v3, %v12414_v31 }
 0x67e   :  { %10923 = vpow2.f32 %v9373_v25  ;;  %v10166_v17 = vpop.f32.mrf.mxu1  ;;  %v9374_v18 = vmul.f32 -1.442695, %v1924_v49 }
 0x67f   :  { %14851 = vst [vmem:[#allocation47_spill] sm:$0xff] %v12457_v58  ;;  %v1708_v51 = vadd.f32 %v10166_v17, %v12414_v31  ;;  %v14856_v17 = vld [vmem:[#allocation30_spill] sm:$0xff] }
 0x680   :  { %v1702_v43 = vpop.f32.mrf.mxu1  ;;  %10925 = vpow2.f32 %v9374_v18 }
 0x681   :  { %v12460_v15 = vadd.f32 %v1702_v43, %v12414_v31  ;;  %v14854_v31 = vld [vmem:[#allocation22_spill] sm:$0xff] }
 0x686   :  { %v1913_v62 = vpop.f32.mrf.mxu1 }
 0x687   :  { %v1914_v57 = vadd.f32 %v1913_v62, %v12463_v21  ;;  %v14857_v62 = vld [vmem:[#allocation19_spill] sm:$0xff] }
 0x688   :  { %v10201_v47 = vpop.f32.mrf.mxu1 }
 0x68b   :  { %v10924_v28 = vpop.eup %10923 }
 0x68c   :  { %v1921_v0 = vadd.f32 1.0, %v10924_v28 }
 0x68d   :  { %v10926_v3 = vpop.eup %10925 }
 0x68e   :  { %10927 = vrcp.f32 %v1921_v0  ;;  %v1928_v58 = vadd.f32 1.0, %v10926_v3  ;;  %v14858_v3 = vld [vmem:[#allocation41_spill] sm:$0xff] }
 0x690   :  { %10929 = vrcp.f32 %v1928_v58  ;;  %v14853_v58 = vld [vmem:[#allocation16_spill] sm:$0xff] }
 0x69b   :  { %v10928_v34 = vpop.eup %10927 }
 0x69c   :  { %v1931_v7 = vmul.f32 %v10928_v34, %v1914_v57  ;;  %v14859_v57 = vld [vmem:[#allocation18_spill] sm:$0xff]  ;;  %v14860_v34 = vld [vmem:[#allocation20_spill] sm:$0xff] }
 0x69d   :  { %v10930_v49 = vpop.eup %10929 }
 0x69e   :  { %v1932_v25 = vadd.f32 %v1931_v7, %v1708_v51  ;;  %v1934_v43 = vsub.f32 1.0, %v10930_v49  ;;  %v1936_v28 = vmul.f32 0.0, %v10930_v49  ;;  %v14861_v51 = vld [vmem:[#allocation38_spill] sm:$0xff] }
 0x6a0   :  { %10931 = vtanh.f32 %v1932_v25 }
 0x6ad   :  { %v10932_v18 = vpop.eup %10931 }
 0x6ae   :  { %v1935_v47 = vmul.f32 %v10932_v18, %v1934_v43 }
 0x6b0   :  { %v12467_v0 = vadd.f32 %v1936_v28, %v1935_v47 }
 0x6b2   :  { %14852 = vst [vmem:[#allocation48_spill] sm:$0xff] %v12467_v0  ;;  %2003 = vmatmul.mubr.f32.vlgmr.msra.gmra.mxu0 %v12467_v0  ;;  %10235 = vmatmul.mubr.f32.vlgmr.msra.gmra.mxu1 %v12467_v0 }
 0x6b3   :  { %2101 = vmatpush1.msra.mxu0 %v12136_v20  ;;  %10238 = vmatpush3.msra.mxu1 %v12173_v4 }
 0x6b4   :  { %2102 = vmatprep.subr.mxu0 %v12138_v38  ;;  %10239 = vmatprep.subr.mxu1 %v14784_v6 }
 0x6b5   :  { %2103 = vmatpush1.msra.mxu0 %v12144_v39  ;;  %10240 = vmatpush3.msra.mxu1 %v12196_v27 }
 0x6b6   :  { %2104 = vmatprep.subr.mxu0 %v12147_v10  ;;  %10241 = vmatprep.subr.mxu1 %v14784_v6 }
 0x6b7   :  { %2105 = vmatpush1.msra.mxu0 %v12151_v12  ;;  %10242 = vmatpush3.msra.mxu1 %v12219_v30 }
 0x6b8   :  { %2106 = vmatprep.subr.mxu0 %v12154_v63  ;;  %10243 = vmatprep.subr.mxu1 %v14784_v6 }
 0x6b9   :  { %2107 = vmatpush1.msra.mxu0 %v12157_v23  ;;  %10244 = vmatpush3.msra.mxu1 %v12239_v33 }
 0x6ba   :  { %2108 = vmatprep.subr.mxu0 %v12163_v42  ;;  %10245 = vmatprep.subr.mxu1 %v14784_v6 }
 0x6bb   :  { %2109 = vmatpush1.msra.mxu0 %v12167_v26  ;;  %10246 = vmatpush3.msra.mxu1 %v12251_v35 }
 0x6bc   :  { %2110 = vmatprep.subr.mxu0 %v12171_v61  ;;  %10247 = vmatprep.subr.mxu1 %v14784_v6 }
 0x6bd   :  { %2111 = vmatpush1.msra.mxu0 %v12176_v55  ;;  %10248 = vmatpush3.msra.mxu1 %v12261_v40 }
 0x6be   :  { %2112 = vmatprep.subr.mxu0 %v12185_v41  ;;  %10249 = vmatprep.subr.mxu1 %v14784_v6 }
 0x6bf   :  { %2113 = vmatpush1.msra.mxu0 %v12189_v24  ;;  %10250 = vmatpush3.msra.mxu1 %v12271_v2 }
 0x6c0   :  { %2114 = vmatprep.subr.mxu0 %v12193_v44  ;;  %10251 = vmatprep.subr.mxu1 %v14784_v6 }
 0x6c1   :  { %2115 = vmatpush1.msra.mxu0 %v12199_v45  ;;  %10252 = vmatpush3.msra.mxu1 %v12281_v5 }
 0x6c2   :  { %2116 = vmatprep.subr.mxu0 %v12208_v46  ;;  %10253 = vmatprep.subr.mxu1 %v14784_v6 }
 0x6c3   :  { %2117 = vmatpush1.msra.mxu0 %v12212_v29  ;;  %10254 = vmatpush3.msra.mxu1 %v12289_v8 }
 0x6c4   :  { %2118 = vmatprep.subr.mxu0 %v12216_v48  ;;  %10255 = vmatprep.subr.mxu1 %v14784_v6 }
 0x6c5   :  { %2119 = vmatpush1.msra.mxu0 %v12222_v50  ;;  %10256 = vmatpush3.msra.mxu1 %v12295_v9 }
 0x6c6   :  { %2120 = vmatprep.subr.mxu0 %v12228_v53  ;;  %10257 = vmatprep.subr.mxu1 %v14784_v6 }
 0x6c7   :  { %2121 = vmatpush1.msra.mxu0 %v12232_v32  ;;  %10258 = vmatpush3.msra.mxu1 %v12300_v11 }
 0x6c8   :  { %2122 = vmatprep.subr.mxu0 %v12236_v54  ;;  %10259 = vmatprep.subr.mxu1 %v14784_v6 }
 0x6c9   :  { %2123 = vmatpush1.msra.mxu0 %v12242_v56  ;;  %10260 = vmatpush3.msra.mxu1 %v12306_v52 }
 0x6ca   :  { %2124 = vmatprep.subr.mxu0 %v12248_v59  ;;  %10261 = vmatprep.subr.mxu1 %v14784_v6 }
 0x6cb   :  { %2125 = vmatpush1.msra.mxu0 %v12254_v60  ;;  %10262 = vmatpush3.msra.mxu1 %v12311_v13 }
 0x6cc   :  { %2126 = vmatprep.subr.mxu0 %v12258_v36  ;;  %10263 = vmatprep.subr.mxu1 %v14784_v6 }
 0x6cd   :  { %2127 = vmatpush1.msra.mxu0 %v14853_v58  ;;  %10264 = vmatpush3.msra.mxu1 %v14854_v31 }
 0x6ce   :  { %2128 = vmatprep.subr.mxu0 %v14855_v19  ;;  %10265 = vmatprep.subr.mxu1 %v14784_v6 }
 0x6cf   :  { %2129 = vmatpush1.msra.mxu0 %v14856_v17  ;;  %10266 = vmatpush3.msra.mxu1 %v14857_v62 }
 0x6d0   :  { %2130 = vmatprep.subr.mxu0 %v14858_v3  ;;  %10267 = vmatprep.subr.mxu1 %v14784_v6 }
 0x6d1   :  { %2131 = vmatpush1.msra.mxu0 %v14859_v57  ;;  %2164 = vmatprep.mubr.f32.mxu0 %v14784_v6 }
 0x6d2   :  { %10268 = vmatpush3.msra.mxu1 %v14860_v34  ;;  %10269 = vmatprep.mubr.msk.f32.mxu1 %vm11369_vm0, %v14784_v6 }
 0x6d3   :  { %2262 = vmatprep.subr.mxu0 %v14861_v51  ;;  %10272 = vmatprep.subr.mxu1 %v14784_v6 }
 0x772   :  { %v2004_v7 = vpop.f32.mrf.mxu0  ;;  %v2075_v25 = vpop.f32.mrf.mxu1 }
 0x773   :  { %v2005_v49 = vadd.f32 %v2004_v7, %v12446_v1  ;;  %v2076_v19 = vadd.f32 %v2075_v25, %v12463_v21  ;;  %v14870_v25 = vld [vmem:[#allocation45_spill] sm:$0xff] }
 0x774   :  { %v2006_v43 = vpop.f32.mrf.mxu0  ;;  %v10236_v18 = vpop.f32.mrf.mxu1 }
 0x775   :  { %v2079_v47 = vadd.f32 %v2005_v49, %v12435_v37  ;;  %v2007_v16 = vadd.f32 %v2006_v43, %v12450_v14 }
 0x777   :  { %v9375_v28 = vmul.f32 -1.442695, %v2079_v47  ;;  %v2086_v34 = vadd.f32 %v2007_v16, %v12437_v22 }
 0x779   :  { %10933 = vpow2.f32 %v9375_v28  ;;  %v9376_v57 = vmul.f32 -1.442695, %v2086_v34 }
 0x77b   :  { %10935 = vpow2.f32 %v9376_v57  ;;  %v14869_v57 = vld [vmem:[#allocation38_spill] sm:$0xff] }
 0x786   :  { %v10934_v3 = vpop.eup %10933 }
 0x787   :  { %v2083_v51 = vadd.f32 1.0, %v10934_v3  ;;  %v14868_v3 = vld [vmem:[#allocation20_spill] sm:$0xff] }
 0x788   :  { %v10936_v62 = vpop.eup %10935 }
 0x789   :  { %10937 = vrcp.f32 %v2083_v51  ;;  %v2090_v17 = vadd.f32 1.0, %v10936_v62  ;;  %v14867_v62 = vld [vmem:[#allocation18_spill] sm:$0xff] }
 0x78b   :  { %10939 = vrcp.f32 %v2090_v17  ;;  %v14866_v17 = vld [vmem:[#allocation41_spill] sm:$0xff] }
 0x796   :  { %v10938_v7 = vpop.eup %10937 }
 0x797   :  { %v2093_v1 = vmul.f32 %v10938_v7, %v2076_v19  ;;  %v14865_v19 = vld [vmem:[#allocation19_spill] sm:$0xff] }
 0x798   :  { %v10940_v49 = vpop.eup %10939 }
 0x799   :  { %v2094_v37 = vadd.f32 %v2093_v1, %v12460_v15  ;;  %v2096_v43 = vsub.f32 1.0, %v10940_v49  ;;  %v2098_v16 = vmul.f32 %v10940_v49, %v12467_v0  ;;  %v14863_v15 = vld [vmem:[#allocation29_spill] sm:$0xff]  ;;  %v14864_v1 = vld [vmem:[#allocation30_spill] sm:$0xff]  ;;  %v14871_v49 = vld [vmem:[#allocation36_spill] sm:$0xff] }
 0x79b   :  { %10941 = vtanh.f32 %v2094_v37 }
 0x7a8   :  { %v10942_v18 = vpop.eup %10941 }
 0x7a9   :  { %v2097_v47 = vmul.f32 %v10942_v18, %v2096_v43 }
 0x7ab   :  { %v12545_v22 = vadd.f32 %v2098_v16, %v2097_v47  ;;  %v14872_v16 = vld [vmem:[#allocation37_spill] sm:$0xff] }
 0x7ad   :  { %14862 = vst [vmem:[#allocation16_spill] sm:$0xff] %v12545_v22  ;;  %2165 = vmatmul.mubr.f32.vlgmr.msra.gmra.mxu0 %v12545_v22  ;;  %10270 = vmatmul.mubr.f32.vlgmr.msra.gmra.mxu1 %v12545_v22 }
 0x7ae   :  { %2263 = vmatpush1.msra.mxu0 %v12136_v20  ;;  %10273 = vmatpush3.msra.mxu1 %v12173_v4 }
 0x7af   :  { %2264 = vmatprep.subr.mxu0 %v12138_v38  ;;  %10274 = vmatprep.subr.mxu1 %v14784_v6 }
 0x7b0   :  { %2265 = vmatpush1.msra.mxu0 %v12144_v39  ;;  %10275 = vmatpush3.msra.mxu1 %v12196_v27 }
 0x7b1   :  { %2266 = vmatprep.subr.mxu0 %v12147_v10  ;;  %10276 = vmatprep.subr.mxu1 %v14784_v6 }
 0x7b2   :  { %2267 = vmatpush1.msra.mxu0 %v12151_v12  ;;  %10277 = vmatpush3.msra.mxu1 %v12219_v30 }
 0x7b3   :  { %2268 = vmatprep.subr.mxu0 %v12154_v63  ;;  %10278 = vmatprep.subr.mxu1 %v14784_v6 }
 0x7b4   :  { %2269 = vmatpush1.msra.mxu0 %v12157_v23  ;;  %10279 = vmatpush3.msra.mxu1 %v12239_v33 }
 0x7b5   :  { %2270 = vmatprep.subr.mxu0 %v12163_v42  ;;  %10280 = vmatprep.subr.mxu1 %v14784_v6 }
 0x7b6   :  { %2271 = vmatpush1.msra.mxu0 %v12167_v26  ;;  %10281 = vmatpush3.msra.mxu1 %v12251_v35 }
 0x7b7   :  { %2272 = vmatprep.subr.mxu0 %v12171_v61  ;;  %10282 = vmatprep.subr.mxu1 %v14784_v6 }
 0x7b8   :  { %2273 = vmatpush1.msra.mxu0 %v12176_v55  ;;  %10283 = vmatpush3.msra.mxu1 %v12261_v40 }
 0x7b9   :  { %2274 = vmatprep.subr.mxu0 %v12185_v41  ;;  %10284 = vmatprep.subr.mxu1 %v14784_v6 }
 0x7ba   :  { %2275 = vmatpush1.msra.mxu0 %v12189_v24  ;;  %10285 = vmatpush3.msra.mxu1 %v12271_v2 }
 0x7bb   :  { %2276 = vmatprep.subr.mxu0 %v12193_v44  ;;  %10286 = vmatprep.subr.mxu1 %v14784_v6 }
 0x7bc   :  { %2277 = vmatpush1.msra.mxu0 %v12199_v45  ;;  %10287 = vmatpush3.msra.mxu1 %v12281_v5 }
 0x7bd   :  { %2278 = vmatprep.subr.mxu0 %v12208_v46  ;;  %10288 = vmatprep.subr.mxu1 %v14784_v6 }
 0x7be   :  { %2279 = vmatpush1.msra.mxu0 %v12212_v29  ;;  %10289 = vmatpush3.msra.mxu1 %v12289_v8 }
 0x7bf   :  { %2280 = vmatprep.subr.mxu0 %v12216_v48  ;;  %10290 = vmatprep.subr.mxu1 %v14784_v6 }
 0x7c0   :  { %2281 = vmatpush1.msra.mxu0 %v12222_v50  ;;  %10291 = vmatpush3.msra.mxu1 %v12295_v9 }
 0x7c1   :  { %2282 = vmatprep.subr.mxu0 %v12228_v53  ;;  %10292 = vmatprep.subr.mxu1 %v14784_v6 }
 0x7c2   :  { %2283 = vmatpush1.msra.mxu0 %v12232_v32  ;;  %10293 = vmatpush3.msra.mxu1 %v12300_v11 }
 0x7c3   :  { %2284 = vmatprep.subr.mxu0 %v12236_v54  ;;  %10294 = vmatprep.subr.mxu1 %v14784_v6 }
 0x7c4   :  { %2285 = vmatpush1.msra.mxu0 %v12242_v56  ;;  %10295 = vmatpush3.msra.mxu1 %v12306_v52 }
 0x7c5   :  { %2286 = vmatprep.subr.mxu0 %v12248_v59  ;;  %10296 = vmatprep.subr.mxu1 %v14784_v6 }
 0x7c6   :  { %2287 = vmatpush1.msra.mxu0 %v12254_v60  ;;  %10297 = vmatpush3.msra.mxu1 %v12311_v13 }
 0x7c7   :  { %2288 = vmatprep.subr.mxu0 %v12258_v36  ;;  %10298 = vmatprep.subr.mxu1 %v14784_v6 }
 0x7c8   :  { %2289 = vmatpush1.msra.mxu0 %v14853_v58  ;;  %10299 = vmatpush3.msra.mxu1 %v14854_v31 }
 0x7c9   :  { %2290 = vmatprep.subr.mxu0 %v14863_v15  ;;  %10300 = vmatprep.subr.mxu1 %v14784_v6 }
 0x7ca   :  { %2291 = vmatpush1.msra.mxu0 %v14864_v1  ;;  %10301 = vmatpush3.msra.mxu1 %v14865_v19 }
 0x7cb   :  { %2292 = vmatprep.subr.mxu0 %v14866_v17  ;;  %10302 = vmatprep.subr.mxu1 %v14784_v6 }
 0x7cc   :  { %2293 = vmatpush1.msra.mxu0 %v14867_v62  ;;  %2326 = vmatprep.mubr.f32.mxu0 %v14784_v6 }
 0x7cd   :  { %10303 = vmatpush3.msra.mxu1 %v14868_v3  ;;  %10304 = vmatprep.mubr.msk.f32.mxu1 %vm11369_vm0, %v14784_v6 }
 0x7ce   :  { %2424 = vmatprep.subr.mxu0 %v14869_v57  ;;  %10307 = vmatprep.subr.mxu1 %v14784_v6 }
 0x86d   :  { %v2166_v34 = vpop.f32.mrf.mxu0  ;;  %v2237_v51 = vpop.f32.mrf.mxu1 }
 0x86e   :  { %v2167_v28 = vadd.f32 %v2166_v34, %v14870_v25  ;;  %v2238_v1 = vadd.f32 %v2237_v51, %v12463_v21  ;;  %v11197_v51 = vld [vmem:[#allocation7 + $0x108] sm:$0xff] }
 0x86f   :  { %v2168_v7 = vpop.f32.mrf.mxu0  ;;  %v10271_v37 = vpop.f32.mrf.mxu1 }
 0x870   :  { %v2241_v43 = vadd.f32 %v2167_v28, %v14871_v49  ;;  %v2169_v47 = vadd.f32 %v2168_v7, %v12450_v14  ;;  %v14873_v37 = vld [vmem:[#allocation46_spill] sm:$0xff] }
 0x872   :  { %v9377_v18 = vmul.f32 -1.442695, %v2241_v43  ;;  %v2248_v0 = vadd.f32 %v2169_v47, %v14872_v16  ;;  %v11199_v47 = vld [vmem:[#allocation7 + $0xf8] sm:$0xff]  ;;  %v11200_v16 = vld [vmem:[#allocation7 + $0xf0] sm:$0xff] }
 0x874   :  { %10943 = vpow2.f32 %v9377_v18  ;;  %v9378_v3 = vmul.f32 -1.442695, %v2248_v0 }
 0x876   :  { %10945 = vpow2.f32 %v9378_v3 }
 0x881   :  { %v10944_v62 = vpop.eup %10943 }
 0x882   :  { %v2245_v57 = vadd.f32 1.0, %v10944_v62  ;;  %v11196_v62 = vld [vmem:[#allocation7 + $0x110] sm:$0xff] }
 0x883   :  { %v10946_v17 = vpop.eup %10945 }
 0x884   :  { %10947 = vrcp.f32 %v2245_v57  ;;  %v2252_v19 = vadd.f32 1.0, %v10946_v17  ;;  %v11195_v17 = vld [vmem:[#allocation7 + $0x130] sm:$0xff]  ;;  %v11201_v57 = vld [vmem:[#allocation7 + $0x100] sm:$0xff] }
 0x886   :  { %10949 = vrcp.f32 %v2252_v19  ;;  %v11194_v19 = vld [vmem:[#allocation7 + $0x120] sm:$0xff] }
 0x891   :  { %v10948_v34 = vpop.eup %10947 }
 0x892   :  { %v2255_v25 = vmul.f32 %v10948_v34, %v2238_v1  ;;  %v11193_v1 = vld [vmem:[#allocation7 + $0x128] sm:$0xff]  ;;  %v11202_v34 = vld [vmem:[#allocation7 + $0xe0] sm:$0xff] }
 0x893   :  { %v10950_v49 = vpop.eup %10949 }
 0x894   :  { %v2256_v28 = vadd.f32 %v2255_v25, %v14873_v37  ;;  %v2258_v7 = vsub.f32 1.0, %v10950_v49  ;;  %v2260_v0 = vmul.f32 %v10950_v49, %v12545_v22  ;;  %v11198_v25 = vld [vmem:[#allocation7 + $0x118] sm:$0xff]  ;;  %v11205_v49 = vld [vmem:[#allocation7 + $0xc8] sm:$0xff] }
 0x895   :  { %v11203_v37 = vld [vmem:[#allocation7 + $0xd8] sm:$0xff] }
 0x896   :  { %10951 = vtanh.f32 %v2256_v28  ;;  %v11204_v28 = vld [vmem:[#allocation7 + $0xe8] sm:$0xff] }
 0x8a3   :  { %v10952_v43 = vpop.eup %10951 }
 0x8a4   :  { %v2259_v18 = vmul.f32 %v10952_v43, %v2258_v7  ;;  %v11206_v7 = vld [vmem:[#allocation7 + $0xc0] sm:$0xff]  ;;  %v11207_v43 = vld [vmem:[#allocation7 + $0xd0] sm:$0xff] }
 0x8a6   :  { %v12623_v3 = vadd.f32 %v2260_v0, %v2259_v18  ;;  %v11208_v18 = vld [vmem:[#allocation7 + $0xb0] sm:$0xff]  ;;  %v11209_v0 = vld [vmem:[#allocation7 + $0xa8] sm:$0xff] }
 0x8a8   :  { %14874 = vst [vmem:[#allocation22_spill] sm:$0xff] %v12623_v3  ;;  %2327 = vmatmul.mubr.f32.vlgmr.msra.gmra.mxu0 %v12623_v3  ;;  %10305 = vmatmul.mubr.f32.vlgmr.msra.gmra.mxu1 %v12623_v3 }
 0x8a9   :  { %2425 = vmatpush1.msra.mxu0 %v12136_v20  ;;  %10308 = vmatpush3.msra.mxu1 %v12173_v4  ;;  %v14875_v20 = vld [vmem:[#allocation30_spill] sm:$0xff] }
 0x8aa   :  { %2426 = vmatprep.subr.mxu0 %v12138_v38  ;;  %10309 = vmatprep.subr.mxu1 %v14784_v6  ;;  %v14876_v38 = vld [vmem:[#allocation19_spill] sm:$0xff] }
 0x8ab   :  { %2427 = vmatpush1.msra.mxu0 %v12144_v39  ;;  %10310 = vmatpush3.msra.mxu1 %v12196_v27  ;;  %v14877_v39 = vld [vmem:[#allocation41_spill] sm:$0xff] }
 0x8ac   :  { %2428 = vmatprep.subr.mxu0 %v12147_v10  ;;  %10311 = vmatprep.subr.mxu1 %v14784_v6  ;;  %v14878_v10 = vld [vmem:[#allocation18_spill] sm:$0xff] }
 0x8ad   :  { %2429 = vmatpush1.msra.mxu0 %v12151_v12  ;;  %10312 = vmatpush3.msra.mxu1 %v12219_v30  ;;  %v14879_v12 = vld [vmem:[#allocation20_spill] sm:$0xff] }
 0x8ae   :  { %2430 = vmatprep.subr.mxu0 %v12154_v63  ;;  %10313 = vmatprep.subr.mxu1 %v14784_v6  ;;  %v11184_v63 = vld [vmem:[#allocation7 + $0x170] sm:$0xff] }
 0x8af   :  { %2431 = vmatpush1.msra.mxu0 %v12157_v23  ;;  %10314 = vmatpush3.msra.mxu1 %v12239_v33 }
 0x8b0   :  { %2432 = vmatprep.subr.mxu0 %v12163_v42  ;;  %10315 = vmatprep.subr.mxu1 %v14784_v6 }
 0x8b1   :  { %2433 = vmatpush1.msra.mxu0 %v12167_v26  ;;  %10316 = vmatpush3.msra.mxu1 %v12251_v35  ;;  %v14880_v26 = vld [vmem:[#allocation45_spill] sm:$0xff] }
 0x8b2   :  { %2434 = vmatprep.subr.mxu0 %v12171_v61  ;;  %10317 = vmatprep.subr.mxu1 %v14784_v6 }
 0x8b3   :  { %2435 = vmatpush1.msra.mxu0 %v12176_v55  ;;  %10318 = vmatpush3.msra.mxu1 %v12261_v40 }
 0x8b4   :  { %2436 = vmatprep.subr.mxu0 %v12185_v41  ;;  %10319 = vmatprep.subr.mxu1 %v14784_v6  ;;  %v14881_v41 = vld [vmem:[#allocation33_spill] sm:$0xff] }
 0x8b5   :  { %2437 = vmatpush1.msra.mxu0 %v12189_v24  ;;  %10320 = vmatpush3.msra.mxu1 %v12271_v2 }
 0x8b6   :  { %2438 = vmatprep.subr.mxu0 %v12193_v44  ;;  %10321 = vmatprep.subr.mxu1 %v14784_v6 }
 0x8b7   :  { %2439 = vmatpush1.msra.mxu0 %v12199_v45  ;;  %10322 = vmatpush3.msra.mxu1 %v12281_v5  ;;  %v14882_v45 = vld [vmem:[#allocation43_spill] sm:$0xff] }
 0x8b8   :  { %2440 = vmatprep.subr.mxu0 %v12208_v46  ;;  %10323 = vmatprep.subr.mxu1 %v14784_v6 }
 0x8b9   :  { %2441 = vmatpush1.msra.mxu0 %v12212_v29  ;;  %10324 = vmatpush3.msra.mxu1 %v12289_v8  ;;  %v11185_v8 = vld [vmem:[#allocation7 + $0x168] sm:$0xff] }
 0x8ba   :  { %2442 = vmatprep.subr.mxu0 %v12216_v48  ;;  %10325 = vmatprep.subr.mxu1 %v14784_v6 }
 0x8bb   :  { %2443 = vmatpush1.msra.mxu0 %v12222_v50  ;;  %10326 = vmatpush3.msra.mxu1 %v12295_v9  ;;  %v11186_v9 = vld [vmem:[#allocation7 + $0x178] sm:$0xff] }
 0x8bc   :  { %2444 = vmatprep.subr.mxu0 %v12228_v53  ;;  %10327 = vmatprep.subr.mxu1 %v14784_v6 }
 0x8bd   :  { %2445 = vmatpush1.msra.mxu0 %v12232_v32  ;;  %10328 = vmatpush3.msra.mxu1 %v12300_v11  ;;  %v11187_v11 = vld [vmem:[#allocation7 + $0x158] sm:$0xff] }
 0x8be   :  { %2446 = vmatprep.subr.mxu0 %v12236_v54  ;;  %10329 = vmatprep.subr.mxu1 %v14784_v6 }
 0x8bf   :  { %2447 = vmatpush1.msra.mxu0 %v12242_v56  ;;  %10330 = vmatpush3.msra.mxu1 %v12306_v52  ;;  %v14883_v56 = vld [vmem:[#allocation47_spill] sm:$0xff]  ;;  %v11188_v52 = vld [vmem:[#allocation7 + $0x150] sm:$0xff] }
 0x8c0   :  { %2448 = vmatprep.subr.mxu0 %v12248_v59  ;;  %10331 = vmatprep.subr.mxu1 %v14784_v6 }
 0x8c1   :  { %2449 = vmatpush1.msra.mxu0 %v12254_v60  ;;  %10332 = vmatpush3.msra.mxu1 %v12311_v13  ;;  %v11189_v13 = vld [vmem:[#allocation7 + $0x160] sm:$0xff] }
 0x8c2   :  { %2450 = vmatprep.subr.mxu0 %v12258_v36  ;;  %10333 = vmatprep.subr.mxu1 %v14784_v6 }
 0x8c3   :  { %2451 = vmatpush1.msra.mxu0 %v14853_v58  ;;  %10334 = vmatpush3.msra.mxu1 %v14854_v31  ;;  %v11190_v58 = vld [vmem:[#allocation7 + $0x140] sm:$0xff]  ;;  %v11191_v31 = vld [vmem:[#allocation7 + $0x138] sm:$0xff] }
 0x8c4   :  { %2452 = vmatprep.subr.mxu0 %v14863_v15  ;;  %10335 = vmatprep.subr.mxu1 %v14784_v6  ;;  %v11192_v15 = vld [vmem:[#allocation7 + $0x148] sm:$0xff] }
 0x8c5   :  { %2453 = vmatpush1.msra.mxu0 %v14875_v20  ;;  %10336 = vmatpush3.msra.mxu1 %v14876_v38  ;;  %v11210_v20 = vld [vmem:[#allocation7 + $0xb8] sm:$0xff] }
 0x8c6   :  { %2454 = vmatprep.subr.mxu0 %v14877_v39  ;;  %10337 = vmatprep.subr.mxu1 %v14784_v6  ;;  %v11211_v38 = vld [vmem:[#allocation7 + $0x98] sm:$0xff]  ;;  %v11212_v39 = vld [vmem:[#allocation7 + $0x90] sm:$0xff] }
 0x8c7   :  { %2455 = vmatpush1.msra.mxu0 %v14878_v10  ;;  %2488 = vmatprep.mubr.f32.mxu0 %v14784_v6  ;;  %v11213_v10 = vld [vmem:[#allocation7 + $0xa0] sm:$0xff] }
 0x8c8   :  { %10338 = vmatpush3.msra.mxu1 %v14879_v12  ;;  %10339 = vmatprep.mubr.msk.f32.mxu1 %vm11369_vm0, %v14784_v6  ;;  %v11214_v12 = vld [vmem:[#allocation7 + $0x80] sm:$0xff] }
 0x8c9   :  { %2586 = vmatprep.subr.mxu0 %v11184_v63  ;;  %10342 = vmatprep.subr.mxu1 %v14784_v6  ;;  %v11215_v63 = vld [vmem:[#allocation7 + $0x78] sm:$0xff] }
 0x968   :  { %v2328_v23 = vpop.f32.mrf.mxu0  ;;  %v2399_v42 = vpop.f32.mrf.mxu1 }
 0x969   :  { %v2329_v61 = vadd.f32 %v2328_v23, %v14880_v26  ;;  %v2400_v32 = vadd.f32 %v2399_v42, %v12463_v21  ;;  %v11216_v23 = vld [vmem:[#allocation7 + $0x88] sm:$0xff] }
 0x96a   :  { %v2330_v4 = vpop.f32.mrf.mxu0  ;;  %v10306_v55 = vpop.f32.mrf.mxu1  ;;  %v11217_v42 = vld [vmem:[#allocation7 + $0x68] sm:$0xff] }
 0x96b   :  { %v2403_v24 = vadd.f32 %v2329_v61, %v14881_v41  ;;  %v2331_v27 = vadd.f32 %v2330_v4, %v12450_v14  ;;  %v11218_v61 = vld [vmem:[#allocation7 + $0x60] sm:$0xff]  ;;  %v11219_v4 = vld [vmem:[#allocation7 + $0x70] sm:$0xff]  ;;  %v11221_v41 = vld [vmem:[#allocation7 + $0x48] sm:$0xff] }
 0x96c   :  { %v11220_v55 = vld [vmem:[#allocation7 + $0x50] sm:$0xff] }
 0x96d   :  { %v9379_v44 = vmul.f32 -1.442695, %v2403_v24  ;;  %v2410_v46 = vadd.f32 %v2331_v27, %v14882_v45  ;;  %v11222_v24 = vld [vmem:[#allocation7 + $0x58] sm:$0xff]  ;;  %v11224_v27 = vld [vmem:[#allocation7 + $0x30] sm:$0xff]  ;;  %v11225_v45 = vld [vmem:[#allocation7 + $0x40] sm:$0xff] }
 0x96f   :  { %10953 = vpow2.f32 %v9379_v44  ;;  %v9380_v29 = vmul.f32 -1.442695, %v2410_v46  ;;  %v11223_v44 = vld [vmem:[#allocation7 + $0x38] sm:$0xff]  ;;  %v11226_v46 = vld [vmem:[#allocation7 + $0x20] sm:$0xff] }
 0x971   :  { %10955 = vpow2.f32 %v9380_v29  ;;  %v11227_v29 = vld [vmem:[#allocation7 + $0x18] sm:$0xff] }
 0x97c   :  { %v10954_v48 = vpop.eup %10953 }
 0x97d   :  { %v2407_v30 = vadd.f32 1.0, %v10954_v48  ;;  %v11228_v48 = vld [vmem:[#allocation7 + $0x28] sm:$0xff] }
 0x97e   :  { %v10956_v50 = vpop.eup %10955 }
 0x97f   :  { %10957 = vrcp.f32 %v2407_v30  ;;  %v2414_v53 = vadd.f32 1.0, %v10956_v50  ;;  %v11229_v30 = vld [vmem:[#allocation7 + $0x8] sm:$0xff]  ;;  %v11230_v50 = vld [vmem:[#allocation7] sm:$0xff] }
 0x981   :  { %10959 = vrcp.f32 %v2414_v53  ;;  %v11231_v53 = vld [vmem:[#allocation7 + $0x10] sm:$0xff] }
 0x98c   :  { %v10958_v54 = vpop.eup %10957 }
 0x98d   :  { %v2417_v33 = vmul.f32 %v10958_v54, %v2400_v32  ;;  %v2806_v32 = vld [vmem:[#allocation9 + $0x170] sm:$0xff] }
 0x98e   :  { %v10960_v35 = vpop.eup %10959 }
 0x98f   :  { %v2418_v59 = vadd.f32 %v2417_v33, %v14883_v56  ;;  %v2420_v60 = vsub.f32 1.0, %v10960_v35  ;;  %v2422_v2 = vmul.f32 %v10960_v35, %v12623_v3  ;;  %v14902_v3 = vld [vmem:[#allocation39_spill] sm:$0xff] }
 0x991   :  { %10961 = vtanh.f32 %v2418_v59 }
 0x99e   :  { %v10962_v36 = vpop.eup %10961 }
 0x99f   :  { %v2421_v40 = vmul.f32 %v10962_v36, %v2420_v60  ;;  %v14885_v60 = vld [vmem:[#allocation31_spill] sm:$0xff] }
 0x9a1   :  { %v12700_v5 = vadd.f32 %v2422_v2, %v2421_v40 }
 0x9a3   :  { %14884 = vst [vmem:[#allocation29_spill] sm:$0xff] %v12700_v5  ;;  %2489 = vmatmul.mubr.f32.vlgmr.msra.gmra.mxu0 %v12700_v5  ;;  %10340 = vmatmul.mubr.f32.vlgmr.msra.gmra.mxu1 %v12700_v5 }
 0x9a4   :  { %2587 = vmatpush1.msra.mxu0 %v11185_v8  ;;  %10343 = vmatpush3.msra.mxu1 %v11186_v9  ;;  %v14886_v8 = vld [vmem:[#allocation32_spill] sm:$0xff] }
 0x9a5   :  { %2588 = vmatprep.subr.mxu0 %v11187_v11  ;;  %10344 = vmatprep.subr.mxu1 %v14784_v6 }
 0x9a6   :  { %2589 = vmatpush1.msra.mxu0 %v11188_v52  ;;  %10345 = vmatpush3.msra.mxu1 %v11189_v13 }
 0x9a7   :  { %2590 = vmatprep.subr.mxu0 %v11190_v58  ;;  %10346 = vmatprep.subr.mxu1 %v14784_v6 }
 0x9a8   :  { %2591 = vmatpush1.msra.mxu0 %v11191_v31  ;;  %10347 = vmatpush3.msra.mxu1 %v11192_v15 }
 0x9a9   :  { %2592 = vmatprep.subr.mxu0 %v11193_v1  ;;  %10348 = vmatprep.subr.mxu1 %v14784_v6 }
 0x9aa   :  { %2593 = vmatpush1.msra.mxu0 %v11194_v19  ;;  %10349 = vmatpush3.msra.mxu1 %v11195_v17  ;;  %v14887_v17 = vld [vmem:[#allocation40_spill] sm:$0xff] }
 0x9ab   :  { %2594 = vmatprep.subr.mxu0 %v11196_v62  ;;  %10350 = vmatprep.subr.mxu1 %v14784_v6 }
 0x9ac   :  { %2595 = vmatpush1.msra.mxu0 %v11197_v51  ;;  %10351 = vmatpush3.msra.mxu1 %v11198_v25 }
 0x9ad   :  { %2596 = vmatprep.subr.mxu0 %v11199_v47  ;;  %10352 = vmatprep.subr.mxu1 %v14784_v6 }
 0x9ae   :  { %2597 = vmatpush1.msra.mxu0 %v11200_v16  ;;  %10353 = vmatpush3.msra.mxu1 %v11201_v57 }
 0x9af   :  { %2598 = vmatprep.subr.mxu0 %v11202_v34  ;;  %10354 = vmatprep.subr.mxu1 %v14784_v6 }
 0x9b0   :  { %2599 = vmatpush1.msra.mxu0 %v11203_v37  ;;  %10355 = vmatpush3.msra.mxu1 %v11204_v28  ;;  %v2805_v37 = vld [vmem:[#allocation9 + $0x168] sm:$0xff]  ;;  %v2807_v28 = vld [vmem:[#allocation9 + $0x178] sm:$0xff] }
 0x9b1   :  { %2600 = vmatprep.subr.mxu0 %v11205_v49  ;;  %10356 = vmatprep.subr.mxu1 %v14784_v6  ;;  %v2803_v49 = vld [vmem:[#allocation9 + $0x158] sm:$0xff] }
 0x9b2   :  { %2601 = vmatpush1.msra.mxu0 %v11206_v7  ;;  %10357 = vmatpush3.msra.mxu1 %v11207_v43  ;;  %v2802_v7 = vld [vmem:[#allocation9 + $0x150] sm:$0xff]  ;;  %v2800_v43 = vld [vmem:[#allocation9 + $0x140] sm:$0xff] }
 0x9b3   :  { %2602 = vmatprep.subr.mxu0 %v11208_v18  ;;  %10358 = vmatprep.subr.mxu1 %v14784_v6  ;;  %v2804_v18 = vld [vmem:[#allocation9 + $0x160] sm:$0xff] }
 0x9b4   :  { %2603 = vmatpush1.msra.mxu0 %v11209_v0  ;;  %10359 = vmatpush3.msra.mxu1 %v11210_v20  ;;  %v2799_v0 = vld [vmem:[#allocation9 + $0x138] sm:$0xff]  ;;  %v2797_v20 = vld [vmem:[#allocation9 + $0x128] sm:$0xff] }
 0x9b5   :  { %2604 = vmatprep.subr.mxu0 %v11211_v38  ;;  %10360 = vmatprep.subr.mxu1 %v14784_v6  ;;  %v2801_v38 = vld [vmem:[#allocation9 + $0x148] sm:$0xff] }
 0x9b6   :  { %2605 = vmatpush1.msra.mxu0 %v11212_v39  ;;  %10361 = vmatpush3.msra.mxu1 %v11213_v10  ;;  %v2796_v39 = vld [vmem:[#allocation9 + $0x120] sm:$0xff]  ;;  %v2794_v10 = vld [vmem:[#allocation9 + $0x110] sm:$0xff] }
 0x9b7   :  { %2606 = vmatprep.subr.mxu0 %v11214_v12  ;;  %10362 = vmatprep.subr.mxu1 %v14784_v6  ;;  %v2798_v12 = vld [vmem:[#allocation9 + $0x130] sm:$0xff] }
 0x9b8   :  { %2607 = vmatpush1.msra.mxu0 %v11215_v63  ;;  %10363 = vmatpush3.msra.mxu1 %v11216_v23  ;;  %v2793_v63 = vld [vmem:[#allocation9 + $0x108] sm:$0xff]  ;;  %v2791_v23 = vld [vmem:[#allocation9 + $0xf8] sm:$0xff] }
 0x9b9   :  { %2608 = vmatprep.subr.mxu0 %v11217_v42  ;;  %10364 = vmatprep.subr.mxu1 %v14784_v6  ;;  %v2795_v42 = vld [vmem:[#allocation9 + $0x118] sm:$0xff] }
 0x9ba   :  { %2609 = vmatpush1.msra.mxu0 %v11218_v61  ;;  %10365 = vmatpush3.msra.mxu1 %v11219_v4  ;;  %v2790_v61 = vld [vmem:[#allocation9 + $0xf0] sm:$0xff]  ;;  %v2788_v4 = vld [vmem:[#allocation9 + $0xe0] sm:$0xff] }
 0x9bb   :  { %2610 = vmatprep.subr.mxu0 %v11220_v55  ;;  %10366 = vmatprep.subr.mxu1 %v14784_v6  ;;  %v2792_v55 = vld [vmem:[#allocation9 + $0x100] sm:$0xff] }
 0x9bc   :  { %2611 = vmatpush1.msra.mxu0 %v11221_v41  ;;  %10367 = vmatpush3.msra.mxu1 %v11222_v24  ;;  %v2787_v41 = vld [vmem:[#allocation9 + $0xd8] sm:$0xff]  ;;  %v2785_v24 = vld [vmem:[#allocation9 + $0xc8] sm:$0xff] }
 0x9bd   :  { %2612 = vmatprep.subr.mxu0 %v11223_v44  ;;  %10368 = vmatprep.subr.mxu1 %v14784_v6  ;;  %v2789_v44 = vld [vmem:[#allocation9 + $0xe8] sm:$0xff] }
 0x9be   :  { %2613 = vmatpush1.msra.mxu0 %v11224_v27  ;;  %10369 = vmatpush3.msra.mxu1 %v11225_v45  ;;  %v2784_v27 = vld [vmem:[#allocation9 + $0xc0] sm:$0xff]  ;;  %v2782_v45 = vld [vmem:[#allocation9 + $0xb0] sm:$0xff] }
 0x9bf   :  { %2614 = vmatprep.subr.mxu0 %v11226_v46  ;;  %10370 = vmatprep.subr.mxu1 %v14784_v6  ;;  %v2786_v46 = vld [vmem:[#allocation9 + $0xd0] sm:$0xff] }
 0x9c0   :  { %2615 = vmatpush1.msra.mxu0 %v11227_v29  ;;  %10371 = vmatpush3.msra.mxu1 %v11228_v48  ;;  %v2781_v29 = vld [vmem:[#allocation9 + $0xa8] sm:$0xff]  ;;  %v2779_v48 = vld [vmem:[#allocation9 + $0x98] sm:$0xff] }
 0x9c1   :  { %2616 = vmatprep.subr.mxu0 %v11229_v30  ;;  %10372 = vmatprep.subr.mxu1 %v14784_v6  ;;  %v2783_v30 = vld [vmem:[#allocation9 + $0xb8] sm:$0xff] }
 0x9c2   :  { %2617 = vmatpush1.msra.mxu0 %v11230_v50  ;;  %2650 = vmatprep.mubr.f32.mxu0 %v14784_v6  ;;  %v2778_v50 = vld [vmem:[#allocation9 + $0x90] sm:$0xff] }
 0x9c3   :  { %10373 = vmatpush3.msra.mxu1 %v11231_v53  ;;  %10374 = vmatprep.mubr.msk.f32.mxu1 %vm11369_vm0, %v14784_v6  ;;  %v2776_v53 = vld [vmem:[#allocation9 + $0x80] sm:$0xff] }
 0x9c4   :  { %10377 = vmatprep.subr.mxu1 %v14784_v6  ;;  %2825 = vmatprep.subr.mxu0 %v2806_v32  ;;  %v2780_v32 = vld [vmem:[#allocation9 + $0xa0] sm:$0xff] }
 0xa63   :  { %v2490_v54 = vpop.f32.mrf.mxu0  ;;  %v2561_v33 = vpop.f32.mrf.mxu1 }
 0xa64   :  { %v2491_v56 = vadd.f32 %v2490_v54, %v14880_v26  ;;  %v2562_v15 = vadd.f32 %v2561_v33, %v12463_v21  ;;  %v2775_v54 = vld [vmem:[#allocation9 + $0x78] sm:$0xff]  ;;  %v2773_v33 = vld [vmem:[#allocation9 + $0x68] sm:$0xff] }
 0xa65   :  { %v2492_v59 = vpop.f32.mrf.mxu0  ;;  %v10341_v35 = vpop.f32.mrf.mxu1 }
 0xa66   :  { %v2565_v36 = vadd.f32 %v2491_v56, %v14885_v60  ;;  %v2493_v2 = vadd.f32 %v2492_v59, %v12450_v14  ;;  %v2777_v56 = vld [vmem:[#allocation9 + $0x88] sm:$0xff]  ;;  %v2772_v59 = vld [vmem:[#allocation9 + $0x60] sm:$0xff]  ;;  %v2770_v35 = vld [vmem:[#allocation9 + $0x50] sm:$0xff] }
 0xa67   :  { %v2774_v60 = vld [vmem:[#allocation9 + $0x70] sm:$0xff] }
 0xa68   :  { %v9381_v40 = vmul.f32 -1.442695, %v2565_v36  ;;  %v2572_v9 = vadd.f32 %v2493_v2, %v14886_v8  ;;  %v2769_v36 = vld [vmem:[#allocation9 + $0x48] sm:$0xff]  ;;  %v2771_v2 = vld [vmem:[#allocation9 + $0x58] sm:$0xff]  ;;  %v2766_v8 = vld [vmem:[#allocation9 + $0x30] sm:$0xff] }
 0xa6a   :  { %10963 = vpow2.f32 %v9381_v40  ;;  %v9382_v11 = vmul.f32 -1.442695, %v2572_v9  ;;  %v2767_v40 = vld [vmem:[#allocation9 + $0x38] sm:$0xff]  ;;  %v2764_v9 = vld [vmem:[#allocation9 + $0x20] sm:$0xff] }
 0xa6c   :  { %10965 = vpow2.f32 %v9382_v11  ;;  %v2768_v11 = vld [vmem:[#allocation9 + $0x40] sm:$0xff] }
 0xa77   :  { %v10964_v52 = vpop.eup %10963 }
 0xa78   :  { %v2569_v13 = vadd.f32 1.0, %v10964_v52  ;;  %v2763_v52 = vld [vmem:[#allocation9 + $0x18] sm:$0xff] }
 0xa79   :  { %v10966_v58 = vpop.eup %10965 }
 0xa7a   :  { %10967 = vrcp.f32 %v2569_v13  ;;  %v2576_v31 = vadd.f32 1.0, %v10966_v58  ;;  %v2761_v13 = vld [vmem:[#allocation9 + $0x8] sm:$0xff] }
 0xa7b   :  { %v2765_v58 = vld [vmem:[#allocation9 + $0x28] sm:$0xff] }
 0xa7c   :  { %10969 = vrcp.f32 %v2576_v31  ;;  %v2760_v31 = vld [vmem:[#allocation9] sm:$0xff] }
 0xa87   :  { %v10968_v1 = vpop.eup %10967 }
 0xa88   :  { %v2579_v19 = vmul.f32 %v10968_v1, %v2562_v15  ;;  %v2755_v15 = vld [vmem:[%s14889_s1] sm:$0xff]  ;;  %v2762_v1 = vld [vmem:[#allocation9 + $0x10] sm:$0xff] }
 0xa89   :  { %v10970_v51 = vpop.eup %10969 }
 0xa8a   :  { %v2580_v62 = vadd.f32 %v2579_v19, %v14887_v17  ;;  %v2582_v25 = vsub.f32 1.0, %v10970_v51  ;;  %v2584_v57 = vmul.f32 %v10970_v51, %v12700_v5  ;;  %v12755_v19 = vld [vmem:[#allocation10 + $0x170] sm:$0xff]  ;;  %v12759_v17 = vld [vmem:[#allocation10 + $0x168] sm:$0xff]  ;;  %v12764_v51 = vld [vmem:[#allocation10 + $0x158] sm:$0xff] }
 0xa8b   :  { %14890 = vst [vmem:[#allocation36_spill] sm:$0xff] %v12755_v19 }
 0xa8c   :  { %10971 = vtanh.f32 %v2580_v62  ;;  %v12761_v62 = vld [vmem:[#allocation10 + $0x178] sm:$0xff] }
 0xa99   :  { %v10972_v47 = vpop.eup %10971 }
 0xa9a   :  { %v2583_v16 = vmul.f32 %v10972_v47, %v2582_v25  ;;  %v12768_v25 = vld [vmem:[#allocation10 + $0x150] sm:$0xff]  ;;  %v12770_v47 = vld [vmem:[#allocation10 + $0x160] sm:$0xff] }
 0xa9c   :  { %v12730_v34 = vadd.f32 %v2584_v57, %v2583_v16  ;;  %v12774_v16 = vld [vmem:[#allocation10 + $0x140] sm:$0xff]  ;;  %v12778_v57 = vld [vmem:[#allocation10 + $0x138] sm:$0xff] }
 0xa9e   :  { %14888 = vst [vmem:[#allocation38_spill] sm:$0xff] %v12730_v34  ;;  %2651 = vmatmul.mubr.f32.vlgmr.msra.gmra.mxu0 %v12730_v34  ;;  %10375 = vmatmul.mubr.f32.vlgmr.msra.gmra.mxu1 %v12730_v34 }
 0xa9f   :  { %2826 = vmatpush1.msra.mxu0 %v2805_v37  ;;  %10378 = vmatpush3.msra.mxu1 %v2807_v28  ;;  %v12780_v37 = vld [vmem:[#allocation10 + $0x148] sm:$0xff] }
 0xaa0   :  { %2827 = vmatprep.subr.mxu0 %v2803_v49  ;;  %10379 = vmatprep.subr.mxu1 %v14784_v6  ;;  %v12784_v28 = vld [vmem:[#allocation10 + $0x128] sm:$0xff]  ;;  %v12788_v49 = vld [vmem:[#allocation10 + $0x120] sm:$0xff] }
 0xaa1   :  { %2828 = vmatpush1.msra.mxu0 %v2802_v7  ;;  %2889 = vmatprep.mubr.f32.mxu0 %v14784_v6  ;;  %v12790_v7 = vld [vmem:[#allocation10 + $0x130] sm:$0xff] }
 0xaa2   :  { %10409 = vmatprep.mubr.msk.f32.mxu1 %vm11369_vm0, %v14784_v6  ;;  %2829 = vmatprep.subr.mxu0 %v2800_v43  ;;  %v12794_v43 = vld [vmem:[#allocation10 + $0x110] sm:$0xff] }
 0xaa3   :  { %10380 = vmatpush3.msra.mxu1 %v2804_v18  ;;  %2830 = vmatpush1.msra.mxu0 %v2799_v0  ;;  %v12798_v18 = vld [vmem:[#allocation10 + $0x108] sm:$0xff]  ;;  %v12800_v0 = vld [vmem:[#allocation10 + $0x118] sm:$0xff] }
 0xaa4   :  { %10381 = vmatprep.subr.mxu1 %v14784_v6  ;;  %2831 = vmatprep.subr.mxu0 %v2797_v20  ;;  %v12804_v20 = vld [vmem:[#allocation10 + $0xf8] sm:$0xff] }
 0xaa5   :  { %10382 = vmatpush3.msra.mxu1 %v2801_v38  ;;  %2832 = vmatpush1.msra.mxu0 %v2796_v39  ;;  %v12808_v38 = vld [vmem:[#allocation10 + $0xf0] sm:$0xff]  ;;  %v12810_v39 = vld [vmem:[#allocation10 + $0x100] sm:$0xff] }
 0xaa6   :  { %10383 = vmatprep.subr.mxu1 %v14784_v6  ;;  %2833 = vmatprep.subr.mxu0 %v2794_v10  ;;  %v12814_v10 = vld [vmem:[#allocation10 + $0xe0] sm:$0xff] }
 0xaa7   :  { %10384 = vmatpush3.msra.mxu1 %v2798_v12  ;;  %2834 = vmatpush1.msra.mxu0 %v2793_v63  ;;  %v12818_v12 = vld [vmem:[#allocation10 + $0xd8] sm:$0xff]  ;;  %v12820_v63 = vld [vmem:[#allocation10 + $0xe8] sm:$0xff] }
 0xaa8   :  { %10385 = vmatprep.subr.mxu1 %v14784_v6  ;;  %2835 = vmatprep.subr.mxu0 %v2791_v23  ;;  %v2756_v23 = vld [vmem:[%s14889_s1 + $0x8] sm:$0xff] }
 0xaa9   :  { %10386 = vmatpush3.msra.mxu1 %v2795_v42  ;;  %2836 = vmatpush1.msra.mxu0 %v2790_v61  ;;  %v12827_v42 = vld [vmem:[#allocation10 + $0xc8] sm:$0xff]  ;;  %v12831_v61 = vld [vmem:[#allocation10 + $0xc0] sm:$0xff] }
 0xaaa   :  { %10387 = vmatprep.subr.mxu1 %v14784_v6  ;;  %2837 = vmatprep.subr.mxu0 %v2788_v4  ;;  %v12833_v4 = vld [vmem:[#allocation10 + $0xd0] sm:$0xff] }
 0xaab   :  { %10388 = vmatpush3.msra.mxu1 %v2792_v55  ;;  %2838 = vmatpush1.msra.mxu0 %v2787_v41  ;;  %v12836_v55 = vld [vmem:[#allocation10 + $0xb0] sm:$0xff]  ;;  %v12843_v41 = vld [vmem:[#allocation10 + $0xa8] sm:$0xff] }
 0xaac   :  { %10389 = vmatprep.subr.mxu1 %v14784_v6  ;;  %2839 = vmatprep.subr.mxu0 %v2785_v24  ;;  %v12845_v24 = vld [vmem:[#allocation10 + $0xb8] sm:$0xff] }
 0xaad   :  { %10390 = vmatpush3.msra.mxu1 %v2789_v44  ;;  %2840 = vmatpush1.msra.mxu0 %v2784_v27  ;;  %v2757_v44 = vld [vmem:[%s14889_s1 + $0x10] sm:$0xff]  ;;  %v12851_v27 = vld [vmem:[#allocation10 + $0x98] sm:$0xff] }
 0xaae   :  { %10391 = vmatprep.subr.mxu1 %v14784_v6  ;;  %2841 = vmatprep.subr.mxu0 %v2782_v45  ;;  %v12857_v45 = vld [vmem:[#allocation10 + $0x90] sm:$0xff] }
 0xaaf   :  { %10392 = vmatpush3.msra.mxu1 %v2786_v46  ;;  %2842 = vmatpush1.msra.mxu0 %v2781_v29  ;;  %v12859_v46 = vld [vmem:[#allocation10 + $0xa0] sm:$0xff] }
 0xab0   :  { %10393 = vmatprep.subr.mxu1 %v14784_v6  ;;  %2843 = vmatprep.subr.mxu0 %v2779_v48  ;;  %v12862_v29 = vld [vmem:[#allocation10 + $0x80] sm:$0xff]  ;;  %v12869_v48 = vld [vmem:[#allocation10 + $0x78] sm:$0xff] }
 0xab1   :  { %10394 = vmatpush3.msra.mxu1 %v2783_v30  ;;  %2844 = vmatpush1.msra.mxu0 %v2778_v50  ;;  %v12871_v30 = vld [vmem:[#allocation10 + $0x88] sm:$0xff]  ;;  %v2758_v50 = vld [vmem:[%s14889_s1 + $0x18] sm:$0xff] }
 0xab2   :  { %10395 = vmatprep.subr.mxu1 %v14784_v6  ;;  %2845 = vmatprep.subr.mxu0 %v2776_v53  ;;  %v12877_v53 = vld [vmem:[#allocation10 + $0x68] sm:$0xff] }
 0xab3   :  { %10396 = vmatpush3.msra.mxu1 %v2780_v32  ;;  %2846 = vmatpush1.msra.mxu0 %v2775_v54  ;;  %v12883_v32 = vld [vmem:[#allocation10 + $0x60] sm:$0xff]  ;;  %v12885_v54 = vld [vmem:[#allocation10 + $0x70] sm:$0xff] }
 0xab4   :  { %10397 = vmatprep.subr.mxu1 %v14784_v6  ;;  %2847 = vmatprep.subr.mxu0 %v2773_v33  ;;  %v12888_v33 = vld [vmem:[#allocation10 + $0x50] sm:$0xff] }
 0xab5   :  { %10398 = vmatpush3.msra.mxu1 %v2777_v56  ;;  %2848 = vmatpush1.msra.mxu0 %v2772_v59  ;;  %v12895_v56 = vld [vmem:[#allocation10 + $0x48] sm:$0xff]  ;;  %v12897_v59 = vld [vmem:[#allocation10 + $0x58] sm:$0xff] }
 0xab6   :  { %10399 = vmatprep.subr.mxu1 %v14784_v6  ;;  %2849 = vmatprep.subr.mxu0 %v2770_v35  ;;  %14891 = vst [vmem:[#allocation37_spill] sm:$0xff] %v12897_v59  ;;  %v2759_v35 = vld [vmem:[%s14889_s1 + $0x20] sm:$0xff] }
 0xab7   :  { %10400 = vmatpush3.msra.mxu1 %v2774_v60  ;;  %2850 = vmatpush1.msra.mxu0 %v2769_v36  ;;  %v12903_v60 = vld [vmem:[#allocation10 + $0x38] sm:$0xff]  ;;  %v12909_v36 = vld [vmem:[#allocation10 + $0x30] sm:$0xff] }
 0xab8   :  { %10401 = vmatprep.subr.mxu1 %v14784_v6  ;;  %2851 = vmatprep.subr.mxu0 %v2767_v40  ;;  %14892 = vst [vmem:[#allocation46_spill] sm:$0xff] %v12903_v60  ;;  %14893 = vst [vmem:[#allocation30_spill] sm:$0xff] %v12909_v36  ;;  %v12911_v40 = vld [vmem:[#allocation10 + $0x40] sm:$0xff] }
 0xab9   :  { %10402 = vmatpush3.msra.mxu1 %v2771_v2  ;;  %2852 = vmatpush1.msra.mxu0 %v2766_v8  ;;  %14894 = vst [vmem:[#allocation19_spill] sm:$0xff] %v12911_v40  ;;  %v12914_v2 = vld [vmem:[#allocation10 + $0x20] sm:$0xff]  ;;  %v12919_v8 = vld [vmem:[#allocation10 + $0x18] sm:$0xff] }
 0xaba   :  { %10403 = vmatprep.subr.mxu1 %v14784_v6  ;;  %2853 = vmatprep.subr.mxu0 %v2764_v9  ;;  %14895 = vst [vmem:[#allocation41_spill] sm:$0xff] %v12914_v2  ;;  %14896 = vst [vmem:[#allocation18_spill] sm:$0xff] %v12919_v8  ;;  %v12923_v9 = vld [vmem:[#allocation10 + $0x28] sm:$0xff] }
 0xabb   :  { %10404 = vmatpush3.msra.mxu1 %v2768_v11  ;;  %2854 = vmatpush1.msra.mxu0 %v2763_v52  ;;  %14897 = vst [vmem:[#allocation20_spill] sm:$0xff] %v12923_v9  ;;  %v12925_v11 = vld [vmem:[#allocation10 + $0x8] sm:$0xff]  ;;  %v12928_v52 = vld [vmem:[#allocation10] sm:$0xff] }
 0xabc   :  { %10405 = vmatprep.subr.mxu1 %v14784_v6  ;;  %2855 = vmatprep.subr.mxu0 %v2761_v13  ;;  %14898 = vst [vmem:[#allocation45_spill] sm:$0xff] %v12925_v11  ;;  %14899 = vst [vmem:[#allocation33_spill] sm:$0xff] %v12928_v52  ;;  %v12932_v13 = vld [vmem:[#allocation10 + $0x10] sm:$0xff] }
 0xabd   :  { %10406 = vmatpush3.msra.mxu1 %v2765_v58  ;;  %2856 = vmatpush1.msra.mxu0 %v2760_v31  ;;  %14900 = vst [vmem:[#allocation43_spill] sm:$0xff] %v12932_v13 }
 0xabe   :  { %10407 = vmatprep.subr.mxu1 %v14784_v6  ;;  %2890 = vmatmul.mubr.f32.vlgmr.msra.gmra.mxu0 %v2755_v15 }
 0xabf   :  { %10408 = vmatpush3.msra.mxu1 %v2762_v1  ;;  %3075 = vmatprep.subr.mxu0 %v12755_v19 }
 0xac0   :  { %10424 = vmatprep.subr.mxu1 %v14784_v6  ;;  %10410 = vmatmul.mubr.f32.vlgmr.msra.gmra.mxu1 %v2755_v15 }
 0xac1   :  { %3076 = vmatpush1.msra.mxu0 %v12759_v17  ;;  %10425 = vmatpush3.msra.mxu1 %v12761_v62 }
 0xac2   :  { %3077 = vmatprep.subr.mxu0 %v12764_v51  ;;  %10426 = vmatprep.subr.mxu1 %v14784_v6 }
 0xac3   :  { %3078 = vmatpush1.msra.mxu0 %v12768_v25  ;;  %10427 = vmatpush3.msra.mxu1 %v12770_v47 }
 0xac4   :  { %3079 = vmatprep.subr.mxu0 %v12774_v16  ;;  %10428 = vmatprep.subr.mxu1 %v14784_v6 }
 0xac5   :  { %3080 = vmatpush1.msra.mxu0 %v12778_v57  ;;  %10429 = vmatpush3.msra.mxu1 %v12780_v37 }
 0xac6   :  { %3081 = vmatprep.subr.mxu0 %v12784_v28  ;;  %10430 = vmatprep.subr.mxu1 %v14784_v6 }
 0xac7   :  { %3082 = vmatpush1.msra.mxu0 %v12788_v49  ;;  %10431 = vmatpush3.msra.mxu1 %v12790_v7 }
 0xac8   :  { %3083 = vmatprep.subr.mxu0 %v12794_v43  ;;  %10432 = vmatprep.subr.mxu1 %v14784_v6 }
 0xac9   :  { %3084 = vmatpush1.msra.mxu0 %v12798_v18  ;;  %10433 = vmatpush3.msra.mxu1 %v12800_v0 }
 0xaca   :  { %3085 = vmatprep.subr.mxu0 %v12804_v20  ;;  %10434 = vmatprep.subr.mxu1 %v14784_v6 }
 0xacb   :  { %3086 = vmatpush1.msra.mxu0 %v12808_v38  ;;  %10435 = vmatpush3.msra.mxu1 %v12810_v39 }
 0xacc   :  { %3087 = vmatprep.subr.mxu0 %v12814_v10  ;;  %10436 = vmatprep.subr.mxu1 %v14784_v6 }
 0xacd   :  { %2895 = vmatprep.mubr.f32.mxu0 %v14784_v6  ;;  %3088 = vmatpush1.msra.mxu0 %v12818_v12 }
 0xace   :  { %10437 = vmatpush3.msra.mxu1 %v12820_v63  ;;  %2896 = vmatmul.mubr.f32.gmra.mxu0 %v2756_v23 }
 0xacf   :  { %3089 = vmatprep.subr.mxu0 %v12827_v42  ;;  %10438 = vmatprep.subr.mxu1 %v14784_v6 }
 0xad0   :  { %10412 = vmatprep.mubr.msk.f32.mxu1 %vm11369_vm0, %v14784_v6  ;;  %3090 = vmatpush1.msra.mxu0 %v12831_v61 }
 0xad1   :  { %10439 = vmatpush3.msra.mxu1 %v12833_v4  ;;  %3091 = vmatprep.subr.mxu0 %v12836_v55 }
 0xad2   :  { %10413 = vmatmul.mubr.f32.gmra.mxu1 %v2756_v23  ;;  %10440 = vmatprep.subr.mxu1 %v14784_v6 }
 0xad3   :  { %2901 = vmatprep.mubr.f32.mxu0 %v14784_v6  ;;  %3092 = vmatpush1.msra.mxu0 %v12843_v41 }
 0xad4   :  { %10441 = vmatpush3.msra.mxu1 %v12845_v24  ;;  %2902 = vmatmul.mubr.f32.gmra.mxu0 %v2757_v44 }
 0xad5   :  { %3093 = vmatprep.subr.mxu0 %v12851_v27  ;;  %10442 = vmatprep.subr.mxu1 %v14784_v6 }
 0xad6   :  { %10415 = vmatprep.mubr.msk.f32.mxu1 %vm11369_vm0, %v14784_v6  ;;  %3094 = vmatpush1.msra.mxu0 %v12857_v45 }
 0xad7   :  { %10443 = vmatpush3.msra.mxu1 %v12859_v46  ;;  %3095 = vmatprep.subr.mxu0 %v12862_v29 }
 0xad8   :  { %10416 = vmatmul.mubr.f32.gmra.mxu1 %v2757_v44  ;;  %10444 = vmatprep.subr.mxu1 %v14784_v6  ;;  %v14901_v44 = vld [vmem:[#allocation23_spill] sm:$0xff] }
 0xad9   :  { %2907 = vmatprep.mubr.f32.mxu0 %v14784_v6  ;;  %3096 = vmatpush1.msra.mxu0 %v12869_v48 }
 0xada   :  { %10445 = vmatpush3.msra.mxu1 %v12871_v30  ;;  %2908 = vmatmul.mubr.f32.gmra.mxu0 %v2758_v50 }
 0xadb   :  { %3097 = vmatprep.subr.mxu0 %v12877_v53  ;;  %10446 = vmatprep.subr.mxu1 %v14784_v6 }
 0xadc   :  { %10418 = vmatprep.mubr.msk.f32.mxu1 %vm11369_vm0, %v14784_v6  ;;  %3098 = vmatpush1.msra.mxu0 %v12883_v32 }
 0xadd   :  { %10447 = vmatpush3.msra.mxu1 %v12885_v54  ;;  %3099 = vmatprep.subr.mxu0 %v12888_v33 }
 0xade   :  { %10419 = vmatmul.mubr.f32.gmra.mxu1 %v2758_v50  ;;  %10448 = vmatprep.subr.mxu1 %v14784_v6 }
 0xadf   :  { %2913 = vmatprep.mubr.f32.mxu0 %v14784_v6  ;;  %3100 = vmatpush1.msra.mxu0 %v12895_v56 }
 0xae0   :  { %10449 = vmatpush3.msra.mxu1 %v12897_v59  ;;  %2914 = vmatmul.mubr.f32.gmra.mxu0 %v2759_v35 }
 0xae1   :  { %3101 = vmatprep.subr.mxu0 %v12903_v60  ;;  %10450 = vmatprep.subr.mxu1 %v14784_v6 }
 0xae2   :  { %10421 = vmatprep.mubr.msk.f32.mxu1 %vm11369_vm0, %v14784_v6  ;;  %3102 = vmatpush1.msra.mxu0 %v12909_v36 }
 0xae3   :  { %10451 = vmatpush3.msra.mxu1 %v12911_v40  ;;  %3103 = vmatprep.subr.mxu0 %v12914_v2 }
 0xae4   :  { %10422 = vmatmul.mubr.f32.gmra.mxu1 %v2759_v35  ;;  %10452 = vmatprep.subr.mxu1 %v14784_v6 }
 0xae5   :  { %3104 = vmatpush1.msra.mxu0 %v12919_v8  ;;  %10453 = vmatpush3.msra.mxu1 %v12923_v9 }
 0xae6   :  { %3105 = vmatprep.subr.mxu0 %v12925_v11  ;;  %10454 = vmatprep.subr.mxu1 %v14784_v6 }
 0xae7   :  { %3106 = vmatpush1.msra.mxu0 %v12928_v52  ;;  %3139 = vmatprep.mubr.f32.mxu0 %v14784_v6 }
 0xae8   :  { %10455 = vmatpush3.msra.mxu1 %v12932_v13  ;;  %10456 = vmatprep.mubr.msk.f32.mxu1 %vm11369_vm0, %v14784_v6 }
 0xae9   :  { %3237 = vmatprep.subr.mxu0 %v12755_v19  ;;  %10459 = vmatprep.subr.mxu1 %v14784_v6 }
 0xb5e   :  { %v2652_v58 = vpop.f32.mrf.mxu0  ;;  %v2723_v31 = vpop.f32.mrf.mxu1 }
 0xb5f   :  { %v2653_v15 = vadd.f32 %v2652_v58, %v14880_v26  ;;  %v2724_v8 = vadd.f32 %v2723_v31, %v12463_v21  ;;  %v14906_v21 = vld [vmem:[#allocation18_spill] sm:$0xff]  ;;  %v14911_v31 = vld [vmem:[#allocation36_spill] sm:$0xff] }
 0xb60   :  { %v2654_v1 = vpop.f32.mrf.mxu0  ;;  %v10376_v23 = vpop.f32.mrf.mxu1 }
 0xb61   :  { %v2727_v50 = vadd.f32 %v2653_v15, %v14901_v44  ;;  %v2655_v5 = vadd.f32 %v2654_v1, %v12450_v14  ;;  %v14903_v23 = vld [vmem:[#allocation35_spill] sm:$0xff] }
 0xb63   :  { %v9383_v35 = vmul.f32 -1.442695, %v2727_v50  ;;  %v2734_v22 = vadd.f32 %v2655_v5, %v14902_v3  ;;  %v14905_v5 = vld [vmem:[#allocation42_spill] sm:$0xff] }
 0xb65   :  { %10973 = vpow2.f32 %v9383_v35  ;;  %v9384_v13 = vmul.f32 -1.442695, %v2734_v22 }
 0xb67   :  { %10975 = vpow2.f32 %v9384_v13 }
 0xb72   :  { %v10974_v52 = vpop.eup %10973 }
 0xb73   :  { %v2731_v19 = vadd.f32 1.0, %v10974_v52  ;;  %v14910_v52 = vld [vmem:[#allocation43_spill] sm:$0xff] }
 0xb74   :  { %v10976_v11 = vpop.eup %10975 }
 0xb75   :  { %10977 = vrcp.f32 %v2731_v19  ;;  %v2738_v9 = vadd.f32 1.0, %v10976_v11  ;;  %v14909_v11 = vld [vmem:[#allocation33_spill] sm:$0xff] }
 0xb77   :  { %10979 = vrcp.f32 %v2738_v9  ;;  %v14908_v9 = vld [vmem:[#allocation45_spill] sm:$0xff] }
 0xb80   :  { %v2986_v13 = vpop.f32.mrf.mxu1 }
 0xb82   :  { %v10978_v26 = vpop.eup %10977  ;;  %v10411_v35 = vpop.f32.mrf.mxu1 }
 0xb83   :  { %v2741_v58 = vmul.f32 %v10978_v26, %v2724_v8  ;;  %v14907_v8 = vld [vmem:[#allocation20_spill] sm:$0xff]  ;;  %v2891_v26 = vpop.f32.mrf.mxu0 }
 0xb84   :  { %v10980_v44 = vpop.eup %10979 }
 0xb85   :  { %v2742_v15 = vadd.f32 %v2741_v58, %v14903_v23  ;;  %v2744_v14 = vsub.f32 1.0, %v10980_v44  ;;  %v2746_v22 = vmul.f32 %v10980_v44, %v12730_v34  ;;  %v2808_v58 = vld [vmem:[%s14645_s12] sm:$0x7]  ;;  %v2893_v23 = vpop.f32.mrf.mxu0 }
 0xb87   :  { %10981 = vtanh.f32 %v2742_v15  ;;  %v14912_v15 = vld [vmem:[#allocation25_spill] sm:$0xff] }
 0xb88   :  { %v2813_v44 = vrot.slane %v2808_v58, %v14912_v15 }
 0xb92   :  { %v2991_v35 = vpop.f32.mrf.mxu1 }
 0xb94   :  { %v10982_v1 = vpop.eup %10981 }
 0xb95   :  { %v2745_v50 = vmul.f32 %v10982_v1, %v2744_v14  ;;  %v2897_v14 = vpop.f32.mrf.mxu0  ;;  %v14913_v1 = vld [vmem:[#allocation26_spill] sm:$0xff] }
 0xb97   :  { %v12951_v3 = vadd.f32 %v2746_v22, %v2745_v50  ;;  %v13031_v50 = vrot.slane %v2808_v58, %v14913_v1  ;;  %v13033_v22 = vadd.f32 %v2897_v14, %v2813_v44 }
 0xb99   :  { %14904 = vst [vmem:[#allocation47_spill] sm:$0xff] %v12951_v3  ;;  %v12955_v19 = vadd.f32 %v12951_v3, %v14905_v5  ;;  %14914 = vst [vmem:[#allocation31_spill] sm:$0xff] %v13031_v50  ;;  %v14916_v3 = vld [vmem:[#allocation34_spill] sm:$0xff]  ;;  %v2899_v5 = vpop.f32.mrf.mxu0 }
 0xb9a   :  { %14915 = vst [vmem:[#allocation32_spill] sm:$0xff] %v13033_v22  ;;  %v2821_v34 = vrot.slane %v2808_v58, %v14916_v3 }
 0xb9b   :  { %3140 = vmatmul.mubr.f32.vlgmr.msra.gmra.mxu0 %v12955_v19  ;;  %10457 = vmatmul.mubr.f32.vlgmr.msra.gmra.mxu1 %v12955_v19 }
 0xb9c   :  { %3238 = vmatpush1.msra.mxu0 %v12759_v17  ;;  %10460 = vmatpush3.msra.mxu1 %v12761_v62 }
 0xb9d   :  { %3239 = vmatprep.subr.mxu0 %v12764_v51  ;;  %10461 = vmatprep.subr.mxu1 %v14784_v6 }
 0xb9e   :  { %3240 = vmatpush1.msra.mxu0 %v12768_v25  ;;  %10462 = vmatpush3.msra.mxu1 %v12770_v47 }
 0xb9f   :  { %3241 = vmatprep.subr.mxu0 %v12774_v16  ;;  %10463 = vmatprep.subr.mxu1 %v14784_v6 }
 0xba0   :  { %3242 = vmatpush1.msra.mxu0 %v12778_v57  ;;  %10464 = vmatpush3.msra.mxu1 %v12780_v37 }
 0xba1   :  { %3243 = vmatprep.subr.mxu0 %v12784_v28  ;;  %10465 = vmatprep.subr.mxu1 %v14784_v6 }
 0xba2   :  { %3244 = vmatpush1.msra.mxu0 %v12788_v49  ;;  %10466 = vmatpush3.msra.mxu1 %v12790_v7 }
 0xba3   :  { %3245 = vmatprep.subr.mxu0 %v12794_v43  ;;  %10467 = vmatprep.subr.mxu1 %v14784_v6 }
 0xba4   :  { %3246 = vmatpush1.msra.mxu0 %v12798_v18  ;;  %10468 = vmatpush3.msra.mxu1 %v12800_v0 }
 0xba5   :  { %3247 = vmatprep.subr.mxu0 %v12804_v20  ;;  %10469 = vmatprep.subr.mxu1 %v14784_v6 }
 0xba6   :  { %3248 = vmatpush1.msra.mxu0 %v12808_v38  ;;  %10470 = vmatpush3.msra.mxu1 %v12810_v39 }
 0xba7   :  { %3249 = vmatprep.subr.mxu0 %v12814_v10  ;;  %10471 = vmatprep.subr.mxu1 %v14784_v6 }
 0xba8   :  { %3250 = vmatpush1.msra.mxu0 %v12818_v12  ;;  %10472 = vmatpush3.msra.mxu1 %v12820_v63 }
 0xba9   :  { %3251 = vmatprep.subr.mxu0 %v12827_v42  ;;  %10473 = vmatprep.subr.mxu1 %v14784_v6 }
 0xbaa   :  { %3252 = vmatpush1.msra.mxu0 %v12831_v61  ;;  %10474 = vmatpush3.msra.mxu1 %v12833_v4 }
 0xbab   :  { %3253 = vmatprep.subr.mxu0 %v12836_v55  ;;  %10475 = vmatprep.subr.mxu1 %v14784_v6 }
 0xbac   :  { %3254 = vmatpush1.msra.mxu0 %v12843_v41  ;;  %10476 = vmatpush3.msra.mxu1 %v12845_v24 }
 0xbad   :  { %3255 = vmatprep.subr.mxu0 %v12851_v27  ;;  %10477 = vmatprep.subr.mxu1 %v14784_v6 }
 0xbae   :  { %3256 = vmatpush1.msra.mxu0 %v12857_v45  ;;  %10478 = vmatpush3.msra.mxu1 %v12859_v46 }
 0xbaf   :  { %3257 = vmatprep.subr.mxu0 %v12862_v29  ;;  %10479 = vmatprep.subr.mxu1 %v14784_v6 }
 0xbb0   :  { %3258 = vmatpush1.msra.mxu0 %v12869_v48  ;;  %10480 = vmatpush3.msra.mxu1 %v12871_v30 }
 0xbb1   :  { %3259 = vmatprep.subr.mxu0 %v12877_v53  ;;  %10481 = vmatprep.subr.mxu1 %v14784_v6 }
 0xbb2   :  { %3260 = vmatpush1.msra.mxu0 %v12883_v32  ;;  %10482 = vmatpush3.msra.mxu1 %v12885_v54 }
 0xbb3   :  { %3261 = vmatprep.subr.mxu0 %v12888_v33  ;;  %10483 = vmatprep.subr.mxu1 %v14784_v6 }
 0xbb4   :  { %3262 = vmatpush1.msra.mxu0 %v12895_v56  ;;  %10484 = vmatpush3.msra.mxu1 %v12897_v59 }
 0xbb5   :  { %3263 = vmatprep.subr.mxu0 %v12903_v60  ;;  %10485 = vmatprep.subr.mxu1 %v14784_v6 }
 0xbb6   :  { %3264 = vmatpush1.msra.mxu0 %v12909_v36  ;;  %10486 = vmatpush3.msra.mxu1 %v12911_v40 }
 0xbb7   :  { %3265 = vmatprep.subr.mxu0 %v12914_v2  ;;  %10487 = vmatprep.subr.mxu1 %v14784_v6 }
 0xbb8   :  { %3266 = vmatpush1.msra.mxu0 %v14906_v21  ;;  %10488 = vmatpush3.msra.mxu1 %v14907_v8 }
 0xbb9   :  { %3267 = vmatprep.subr.mxu0 %v14908_v9  ;;  %10489 = vmatprep.subr.mxu1 %v14784_v6  ;;  %v2903_v9 = vpop.f32.mrf.mxu0 }
 0xbba   :  { %3268 = vmatpush1.msra.mxu0 %v14909_v11  ;;  %3301 = vmatprep.mubr.f32.mxu0 %v14784_v6  ;;  %v10414_v11 = vpop.f32.mrf.mxu1  ;;  %v13041_v8 = vadd.f32 %v2903_v9, %v2813_v44 }
 0xbbb   :  { %10490 = vmatpush3.msra.mxu1 %v14910_v52  ;;  %10491 = vmatprep.mubr.msk.f32.mxu1 %vm11369_vm0, %v14784_v6  ;;  %v13039_v52 = vadd.f32 %v2991_v35, %v2821_v34  ;;  %v2905_v21 = vpop.f32.mrf.mxu0 }
 0xbbc   :  { %3399 = vmatprep.subr.mxu0 %v14911_v31  ;;  %10494 = vmatprep.subr.mxu1 %v14784_v6  ;;  %v13037_v31 = vadd.f32 %v2899_v5, %v13031_v50  ;;  %14919 = vst [vmem:[#allocation39_spill] sm:$0xff] %v13041_v8  ;;  %v13044_v2 = vadd.f32 %v2905_v21, %v13031_v50  ;;  %v2996_v40 = vpop.f32.mrf.mxu1 }
 0xbbd   :  { %14918 = vst [vmem:[#allocation23_spill] sm:$0xff] %v13039_v52  ;;  %v13046_v14 = vadd.f32 %v2996_v40, %v2821_v34  ;;  %v2909_v58 = vpop.f32.mrf.mxu0 }
 0xbbe   :  { %14917 = vst [vmem:[#allocation40_spill] sm:$0xff] %v13037_v31  ;;  %14920 = vst [vmem:[#allocation35_spill] sm:$0xff] %v13044_v2  ;;  %v10417_v22 = vpop.f32.mrf.mxu1  ;;  %v13048_v36 = vadd.f32 %v2909_v58, %v2813_v44 }
 0xbbf   :  { %14921 = vst [vmem:[#allocation26_spill] sm:$0xff] %v13046_v14  ;;  %v2911_v5 = vpop.f32.mrf.mxu0  ;;  %v3058_v22 = vld [vmem:[%s14646_s13] sm:$0x7]  ;;  %v2894_v14 = vadd.f32 %v2893_v23, %v13031_v50 }
 0xbc0   :  { %14922 = vst [vmem:[#allocation34_spill] sm:$0xff] %v13048_v36  ;;  %v13051_v31 = vadd.f32 %v2911_v5, %v13031_v50  ;;  %v3001_v35 = vpop.f32.mrf.mxu1  ;;  %v13063_v58 = vrot.slane %v3058_v22, %v14912_v15 }
 0xbc1   :  { %v13053_v11 = vadd.f32 %v3001_v35, %v2821_v34  ;;  %v2915_v8 = vpop.f32.mrf.mxu0 }
 0xbc2   :  { %14923 = vst [vmem:[#allocation49_spill] sm:$0xff] %v13051_v31  ;;  %v10420_v9 = vpop.f32.mrf.mxu1  ;;  %v13055_v52 = vadd.f32 %v2915_v8, %v2813_v44  ;;  %14927 = vst [vmem:[#allocation53_spill] sm:$0xff] %v13063_v58  ;;  %v13069_v8 = vrot.slane %v3058_v22, %v14913_v1 }
 0xbc3   :  { %14924 = vst [vmem:[#allocation50_spill] sm:$0xff] %v13053_v11  ;;  %v13065_v5 = vpop.f32.mrf.mxu0  ;;  %v2892_v11 = vadd.f32 %v2891_v26, %v2813_v44 }
 0xbc4   :  { %14925 = vst [vmem:[#allocation51_spill] sm:$0xff] %v13055_v52  ;;  %v3006_v21 = vpop.f32.mrf.mxu1  ;;  %14928 = vst [vmem:[#allocation54_spill] sm:$0xff] %v13065_v5 }
 0xbc5   :  { %v13057_v2 = vadd.f32 %v3006_v21, %v2821_v34 }
 0xbc6   :  { %v10423_v40 = vpop.f32.mrf.mxu1 }
 0xbc7   :  { %14926 = vst [vmem:[#allocation52_spill] sm:$0xff] %v13057_v2 }
 0xc5b   :  { %v3141_v31 = vpop.f32.mrf.mxu0  ;;  %v3212_v35 = vpop.f32.mrf.mxu1 }
 0xc5c   :  { %v3142_v9 = vadd.f32 %v3141_v31, %v13063_v58  ;;  %v13074_v31 = vrot.slane %v3058_v22, %v14916_v3  ;;  %v14931_v3 = vld [vmem:[#allocation46_spill] sm:$0xff] }
 0xc5d   :  { %v3143_v21 = vpop.f32.mrf.mxu0  ;;  %v10458_v2 = vpop.f32.mrf.mxu1  ;;  %v14935_v22 = vld [vmem:[#allocation18_spill] sm:$0xff] }
 0xc5e   :  { %v3216_v40 = vadd.f32 %v3142_v9, %v2892_v11  ;;  %v3144_v36 = vadd.f32 %v3143_v21, %v13069_v8  ;;  %v3213_v2 = vadd.f32 %v3212_v35, %v13074_v31  ;;  %v2987_v11 = vadd.f32 %v2986_v13, %v2821_v34  ;;  %v14930_v34 = vld [vmem:[#allocation37_spill] sm:$0xff]  ;;  %v14933_v13 = vld [vmem:[#allocation19_spill] sm:$0xff] }
 0xc5f   :  { %v14937_v35 = vld [vmem:[#allocation45_spill] sm:$0xff] }
 0xc60   :  { %v9385_v52 = vmul.f32 -1.442695, %v3216_v40  ;;  %v3223_v15 = vadd.f32 %v3144_v36, %v2894_v14  ;;  %v14934_v14 = vld [vmem:[#allocation41_spill] sm:$0xff] }
 0xc61   :  { %v14938_v40 = vld [vmem:[#allocation33_spill] sm:$0xff] }
 0xc62   :  { %10983 = vpow2.f32 %v9385_v52  ;;  %v9386_v60 = vmul.f32 -1.442695, %v3223_v15 }
 0xc64   :  { %10985 = vpow2.f32 %v9386_v60 }
 0xc6f   :  { %v10984_v5 = vpop.eup %10983 }
 0xc70   :  { %v3220_v59 = vadd.f32 1.0, %v10984_v5  ;;  %v14936_v5 = vld [vmem:[#allocation20_spill] sm:$0xff] }
 0xc71   :  { %v10986_v26 = vpop.eup %10985 }
 0xc72   :  { %10987 = vrcp.f32 %v3220_v59  ;;  %v3227_v44 = vadd.f32 1.0, %v10986_v26  ;;  %v14939_v26 = vld [vmem:[#allocation43_spill] sm:$0xff] }
 0xc74   :  { %10989 = vrcp.f32 %v3227_v44  ;;  %v14940_v44 = vld [vmem:[#allocation36_spill] sm:$0xff] }
 0xc7f   :  { %v10988_v1 = vpop.eup %10987 }
 0xc80   :  { %v3230_v9 = vmul.f32 %v10988_v1, %v3213_v2 }
 0xc81   :  { %v10990_v52 = vpop.eup %10989 }
 0xc82   :  { %v3231_v21 = vadd.f32 %v3230_v9, %v2987_v11  ;;  %v3233_v36 = vsub.f32 1.0, %v10990_v52  ;;  %v3235_v15 = vmul.f32 %v10990_v52, %v12955_v19  ;;  %v14932_v19 = vld [vmem:[#allocation30_spill] sm:$0xff]  ;;  %v14941_v52 = vld [vmem:[#allocation32_spill] sm:$0xff] }
 0xc84   :  { %10991 = vtanh.f32 %v3231_v21 }
 0xc91   :  { %v10992_v23 = vpop.eup %10991 }
 0xc92   :  { %v3234_v60 = vmul.f32 %v10992_v23, %v3233_v36 }
 0xc94   :  { %v13078_v59 = vadd.f32 %v3235_v15, %v3234_v60  ;;  %v14942_v15 = vld [vmem:[#allocation40_spill] sm:$0xff] }
 0xc96   :  { %14929 = vst [vmem:[#allocation55_spill] sm:$0xff] %v13078_v59  ;;  %3302 = vmatmul.mubr.f32.vlgmr.msra.gmra.mxu0 %v13078_v59  ;;  %10492 = vmatmul.mubr.f32.vlgmr.msra.gmra.mxu1 %v13078_v59 }
 0xc97   :  { %3400 = vmatpush1.msra.mxu0 %v12759_v17  ;;  %10495 = vmatpush3.msra.mxu1 %v12761_v62 }
 0xc98   :  { %3401 = vmatprep.subr.mxu0 %v12764_v51  ;;  %10496 = vmatprep.subr.mxu1 %v14784_v6 }
 0xc99   :  { %3402 = vmatpush1.msra.mxu0 %v12768_v25  ;;  %10497 = vmatpush3.msra.mxu1 %v12770_v47 }
 0xc9a   :  { %3403 = vmatprep.subr.mxu0 %v12774_v16  ;;  %10498 = vmatprep.subr.mxu1 %v14784_v6 }
 0xc9b   :  { %3404 = vmatpush1.msra.mxu0 %v12778_v57  ;;  %10499 = vmatpush3.msra.mxu1 %v12780_v37 }
 0xc9c   :  { %3405 = vmatprep.subr.mxu0 %v12784_v28  ;;  %10500 = vmatprep.subr.mxu1 %v14784_v6 }
 0xc9d   :  { %3406 = vmatpush1.msra.mxu0 %v12788_v49  ;;  %10501 = vmatpush3.msra.mxu1 %v12790_v7 }
 0xc9e   :  { %3407 = vmatprep.subr.mxu0 %v12794_v43  ;;  %10502 = vmatprep.subr.mxu1 %v14784_v6 }
 0xc9f   :  { %3408 = vmatpush1.msra.mxu0 %v12798_v18  ;;  %10503 = vmatpush3.msra.mxu1 %v12800_v0 }
 0xca0   :  { %3409 = vmatprep.subr.mxu0 %v12804_v20  ;;  %10504 = vmatprep.subr.mxu1 %v14784_v6 }
 0xca1   :  { %3410 = vmatpush1.msra.mxu0 %v12808_v38  ;;  %10505 = vmatpush3.msra.mxu1 %v12810_v39 }
 0xca2   :  { %3411 = vmatprep.subr.mxu0 %v12814_v10  ;;  %10506 = vmatprep.subr.mxu1 %v14784_v6 }
 0xca3   :  { %3412 = vmatpush1.msra.mxu0 %v12818_v12  ;;  %10507 = vmatpush3.msra.mxu1 %v12820_v63 }
 0xca4   :  { %3413 = vmatprep.subr.mxu0 %v12827_v42  ;;  %10508 = vmatprep.subr.mxu1 %v14784_v6 }
 0xca5   :  { %3414 = vmatpush1.msra.mxu0 %v12831_v61  ;;  %10509 = vmatpush3.msra.mxu1 %v12833_v4 }
 0xca6   :  { %3415 = vmatprep.subr.mxu0 %v12836_v55  ;;  %10510 = vmatprep.subr.mxu1 %v14784_v6 }
 0xca7   :  { %3416 = vmatpush1.msra.mxu0 %v12843_v41  ;;  %10511 = vmatpush3.msra.mxu1 %v12845_v24 }
 0xca8   :  { %3417 = vmatprep.subr.mxu0 %v12851_v27  ;;  %10512 = vmatprep.subr.mxu1 %v14784_v6 }
 0xca9   :  { %3418 = vmatpush1.msra.mxu0 %v12857_v45  ;;  %10513 = vmatpush3.msra.mxu1 %v12859_v46 }
 0xcaa   :  { %3419 = vmatprep.subr.mxu0 %v12862_v29  ;;  %10514 = vmatprep.subr.mxu1 %v14784_v6 }
 0xcab   :  { %3420 = vmatpush1.msra.mxu0 %v12869_v48  ;;  %10515 = vmatpush3.msra.mxu1 %v12871_v30 }
 0xcac   :  { %3421 = vmatprep.subr.mxu0 %v12877_v53  ;;  %10516 = vmatprep.subr.mxu1 %v14784_v6 }
 0xcad   :  { %3422 = vmatpush1.msra.mxu0 %v12883_v32  ;;  %10517 = vmatpush3.msra.mxu1 %v12885_v54 }
 0xcae   :  { %3423 = vmatprep.subr.mxu0 %v12888_v33  ;;  %10518 = vmatprep.subr.mxu1 %v14784_v6 }
 0xcaf   :  { %3424 = vmatpush1.msra.mxu0 %v12895_v56  ;;  %10519 = vmatpush3.msra.mxu1 %v14930_v34 }
 0xcb0   :  { %3425 = vmatprep.subr.mxu0 %v14931_v3  ;;  %10520 = vmatprep.subr.mxu1 %v14784_v6 }
 0xcb1   :  { %3426 = vmatpush1.msra.mxu0 %v14932_v19  ;;  %10521 = vmatpush3.msra.mxu1 %v14933_v13 }
 0xcb2   :  { %3427 = vmatprep.subr.mxu0 %v14934_v14  ;;  %10522 = vmatprep.subr.mxu1 %v14784_v6 }
 0xcb3   :  { %3428 = vmatpush1.msra.mxu0 %v14935_v22  ;;  %10523 = vmatpush3.msra.mxu1 %v14936_v5 }
 0xcb4   :  { %3429 = vmatprep.subr.mxu0 %v14937_v35  ;;  %10524 = vmatprep.subr.mxu1 %v14784_v6 }
 0xcb5   :  { %3430 = vmatpush1.msra.mxu0 %v14938_v40  ;;  %3463 = vmatprep.mubr.f32.mxu0 %v14784_v6 }
 0xcb6   :  { %10525 = vmatpush3.msra.mxu1 %v14939_v26  ;;  %10526 = vmatprep.mubr.msk.f32.mxu1 %vm11369_vm0, %v14784_v6 }
 0xcb7   :  { %3561 = vmatprep.subr.mxu0 %v14940_v44  ;;  %10529 = vmatprep.subr.mxu1 %v14784_v6 }
 0xd56   :  { %v3303_v2 = vpop.f32.mrf.mxu0  ;;  %v3374_v1 = vpop.f32.mrf.mxu1 }
 0xd57   :  { %v3304_v11 = vadd.f32 %v3303_v2, %v13063_v58  ;;  %v3375_v22 = vadd.f32 %v3374_v1, %v13074_v31 }
 0xd58   :  { %v3305_v9 = vpop.f32.mrf.mxu0  ;;  %v10493_v21 = vpop.f32.mrf.mxu1 }
 0xd59   :  { %v3378_v36 = vadd.f32 %v3304_v11, %v14941_v52  ;;  %v3306_v60 = vadd.f32 %v3305_v9, %v13069_v8  ;;  %v14943_v21 = vld [vmem:[#allocation23_spill] sm:$0xff] }
 0xd5b   :  { %v9387_v23 = vmul.f32 -1.442695, %v3378_v36  ;;  %v3385_v50 = vadd.f32 %v3306_v60, %v14942_v15  ;;  %v14950_v15 = vld [vmem:[#allocation53_spill] sm:$0xff] }
 0xd5d   :  { %10993 = vpow2.f32 %v9387_v23  ;;  %v9388_v26 = vmul.f32 -1.442695, %v3385_v50 }
 0xd5f   :  { %10995 = vpow2.f32 %v9388_v26 }
 0xd6a   :  { %v10994_v40 = vpop.eup %10993 }
 0xd6b   :  { %v3382_v44 = vadd.f32 1.0, %v10994_v40  ;;  %v14948_v40 = vld [vmem:[#allocation43_spill] sm:$0xff] }
 0xd6c   :  { %v10996_v35 = vpop.eup %10995 }
 0xd6d   :  { %10997 = vrcp.f32 %v3382_v44  ;;  %v3389_v5 = vadd.f32 1.0, %v10996_v35  ;;  %v14947_v35 = vld [vmem:[#allocation33_spill] sm:$0xff]  ;;  %v14949_v44 = vld [vmem:[#allocation36_spill] sm:$0xff] }
 0xd6f   :  { %10999 = vrcp.f32 %v3389_v5  ;;  %v14946_v5 = vld [vmem:[#allocation45_spill] sm:$0xff] }
 0xd7a   :  { %v10998_v2 = vpop.eup %10997 }
 0xd7b   :  { %v3392_v58 = vmul.f32 %v10998_v2, %v3375_v22  ;;  %v14945_v22 = vld [vmem:[#allocation20_spill] sm:$0xff] }
 0xd7c   :  { %v11000_v52 = vpop.eup %10999 }
 0xd7d   :  { %v3393_v11 = vadd.f32 %v3392_v58, %v14943_v21  ;;  %v3395_v9 = vsub.f32 1.0, %v11000_v52  ;;  %v3397_v50 = vmul.f32 %v11000_v52, %v13078_v59  ;;  %v14944_v58 = vld [vmem:[#allocation18_spill] sm:$0xff]  ;;  %v14951_v52 = vld [vmem:[#allocation39_spill] sm:$0xff] }
 0xd7f   :  { %11001 = vtanh.f32 %v3393_v11 }
 0xd8c   :  { %v11002_v36 = vpop.eup %11001 }
 0xd8d   :  { %v3396_v23 = vmul.f32 %v11002_v36, %v3395_v9 }
 0xd8f   :  { %v13156_v26 = vadd.f32 %v3397_v50, %v3396_v23  ;;  %v14952_v50 = vld [vmem:[#allocation35_spill] sm:$0xff] }
 0xd91   :  { %3464 = vmatmul.mubr.f32.vlgmr.msra.gmra.mxu0 %v13156_v26  ;;  %10527 = vmatmul.mubr.f32.vlgmr.msra.gmra.mxu1 %v13156_v26 }
 0xd92   :  { %3562 = vmatpush1.msra.mxu0 %v12759_v17  ;;  %10530 = vmatpush3.msra.mxu1 %v12761_v62 }
 0xd93   :  { %3563 = vmatprep.subr.mxu0 %v12764_v51  ;;  %10531 = vmatprep.subr.mxu1 %v14784_v6 }
 0xd94   :  { %3564 = vmatpush1.msra.mxu0 %v12768_v25  ;;  %10532 = vmatpush3.msra.mxu1 %v12770_v47 }
 0xd95   :  { %3565 = vmatprep.subr.mxu0 %v12774_v16  ;;  %10533 = vmatprep.subr.mxu1 %v14784_v6 }
 0xd96   :  { %3566 = vmatpush1.msra.mxu0 %v12778_v57  ;;  %10534 = vmatpush3.msra.mxu1 %v12780_v37 }
 0xd97   :  { %3567 = vmatprep.subr.mxu0 %v12784_v28  ;;  %10535 = vmatprep.subr.mxu1 %v14784_v6 }
 0xd98   :  { %3568 = vmatpush1.msra.mxu0 %v12788_v49  ;;  %10536 = vmatpush3.msra.mxu1 %v12790_v7 }
 0xd99   :  { %3569 = vmatprep.subr.mxu0 %v12794_v43  ;;  %10537 = vmatprep.subr.mxu1 %v14784_v6 }
 0xd9a   :  { %3570 = vmatpush1.msra.mxu0 %v12798_v18  ;;  %10538 = vmatpush3.msra.mxu1 %v12800_v0 }
 0xd9b   :  { %3571 = vmatprep.subr.mxu0 %v12804_v20  ;;  %10539 = vmatprep.subr.mxu1 %v14784_v6 }
 0xd9c   :  { %3572 = vmatpush1.msra.mxu0 %v12808_v38  ;;  %10540 = vmatpush3.msra.mxu1 %v12810_v39 }
 0xd9d   :  { %3573 = vmatprep.subr.mxu0 %v12814_v10  ;;  %10541 = vmatprep.subr.mxu1 %v14784_v6 }
 0xd9e   :  { %3574 = vmatpush1.msra.mxu0 %v12818_v12  ;;  %10542 = vmatpush3.msra.mxu1 %v12820_v63 }
 0xd9f   :  { %3575 = vmatprep.subr.mxu0 %v12827_v42  ;;  %10543 = vmatprep.subr.mxu1 %v14784_v6 }
 0xda0   :  { %3576 = vmatpush1.msra.mxu0 %v12831_v61  ;;  %10544 = vmatpush3.msra.mxu1 %v12833_v4 }
 0xda1   :  { %3577 = vmatprep.subr.mxu0 %v12836_v55  ;;  %10545 = vmatprep.subr.mxu1 %v14784_v6 }
 0xda2   :  { %3578 = vmatpush1.msra.mxu0 %v12843_v41  ;;  %10546 = vmatpush3.msra.mxu1 %v12845_v24 }
 0xda3   :  { %3579 = vmatprep.subr.mxu0 %v12851_v27  ;;  %10547 = vmatprep.subr.mxu1 %v14784_v6 }
 0xda4   :  { %3580 = vmatpush1.msra.mxu0 %v12857_v45  ;;  %10548 = vmatpush3.msra.mxu1 %v12859_v46 }
 0xda5   :  { %3581 = vmatprep.subr.mxu0 %v12862_v29  ;;  %10549 = vmatprep.subr.mxu1 %v14784_v6 }
 0xda6   :  { %3582 = vmatpush1.msra.mxu0 %v12869_v48  ;;  %10550 = vmatpush3.msra.mxu1 %v12871_v30 }
 0xda7   :  { %3583 = vmatprep.subr.mxu0 %v12877_v53  ;;  %10551 = vmatprep.subr.mxu1 %v14784_v6 }
 0xda8   :  { %3584 = vmatpush1.msra.mxu0 %v12883_v32  ;;  %10552 = vmatpush3.msra.mxu1 %v12885_v54 }
 0xda9   :  { %3585 = vmatprep.subr.mxu0 %v12888_v33  ;;  %10553 = vmatprep.subr.mxu1 %v14784_v6 }
 0xdaa   :  { %3586 = vmatpush1.msra.mxu0 %v12895_v56  ;;  %10554 = vmatpush3.msra.mxu1 %v14930_v34 }
 0xdab   :  { %3587 = vmatprep.subr.mxu0 %v14931_v3  ;;  %10555 = vmatprep.subr.mxu1 %v14784_v6 }
 0xdac   :  { %3588 = vmatpush1.msra.mxu0 %v14932_v19  ;;  %10556 = vmatpush3.msra.mxu1 %v14933_v13 }
 0xdad   :  { %3589 = vmatprep.subr.mxu0 %v14934_v14  ;;  %10557 = vmatprep.subr.mxu1 %v14784_v6 }
 0xdae   :  { %3590 = vmatpush1.msra.mxu0 %v14944_v58  ;;  %10558 = vmatpush3.msra.mxu1 %v14945_v22 }
 0xdaf   :  { %3591 = vmatprep.subr.mxu0 %v14946_v5  ;;  %10559 = vmatprep.subr.mxu1 %v14784_v6 }
 0xdb0   :  { %3592 = vmatpush1.msra.mxu0 %v14947_v35  ;;  %3625 = vmatprep.mubr.f32.mxu0 %v14784_v6 }
 0xdb1   :  { %10560 = vmatpush3.msra.mxu1 %v14948_v40  ;;  %10561 = vmatprep.mubr.msk.f32.mxu1 %vm11369_vm0, %v14784_v6 }
 0xdb2   :  { %3723 = vmatprep.subr.mxu0 %v14949_v44  ;;  %10564 = vmatprep.subr.mxu1 %v14784_v6 }
 0xe51   :  { %v3465_v1 = vpop.f32.mrf.mxu0  ;;  %v3536_v60 = vpop.f32.mrf.mxu1 }
 0xe52   :  { %v3466_v2 = vadd.f32 %v3465_v1, %v14950_v15  ;;  %v3537_v58 = vadd.f32 %v3536_v60, %v13074_v31 }
 0xe53   :  { %v3467_v21 = vpop.f32.mrf.mxu0  ;;  %v10528_v11 = vpop.f32.mrf.mxu1 }
 0xe54   :  { %v3540_v9 = vadd.f32 %v3466_v2, %v14951_v52  ;;  %v3468_v23 = vadd.f32 %v3467_v21, %v13069_v8  ;;  %v14953_v11 = vld [vmem:[#allocation26_spill] sm:$0xff] }
 0xe56   :  { %v9389_v36 = vmul.f32 -1.442695, %v3540_v9  ;;  %v3547_v59 = vadd.f32 %v3468_v23, %v14952_v50 }
 0xe58   :  { %11003 = vpow2.f32 %v9389_v36  ;;  %v9390_v40 = vmul.f32 -1.442695, %v3547_v59 }
 0xe5a   :  { %11005 = vpow2.f32 %v9390_v40 }
 0xe65   :  { %v11004_v35 = vpop.eup %11003 }
 0xe66   :  { %v3544_v44 = vadd.f32 1.0, %v11004_v35 }
 0xe67   :  { %v11006_v5 = vpop.eup %11005 }
 0xe68   :  { %11007 = vrcp.f32 %v3544_v44  ;;  %v3551_v22 = vadd.f32 1.0, %v11006_v5 }
 0xe6a   :  { %11009 = vrcp.f32 %v3551_v22  ;;  %v14967_v22 = vld [vmem:[#allocation16_spill] sm:$0xff] }
 0xe75   :  { %v11008_v1 = vpop.eup %11007 }
 0xe76   :  { %v3554_v15 = vmul.f32 %v11008_v1, %v3537_v58  ;;  %v14966_v58 = vld [vmem:[#allocation28_spill] sm:$0xff]  ;;  %v14968_v1 = vld [vmem:[#allocation27_spill] sm:$0xff] }
 0xe77   :  { %v11010_v52 = vpop.eup %11009  ;;  %v2752_v5 = vadd.f32 %v14967_v22, %v14966_v58 }
 0xe78   :  { %v3555_v2 = vadd.f32 %v3554_v15, %v14953_v11  ;;  %v3557_v21 = vsub.f32 1.0, %v11010_v52  ;;  %v3559_v59 = vmul.f32 %v11010_v52, %v13156_v26  ;;  %v14969_v11 = vld [vmem:[#allocation22_spill] sm:$0xff] }
 0xe79   :  { %v4095_v50 = vcombine.high %v2752_v5, %v2752_v5 }
 0xe7a   :  { %11011 = vtanh.f32 %v3555_v2  ;;  %v2751_v2 = vadd.f32 %v14969_v11, %v14968_v1  ;;  %v14977_v11 = vld [vmem:[#allocation51_spill] sm:$0xff] }
 0xe87   :  { %v11012_v9 = vpop.eup %11011 }
 0xe88   :  { %v3558_v36 = vmul.f32 %v11012_v9, %v3557_v21 }
 0xe8a   :  { %v13234_v40 = vadd.f32 %v3559_v59, %v3558_v36 }
 0xe8c   :  { %3626 = vmatmul.mubr.f32.vlgmr.msra.gmra.mxu0 %v13234_v40  ;;  %10562 = vmatmul.mubr.f32.vlgmr.msra.gmra.mxu1 %v13234_v40 }
 0xe8d   :  { %3724 = vmatpush1.msra.mxu0 %v12759_v17  ;;  %10565 = vmatpush3.msra.mxu1 %v12761_v62  ;;  %v14954_v17 = vld [vmem:[#allocation18_spill] sm:$0xff]  ;;  %v14955_v62 = vld [vmem:[#allocation20_spill] sm:$0xff] }
 0xe8e   :  { %3725 = vmatprep.subr.mxu0 %v12764_v51  ;;  %10566 = vmatprep.subr.mxu1 %v14784_v6  ;;  %v14956_v51 = vld [vmem:[#allocation45_spill] sm:$0xff] }
 0xe8f   :  { %3726 = vmatpush1.msra.mxu0 %v12768_v25  ;;  %10567 = vmatpush3.msra.mxu1 %v12770_v47  ;;  %v14957_v25 = vld [vmem:[#allocation33_spill] sm:$0xff]  ;;  %v14958_v47 = vld [vmem:[#allocation43_spill] sm:$0xff] }
 0xe90   :  { %3727 = vmatprep.subr.mxu0 %v12774_v16  ;;  %10568 = vmatprep.subr.mxu1 %v14784_v6 }
 0xe91   :  { %3728 = vmatpush1.msra.mxu0 %v12778_v57  ;;  %10569 = vmatpush3.msra.mxu1 %v12780_v37  ;;  %v14959_v37 = vld [vmem:[#allocation53_spill] sm:$0xff] }
 0xe92   :  { %3729 = vmatprep.subr.mxu0 %v12784_v28  ;;  %10570 = vmatprep.subr.mxu1 %v14784_v6 }
 0xe93   :  { %3730 = vmatpush1.msra.mxu0 %v12788_v49  ;;  %10571 = vmatpush3.msra.mxu1 %v12790_v7 }
 0xe94   :  { %3731 = vmatprep.subr.mxu0 %v12794_v43  ;;  %10572 = vmatprep.subr.mxu1 %v14784_v6  ;;  %v14960_v43 = vld [vmem:[#allocation34_spill] sm:$0xff] }
 0xe95   :  { %3732 = vmatpush1.msra.mxu0 %v12798_v18  ;;  %10573 = vmatpush3.msra.mxu1 %v12800_v0 }
 0xe96   :  { %3733 = vmatprep.subr.mxu0 %v12804_v20  ;;  %10574 = vmatprep.subr.mxu1 %v14784_v6 }
 0xe97   :  { %3734 = vmatpush1.msra.mxu0 %v12808_v38  ;;  %10575 = vmatpush3.msra.mxu1 %v12810_v39  ;;  %v14961_v38 = vld [vmem:[#allocation49_spill] sm:$0xff] }
 0xe98   :  { %3735 = vmatprep.subr.mxu0 %v12814_v10  ;;  %10576 = vmatprep.subr.mxu1 %v14784_v6 }
 0xe99   :  { %3736 = vmatpush1.msra.mxu0 %v12818_v12  ;;  %10577 = vmatpush3.msra.mxu1 %v12820_v63 }
 0xe9a   :  { %3737 = vmatprep.subr.mxu0 %v12827_v42  ;;  %10578 = vmatprep.subr.mxu1 %v14784_v6 }
 0xe9b   :  { %3738 = vmatpush1.msra.mxu0 %v12831_v61  ;;  %10579 = vmatpush3.msra.mxu1 %v12833_v4 }
 0xe9c   :  { %3739 = vmatprep.subr.mxu0 %v12836_v55  ;;  %10580 = vmatprep.subr.mxu1 %v14784_v6 }
 0xe9d   :  { %3740 = vmatpush1.msra.mxu0 %v12843_v41  ;;  %10581 = vmatpush3.msra.mxu1 %v12845_v24  ;;  %v14962_v24 = vld [vmem:[#allocation50_spill] sm:$0xff] }
 0xe9e   :  { %3741 = vmatprep.subr.mxu0 %v12851_v27  ;;  %10582 = vmatprep.subr.mxu1 %v14784_v6 }
 0xe9f   :  { %3742 = vmatpush1.msra.mxu0 %v12857_v45  ;;  %10583 = vmatpush3.msra.mxu1 %v12859_v46 }
 0xea0   :  { %3743 = vmatprep.subr.mxu0 %v12862_v29  ;;  %10584 = vmatprep.subr.mxu1 %v14784_v6 }
 0xea1   :  { %3744 = vmatpush1.msra.mxu0 %v12869_v48  ;;  %10585 = vmatpush3.msra.mxu1 %v12871_v30 }
 0xea2   :  { %3745 = vmatprep.subr.mxu0 %v12877_v53  ;;  %10586 = vmatprep.subr.mxu1 %v14784_v6 }
 0xea3   :  { %3746 = vmatpush1.msra.mxu0 %v12883_v32  ;;  %10587 = vmatpush3.msra.mxu1 %v12885_v54  ;;  %v11370_v32 = vmov 1966171168  }
 0xea4   :  { %3747 = vmatprep.subr.mxu0 %v12888_v33  ;;  %10588 = vmatprep.subr.mxu1 %v14784_v6  ;;  %v3889_v54 = vunpack.c.l.s4 %v11370_v32 }
 0xea5   :  { %3748 = vmatpush1.msra.mxu0 %v12895_v56  ;;  %10589 = vmatpush3.msra.mxu1 %v14930_v34  ;;  %v14963_v56 = vld [vmem:[#allocation42_spill] sm:$0xff]  ;;  %v14964_v34 = vld [vmem:[#allocation48_spill] sm:$0xff] }
 0xea6   :  { %3749 = vmatprep.subr.mxu0 %v14931_v3  ;;  %10590 = vmatprep.subr.mxu1 %v14784_v6  ;;  %v3890_v33 = vunpack.c.0.s8 %v3889_v54  ;;  %v2753_v3 = vadd.f32 %v14964_v34, %v14963_v56  ;;  %v14973_v56 = vld [vmem:[#allocation21_spill] sm:$0xff]  ;;  %v14974_v34 = vld [vmem:[#allocation38_spill] sm:$0xff] }
 0xea7   :  { %3750 = vmatpush1.msra.mxu0 %v14932_v19  ;;  %10591 = vmatpush3.msra.mxu1 %v14933_v13  ;;  %v14965_v19 = vld [vmem:[#allocation24_spill] sm:$0xff] }
 0xea8   :  { %3751 = vmatprep.subr.mxu0 %v14934_v14  ;;  %10592 = vmatprep.subr.mxu1 %v14784_v6  ;;  %v13323_v13 = vsub.s32 %v3890_v33, %v14965_v19  ;;  %v4145_v14 = vcombine.high %v2753_v3, %v2753_v3 }
 0xea9   :  { %3752 = vmatpush1.msra.mxu0 %v14954_v17  ;;  %10593 = vmatpush3.msra.mxu1 %v14955_v62  ;;  %v4045_v62 = vcombine.high %v2751_v2, %v2751_v2 }
 0xeaa   :  { %3753 = vmatprep.subr.mxu0 %v14956_v51  ;;  %10594 = vmatprep.subr.mxu1 %v14784_v6  ;;  %v4152_v35 = vrot.slane %v2753_v3, %v13323_v13  ;;  %v4159_v60 = vrot.slane %v4145_v14, %v13323_v13  ;;  %v4102_v15 = vrot.slane %v2752_v5, %v13323_v13 }
 0xeab   :  { %3754 = vmatpush1.msra.mxu0 %v14957_v25  ;;  %3787 = vmatprep.mubr.f32.mxu0 %v14784_v6  ;;  %v4109_v36 = vrot.slane %v4095_v50, %v13323_v13  ;;  %v2749_v3 = vadd.f32 %v14974_v34, %v14973_v56 }
 0xeac   :  { %10595 = vmatpush3.msra.mxu1 %v14958_v47  ;;  %10596 = vmatprep.mubr.msk.f32.mxu1 %vm11369_vm0, %v14784_v6  ;;  %v4160_v23 = vcombine.high %v4152_v35, %v4152_v35  ;;  %v4161_v44 = vcombine.high %v4159_v60, %v4159_v60  ;;  %v13333_v52 = vrot.slane %v4152_v35, %v13323_v13 }
 0xead   :  { %10599 = vmatprep.subr.mxu0 %v14784_v6  ;;  %10604 = vmatprep.subr.mxu1 %v14784_v6  ;;  %v4110_v21 = vcombine.high %v4102_v15, %v4102_v15  ;;  %v13340_v59 = vrot.slane %v4159_v60, %v13323_v13  ;;  %v13346_v51 = vrot.slane %v4102_v15, %v13323_v13 }
 0xeae   :  { %v13336_v9 = vrot.slane %v4160_v23, %v13323_v13  ;;  %v13343_v17 = vrot.slane %v4161_v44, %v13323_v13  ;;  %v4190_v25 = vcombine.high %v13333_v52, %v13333_v52  ;;  %v4052_v47 = vrot.slane %v2751_v2, %v13323_v13  ;;  %v14975_v44 = vld [vmem:[#allocation44_spill] sm:$0xff] }
 0xf4c   :  { %v3627_v16 = vpop.f32.mrf.mxu0  ;;  %v3698_v57 = vpop.f32.mrf.mxu1 }
 0xf4d   :  { %v3628_v28 = vadd.f32 %v3627_v16, %v14959_v37  ;;  %v3699_v4 = vadd.f32 %v3698_v57, %v13074_v31  ;;  %v13352_v16 = vrot.slane %v4110_v21, %v13323_v13  ;;  %v4192_v57 = vcombine.high %v13336_v9, %v13336_v9 }
 0xf4e   :  { %v3629_v49 = vpop.f32.mrf.mxu0  ;;  %v10563_v7 = vpop.f32.mrf.mxu1 }
 0xf4f   :  { %v3702_v18 = vadd.f32 %v3628_v28, %v14960_v43  ;;  %v3630_v20 = vadd.f32 %v3629_v49, %v13069_v8  ;;  %v4111_v28 = vcombine.high %v4109_v36, %v4109_v36  ;;  %v4191_v49 = vcombine.high %v13340_v59, %v13340_v59  ;;  %v14970_v43 = vld [vmem:[#allocation25_spill] sm:$0xff] }
 0xf50   :  { %v4193_v7 = vcombine.high %v13343_v17, %v13343_v17 }
 0xf51   :  { %v9391_v0 = vmul.f32 -1.442695, %v3702_v18  ;;  %v3709_v39 = vadd.f32 %v3630_v20, %v14961_v38  ;;  %v13365_v20 = vrot.slane %v4109_v36, %v13323_v13  ;;  %v4140_v38 = vcombine.high %v13346_v51, %v13346_v51 }
 0xf53   :  { %11013 = vpow2.f32 %v9391_v0  ;;  %v9392_v10 = vmul.f32 -1.442695, %v3709_v39  ;;  %v13370_v39 = vrot.slane %v4190_v25, %v14970_v43  ;;  %v4141_v33 = vcombine.high %v13365_v20, %v13365_v20 }
 0xf54   :  { %v13408_v14 = vrot.slane %v4140_v38, %v14970_v43  ;;  %v3952_v38 = vrot.slane %v2749_v3, %v13323_v13 }
 0xf55   :  { %11015 = vpow2.f32 %v9392_v10  ;;  %v4059_v10 = vrot.slane %v4045_v62, %v13323_v13  ;;  %v13430_v25 = vrot.slane %v4141_v33, %v14970_v43 }
 0xf57   :  { %v4061_v58 = vcombine.high %v4059_v10, %v4059_v10  ;;  %v13427_v62 = vrot.slane %v4059_v10, %v13323_v13 }
 0xf60   :  { %v11014_v12 = vpop.eup %11013 }
 0xf61   :  { %v3706_v63 = vadd.f32 1.0, %v11014_v12 }
 0xf62   :  { %v11016_v42 = vpop.eup %11015 }
 0xf63   :  { %11017 = vrcp.f32 %v3706_v63  ;;  %v3713_v61 = vadd.f32 1.0, %v11016_v42  ;;  %v14971_v63 = vld [vmem:[#allocation17_spill] sm:$0xff] }
 0xf64   :  { %v14972_v42 = vld [vmem:[#allocation29_spill] sm:$0xff] }
 0xf65   :  { %11019 = vrcp.f32 %v3713_v61  ;;  %v2750_v61 = vadd.f32 %v14972_v42, %v14971_v63 }
 0xf67   :  { %v4002_v22 = vrot.slane %v2750_v61, %v13323_v13  ;;  %v3995_v50 = vcombine.high %v2750_v61, %v2750_v61 }
 0xf69   :  { %v13440_v63 = vrot.slane %v4002_v22, %v13323_v13  ;;  %v4010_v10 = vcombine.high %v4002_v22, %v4002_v22  ;;  %v4009_v33 = vrot.slane %v3995_v50, %v13323_v13 }
 0xf6b   :  { %v4032_v50 = vrot.slane %v4010_v10, %v13323_v13 }
 0xf6d   :  { %v4042_v12 = vcombine.high %v4032_v50, %v4032_v50 }
 0xf70   :  { %v11018_v55 = vpop.eup %11017 }
 0xf71   :  { %v3716_v41 = vmul.f32 %v11018_v55, %v3699_v4  ;;  %v4060_v4 = vcombine.high %v4052_v47, %v4052_v47  ;;  %v4142_v55 = vcombine.high %v13352_v16, %v13352_v16 }
 0xf72   :  { %v11020_v45 = vpop.eup %11019 }
 0xf73   :  { %v3717_v27 = vadd.f32 %v3716_v41, %v14962_v24  ;;  %v3719_v46 = vsub.f32 1.0, %v11020_v45  ;;  %v3721_v30 = vmul.f32 %v11020_v45, %v13234_v40  ;;  %v13380_v41 = vrot.slane %v4192_v57, %v14970_v43 }
 0xf74   :  { %v13383_v24 = vrot.slane %v4111_v28, %v13323_v13  ;;  %v13388_v45 = vrot.slane %v4191_v49, %v14970_v43  ;;  %v13412_v60 = vrot.slane %v4060_v4, %v13323_v13  ;;  %v13415_v15 = vrot.slane %v4142_v55, %v14970_v43  ;;  %v14978_v4 = vld [vmem:[#allocation31_spill] sm:$0xff]  ;;  %v14979_v55 = vld [vmem:[#allocation54_spill] sm:$0xff] }
 0xf75   :  { %11021 = vtanh.f32 %v3717_v27  ;;  %v3945_v57 = vcombine.high %v2749_v3, %v2749_v3  ;;  %v4091_v3 = vcombine.high %v13427_v62, %v13427_v62 }
 0xf76   :  { %v4092_v42 = vcombine.high %v13412_v60, %v13412_v60  ;;  %v4281_v34 = vrot.slane %v13412_v60, %v14970_v43 }
 0xf77   :  { %v13476_v10 = vrot.slane %v4091_v3, %v14970_v43 }
 0xf82   :  { %v11022_v29 = vpop.eup %11021 }
 0xf83   :  { %v3720_v48 = vmul.f32 %v11022_v29, %v3719_v46  ;;  %v13391_v46 = vrot.slane %v4193_v7, %v14970_v43  ;;  %v13436_v7 = vrot.slane %v4061_v58, %v13323_v13 }
 0xf85   :  { %v13312_v53 = vadd.f32 %v3721_v30, %v3720_v48  ;;  %v13396_v30 = vrot.slane %v4052_v47, %v13323_v13 }
 0xf87   :  { %3788 = vmatmul.mubr.f32.vlgmr.msra.gmra.mxu0 %v13312_v53  ;;  %10597 = vmatmul.mubr.f32.vlgmr.msra.gmra.mxu1 %v13312_v53  ;;  %v4090_v36 = vcombine.high %v13396_v30, %v13396_v30  ;;  %v4277_v56 = vrot.slane %v13396_v30, %v14970_v43 }
 0xf88   :  { %10601 = vmatprep.mubr.msk.f32.mxu0 %vm11369_vm0, %v14784_v6  ;;  %10606 = vmatprep.mubr.msk.f32.mxu1 %vm11369_vm0, %v14784_v6 }
 0xf89   :  { %v13456_v22 = vrot.slane %v4090_v36, %v14970_v43  ;;  %v13471_v36 = vrot.slane %v4009_v33, %v13323_v13 }
 0xf8b   :  { %v4253_v3 = vrot.slane %v13471_v36, %v14970_v43  ;;  %v4041_v18 = vcombine.high %v13471_v36, %v13471_v36 }
0x1047   :  { %v3789_v29 = vpop.f32.mrf.mxu0  ;;  %v13393_v48 = vpop.f32.mrf.mxu1 }
0x1048   :  { %v3790_v19 = vadd.f32 %v3789_v29, %v14959_v37  ;;  %v14976_v37 = vld [vmem:[#allocation47_spill] sm:$0xff]  ;;  %v2918_v29 = vadd.f32 %v14979_v55, %v14978_v4 }
0x1049   :  { %v3791_v5 = vpop.f32.mrf.mxu0  ;;  %v10598_v35 = vpop.f32.mrf.mxu1  ;;  %v2748_v1 = vadd.f32 %v14976_v37, %v14975_v44  ;;  %v4040_v44 = vcombine.high %v13440_v63, %v13440_v63 }
0x104a   :  { %v3864_v2 = vadd.f32 %v3790_v19, %v14977_v11  ;;  %v3792_v49 = vadd.f32 %v3791_v5, %v13069_v8  ;;  %v3959_v19 = vrot.slane %v3945_v57, %v13323_v13  ;;  %v4093_v5 = vcombine.high %v13436_v7, %v13436_v7 }
0x104b   :  { %v3887_v61 = vcombine.high %v2748_v1, %v2748_v1  ;;  %v3894_v8 = vrot.slane %v2748_v1, %v13323_v13  ;;  %v3960_v35 = vcombine.high %v3952_v38, %v3952_v38  ;;  %v3968_v1 = vrot.slane %v3952_v38, %v13323_v13 }
0x104c   :  { %v9393_v28 = vmul.f32 -1.442695, %v3864_v2  ;;  %v3871_v58 = vadd.f32 %v3792_v49, %v2918_v29  ;;  %v13467_v11 = vrot.slane %v4092_v42, %v14970_v43  ;;  %v3961_v38 = vcombine.high %v3959_v19, %v3959_v19 }
0x104d   :  { %v3901_v2 = vrot.slane %v3887_v61, %v13323_v13  ;;  %v3902_v57 = vcombine.high %v3894_v8, %v3894_v8  ;;  %v3910_v55 = vrot.slane %v3894_v8, %v13323_v13  ;;  %v13480_v42 = vrot.slane %v4093_v5, %v14970_v43 }
0x104e   :  { %11023 = vpow2.f32 %v9393_v28  ;;  %v4011_v28 = vcombine.high %v4009_v33, %v4009_v33  ;;  %v9394_v4 = vmul.f32 -1.442695, %v3871_v58  ;;  %v4237_v61 = vrot.slane %v13440_v63, %v14970_v43 }
0x104f   :  { %v3982_v29 = vrot.slane %v3960_v35, %v13323_v13  ;;  %v4241_v33 = vrot.slane %v4032_v50, %v14970_v43  ;;  %v4245_v27 = vrot.slane %v4040_v44, %v14970_v43  ;;  %v3990_v21 = vcombine.high %v3968_v1, %v3968_v1 }
0x1050   :  { %v3903_v58 = vcombine.high %v3901_v2, %v3901_v2  ;;  %v3924_v8 = vrot.slane %v3902_v57, %v13323_v13  ;;  %v3975_v5 = vrot.slane %v3959_v19, %v13323_v13  ;;  %v4039_v47 = vrot.slane %v4011_v28, %v13323_v13 }
0x1051   :  { %11025 = vpow2.f32 %v9394_v4  ;;  %v4197_v63 = vrot.slane %v3968_v1, %v14970_v43  ;;  %v3932_v35 = vcombine.high %v3910_v55, %v3910_v55  ;;  %v3989_v49 = vrot.slane %v3961_v38, %v13323_v13 }
0x1052   :  { %v4201_v44 = vrot.slane %v3982_v29, %v14970_v43  ;;  %v3992_v50 = vcombine.high %v3982_v29, %v3982_v29  ;;  %v3917_v0 = vrot.slane %v3901_v2, %v13323_v13  ;;  %v4205_v19 = vrot.slane %v3990_v21, %v14970_v43 }
0x1053   :  { %v4395_v57 = vsel %vm4394_vm1, %v3910_v55, %v4197_v63  ;;  %v3931_v28 = vrot.slane %v3903_v58, %v13323_v13  ;;  %v4249_v38 = vrot.slane %v4042_v12, %v14970_v43  ;;  %v4213_v23 = vrot.slane %v3975_v5, %v14970_v43 }
0x1054   :  { %v4396_v1 = vsel %vm4394_vm1, %v3924_v8, %v4201_v44  ;;  %v3991_v29 = vcombine.high %v3975_v5, %v3975_v5  ;;  %v4397_v2 = vsel %vm4394_vm1, %v3932_v35, %v4205_v19  ;;  %v3934_v32 = vcombine.high %v3924_v8, %v3924_v8 }
0x1055   :  { %v3993_v36 = vcombine.high %v3989_v49, %v3989_v49  ;;  %v4404_v55 = vsel %vm4403_vm2, %v4395_v57, %v4237_v61  ;;  %v4209_v21 = vrot.slane %v3992_v50, %v14970_v43  ;;  %v4399_v58 = vsel %vm4394_vm1, %v3917_v0, %v4213_v23 }
0x1056   :  { %v4405_v63 = vsel %vm4403_vm2, %v4396_v1, %v4241_v33  ;;  %v3933_v44 = vcombine.high %v3917_v0, %v3917_v0  ;;  %v3935_v12 = vcombine.high %v3931_v28, %v3931_v28  ;;  %v4406_v37 = vsel %vm4403_vm2, %v4397_v2, %v4245_v27  ;;  %v14983_v1 = vld [vmem:[#allocation55_spill] sm:$0xff] }
0x1057   :  { %v4217_v5 = vrot.slane %v3989_v49, %v14970_v43  ;;  %v4257_v35 = vrot.slane %v4039_v47, %v14970_v43  ;;  %v4043_v8 = vcombine.high %v4039_v47, %v4039_v47  ;;  %v4398_v19 = vsel %vm4394_vm1, %v3934_v32, %v4209_v21 }
0x1058   :  { %v4408_v61 = vsel %vm4403_vm2, %v4399_v58, %v4253_v3  ;;  %v4221_v50 = vrot.slane %v3991_v29, %v14970_v43  ;;  %v4225_v23 = vrot.slane %v3993_v36, %v14970_v43  ;;  %v4413_v0 = vsel %vm4412_vm3, %v4404_v55, %v4277_v56 }
0x1059   :  { %v4414_v27 = vsel %vm4412_vm3, %v4405_v63, %v4281_v34  ;;  %v4415_v32 = vsel %vm4412_vm3, %v4406_v37, %v13456_v22  ;;  %v4261_v47 = vrot.slane %v4041_v18, %v14970_v43  ;;  %v4407_v30 = vsel %vm4403_vm2, %v4398_v19, %v4249_v38 }
0x105a   :  { %v4401_v49 = vsel %vm4394_vm1, %v3933_v44, %v4221_v50  ;;  %v4402_v33 = vsel %vm4394_vm1, %v3935_v12, %v4225_v23  ;;  %v14980_v56 = vrot.slane %v13427_v62, %v14970_v43  ;;  %v4265_v34 = vrot.slane %v4043_v8, %v14970_v43 }
0x105b   :  { %v11024_v4 = vpop.eup %11023  ;;  %v14981_v3 = vrot.slane %v13346_v51, %v14970_v43  ;;  %v14982_v18 = vrot.slane %v13352_v16, %v14970_v43  ;;  %v4498_v57 = vcombine.high %v13156_v26, %v13156_v26  ;;  %v4440_v38 = vcombine.high %v14983_v1, %v14983_v1 }
0x105c   :  { %v3868_v54 = vadd.f32 1.0, %v11024_v4  ;;  %v4417_v60 = vsel %vm4412_vm3, %v4408_v61, %v14980_v56  ;;  %v4424_v4 = vsel %vm4421_vm4, %v4415_v32, %v13408_v14  ;;  %v4410_v51 = vsel %vm4403_vm2, %v4401_v49, %v4261_v47  ;;  %v14992_v56 = vld [vmem:[#allocation52_spill] sm:$0xff] }
0x105d   :  { %v4422_v22 = vsel %vm4421_vm4, %v4413_v0, %v14981_v3  ;;  %v4423_v37 = vsel %vm4421_vm4, %v4414_v27, %v14982_v18  ;;  %v4411_v29 = vsel %vm4403_vm2, %v4402_v33, %v4265_v34  ;;  %v4447_v16 = vrot.slane %v14983_v1, %v13323_v13 }
0x105e   :  { %11027 = vrcp.f32 %v3868_v54  ;;  %v4400_v54 = vsel %vm4394_vm1, %v3931_v28, %v4217_v5  ;;  %v11026_v62 = vpop.eup %11025  ;;  %v4505_v2 = vrot.slane %v13156_v26, %v13323_v13  ;;  %v4416_v36 = vsel %vm4412_vm3, %v4407_v30, %v13467_v11 }
0x105f   :  { %v4409_v28 = vsel %vm4403_vm2, %v4400_v54, %v4257_v35  ;;  %v14984_v55 = vrot.slane %v13365_v20, %v14970_v43  ;;  %v14985_v21 = vrot.slane %v13333_v52, %v14970_v43  ;;  %v14986_v63 = vrot.slane %v13336_v9, %v14970_v43 }
0x1060   :  { %v14987_v26 = vrot.slane %v13436_v7, %v14970_v43  ;;  %v14988_v20 = vcombine.high %v13383_v24, %v13383_v24  ;;  %v3875_v52 = vadd.f32 1.0, %v11026_v62  ;;  %v4512_v5 = vrot.slane %v4498_v57, %v13323_v13 }
0x1061   :  { %v4426_v14 = vsel %vm4421_vm4, %v4417_v60, %v14984_v55  ;;  %v13567_v58 = vsel %vm4430_vm5, %v4422_v22, %v14985_v21  ;;  %v13573_v44 = vsel %vm4430_vm5, %v4423_v37, %v14986_v63  ;;  %v4419_v35 = vsel %vm4412_vm3, %v4410_v51, %v13476_v10 }
0x1062   :  { %v4418_v11 = vsel %vm4412_vm3, %v4409_v28, %v14987_v26  ;;  %v4345_v12 = vrot.slane %v14988_v20, %v14970_v43  ;;  %v4420_v9 = vsel %vm4412_vm3, %v4411_v29, %v13480_v42  ;;  %v13590_v8 = vsel %vm4430_vm5, %v4424_v4, %v13370_v39 }
0x1063   :  { %v4454_v7 = vrot.slane %v4440_v38, %v13323_v13  ;;  %v4425_v19 = vsel %vm4421_vm4, %v4416_v36, %v13415_v15  ;;  %v14989_v61 = vrot.slane %v13340_v59, %v14970_v43  ;;  %v3861_v10 = vadd.f32 %v13393_v48, %v13074_v31 }
0x1064   :  { %v4455_v23 = vcombine.high %v4447_v16, %v4447_v16  ;;  %v4513_v42 = vcombine.high %v4505_v2, %v4505_v2  ;;  %v14990_v39 = vrot.slane %v13383_v24, %v14970_v43  ;;  %v4521_v54 = vrot.slane %v4505_v2, %v13323_v13 }
0x1065   :  { %v13599_v50 = vsel %vm4430_vm5, %v4426_v14, %v14989_v61  ;;  %v4548_v15 = vcombine.high %v13234_v40, %v13234_v40  ;;  %v4428_v59 = vsel %vm4421_vm4, %v4419_v35, %v13430_v25  ;;  %v4429_v32 = vsel %vm4421_vm4, %v4420_v9, %v4345_v12 }
0x1066   :  { %v4427_v0 = vsel %vm4421_vm4, %v4418_v11, %v14990_v39  ;;  %11029 = vrcp.f32 %v3875_v52  ;;  %v4555_v31 = vrot.slane %v13234_v40, %v13323_v13  ;;  %v4514_v48 = vcombine.high %v4512_v5, %v4512_v5 }
0x1067   :  { %v4463_v24 = vrot.slane %v4447_v16, %v13323_v13  ;;  %v13618_v49 = vsel %vm4430_vm5, %v4425_v19, %v13380_v41  ;;  %v4456_v33 = vcombine.high %v4454_v7, %v4454_v7  ;;  %v14991_v30 = vrot.slane %v13343_v17, %v14970_v43 }
0x1068   :  { %v4477_v34 = vrot.slane %v4455_v23, %v13323_v13  ;;  %v4535_v40 = vrot.slane %v4513_v42, %v13323_v13  ;;  %v4528_v3 = vrot.slane %v4512_v5, %v13323_v13  ;;  %v4562_v22 = vrot.slane %v4548_v15, %v13323_v13 }
0x1069   :  { %v13624_v25 = vsel %vm4430_vm5, %v4427_v0, %v14991_v30  ;;  %v4598_v41 = vcombine.high %v13312_v53, %v13312_v53  ;;  %v13635_v18 = vsel %vm4430_vm5, %v4428_v59, %v13388_v45  ;;  %v13639_v17 = vsel %vm4430_vm5, %v4429_v32, %v13391_v46 }
0x106a   :  { %v4563_v37 = vcombine.high %v4555_v31, %v4555_v31  ;;  %v4543_v57 = vcombine.high %v4521_v54, %v4521_v54  ;;  %v4542_v28 = vrot.slane %v4514_v48, %v13323_v13  ;;  %v4605_v62 = vrot.slane %v13312_v53, %v13323_v13 }
0x106b   :  { %v11028_v27 = vpop.eup %11027  ;;  %v4700_v4 = vrot.slane %v4521_v54, %v14970_v43  ;;  %v4470_v1 = vrot.slane %v4454_v7, %v13323_v13  ;;  %v4484_v38 = vrot.slane %v4456_v33, %v13323_v13  ;;  %v4485_v45 = vcombine.high %v4463_v24, %v4463_v24 }
0x106c   :  { %v3878_v47 = vmul.f32 %v11028_v27, %v3861_v10  ;;  %v4487_v51 = vcombine.high %v4477_v34, %v4477_v34  ;;  %v4545_v29 = vcombine.high %v4535_v40, %v4535_v40  ;;  %v4544_v16 = vcombine.high %v4528_v3, %v4528_v3 }
0x106d   :  { %v4571_v46 = vrot.slane %v4555_v31, %v13323_v13  ;;  %v4704_v2 = vrot.slane %v4535_v40, %v14970_v43  ;;  %v4612_v36 = vrot.slane %v4598_v41, %v13323_v13  ;;  %v4564_v55 = vcombine.high %v4562_v22, %v4562_v22 }
0x106e   :  { %v3879_v60 = vadd.f32 %v3878_v47, %v14992_v56  ;;  %v4585_v14 = vrot.slane %v4563_v37, %v13323_v13  ;;  %v4708_v21 = vrot.slane %v4543_v57, %v14970_v43  ;;  %v4716_v63 = vrot.slane %v4528_v3, %v14970_v43 }
0x106f   :  { %v4546_v26 = vcombine.high %v4542_v28, %v4542_v28  ;;  %v4857_v11 = vsel %vm4394_vm1, %v4463_v24, %v4700_v4  ;;  %v4613_v20 = vcombine.high %v4605_v62, %v4605_v62  ;;  %v4486_v12 = vcombine.high %v4470_v1, %v4470_v1 }
0x1070   :  { %11031 = vtanh.f32 %v3879_v60  ;;  %v4488_v52 = vcombine.high %v4484_v38, %v4484_v38  ;;  %v4712_v5 = vrot.slane %v4545_v29, %v14970_v43  ;;  %v4578_v35 = vrot.slane %v4562_v22, %v13323_v13 }
0x1071   :  { %v4720_v9 = vrot.slane %v4542_v28, %v14970_v43  ;;  %v4724_v7 = vrot.slane %v4544_v16, %v14970_v43  ;;  %v4858_v19 = vsel %vm4394_vm1, %v4477_v34, %v4704_v2  ;;  %v4593_v61 = vcombine.high %v4571_v46, %v4571_v46 }
0x1072   :  { %v4592_v10 = vrot.slane %v4564_v55, %v13323_v13  ;;  %v4614_v23 = vcombine.high %v4612_v36, %v4612_v36  ;;  %v4859_v42 = vsel %vm4394_vm1, %v4485_v45, %v4708_v21  ;;  %v4595_v39 = vcombine.high %v4585_v14, %v4585_v14 }
0x1073   :  { %v4861_v0 = vsel %vm4394_vm1, %v4470_v1, %v4716_v63  ;;  %v4728_v27 = vrot.slane %v4546_v26, %v14970_v43  ;;  %v11030_v54 = vpop.eup %11029  ;;  %v4621_v15 = vrot.slane %v4605_v62, %v13323_v13  ;;  %v4740_v59 = vrot.slane %v4571_v46, %v14970_v43 }
0x1074   :  { %v4635_v32 = vrot.slane %v4613_v20, %v13323_v13  ;;  %v4744_v47 = vrot.slane %v4585_v14, %v14970_v43  ;;  %v4860_v31 = vsel %vm4394_vm1, %v4487_v51, %v4712_v5  ;;  %v4862_v48 = vsel %vm4394_vm1, %v4484_v38, %v4720_v9 }
0x1075   :  { %v4594_v24 = vcombine.high %v4578_v35, %v4578_v35  ;;  %v4863_v33 = vsel %vm4394_vm1, %v4486_v12, %v4724_v7  ;;  %v4748_v30 = vrot.slane %v4593_v61, %v14970_v43  ;;  %v4628_v56 = vrot.slane %v4612_v36, %v13323_v13 }
0x1076   :  { %v4642_v60 = vrot.slane %v4614_v23, %v13323_v13  ;;  %v4596_v34 = vcombine.high %v4592_v10, %v4592_v10  ;;  %v3881_v40 = vsub.f32 1.0, %v11030_v54  ;;  %v4752_v3 = vrot.slane %v4595_v39, %v14970_v43 }
0x1077   :  { %v4756_v22 = vrot.slane %v4578_v35, %v14970_v43  ;;  %v4864_v41 = vsel %vm4394_vm1, %v4488_v52, %v4728_v27  ;;  %v4865_v57 = vsel %vm4403_vm2, %v4857_v11, %v4740_v59  ;;  %v4866_v28 = vsel %vm4403_vm2, %v4858_v19, %v4744_v47 }
0x1078   :  { %v4643_v62 = vcombine.high %v4621_v15, %v4621_v15  ;;  %v4645_v4 = vcombine.high %v4635_v32, %v4635_v32  ;;  %v3883_v38 = vmul.f32 %v11030_v54, %v13312_v53  ;;  %v4760_v45 = vrot.slane %v4592_v10, %v14970_v43 }
0x1079   :  { %v4764_v51 = vrot.slane %v4594_v24, %v14970_v43  ;;  %v4867_v29 = vsel %vm4403_vm2, %v4859_v42, %v4748_v30  ;;  %v4644_v16 = vcombine.high %v4628_v56, %v4628_v56  ;;  %v4646_v46 = vcombine.high %v4642_v60, %v4642_v60 }
0x107a   :  { %v4768_v2 = vrot.slane %v4596_v34, %v14970_v43  ;;  %v4780_v55 = vrot.slane %v4621_v15, %v14970_v43  ;;  %v4868_v14 = vsel %vm4403_vm2, %v4860_v31, %v4752_v3  ;;  %v4869_v21 = vsel %vm4403_vm2, %v4861_v0, %v4756_v22 }
0x107b   :  { %v4784_v63 = vrot.slane %v4635_v32, %v14970_v43  ;;  %v4788_v53 = vrot.slane %v4643_v62, %v14970_v43  ;;  %v4792_v26 = vrot.slane %v4645_v4, %v14970_v43  ;;  %v4796_v11 = vrot.slane %v4628_v56, %v14970_v43 }
0x107c   :  { %v4870_v52 = vsel %vm4403_vm2, %v4862_v48, %v4760_v45  ;;  %v4871_v5 = vsel %vm4403_vm2, %v4863_v33, %v4764_v51  ;;  %v4800_v35 = vrot.slane %v4642_v60, %v14970_v43  ;;  %v4804_v9 = vrot.slane %v4644_v16, %v14970_v43 }
0x107d   :  { %v11032_v37 = vpop.eup %11031  ;;  %v4808_v7 = vrot.slane %v4646_v46, %v14970_v43  ;;  %v4872_v19 = vsel %vm4403_vm2, %v4864_v41, %v4768_v2  ;;  %v4873_v10 = vsel %vm4412_vm3, %v4865_v57, %v4780_v55  ;;  %v4874_v39 = vsel %vm4412_vm3, %v4866_v28, %v4784_v63 }
0x107e   :  { %v3882_v1 = vmul.f32 %v11032_v37, %v3881_v40  ;;  %v4875_v0 = vsel %vm4412_vm3, %v4867_v29, %v4788_v53  ;;  %v4876_v27 = vsel %vm4412_vm3, %v4868_v14, %v4792_v26  ;;  %v13707_v54 = vsel %vm4412_vm3, %v4869_v21, %v4796_v11 }
0x107f   :  { %v13715_v48 = vsel %vm4412_vm3, %v4870_v52, %v4800_v35  ;;  %v13718_v24 = vsel %vm4412_vm3, %v4871_v5, %v4804_v9  ;;  %v13721_v33 = vsel %vm4412_vm3, %v4872_v19, %v4808_v7 }
0x1080   :  { %v3884_v36 = vadd.f32 %v3883_v38, %v3882_v1 }
0x1082   :  { %3885 = vst [vmem:[%s14653_s20] sm:$0xff] %v3884_v36  ;;  %v4655_v20 = vrot.slane %v3884_v36, %v13323_v13  ;;  %v4648_v12 = vcombine.high %v3884_v36, %v3884_v36 }
0x1084   :  { %v4671_v61 = vrot.slane %v4655_v20, %v13323_v13  ;;  %v4663_v23 = vcombine.high %v4655_v20, %v4655_v20  ;;  %v4662_v42 = vrot.slane %v4648_v12, %v13323_v13 }
0x1086   :  { %v4820_v15 = vrot.slane %v4671_v61, %v14970_v43  ;;  %v4685_v59 = vrot.slane %v4663_v23, %v13323_v13  ;;  %v4693_v32 = vcombine.high %v4671_v61, %v4671_v61  ;;  %v13712_v47 = vrot.slane %v4662_v42, %v13323_v13 }
0x1087   :  { %v4664_v31 = vcombine.high %v4662_v42, %v4662_v42 }
0x1088   :  { %v4881_v30 = vsel %vm4421_vm4, %v4873_v10, %v4820_v15  ;;  %v4824_v56 = vrot.slane %v4685_v59, %v14970_v43  ;;  %v4828_v60 = vrot.slane %v4693_v32, %v14970_v43  ;;  %v4695_v34 = vcombine.high %v4685_v59, %v4685_v59 }
0x1089   :  { %10600 = vmatpush3.xpose.msra.mxu0 %v4881_v30  ;;  %v7168_v40 = vcombine.high %v4881_v30, %v4881_v30  ;;  %v7175_v3 = vrot.slane %v4881_v30, %v13323_v13  ;;  %v4836_v22 = vrot.slane %v13712_v47, %v14970_v43  ;;  %v13730_v41 = vrot.slane %v4664_v31, %v13323_v13 }
0x108a   :  { %v4882_v37 = vsel %vm4421_vm4, %v4874_v39, %v4824_v56  ;;  %10609 = vmatprep.subr.mxu0 %v14784_v6  ;;  %v4883_v57 = vsel %vm4421_vm4, %v4875_v0, %v4828_v60  ;;  %v4832_v28 = vrot.slane %v4695_v34, %v14970_v43  ;;  %v4694_v62 = vcombine.high %v13712_v47, %v13712_v47 }
0x108b   :  { %v7182_v4 = vrot.slane %v7168_v40, %v13323_v13  ;;  %v7183_v1 = vcombine.high %v7175_v3, %v7175_v3  ;;  %v7190_v38 = vrot.slane %v7175_v3, %v13323_v13  ;;  %10605 = vmatpush3.xpose.msra.mxu1 %v4882_v37  ;;  %v7207_v45 = vcombine.high %v4882_v37, %v4882_v37 }
0x108c   :  { %v7214_v51 = vrot.slane %v4882_v37, %v13323_v13  ;;  %10602 = vmatmul.mubr.f32.vlgmr.msra.gmra.mxu0 %v13567_v58  ;;  %v7246_v29 = vcombine.high %v4883_v57, %v4883_v57  ;;  %v7253_v16 = vrot.slane %v4883_v57, %v13323_v13  ;;  %10614 = vmatprep.subr.mxu1 %v14784_v6 }
0x108d   :  { %v7197_v46 = vrot.slane %v7182_v4, %v13323_v13  ;;  %v7204_v2 = vrot.slane %v7183_v1, %v13323_v13  ;;  %v7221_v36 = vrot.slane %v7207_v45, %v13323_v13  ;;  %10610 = vmatpush3.xpose.msra.mxu0 %v4883_v57  ;;  %10611 = vmatprep.mubr.msk.f32.mxu0 %vm11369_vm0, %v14784_v6 }
0x108e   :  { %v7222_v55 = vcombine.high %v7214_v51, %v7214_v51  ;;  %v7229_v14 = vrot.slane %v7214_v51, %v13323_v13  ;;  %v7260_v21 = vrot.slane %v7246_v29, %v13323_v13  ;;  %v7261_v63 = vcombine.high %v7253_v16, %v7253_v16  ;;  %10607 = vmatmul.mubr.f32.vlgmr.msra.gmra.mxu1 %v13573_v44 }
0x108f   :  { %v7480_v53 = vcombine.low %v7190_v38, %v7204_v2  ;;  %v9415_v26 = vcombine.high %v7190_v38, %v7204_v2  ;;  %v7236_v11 = vrot.slane %v7221_v36, %v13323_v13  ;;  %v13754_v20 = vrot.slane %v7253_v16, %v13323_v13  ;;  %10619 = vmatprep.subr.mxu0 %v14784_v6 }
0x1090   :  { %v7243_v12 = vrot.slane %v7222_v55, %v13323_v13  ;;  %v7244_v52 = vcombine.high %v7229_v14, %v7229_v14  ;;  %v13758_v5 = vcombine.low %v7197_v46, %v7229_v14  ;;  %v7275_v35 = vrot.slane %v7260_v21, %v13323_v13  ;;  %10612 = vmatmul.mubr.f32.vlgmr.msra.gmra.mxu0 %v13590_v8 }
0x1091   :  { %v13763_v9 = vrot.slane %v7480_v53, %v13323_v13  ;;  %v13766_v7 = vrot.slane %v9415_v26, %v13323_v13  ;;  %v13769_v19 = vrot.slane %v7261_v63, %v13323_v13  ;;  %v4884_v61 = vsel %vm4421_vm4, %v4876_v27, %v4832_v28  ;;  %10616 = vmatprep.mubr.msk.f32.mxu1 %vm11369_vm0, %v14784_v6 }
0x1092   :  { %v7245_v10 = vcombine.high %v7243_v12, %v7243_v12  ;;  %v13774_v23 = vcombine.low %v7243_v12, %v7244_v52  ;;  %v7504_v42 = vrot.slane %v13758_v5, %v13323_v13  ;;  %10615 = vmatpush3.xpose.msra.mxu1 %v4884_v61  ;;  %v7285_v39 = vcombine.high %v4884_v61, %v4884_v61 }
0x1093   :  { %v7530_v0 = vcombine.low %v13754_v20, %v13769_v19  ;;  %v9416_v15 = vcombine.high %v13754_v20, %v13769_v19  ;;  %v7292_v59 = vrot.slane %v4884_v61, %v13323_v13  ;;  %v4885_v27 = vsel %vm4421_vm4, %v13707_v54, %v4836_v22  ;;  %10624 = vmatprep.subr.mxu1 %v14784_v6 }
0x1094   :  { %v13786_v32 = vcombine.low %v7245_v10, %v7236_v11  ;;  %v7299_v31 = vrot.slane %v7285_v39, %v13323_v13  ;;  %10620 = vmatpush3.xpose.msra.mxu0 %v4885_v27  ;;  %v7324_v30 = vcombine.high %v4885_v27, %v4885_v27  ;;  %v7331_v56 = vrot.slane %v4885_v27, %v13323_v13 }
0x1095   :  { %v7300_v60 = vcombine.high %v7292_v59, %v7292_v59  ;;  %v7307_v34 = vrot.slane %v7292_v59, %v13323_v13  ;;  %10617 = vmatmul.mubr.f32.vlgmr.msra.gmra.mxu1 %v13618_v49  ;;  %10621 = vmatprep.mubr.msk.f32.mxu0 %vm11369_vm0, %v14784_v6  ;;  %v4840_v54 = vrot.slane %v13730_v41, %v14970_v43 }
0x1096   :  { %v7314_v40 = vrot.slane %v7299_v31, %v13323_v13  ;;  %v7338_v3 = vrot.slane %v7324_v30, %v13323_v13  ;;  %v7339_v22 = vcombine.high %v7331_v56, %v7331_v56  ;;  %v13799_v37 = vrot.slane %v7331_v56, %v13323_v13  ;;  %10629 = vmatprep.subr.mxu0 %v14784_v6 }
0x1097   :  { %v7321_v57 = vrot.slane %v7300_v60, %v13323_v13  ;;  %v7322_v28 = vcombine.high %v7307_v34, %v7307_v34  ;;  %v13803_v4 = vcombine.low %v7275_v35, %v7307_v34  ;;  %v4886_v1 = vsel %vm4421_vm4, %v13715_v48, %v4840_v54  ;;  %10622 = vmatmul.mubr.f32.vlgmr.msra.gmra.mxu0 %v13599_v50 }
0x1098   :  { %v7353_v38 = vrot.slane %v7338_v3, %v13323_v13  ;;  %v13810_v45 = vrot.slane %v7339_v22, %v13323_v13  ;;  %10625 = vmatpush3.xpose.msra.mxu1 %v4886_v1  ;;  %v7363_v51 = vcombine.high %v4886_v1, %v4886_v1  ;;  %v7370_v29 = vrot.slane %v4886_v1, %v13323_v13 }
0x1099   :  { %v7323_v16 = vcombine.high %v7321_v57, %v7321_v57  ;;  %v13813_v46 = vcombine.low %v7321_v57, %v7322_v28  ;;  %10626 = vmatprep.mubr.msk.f32.mxu1 %vm11369_vm0, %v14784_v6  ;;  %v4844_v48 = vrot.slane %v4694_v62, %v14970_v43  ;;  %10634 = vmatprep.subr.mxu1 %v14784_v6 }
0x109a   :  { %v7580_v2 = vcombine.low %v13799_v37, %v13810_v45  ;;  %v9417_v36 = vcombine.high %v13799_v37, %v13810_v45  ;;  %v7377_v55 = vrot.slane %v7363_v51, %v13323_v13  ;;  %v7378_v14 = vcombine.high %v7370_v29, %v7370_v29  ;;  %10631 = vmatprep.mubr.msk.f32.mxu0 %vm11369_vm0, %v14784_v6 }
0x109b   :  { %v13829_v21 = vcombine.low %v7323_v16, %v7314_v40  ;;  %v7385_v63 = vrot.slane %v7370_v29, %v13323_v13  ;;  %v4887_v47 = vsel %vm4421_vm4, %v13718_v24, %v4844_v48  ;;  %10627 = vmatmul.mubr.f32.vlgmr.msra.gmra.mxu1 %v13624_v25  ;;  %v4696_v62 = vcombine.high %v13730_v41, %v13730_v41 }
0x109c   :  { %v7392_v53 = vrot.slane %v7377_v55, %v13323_v13  ;;  %v7399_v26 = vrot.slane %v7378_v14, %v13323_v13  ;;  %10630 = vmatpush3.xpose.msra.mxu0 %v4887_v47  ;;  %v7402_v11 = vcombine.high %v4887_v47, %v4887_v47  ;;  %v7409_v12 = vrot.slane %v4887_v47, %v13323_v13 }
0x109d   :  { %v7400_v52 = vcombine.high %v7385_v63, %v7385_v63  ;;  %v13840_v35 = vcombine.low %v7353_v38, %v7385_v63  ;;  %v4848_v61 = vrot.slane %v4696_v62, %v14970_v43  ;;  %10639 = vmatprep.subr.mxu0 %v14784_v6  ;;  %10636 = vmatprep.mubr.msk.f32.mxu1 %vm11369_vm0, %v14784_v6 }
0x109e   :  { %v7401_v24 = vcombine.high %v7399_v26, %v7399_v26  ;;  %v7416_v41 = vrot.slane %v7402_v11, %v13323_v13  ;;  %v7417_v10 = vcombine.high %v7409_v12, %v7409_v12  ;;  %v7424_v39 = vrot.slane %v7409_v12, %v13323_v13 }
0x109f   :  { %v7628_v59 = vcombine.low %v7399_v26, %v7400_v52  ;;  %v4888_v27 = vsel %vm4421_vm4, %v13721_v33, %v4848_v61  ;;  %10632 = vmatmul.mubr.f32.vlgmr.msra.gmra.mxu0 %v13635_v18  ;;  %v7511_v43 = vrot.slane %v13774_v23, %v13323_v13  ;;  %v7512_v31 = vcombine.low %v13763_v9, %v13766_v7 }
0x10a0   :  { %v7629_v30 = vcombine.low %v7401_v24, %v7392_v53  ;;  %v7431_v56 = vrot.slane %v7416_v41, %v13323_v13  ;;  %v7438_v60 = vrot.slane %v7417_v10, %v13323_v13  ;;  %10635 = vmatpush3.xpose.msra.mxu1 %v4888_v27  ;;  %v7441_v34 = vcombine.high %v4888_v27, %v4888_v27 }
0x10a1   :  { %v7448_v54 = vrot.slane %v4888_v27, %v13323_v13  ;;  %10640 = vmatpush3.msk.msra.mxu0 %vm5638_vm6, %v13567_v58  ;;  %10644 = vmatprep.subr.mxu1 %v14784_v6  ;;  %v7513_v33 = vcombine.low %v7504_v42, %v7511_v43  ;;  %v7520_v9 = vrot.slane %v7512_v31, %v13323_v13 }
0x10a2   :  { %v7630_v7 = vcombine.low %v7424_v39, %v7438_v60  ;;  %v9418_v23 = vcombine.high %v7424_v39, %v7438_v60  ;;  %v7455_v40 = vrot.slane %v7441_v34, %v13323_v13  ;;  %10641 = vmatprep.mubr.msk.f32.mxu0 %vm11369_vm0, %v14784_v6  ;;  %10649 = vmatprep.subr.mxu0 %v14784_v6 }
0x10a3   :  { %v7456_v3 = vcombine.high %v7448_v54, %v7448_v54  ;;  %v7463_v58 = vrot.slane %v7448_v54, %v13323_v13  ;;  %10637 = vmatmul.mubr.f32.vlgmr.msra.gmra.mxu1 %v13639_v17  ;;  %v7527_v22 = vrot.slane %v7513_v33, %v13323_v13  ;;  %v7539_v5 = vrot.slane %v13786_v32, %v13323_v13 }
0x10a4   :  { %v7470_v42 = vrot.slane %v7455_v40, %v13323_v13  ;;  %10645 = vmatpush3.msk.msra.mxu1 %vm5638_vm6, %v13573_v44  ;;  %10646 = vmatprep.mubr.msk.f32.mxu1 %vm11369_vm0, %v14784_v6  ;;  %v7546_v57 = vrot.slane %v7530_v0, %v13323_v13  ;;  %v7553_v28 = vrot.slane %v9416_v15, %v13323_v13 }
0x10a5   :  { %v7477_v32 = vrot.slane %v7456_v3, %v13323_v13  ;;  %v7478_v1 = vcombine.high %v7463_v58, %v7463_v58  ;;  %v7677_v38 = vcombine.low %v7431_v56, %v7463_v58  ;;  %10654 = vmatprep.subr.mxu1 %v14784_v6  ;;  %v13889_v44 = vcombine.low %v7520_v9, %v7527_v22 }
0x10a6   :  { %v7560_v51 = vrot.slane %v13803_v4, %v13323_v13  ;;  %v7561_v29 = vcombine.low %v7539_v5, %v7546_v57  ;;  %v7588_v0 = vrot.slane %v13813_v46, %v13323_v13  ;;  %v7595_v16 = vrot.slane %v13829_v21, %v13323_v13 }
0x10a7   :  { %v7479_v20 = vcombine.high %v7477_v32, %v7477_v32  ;;  %v7678_v19 = vcombine.low %v7477_v32, %v7478_v1  ;;  %v7602_v15 = vrot.slane %v7580_v2, %v13323_v13  ;;  %v7609_v48 = vrot.slane %v9417_v36, %v13323_v13 }
0x10a8   :  { %v7562_v4 = vcombine.low %v7553_v28, %v7560_v51  ;;  %v7569_v55 = vrot.slane %v7561_v29, %v13323_v13  ;;  %v7610_v14 = vcombine.low %v7588_v0, %v7595_v16  ;;  %v7637_v46 = vrot.slane %v13840_v35, %v13323_v13 }
0x10a9   :  { %v7679_v21 = vcombine.low %v7479_v20, %v7470_v42  ;;  %v7611_v63 = vcombine.low %v7602_v15, %v7609_v48  ;;  %v7644_v47 = vrot.slane %v7628_v59, %v13323_v13  ;;  %v7651_v62 = vrot.slane %v7629_v30, %v13323_v13 }
0x10aa   :  { %v7576_v2 = vrot.slane %v7562_v4, %v13323_v13  ;;  %v7618_v53 = vrot.slane %v7610_v14, %v13323_v13  ;;  %v7658_v37 = vrot.slane %v7630_v7, %v13323_v13  ;;  %v7686_v45 = vrot.slane %v9418_v23, %v13323_v13 }
0x10ab   :  { %v7625_v36 = vrot.slane %v7611_v63, %v13323_v13  ;;  %v7659_v26 = vcombine.low %v7637_v46, %v7644_v47  ;;  %v7693_v11 = vrot.slane %v7677_v38, %v13323_v13  ;;  %v7700_v35 = vrot.slane %v7678_v19, %v13323_v13 }
0x10ac   :  { %v13916_v12 = vcombine.low %v7569_v55, %v7576_v2  ;;  %v7660_v52 = vcombine.low %v7651_v62, %v7658_v37  ;;  %v7707_v61 = vrot.slane %v7679_v21, %v13323_v13 }
0x10ad   :  { %v13920_v24 = vcombine.low %v7618_v53, %v7625_v36  ;;  %v7708_v41 = vcombine.low %v7686_v45, %v7693_v11  ;;  %v7667_v10 = vrot.slane %v7659_v26, %v13323_v13 }
0x10ae   :  { %v7674_v39 = vrot.slane %v7660_v52, %v13323_v13  ;;  %v7709_v59 = vcombine.low %v7700_v35, %v7707_v61 }
0x10af   :  { %v7716_v43 = vrot.slane %v7708_v41, %v13323_v13 }
0x10b0   :  { %v13924_v27 = vcombine.low %v7667_v10, %v7674_v39  ;;  %v7723_v31 = vrot.slane %v7709_v59, %v13323_v13 }
0x10b2   :  { %v13928_v30 = vcombine.low %v7716_v43, %v7723_v31 }
0x114c   :  { %v4955_v56 = vpop.f32.mrf.mxu0 }
0x114d   :  { %v5450_v60 = vsel %vm5449_vm7, %v4955_v56, -inf }
0x114e   :  { %v5451_v34 = vrot.slane %v5450_v60, 4  ;;  %v10603_v54 = vpop.f32.mrf.mxu0  ;;  %v5025_v33 = vpop.f32.mrf.mxu1 }
0x114f   :  { %v5457_v9 = vsel %vm5449_vm7, %v5025_v33, -inf }
0x1150   :  { %v5452_v7 = vmax.f32 %v5450_v60, %v5451_v34  ;;  %v5458_v23 = vrot.slane %v5457_v9, 4  ;;  %v10608_v40 = vpop.f32.mrf.mxu1  ;;  %v5095_v3 = vpop.f32.mrf.mxu0 }
0x1151   :  { %v5464_v58 = vsel %vm5449_vm7, %v5095_v3, -inf }
0x1152   :  { %v5453_v22 = vrot.slane %v5452_v7, 2  ;;  %v5459_v5 = vmax.f32 %v5457_v9, %v5458_v23  ;;  %v5465_v42 = vrot.slane %v5464_v58, 4  ;;  %v10613_v57 = vpop.f32.mrf.mxu0 }
0x1154   :  { %v5454_v28 = vmax.f32 %v5452_v7, %v5453_v22  ;;  %v5460_v32 = vrot.slane %v5459_v5, 2  ;;  %v5466_v1 = vmax.f32 %v5464_v58, %v5465_v42 }
0x1155   :  { %v5165_v38 = vpop.f32.mrf.mxu1 }
0x1156   :  { %v5455_v51 = vrot.slane %v5454_v28, 1  ;;  %v5461_v29 = vmax.f32 %v5459_v5, %v5460_v32  ;;  %v5467_v0 = vrot.slane %v5466_v1, 2  ;;  %v5471_v16 = vsel %vm5449_vm7, %v5165_v38, -inf }
0x1157   :  { %v5472_v20 = vrot.slane %v5471_v16, 4  ;;  %v10618_v19 = vpop.f32.mrf.mxu1  ;;  %v5235_v15 = vpop.f32.mrf.mxu0 }
0x1158   :  { %v5456_v48 = vmax.f32 %v5454_v28, %v5455_v51  ;;  %v5462_v4 = vrot.slane %v5461_v29, 1  ;;  %v5468_v55 = vmax.f32 %v5466_v1, %v5467_v0  ;;  %v5478_v14 = vsel %vm5449_vm7, %v5235_v15, -inf }
0x1159   :  { %v5473_v46 = vmax.f32 %v5471_v16, %v5472_v20  ;;  %v5479_v21 = vrot.slane %v5478_v14, 4  ;;  %v10623_v63 = vpop.f32.mrf.mxu0 }
0x115a   :  { %v5506_v47 = vsub.f32 %v4955_v56, %v5456_v48  ;;  %v5463_v62 = vmax.f32 %v5461_v29, %v5462_v4  ;;  %v5469_v2 = vrot.slane %v5468_v55, 1 }
0x115b   :  { %v5474_v53 = vrot.slane %v5473_v46, 2  ;;  %v5480_v37 = vmax.f32 %v5478_v14, %v5479_v21  ;;  %v5305_v45 = vpop.f32.mrf.mxu1 }
0x115c   :  { %v5514_v36 = vmul.f32 1.442695, %v5506_v47  ;;  %v5507_v26 = vsub.f32 %v5025_v33, %v5463_v62  ;;  %v5470_v11 = vmax.f32 %v5468_v55, %v5469_v2  ;;  %v5485_v52 = vsel %vm5449_vm7, %v5305_v45, -inf }
0x115d   :  { %v5475_v35 = vmax.f32 %v5473_v46, %v5474_v53  ;;  %v5481_v61 = vrot.slane %v5480_v37, 2  ;;  %v5486_v41 = vrot.slane %v5485_v52, 4  ;;  %v10628_v10 = vpop.f32.mrf.mxu1 }
0x115e   :  { %11033 = vpow2.f32 %v5514_v36  ;;  %v5516_v39 = vmul.f32 1.442695, %v5507_v26  ;;  %v5508_v59 = vsub.f32 %v5095_v3, %v5470_v11 }
0x115f   :  { %v5476_v43 = vrot.slane %v5475_v35, 1  ;;  %v5482_v31 = vmax.f32 %v5480_v37, %v5481_v61  ;;  %v5487_v56 = vmax.f32 %v5485_v52, %v5486_v41  ;;  %v5375_v60 = vpop.f32.mrf.mxu0 }
0x1160   :  { %11035 = vpow2.f32 %v5516_v39  ;;  %v5518_v34 = vmul.f32 1.442695, %v5508_v59  ;;  %v5492_v54 = vsel %vm5449_vm7, %v5375_v60, -inf }
0x1161   :  { %v5477_v9 = vmax.f32 %v5475_v35, %v5476_v43  ;;  %v5483_v33 = vrot.slane %v5482_v31, 1  ;;  %v5488_v7 = vrot.slane %v5487_v56, 2  ;;  %v5493_v23 = vrot.slane %v5492_v54, 4  ;;  %v10633_v40 = vpop.f32.mrf.mxu0 }
0x1162   :  { %11037 = vpow2.f32 %v5518_v34 }
0x1163   :  { %v5509_v58 = vsub.f32 %v5165_v38, %v5477_v9  ;;  %v5484_v22 = vmax.f32 %v5482_v31, %v5483_v33  ;;  %v5489_v5 = vmax.f32 %v5487_v56, %v5488_v7  ;;  %v5494_v42 = vmax.f32 %v5492_v54, %v5493_v23  ;;  %v5445_v57 = vpop.f32.mrf.mxu1 }
0x1164   :  { %v5499_v3 = vsel %vm5449_vm7, %v5445_v57, -inf }
0x1165   :  { %v5520_v28 = vmul.f32 1.442695, %v5509_v58  ;;  %v5510_v32 = vsub.f32 %v5235_v15, %v5484_v22  ;;  %v5490_v1 = vrot.slane %v5489_v5, 1  ;;  %v5495_v51 = vrot.slane %v5494_v42, 2  ;;  %v10638_v29 = vpop.f32.mrf.mxu1 }
0x1166   :  { %v5500_v0 = vrot.slane %v5499_v3, 4 }
0x1167   :  { %11039 = vpow2.f32 %v5520_v28  ;;  %v5522_v16 = vmul.f32 1.442695, %v5510_v32  ;;  %v5491_v20 = vmax.f32 %v5489_v5, %v5490_v1  ;;  %v5496_v19 = vmax.f32 %v5494_v42, %v5495_v51 }
0x1168   :  { %v5501_v48 = vmax.f32 %v5499_v3, %v5500_v0 }
0x1169   :  { %11041 = vpow2.f32 %v5522_v16  ;;  %v5511_v4 = vsub.f32 %v5305_v45, %v5491_v20  ;;  %v5497_v38 = vrot.slane %v5496_v19, 1 }
0x116a   :  { %v5502_v55 = vrot.slane %v5501_v48, 2 }
0x116b   :  { %v13938_v14 = vpop.eup %11033  ;;  %v5524_v46 = vmul.f32 1.442695, %v5511_v4  ;;  %v5498_v21 = vmax.f32 %v5496_v19, %v5497_v38 }
0x116c   :  { %v5530_v15 = vsel %vm5449_vm7, %v13938_v14, 0.0  ;;  %v5503_v63 = vmax.f32 %v5501_v48, %v5502_v55 }
0x116d   :  { %v13942_v47 = vpop.eup %11035  ;;  %v5531_v62 = vrot.slane %v5530_v15, 4  ;;  %11043 = vpow2.f32 %v5524_v46  ;;  %v5512_v2 = vsub.f32 %v5375_v60, %v5498_v21 }
0x116e   :  { %v5537_v53 = vsel %vm5449_vm7, %v13942_v47, 0.0  ;;  %v5504_v37 = vrot.slane %v5503_v63, 1 }
0x116f   :  { %v13946_v45 = vpop.eup %11037  ;;  %v5532_v36 = vadd.f32 %v5531_v62, %v5530_v15  ;;  %v5538_v26 = vrot.slane %v5537_v53, 4  ;;  %v5526_v11 = vmul.f32 1.442695, %v5512_v2 }
0x1170   :  { %v5544_v52 = vsel %vm5449_vm7, %v13946_v45, 0.0  ;;  %v5505_v35 = vmax.f32 %v5503_v63, %v5504_v37 }
0x1171   :  { %v5539_v61 = vadd.f32 %v5538_v26, %v5537_v53  ;;  %v5545_v41 = vrot.slane %v5544_v52, 4  ;;  %11045 = vpow2.f32 %v5526_v11  ;;  %v5533_v10 = vrot.slane %v5532_v36, 2 }
0x1172   :  { %v5513_v39 = vsub.f32 %v5445_v57, %v5505_v35 }
0x1173   :  { %v5540_v59 = vrot.slane %v5539_v61, 2  ;;  %v5546_v43 = vadd.f32 %v5545_v41, %v5544_v52  ;;  %v5534_v31 = vadd.f32 %v5533_v10, %v5532_v36 }
0x1174   :  { %v13950_v56 = vpop.eup %11039  ;;  %v5528_v60 = vmul.f32 1.442695, %v5513_v39 }
0x1175   :  { %v5551_v34 = vsel %vm5449_vm7, %v13950_v56, 0.0  ;;  %v5535_v54 = vrot.slane %v5534_v31, 1  ;;  %v5547_v9 = vrot.slane %v5546_v43, 2  ;;  %v5541_v33 = vadd.f32 %v5540_v59, %v5539_v61 }
0x1176   :  { %v13954_v7 = vpop.eup %11041  ;;  %v5552_v23 = vrot.slane %v5551_v34, 4  ;;  %11047 = vpow2.f32 %v5528_v60 }
0x1177   :  { %v5558_v40 = vsel %vm5449_vm7, %v13954_v7, 0.0  ;;  %v5536_v58 = vadd.f32 %v5535_v54, %v5534_v31  ;;  %v5548_v22 = vadd.f32 %v5547_v9, %v5546_v43  ;;  %v5542_v5 = vrot.slane %v5541_v33, 1 }
0x1178   :  { %v5553_v42 = vadd.f32 %v5552_v23, %v5551_v34  ;;  %v5559_v57 = vrot.slane %v5558_v40, 4 }
0x1179   :  { %11049 = vrcp.f32 %v5536_v58  ;;  %v5549_v3 = vrot.slane %v5548_v22, 1  ;;  %v5543_v28 = vadd.f32 %v5542_v5, %v5541_v33 }
0x117a   :  { %v11044_v32 = vpop.eup %11043  ;;  %v5554_v1 = vrot.slane %v5553_v42, 2  ;;  %v5560_v51 = vadd.f32 %v5559_v57, %v5558_v40 }
0x117b   :  { %v5565_v29 = vsel %vm5449_vm7, %v11044_v32, 0.0  ;;  %v5550_v0 = vadd.f32 %v5549_v3, %v5548_v22  ;;  %11051 = vrcp.f32 %v5543_v28 }
0x117c   :  { %v5561_v16 = vrot.slane %v5560_v51, 2  ;;  %v5566_v20 = vrot.slane %v5565_v29, 4  ;;  %v5555_v19 = vadd.f32 %v5554_v1, %v5553_v42 }
0x117d   :  { %11053 = vrcp.f32 %v5550_v0 }
0x117e   :  { %v11046_v48 = vpop.eup %11045  ;;  %v5567_v4 = vadd.f32 %v5566_v20, %v5565_v29  ;;  %v5556_v38 = vrot.slane %v5555_v19, 1  ;;  %v5562_v55 = vadd.f32 %v5561_v16, %v5560_v51  ;;  %v6483_v29 = vld [vmem:[%s14647_s14 + $0x78] sm:$0xff]  ;;  %v6482_v16 = vld [vmem:[%s14647_s14 + $0x70] sm:$0xff]  ;;  %v6496_v20 = vld [vmem:[%s14648_s15 + $0x60] sm:$0xff] }
0x117f   :  { %v5572_v46 = vsel %vm5449_vm7, %v11046_v48, 0.0 }
0x1180   :  { %v5568_v21 = vrot.slane %v5567_v4, 2  ;;  %v5573_v15 = vrot.slane %v5572_v46, 4  ;;  %v5557_v63 = vadd.f32 %v5556_v38, %v5555_v19  ;;  %v5563_v62 = vrot.slane %v5562_v55, 1  ;;  %v6481_v19 = vld [vmem:[%s14647_s14 + $0x68] sm:$0xff]  ;;  %v6479_v38 = vld [vmem:[%s14647_s14 + $0x58] sm:$0xff] }
0x1182   :  { %v5574_v2 = vadd.f32 %v5573_v15, %v5572_v46  ;;  %11055 = vrcp.f32 %v5557_v63  ;;  %v5564_v53 = vadd.f32 %v5563_v62, %v5562_v55  ;;  %v5569_v37 = vadd.f32 %v5568_v21, %v5567_v4  ;;  %v6480_v4 = vld [vmem:[%s14647_s14 + $0x60] sm:$0xff]  ;;  %v6478_v55 = vld [vmem:[%s14647_s14 + $0x50] sm:$0xff]  ;;  %v6477_v46 = vld [vmem:[%s14647_s14 + $0x48] sm:$0xff] }
0x1183   :  { %v11048_v36 = vpop.eup %11047  ;;  %v6476_v21 = vld [vmem:[%s14647_s14 + $0x40] sm:$0xff]  ;;  %v6475_v15 = vld [vmem:[%s14647_s14 + $0x38] sm:$0xff]  ;;  %v6474_v63 = vld [vmem:[%s14647_s14 + $0x30] sm:$0xff] }
0x1184   :  { %v5575_v26 = vrot.slane %v5574_v2, 2  ;;  %v5579_v11 = vsel %vm5449_vm7, %v11048_v36, 0.0  ;;  %11057 = vrcp.f32 %v5564_v53  ;;  %v5570_v52 = vrot.slane %v5569_v37, 1  ;;  %v6473_v62 = vld [vmem:[%s14647_s14 + $0x28] sm:$0xff]  ;;  %v6471_v53 = vld [vmem:[%s14647_s14 + $0x18] sm:$0xff] }
0x1185   :  { %v5580_v35 = vrot.slane %v5579_v11, 4 }
0x1186   :  { %v11050_v61 = vpop.eup %11049  ;;  %v5576_v41 = vadd.f32 %v5575_v26, %v5574_v2  ;;  %v5571_v10 = vadd.f32 %v5570_v52, %v5569_v37  ;;  %v6472_v2 = vld [vmem:[%s14647_s14 + $0x20] sm:$0xff]  ;;  %v6470_v37 = vld [vmem:[%s14647_s14 + $0x10] sm:$0xff] }
0x1187   :  { %v5581_v39 = vadd.f32 %v5580_v35, %v5579_v11  ;;  %v5587_v59 = vmul.f32 %v11050_v61, %v13938_v14  ;;  %v6468_v26 = vld [vmem:[%s14647_s14] sm:$0xff]  ;;  %v6489_v11 = vld [vmem:[%s14648_s15 + $0x28] sm:$0xff]  ;;  %v6487_v35 = vld [vmem:[%s14648_s15 + $0x18] sm:$0xff] }
0x1188   :  { %v11052_v43 = vpop.eup %11051  ;;  %v5577_v31 = vrot.slane %v5576_v41, 1  ;;  %11059 = vrcp.f32 %v5571_v10  ;;  %v6488_v52 = vld [vmem:[%s14648_s15 + $0x20] sm:$0xff]  ;;  %v6486_v61 = vld [vmem:[%s14648_s15 + $0x10] sm:$0xff] }
0x1189   :  { %v5582_v60 = vrot.slane %v5581_v39, 2  ;;  %5602 = vxpose.xlu0.b32.start.end [1/1] (short) (narrow) %v5587_v59, 8  ;;  %v5589_v33 = vmul.f32 %v11052_v43, %v13942_v47  ;;  %v6484_v10 = vld [vmem:[%s14648_s15] sm:$0xff] }
0x118a   :  { %v11054_v34 = vpop.eup %11053  ;;  %v5578_v54 = vadd.f32 %v5577_v31, %v5576_v41  ;;  %v6485_v41 = vld [vmem:[%s14648_s15 + $0x8] sm:$0xff] }
0x118b   :  { %v5591_v9 = vmul.f32 %v11054_v34, %v13946_v45  ;;  %v5583_v23 = vadd.f32 %v5582_v60, %v5581_v39 }
0x118c   :  { %11061 = vrcp.f32 %v5578_v54 }
0x118d   :  { %5820 = vxpose.xlu1.b32.start.end [1/1] (short) (narrow) %v5591_v9, 8  ;;  %5712 = vxpose.xlu0.b32.start.end [1/1] (short) (narrow) %v5589_v33, 8  ;;  %v5584_v40 = vrot.slane %v5583_v23, 1 }
0x118f   :  { %v11056_v58 = vpop.eup %11055  ;;  %v5585_v22 = vadd.f32 %v5584_v40, %v5583_v23 }
0x1190   :  { %v5593_v14 = vmul.f32 %v11056_v58, %v13950_v56 }
0x1191   :  { %v11058_v5 = vpop.eup %11057  ;;  %11063 = vrcp.f32 %v5585_v22 }
0x1192   :  { %5928 = vxpose.xlu1.b32.start.end [1/1] (short) (narrow) %v5593_v14, 8  ;;  %v5595_v42 = vmul.f32 %v11058_v5, %v13954_v7 }
0x1194   :  { %6036 = vxpose.xlu0.b32.start.end [1/1] (short) (narrow) %v5595_v42, 8 }
0x1195   :  { %v11060_v57 = vpop.eup %11059 }
0x1196   :  { %v5597_v3 = vmul.f32 %v11060_v57, %v11044_v32 }
0x1198   :  { %6144 = vxpose.xlu1.b32.start.end [1/1] (short) (narrow) %v5597_v3, 8 }
0x1199   :  { %v11062_v45 = vpop.eup %11061 }
0x119a   :  { %v5599_v47 = vmul.f32 %v11062_v45, %v11046_v48  ;;  %v6495_v48 = vld [vmem:[%s14648_s15 + $0x58] sm:$0xff] }
0x119c   :  { %6252 = vxpose.xlu0.b32.start.end [1/1] (short) (narrow) %v5599_v47, 8 }
0x119e   :  { %v11064_v28 = vpop.eup %11063 }
0x119f   :  { %v5601_v1 = vmul.f32 %v11064_v28, %v11048_v36  ;;  %v6469_v36 = vld [vmem:[%s14647_s14 + $0x8] sm:$0xff] }
0x11a1   :  { %6360 = vxpose.xlu1.b32.start.end [1/1] (short) (narrow) %v5601_v1, 8 }
0x1205   :  { %v5618_v51 = vpop.trf.xlu0 }
0x1206   :  { %10642 = vmatmul.mubr.msk.f32.vlgmr.msra.gmra.mxu0 %vm5634_vm8, %v5618_v51 }
0x1207   :  { %10650 = vmatpush3.msk.msra.mxu0 %vm5638_vm6, %v13590_v8  ;;  %10651 = vmatprep.mubr.msk.f32.mxu0 %vm11369_vm0, %v14784_v6 }
0x1208   :  { %10659 = vmatprep.subr.mxu0 %v14784_v6 }
0x1209   :  { %v5836_v56 = vpop.trf.xlu1  ;;  %v5728_v7 = vpop.trf.xlu0 }
0x120a   :  { %10647 = vmatmul.mubr.msk.f32.vlgmr.msra.gmra.mxu1 %vm5634_vm8, %v5728_v7  ;;  %10652 = vmatmul.mubr.msk.f32.vlgmr.msra.gmra.mxu0 %vm5634_vm8, %v5836_v56 }
0x120b   :  { %10655 = vmatpush3.msk.msra.mxu1 %vm5638_vm6, %v13618_v49  ;;  %10660 = vmatpush3.msk.msra.mxu0 %vm5638_vm6, %v13599_v50  ;;  %v6499_v49 = vld [vmem:[%s14648_s15 + $0x78] sm:$0xff] }
0x120c   :  { %10656 = vmatprep.mubr.msk.f32.mxu1 %vm11369_vm0, %v14784_v6  ;;  %10661 = vmatprep.mubr.msk.f32.mxu0 %vm11369_vm0, %v14784_v6 }
0x120d   :  { %10664 = vmatprep.subr.mxu1 %v14784_v6  ;;  %10669 = vmatprep.subr.mxu0 %v14784_v6 }
0x120e   :  { %v5944_v8 = vpop.trf.xlu1 }
0x120f   :  { %10657 = vmatmul.mubr.msk.f32.vlgmr.msra.gmra.mxu1 %vm5634_vm8, %v5944_v8 }
0x1210   :  { %v6052_v32 = vpop.trf.xlu0  ;;  %10665 = vmatpush3.msk.msra.mxu1 %vm5638_vm6, %v13624_v25  ;;  %10666 = vmatprep.mubr.msk.f32.mxu1 %vm11369_vm0, %v14784_v6 }
0x1211   :  { %10662 = vmatmul.mubr.msk.f32.vlgmr.msra.gmra.mxu0 %vm5634_vm8, %v6052_v32  ;;  %10674 = vmatprep.subr.mxu1 %v14784_v6 }
0x1212   :  { %10670 = vmatpush3.msk.msra.mxu0 %vm5638_vm6, %v13635_v18  ;;  %10671 = vmatprep.mubr.msk.f32.mxu0 %vm11369_vm0, %v14784_v6  ;;  %v6498_v18 = vld [vmem:[%s14648_s15 + $0x70] sm:$0xff] }
0x1213   :  { %10679 = vmatprep.subr.mxu0 %v14784_v6 }
0x1214   :  { %v6160_v50 = vpop.trf.xlu1 }
0x1215   :  { %10667 = vmatmul.mubr.msk.f32.vlgmr.msra.gmra.mxu1 %vm5634_vm8, %v6160_v50 }
0x1216   :  { %10675 = vmatpush3.msk.msra.mxu1 %vm5638_vm6, %v13639_v17  ;;  %10676 = vmatprep.mubr.msk.f32.mxu1 %vm11369_vm0, %v14784_v6  ;;  %v6497_v17 = vld [vmem:[%s14648_s15 + $0x68] sm:$0xff] }
0x1217   :  { %10726 = vmatprep.subr.mxu1 %v14784_v6 }
0x1218   :  { %v6268_v25 = vpop.trf.xlu0 }
0x1219   :  { %10672 = vmatmul.mubr.msk.f32.vlgmr.msra.gmra.mxu0 %vm5634_vm8, %v6268_v25 }
0x121a   :  { %10680 = vmatpush3.msra.mxu0 %v6499_v49  ;;  %10711 = vmatprep.mubr.msk.f32.mxu0 %vm11369_vm0, %v14784_v6 }
0x121b   :  { %10681 = vmatprep.subr.mxu0 %v14784_v6 }
0x121c   :  { %10682 = vmatpush3.msra.mxu0 %v6498_v18 }
0x121d   :  { %v6376_v0 = vpop.trf.xlu1  ;;  %10683 = vmatprep.subr.mxu0 %v14784_v6 }
0x121e   :  { %10677 = vmatmul.mubr.msk.f32.vlgmr.msra.gmra.mxu1 %vm5634_vm8, %v6376_v0  ;;  %10684 = vmatpush3.msra.mxu0 %v6497_v17 }
0x121f   :  { %10727 = vmatpush3.msra.mxu1 %v6483_v29  ;;  %10758 = vmatprep.mubr.msk.f32.mxu1 %vm11369_vm0, %v14784_v6 }
0x1220   :  { %10728 = vmatprep.subr.mxu1 %v14784_v6  ;;  %10685 = vmatprep.subr.mxu0 %v14784_v6 }
0x1221   :  { %10729 = vmatpush3.msra.mxu1 %v6482_v16  ;;  %10686 = vmatpush3.msra.mxu0 %v6496_v20 }
0x1222   :  { %10730 = vmatprep.subr.mxu1 %v14784_v6  ;;  %10687 = vmatprep.subr.mxu0 %v14784_v6 }
0x1223   :  { %10731 = vmatpush3.msra.mxu1 %v6481_v19  ;;  %10688 = vmatpush3.msra.mxu0 %v6495_v48 }
0x1224   :  { %10732 = vmatprep.subr.mxu1 %v14784_v6  ;;  %10689 = vmatprep.subr.mxu0 %v14784_v6 }
0x1225   :  { %10733 = vmatpush3.msra.mxu1 %v6480_v4 }
0x1226   :  { %10734 = vmatprep.subr.mxu1 %v14784_v6 }
0x1227   :  { %10735 = vmatpush3.msra.mxu1 %v6479_v38 }
0x1228   :  { %10736 = vmatprep.subr.mxu1 %v14784_v6 }
0x1229   :  { %10737 = vmatpush3.msra.mxu1 %v6478_v55 }
0x122a   :  { %10738 = vmatprep.subr.mxu1 %v14784_v6 }
0x122b   :  { %10739 = vmatpush3.msra.mxu1 %v6477_v46 }
0x122c   :  { %10740 = vmatprep.subr.mxu1 %v14784_v6 }
0x122d   :  { %10741 = vmatpush3.msra.mxu1 %v6476_v21 }
0x122e   :  { %10742 = vmatprep.subr.mxu1 %v14784_v6 }
0x122f   :  { %10743 = vmatpush3.msra.mxu1 %v6475_v15 }
0x1230   :  { %10744 = vmatprep.subr.mxu1 %v14784_v6 }
0x1231   :  { %10745 = vmatpush3.msra.mxu1 %v6474_v63 }
0x1232   :  { %10746 = vmatprep.subr.mxu1 %v14784_v6 }
0x1233   :  { %10747 = vmatpush3.msra.mxu1 %v6473_v62 }
0x1234   :  { %10748 = vmatprep.subr.mxu1 %v14784_v6 }
0x1235   :  { %10749 = vmatpush3.msra.mxu1 %v6472_v2 }
0x1236   :  { %10750 = vmatprep.subr.mxu1 %v14784_v6 }
0x1237   :  { %10751 = vmatpush3.msra.mxu1 %v6471_v53 }
0x1238   :  { %10752 = vmatprep.subr.mxu1 %v14784_v6 }
0x1239   :  { %10753 = vmatpush3.msra.mxu1 %v6470_v37 }
0x123a   :  { %10754 = vmatprep.subr.mxu1 %v14784_v6 }
0x123b   :  { %10755 = vmatpush3.msra.mxu1 %v6469_v36 }
0x123c   :  { %10756 = vmatprep.subr.mxu1 %v14784_v6 }
0x123d   :  { %10757 = vmatpush3.msra.mxu1 %v6468_v26 }
0x123e   :  { %10759 = vmatmul.mubr.f32.vlgmr.msra.gmra.mxu1 %v13889_v44  ;;  %10820 = vmatprep.subr.mxu1 %v14784_v6  ;;  %v6494_v44 = vld [vmem:[%s14648_s15 + $0x50] sm:$0xff] }
0x123f   :  { %10761 = vmatprep.mubr.msk.f32.mxu1 %vm11369_vm0, %v14784_v6  ;;  %10690 = vmatpush3.msra.mxu0 %v6494_v44 }
0x1240   :  { %10691 = vmatprep.subr.mxu0 %v14784_v6 }
0x1242   :  { %10762 = vmatmul.mubr.f32.gmra.mxu1 %v13916_v12  ;;  %v6493_v12 = vld [vmem:[%s14648_s15 + $0x48] sm:$0xff] }
0x1243   :  { %10764 = vmatprep.mubr.msk.f32.mxu1 %vm11369_vm0, %v14784_v6  ;;  %10692 = vmatpush3.msra.mxu0 %v6493_v12 }
0x1244   :  { %10693 = vmatprep.subr.mxu0 %v14784_v6 }
0x1246   :  { %10765 = vmatmul.mubr.f32.gmra.mxu1 %v13920_v24  ;;  %v6492_v24 = vld [vmem:[%s14648_s15 + $0x40] sm:$0xff] }
0x1247   :  { %10767 = vmatprep.mubr.msk.f32.mxu1 %vm11369_vm0, %v14784_v6  ;;  %10694 = vmatpush3.msra.mxu0 %v6492_v24 }
0x1248   :  { %10695 = vmatprep.subr.mxu0 %v14784_v6 }
0x124a   :  { %10768 = vmatmul.mubr.f32.gmra.mxu1 %v13924_v27  ;;  %v6491_v27 = vld [vmem:[%s14648_s15 + $0x38] sm:$0xff] }
0x124b   :  { %10770 = vmatprep.mubr.msk.f32.mxu1 %vm11369_vm0, %v14784_v6  ;;  %10696 = vmatpush3.msra.mxu0 %v6491_v27 }
0x124c   :  { %10697 = vmatprep.subr.mxu0 %v14784_v6 }
0x124e   :  { %10771 = vmatmul.mubr.f32.gmra.mxu1 %v13928_v30  ;;  %v6490_v30 = vld [vmem:[%s14648_s15 + $0x30] sm:$0xff] }
0x124f   :  { %10814 = vmatprep.mubr.msk.f32.mxu1 %vm11369_vm0, %v14784_v6  ;;  %10698 = vmatpush3.msra.mxu0 %v6490_v30 }
0x1250   :  { %10699 = vmatprep.subr.mxu0 %v14784_v6 }
0x1251   :  { %10700 = vmatpush3.msra.mxu0 %v6489_v11 }
0x1252   :  { %10701 = vmatprep.subr.mxu0 %v14784_v6 }
0x1253   :  { %10702 = vmatpush3.msra.mxu0 %v6488_v52 }
0x1254   :  { %10703 = vmatprep.subr.mxu0 %v14784_v6 }
0x1255   :  { %10704 = vmatpush3.msra.mxu0 %v6487_v35 }
0x1256   :  { %10705 = vmatprep.subr.mxu0 %v14784_v6 }
0x1257   :  { %10706 = vmatpush3.msra.mxu0 %v6486_v61 }
0x1258   :  { %10707 = vmatprep.subr.mxu0 %v14784_v6 }
0x1259   :  { %10708 = vmatpush3.msra.mxu0 %v6485_v41 }
0x125a   :  { %10709 = vmatprep.subr.mxu0 %v14784_v6 }
0x125b   :  { %10710 = vmatpush3.msra.mxu0 %v6484_v10 }
0x125c   :  { %10773 = vmatprep.subr.mxu0 %v14784_v6 }
0x12c6   :  { %v5708_v39 = vpop.f32.mrf.mxu0 }
0x12c7   :  { %v6508_v59 = vcombine.high %v5708_v39, %v5708_v39  ;;  %v6515_v43 = vrot.slane %v5708_v39, %v13323_v13 }
0x12c8   :  { %v10643_v31 = vpop.f32.mrf.mxu0 }
0x12c9   :  { %v6522_v60 = vrot.slane %v6508_v59, %v13323_v13  ;;  %v6523_v34 = vcombine.high %v6515_v43, %v6515_v43  ;;  %v6530_v33 = vrot.slane %v6515_v43, %v13323_v13 }
0x12ca   :  { %v5816_v54 = vpop.f32.mrf.mxu1  ;;  %v5924_v9 = vpop.f32.mrf.mxu0 }
0x12cb   :  { %v6544_v23 = vrot.slane %v6523_v34, %v13323_v13  ;;  %v6547_v40 = vcombine.high %v5816_v54, %v5816_v54  ;;  %v6554_v58 = vrot.slane %v5816_v54, %v13323_v13  ;;  %v6537_v22 = vrot.slane %v6522_v60, %v13323_v13 }
0x12cc   :  { %v6586_v14 = vcombine.high %v5924_v9, %v5924_v9  ;;  %v6593_v5 = vrot.slane %v5924_v9, %v13323_v13  ;;  %v10648_v42 = vpop.f32.mrf.mxu1  ;;  %v10653_v57 = vpop.f32.mrf.mxu0 }
0x12cd   :  { %v6820_v3 = vcombine.low %v6530_v33, %v6544_v23  ;;  %v9411_v45 = vcombine.high %v6530_v33, %v6544_v23  ;;  %v6561_v47 = vrot.slane %v6547_v40, %v13323_v13  ;;  %v6562_v28 = vcombine.high %v6554_v58, %v6554_v58 }
0x12ce   :  { %v6569_v1 = vrot.slane %v6554_v58, %v13323_v13  ;;  %v6600_v51 = vrot.slane %v6586_v14, %v13323_v13  ;;  %v6601_v56 = vcombine.high %v6593_v5, %v6593_v5  ;;  %v6608_v7 = vrot.slane %v6593_v5, %v13323_v13 }
0x12cf   :  { %v14163_v8 = vrot.slane %v6820_v3, %v13323_v13  ;;  %v14166_v32 = vrot.slane %v9411_v45, %v13323_v13  ;;  %v6583_v50 = vrot.slane %v6562_v28, %v13323_v13  ;;  %v6032_v49 = vpop.f32.mrf.mxu1  ;;  %v6576_v25 = vrot.slane %v6561_v47, %v13323_v13 }
0x12d0   :  { %v6584_v18 = vcombine.high %v6569_v1, %v6569_v1  ;;  %v6822_v17 = vcombine.low %v6537_v22, %v6569_v1  ;;  %v6622_v29 = vrot.slane %v6601_v56, %v13323_v13  ;;  %v6615_v16 = vrot.slane %v6600_v51, %v13323_v13 }
0x12d1   :  { %v6585_v0 = vcombine.high %v6583_v50, %v6583_v50  ;;  %v6625_v20 = vcombine.high %v6032_v49, %v6032_v49  ;;  %v6632_v19 = vrot.slane %v6032_v49, %v13323_v13  ;;  %v10658_v48 = vpop.f32.mrf.mxu1  ;;  %v6140_v4 = vpop.f32.mrf.mxu0  ;;  %v6852_v38 = vcombine.low %v14163_v8, %v14166_v32 }
0x12d2   :  { %v6823_v55 = vcombine.low %v6583_v50, %v6584_v18  ;;  %v6870_v46 = vcombine.low %v6608_v7, %v6622_v29  ;;  %v9412_v21 = vcombine.high %v6608_v7, %v6622_v29  ;;  %v6844_v37 = vrot.slane %v6822_v17, %v13323_v13 }
0x12d3   :  { %v14175_v15 = vcombine.low %v6585_v0, %v6576_v25  ;;  %v6639_v63 = vrot.slane %v6625_v20, %v13323_v13  ;;  %v6640_v62 = vcombine.high %v6632_v19, %v6632_v19  ;;  %v6647_v2 = vrot.slane %v6632_v19, %v13323_v13  ;;  %v10663_v53 = vpop.f32.mrf.mxu0 }
0x12d4   :  { %v6851_v36 = vrot.slane %v6823_v55, %v13323_v13  ;;  %v6886_v26 = vrot.slane %v6870_v46, %v13323_v13  ;;  %v6664_v44 = vcombine.high %v6140_v4, %v6140_v4  ;;  %v6893_v12 = vrot.slane %v9412_v21, %v13323_v13 }
0x12d5   :  { %v6654_v24 = vrot.slane %v6639_v63, %v13323_v13  ;;  %v6661_v27 = vrot.slane %v6640_v62, %v13323_v13  ;;  %v6662_v30 = vcombine.high %v6647_v2, %v6647_v2  ;;  %v6248_v11 = vpop.f32.mrf.mxu1  ;;  %v6879_v52 = vrot.slane %v14175_v15, %v13323_v13 }
0x12d6   :  { %v6872_v35 = vcombine.low %v6615_v16, %v6647_v2  ;;  %v6671_v61 = vrot.slane %v6140_v4, %v13323_v13  ;;  %v6678_v41 = vrot.slane %v6664_v44, %v13323_v13  ;;  %v6703_v59 = vcombine.high %v6248_v11, %v6248_v11 }
0x12d7   :  { %v6663_v10 = vcombine.high %v6661_v27, %v6661_v27  ;;  %v14189_v39 = vcombine.low %v6661_v27, %v6662_v30  ;;  %v6710_v43 = vrot.slane %v6248_v11, %v13323_v13  ;;  %v10668_v31 = vpop.f32.mrf.mxu1  ;;  %v6853_v60 = vcombine.low %v6844_v37, %v6851_v36 }
0x12d8   :  { %v6679_v34 = vcombine.high %v6671_v61, %v6671_v61  ;;  %v6686_v54 = vrot.slane %v6671_v61, %v13323_v13  ;;  %v6693_v9 = vrot.slane %v6678_v41, %v13323_v13  ;;  %v6900_v33 = vrot.slane %v6872_v35, %v13323_v13 }
0x12d9   :  { %v6919_v23 = vcombine.low %v6663_v10, %v6654_v24  ;;  %v6717_v40 = vrot.slane %v6703_v59, %v13323_v13  ;;  %v6718_v58 = vcombine.high %v6710_v43, %v6710_v43  ;;  %v6356_v22 = vpop.f32.mrf.mxu0  ;;  %v6725_v5 = vrot.slane %v6710_v43, %v13323_v13 }
0x12da   :  { %v6700_v14 = vrot.slane %v6679_v34, %v13323_v13  ;;  %v6742_v42 = vcombine.high %v6356_v22, %v6356_v22  ;;  %v6749_v57 = vrot.slane %v6356_v22, %v13323_v13  ;;  %v6928_v3 = vrot.slane %v14189_v39, %v13323_v13 }
0x12db   :  { %v6935_v45 = vrot.slane %v6919_v23, %v13323_v13  ;;  %v6732_v47 = vrot.slane %v6717_v40, %v13323_v13  ;;  %v6739_v28 = vrot.slane %v6718_v58, %v13323_v13  ;;  %v10673_v1 = vpop.f32.mrf.mxu0  ;;  %v6740_v7 = vcombine.high %v6725_v5, %v6725_v5 }
0x12dc   :  { %v6920_v51 = vcombine.low %v6686_v54, %v6700_v14  ;;  %v9413_v56 = vcombine.high %v6686_v54, %v6700_v14  ;;  %v6967_v8 = vcombine.low %v6693_v9, %v6725_v5  ;;  %v6756_v50 = vrot.slane %v6742_v42, %v13323_v13 }
0x12dd   :  { %v6741_v32 = vcombine.high %v6739_v28, %v6739_v28  ;;  %v6757_v49 = vcombine.high %v6749_v57, %v6749_v57  ;;  %v6764_v25 = vrot.slane %v6749_v57, %v13323_v13  ;;  %v6968_v29 = vcombine.low %v6739_v28, %v6740_v7 }
0x12de   :  { %v6942_v18 = vrot.slane %v6920_v51, %v13323_v13  ;;  %v6949_v17 = vrot.slane %v9413_v56, %v13323_v13  ;;  %v6464_v0 = vpop.f32.mrf.mxu1  ;;  %v6860_v16 = vrot.slane %v6852_v38, %v13323_v13  ;;  %v6977_v19 = vrot.slane %v6967_v8, %v13323_v13 }
0x12df   :  { %v6969_v20 = vcombine.low %v6741_v32, %v6732_v47  ;;  %v6778_v48 = vrot.slane %v6757_v49, %v13323_v13  ;;  %v6781_v4 = vcombine.high %v6464_v0, %v6464_v0  ;;  %v6771_v55 = vrot.slane %v6756_v50, %v13323_v13 }
0x12e0   :  { %v6788_v46 = vrot.slane %v6464_v0, %v13323_v13  ;;  %v10678_v21 = vpop.f32.mrf.mxu1  ;;  %v6867_v15 = vrot.slane %v6853_v60, %v13323_v13  ;;  %v6901_v63 = vcombine.low %v6879_v52, %v6886_v26  ;;  %v6984_v62 = vrot.slane %v6968_v29, %v13323_v13  ;;  %v8254_v29 = vld [vmem:[%s14650_s17 + $0x70] sm:$0xff]  ;;  %v8253_v0 = vld [vmem:[%s14650_s17 + $0x68] sm:$0xff] }
0x12e1   :  { %v6991_v2 = vrot.slane %v6969_v20, %v13323_v13  ;;  %v6970_v53 = vcombine.low %v6764_v25, %v6778_v48  ;;  %v6795_v38 = vrot.slane %v6781_v4, %v13323_v13  ;;  %v6902_v24 = vcombine.low %v6893_v12, %v6900_v33  ;;  %v8251_v20 = vld [vmem:[%s14650_s17 + $0x58] sm:$0xff]  ;;  %v8248_v4 = vld [vmem:[%s14650_s17 + $0x40] sm:$0xff]  ;;  %v8245_v21 = vld [vmem:[%s14650_s17 + $0x28] sm:$0xff] }
0x12e2   :  { %v6796_v37 = vcombine.high %v6788_v46, %v6788_v46  ;;  %v6803_v36 = vrot.slane %v6788_v46, %v13323_v13  ;;  %v6868_v44 = vcombine.low %v6860_v16, %v6867_v15  ;;  %v9414_v30 = vcombine.high %v6764_v25, %v6778_v48  ;;  %v8252_v16 = vld [vmem:[%s14650_s17 + $0x60] sm:$0xff]  ;;  %v8249_v48 = vld [vmem:[%s14650_s17 + $0x48] sm:$0xff]  ;;  %v8246_v46 = vld [vmem:[%s14650_s17 + $0x30] sm:$0xff] }
0x12e3   :  { %v6998_v27 = vrot.slane %v6970_v53, %v13323_v13  ;;  %v6810_v11 = vrot.slane %v6795_v38, %v13323_v13  ;;  %v6909_v35 = vrot.slane %v6901_v63, %v13323_v13  ;;  %v6916_v41 = vrot.slane %v6902_v24, %v13323_v13  ;;  %v8244_v15 = vld [vmem:[%s14650_s17 + $0x20] sm:$0xff]  ;;  %v8243_v63 = vld [vmem:[%s14650_s17 + $0x18] sm:$0xff] }
0x12e4   :  { %v6817_v26 = vrot.slane %v6796_v37, %v13323_v13  ;;  %v6818_v52 = vcombine.high %v6803_v36, %v6803_v36  ;;  %v7017_v61 = vcombine.low %v6771_v55, %v6803_v36  ;;  %10712 = vmatmul.mubr.f32.vlgmr.msra.gmra.mxu0 %v6868_v44  ;;  %v6950_v10 = vcombine.low %v6928_v3, %v6935_v45  ;;  %v8247_v55 = vld [vmem:[%s14650_s17 + $0x38] sm:$0xff]  ;;  %v8240_v53 = vld [vmem:[%s14650_s17] sm:$0xff] }
0x12e5   :  { %10714 = vmatprep.mubr.msk.f32.mxu0 %vm11369_vm0, %v14784_v6  ;;  %v6951_v39 = vcombine.low %v6942_v18, %v6949_v17  ;;  %v6917_v43 = vcombine.low %v6909_v35, %v6916_v41  ;;  %v7000_v31 = vcombine.low %v6991_v2, %v6998_v27  ;;  %v7026_v60 = vrot.slane %v9414_v30, %v13323_v13  ;;  %v8255_v17 = vld [vmem:[%s14650_s17 + $0x78] sm:$0xff]  ;;  %v8241_v2 = vld [vmem:[%s14650_s17 + $0x8] sm:$0xff]  ;;  %v9419_v38 = vld [vmem:[%s14649_s16] ss:$0 sm:$0xff] }
0x12e6   :  { %v6819_v12 = vcombine.high %v6817_v26, %v6817_v26  ;;  %v7018_v59 = vcombine.low %v6817_v26, %v6818_v52  ;;  %v6958_v34 = vrot.slane %v6950_v10, %v13323_v13  ;;  %v7033_v33 = vrot.slane %v7017_v61, %v13323_v13  ;;  %10774 = vmatpush3.msra.mxu0 %v8255_v17 }
0x12e7   :  { %v6965_v54 = vrot.slane %v6951_v39, %v13323_v13  ;;  %v6999_v40 = vcombine.low %v6977_v19, %v6984_v62  ;;  %v7014_v14 = vrot.slane %v7000_v31, %v13323_v13  ;;  %10836 = vmatpush3.msra.mxu1 %v8255_v17  ;;  %10775 = vmatprep.subr.mxu0 %v14784_v6  ;;  %v8250_v19 = vld [vmem:[%s14650_s17 + $0x50] sm:$0xff] }
0x12e8   :  { %v7019_v9 = vcombine.low %v6819_v12, %v6810_v11  ;;  %v7040_v23 = vrot.slane %v7018_v59, %v13323_v13  ;;  %10715 = vmatmul.mubr.f32.gmra.mxu0 %v6917_v43  ;;  %v7048_v42 = vcombine.low %v7026_v60, %v7033_v33  ;;  %10821 = vmatprep.subr.mxu1 %v14784_v6  ;;  %v8242_v62 = vld [vmem:[%s14650_s17 + $0x10] sm:$0xff] }
0x12e9   :  { %10717 = vmatprep.mubr.msk.f32.mxu0 %vm11369_vm0, %v14784_v6  ;;  %v6966_v22 = vcombine.low %v6958_v34, %v6965_v54  ;;  %v7007_v5 = vrot.slane %v6999_v40, %v13323_v13  ;;  %10776 = vmatpush3.msra.mxu0 %v8254_v29  ;;  %v8123_v37 = vrot.slane %v9419_v38, %v13323_v13 }
0x12ea   :  { %v7047_v58 = vrot.slane %v7019_v9, %v13323_v13  ;;  %v7056_v47 = vrot.slane %v7048_v42, %v13323_v13  ;;  %10837 = vmatpush3.msra.mxu1 %v8254_v29  ;;  %10777 = vmatprep.subr.mxu0 %v14784_v6  ;;  %v8116_v36 = vcombine.high %v9419_v38, %v9419_v38 }
0x12eb   :  { %v7015_v3 = vcombine.low %v7007_v5, %v7014_v14  ;;  %10822 = vmatprep.subr.mxu1 %v14784_v6  ;;  %10778 = vmatpush3.msra.mxu0 %v8253_v0  ;;  %v8131_v44 = vcombine.high %v8123_v37, %v8123_v37  ;;  %v14338_v11 = vrot.slane %v8123_v37, %v13323_v13 }
0x12ec   :  { %10718 = vmatmul.mubr.f32.gmra.mxu0 %v6966_v22  ;;  %v7049_v57 = vcombine.low %v7040_v23, %v7047_v58  ;;  %10838 = vmatpush3.msra.mxu1 %v8253_v0  ;;  %v8130_v30 = vrot.slane %v8116_v36, %v13323_v13 }
0x12ed   :  { %10720 = vmatprep.mubr.msk.f32.mxu0 %vm11369_vm0, %v14784_v6  ;;  %10779 = vmatprep.subr.mxu0 %v14784_v6  ;;  %v14341_v35 = vrot.slane %v8131_v44, %v13323_v13  ;;  %v14352_v31 = vcombine.high %v14338_v11, %v14338_v11 }
0x12ee   :  { %v7063_v45 = vrot.slane %v7049_v57, %v13323_v13  ;;  %10823 = vmatprep.subr.mxu1 %v14784_v6  ;;  %10780 = vmatpush3.msra.mxu0 %v8252_v16  ;;  %v14348_v43 = vrot.slane %v8130_v30, %v13323_v13 }
0x12ef   :  { %10839 = vmatpush3.msra.mxu1 %v8252_v16  ;;  %10781 = vmatprep.subr.mxu0 %v14784_v6  ;;  %v14356_v60 = vcombine.high %v14341_v35, %v14341_v35 }
0x12f0   :  { %10721 = vmatmul.mubr.f32.gmra.mxu0 %v7015_v3  ;;  %v7064_v28 = vcombine.low %v7056_v47, %v7063_v45  ;;  %10824 = vmatprep.subr.mxu1 %v14784_v6 }
0x12f1   :  { %10723 = vmatprep.mubr.msk.f32.mxu0 %vm11369_vm0, %v14784_v6  ;;  %10782 = vmatpush3.msra.mxu0 %v8251_v20 }
0x12f2   :  { %10840 = vmatpush3.msra.mxu1 %v8251_v20  ;;  %10783 = vmatprep.subr.mxu0 %v14784_v6 }
0x12f3   :  { %10825 = vmatprep.subr.mxu1 %v14784_v6  ;;  %10784 = vmatpush3.msra.mxu0 %v8250_v19 }
0x12f4   :  { %10724 = vmatmul.mubr.f32.gmra.mxu0 %v7064_v28  ;;  %10841 = vmatpush3.msra.mxu1 %v8250_v19 }
0x12f5   :  { %10805 = vmatprep.mubr.msk.f32.mxu0 %vm11369_vm0, %v14784_v6  ;;  %10785 = vmatprep.subr.mxu0 %v14784_v6 }
0x12f6   :  { %10826 = vmatprep.subr.mxu1 %v14784_v6  ;;  %10786 = vmatpush3.msra.mxu0 %v8249_v48 }
0x12f7   :  { %10842 = vmatpush3.msra.mxu1 %v8249_v48  ;;  %10787 = vmatprep.subr.mxu0 %v14784_v6 }
0x12f8   :  { %10827 = vmatprep.subr.mxu1 %v14784_v6  ;;  %10788 = vmatpush3.msra.mxu0 %v8248_v4 }
0x12f9   :  { %10843 = vmatpush3.msra.mxu1 %v8248_v4  ;;  %10789 = vmatprep.subr.mxu0 %v14784_v6 }
0x12fa   :  { %10828 = vmatprep.subr.mxu1 %v14784_v6  ;;  %10790 = vmatpush3.msra.mxu0 %v8247_v55 }
0x12fb   :  { %10844 = vmatpush3.msra.mxu1 %v8247_v55  ;;  %10791 = vmatprep.subr.mxu0 %v14784_v6 }
0x12fc   :  { %10829 = vmatprep.subr.mxu1 %v14784_v6  ;;  %10792 = vmatpush3.msra.mxu0 %v8246_v46 }
0x12fd   :  { %10845 = vmatpush3.msra.mxu1 %v8246_v46  ;;  %10793 = vmatprep.subr.mxu0 %v14784_v6 }
0x12fe   :  { %v14243_v1 = vpop.f32.mrf.mxu1  ;;  %10830 = vmatprep.subr.mxu1 %v14784_v6  ;;  %10794 = vmatpush3.msra.mxu0 %v8245_v21 }
0x12ff   :  { %10846 = vmatpush3.msra.mxu1 %v8245_v21  ;;  %10795 = vmatprep.subr.mxu0 %v14784_v6 }
0x1300   :  { %v10760_v51 = vpop.f32.mrf.mxu1  ;;  %10831 = vmatprep.subr.mxu1 %v14784_v6  ;;  %10796 = vmatpush3.msra.mxu0 %v8244_v15 }
0x1301   :  { %10847 = vmatpush3.msra.mxu1 %v8244_v15  ;;  %10797 = vmatprep.subr.mxu0 %v14784_v6 }
0x1302   :  { %v14245_v56 = vpop.f32.mrf.mxu1  ;;  %10832 = vmatprep.subr.mxu1 %v14784_v6  ;;  %10798 = vmatpush3.msra.mxu0 %v8243_v63 }
0x1303   :  { %10848 = vmatpush3.msra.mxu1 %v8243_v63  ;;  %10799 = vmatprep.subr.mxu0 %v14784_v6 }
0x1304   :  { %v10763_v7 = vpop.f32.mrf.mxu1  ;;  %10833 = vmatprep.subr.mxu1 %v14784_v6  ;;  %10800 = vmatpush3.msra.mxu0 %v8242_v62 }
0x1305   :  { %10849 = vmatpush3.msra.mxu1 %v8242_v62  ;;  %10801 = vmatprep.subr.mxu0 %v14784_v6 }
0x1306   :  { %v14247_v8 = vpop.f32.mrf.mxu1  ;;  %10834 = vmatprep.subr.mxu1 %v14784_v6  ;;  %10802 = vmatpush3.msra.mxu0 %v8241_v2 }
0x1307   :  { %10850 = vmatpush3.msra.mxu1 %v8241_v2  ;;  %10803 = vmatprep.subr.mxu0 %v14784_v6 }
0x1308   :  { %v10766_v32 = vpop.f32.mrf.mxu1  ;;  %10835 = vmatprep.subr.mxu1 %v14784_v6  ;;  %10804 = vmatpush3.msra.mxu0 %v8240_v53 }
0x1309   :  { %10851 = vmatpush3.msra.mxu1 %v8240_v53 }
0x130a   :  { %v14249_v50 = vpop.f32.mrf.mxu1 }
0x130c   :  { %v10769_v49 = vpop.f32.mrf.mxu1 }
0x130e   :  { %v14251_v25 = vpop.f32.mrf.mxu1 }
0x1310   :  { %v10772_v18 = vpop.f32.mrf.mxu1 }
0x13a4   :  { %v7136_v24 = vpop.f32.mrf.mxu0 }
0x13a5   :  { %v7797_v27 = vadd.f32 %v14243_v1, %v7136_v24 }
0x13a6   :  { %v10713_v26 = vpop.f32.mrf.mxu0 }
0x13a7   :  { %v7825_v52 = vcombine.high %v7797_v27, %v7797_v27  ;;  %v7832_v61 = vrot.slane %v7797_v27, %v13323_v13 }
0x13a8   :  { %v7141_v41 = vpop.f32.mrf.mxu0 }
0x13a9   :  { %v7839_v10 = vrot.slane %v7825_v52, %v13323_v13  ;;  %v7840_v39 = vcombine.high %v7832_v61, %v7832_v61  ;;  %v7848_v12 = vrot.slane %v7832_v61, %v13323_v13  ;;  %v7802_v59 = vadd.f32 %v14245_v56, %v7141_v41 }
0x13aa   :  { %v10716_v34 = vpop.f32.mrf.mxu0 }
0x13ab   :  { %v7841_v54 = vcombine.high %v7839_v10, %v7839_v10  ;;  %v7855_v9 = vrot.slane %v7839_v10, %v13323_v13  ;;  %v7862_v33 = vrot.slane %v7840_v39, %v13323_v13  ;;  %v7870_v23 = vcombine.high %v7848_v12, %v7848_v12 }
0x13ac   :  { %v8160_v40 = vadd.f32 %v14338_v11, %v7848_v12  ;;  %v7874_v58 = vcombine.high %v7802_v59, %v7802_v59  ;;  %v7881_v22 = vrot.slane %v7802_v59, %v13323_v13  ;;  %v7146_v14 = vpop.f32.mrf.mxu0 }
0x13ad   :  { %v7869_v5 = vrot.slane %v7841_v54, %v13323_v13  ;;  %v7871_v42 = vcombine.high %v7855_v9, %v7855_v9  ;;  %v7872_v57 = vcombine.high %v7862_v33, %v7862_v33  ;;  %v8161_v3 = vadd.f32 %v14341_v35, %v7862_v33 }
0x13ae   :  { %v8162_v45 = vadd.f32 %v14352_v31, %v7870_v23  ;;  %v8164_v47 = vadd.f32 %v14348_v43, %v7855_v9  ;;  %11065 = vtanh.f32 %v8160_v40  ;;  %v7888_v28 = vrot.slane %v7874_v58, %v13323_v13  ;;  %v10719_v1 = vpop.f32.mrf.mxu0 }
0x13af   :  { %v7873_v51 = vcombine.high %v7869_v5, %v7869_v5  ;;  %v8163_v56 = vadd.f32 %v14356_v60, %v7872_v57  ;;  %v8165_v7 = vadd.f32 %v14338_v11, %v7869_v5  ;;  %v8166_v32 = vadd.f32 %v14341_v35, %v7871_v42 }
0x13b0   :  { %11067 = vtanh.f32 %v8161_v3  ;;  %v7889_v49 = vcombine.high %v7881_v22, %v7881_v22  ;;  %v7890_v18 = vcombine.high %v7888_v28, %v7888_v28  ;;  %v7897_v17 = vrot.slane %v7881_v22, %v13323_v13  ;;  %v7151_v29 = vpop.f32.mrf.mxu0 }
0x13b1   :  { %v8167_v0 = vadd.f32 %v14352_v31, %v7873_v51  ;;  %11069 = vtanh.f32 %v8162_v45  ;;  %v7904_v16 = vrot.slane %v7888_v28, %v13323_v13  ;;  %v7807_v20 = vadd.f32 %v14247_v8, %v7146_v14 }
0x13b2   :  { %11071 = vtanh.f32 %v8163_v56  ;;  %v7911_v19 = vrot.slane %v7889_v49, %v13323_v13  ;;  %v7918_v48 = vrot.slane %v7890_v18, %v13323_v13  ;;  %v7919_v4 = vcombine.high %v7897_v17, %v7897_v17  ;;  %v10722_v55 = vpop.f32.mrf.mxu0 }
0x13b3   :  { %11073 = vtanh.f32 %v8164_v47  ;;  %v7920_v46 = vcombine.high %v7904_v16, %v7904_v16  ;;  %v8168_v21 = vadd.f32 %v14356_v60, %v7897_v17  ;;  %v8172_v53 = vadd.f32 %v14352_v31, %v7904_v16 }
0x13b4   :  { %11075 = vtanh.f32 %v8165_v7  ;;  %v7921_v15 = vcombine.high %v7911_v19, %v7911_v19  ;;  %v7922_v63 = vcombine.high %v7918_v48, %v7918_v48  ;;  %v8169_v62 = vadd.f32 %v14348_v43, %v7911_v19  ;;  %v7156_v2 = vpop.f32.mrf.mxu0 }
0x13b5   :  { %11077 = vtanh.f32 %v8166_v32  ;;  %v8170_v8 = vadd.f32 %v14338_v11, %v7919_v4  ;;  %v8173_v37 = vadd.f32 %v14356_v60, %v7918_v48  ;;  %v7923_v36 = vcombine.high %v7807_v20, %v7807_v20 }
0x13b6   :  { %11079 = vtanh.f32 %v8167_v0  ;;  %v8171_v38 = vadd.f32 %v14341_v35, %v7921_v15  ;;  %v10725_v44 = vpop.f32.mrf.mxu0  ;;  %v8174_v24 = vadd.f32 %v14348_v43, %v7920_v46  ;;  %v7930_v27 = vrot.slane %v7807_v20, %v13323_v13 }
0x13b7   :  { %11081 = vtanh.f32 %v8168_v21  ;;  %v7812_v30 = vadd.f32 %v14249_v50, %v7151_v29  ;;  %v8175_v26 = vadd.f32 %v14338_v11, %v7922_v63  ;;  %v7937_v52 = vrot.slane %v7923_v36, %v13323_v13 }
0x13b8   :  { %11083 = vtanh.f32 %v8169_v62  ;;  %v14388_v61 = vadd.f32 %v14251_v25, %v7156_v2  ;;  %v7938_v41 = vcombine.high %v7930_v27, %v7930_v27  ;;  %v7946_v10 = vrot.slane %v7930_v27, %v13323_v13 }
0x13b9   :  { %11085 = vtanh.f32 %v8170_v8  ;;  %v7972_v39 = vcombine.high %v7812_v30, %v7812_v30  ;;  %v7939_v12 = vcombine.high %v7937_v52, %v7937_v52  ;;  %v7953_v59 = vrot.slane %v7937_v52, %v13323_v13 }
0x13ba   :  { %11087 = vtanh.f32 %v8171_v38  ;;  %v7979_v34 = vrot.slane %v7812_v30, %v13323_v13  ;;  %v7960_v54 = vrot.slane %v7938_v41, %v13323_v13  ;;  %v7968_v9 = vcombine.high %v7946_v10, %v7946_v10 }
0x13bb   :  { %v14393_v50 = vpop.eup %11065  ;;  %11089 = vtanh.f32 %v8172_v53  ;;  %v8176_v25 = vadd.f32 %v14341_v35, %v7946_v10  ;;  %v7967_v33 = vrot.slane %v7939_v12, %v13323_v13  ;;  %v7969_v23 = vcombine.high %v7953_v59, %v7953_v59 }
0x13bc   :  { %11091 = vtanh.f32 %v8173_v37  ;;  %v8180_v40 = vadd.f32 %v14338_v11, %v7953_v59  ;;  %v7970_v22 = vcombine.high %v7960_v54, %v7960_v54  ;;  %v8177_v14 = vadd.f32 %v14352_v31, %v7960_v54 }
0x13bd   :  { %v14399_v58 = vpop.eup %11067  ;;  %11093 = vtanh.f32 %v8174_v24  ;;  %v8178_v5 = vadd.f32 %v14356_v60, %v7968_v9  ;;  %v7971_v57 = vcombine.high %v7967_v33, %v7967_v33  ;;  %v8181_v3 = vadd.f32 %v14341_v35, %v7967_v33 }
0x13be   :  { %v14403_v42 = vpop.eup %11069  ;;  %11095 = vtanh.f32 %v8175_v26  ;;  %v8182_v45 = vadd.f32 %v14352_v31, %v7969_v23  ;;  %v8179_v28 = vadd.f32 %v14348_v43, %v7970_v22  ;;  %v7986_v1 = vrot.slane %v7972_v39, %v13323_v13 }
0x13bf   :  { %v14407_v47 = vpop.eup %11071  ;;  %11097 = vtanh.f32 %v8176_v25  ;;  %v7987_v51 = vcombine.high %v7979_v34, %v7979_v34  ;;  %v8183_v7 = vadd.f32 %v14356_v60, %v7971_v57  ;;  %v7995_v32 = vrot.slane %v7979_v34, %v13323_v13 }
0x13c0   :  { %v14411_v56 = vpop.eup %11073  ;;  %11099 = vtanh.f32 %v8177_v14  ;;  %v8021_v49 = vcombine.high %v14388_v61, %v14388_v61  ;;  %v7988_v17 = vcombine.high %v7986_v1, %v7986_v1  ;;  %v8002_v29 = vrot.slane %v7986_v1, %v13323_v13 }
0x13c1   :  { %v14417_v18 = vpop.eup %11075  ;;  %11101 = vtanh.f32 %v8178_v5  ;;  %v8009_v0 = vrot.slane %v7987_v51, %v13323_v13  ;;  %v8017_v20 = vcombine.high %v7995_v32, %v7995_v32  ;;  %v8184_v19 = vadd.f32 %v14348_v43, %v7995_v32 }
0x13c2   :  { %v14421_v16 = vpop.eup %11077  ;;  %11103 = vtanh.f32 %v8179_v28  ;;  %v8028_v48 = vrot.slane %v14388_v61, %v13323_v13  ;;  %v8016_v55 = vrot.slane %v7988_v17, %v13323_v13  ;;  %v8018_v46 = vcombine.high %v8002_v29, %v8002_v29 }
0x13c3   :  { %v14426_v4 = vpop.eup %11079  ;;  %11105 = vtanh.f32 %v8180_v40  ;;  %v8019_v21 = vcombine.high %v8009_v0, %v8009_v0  ;;  %v8185_v63 = vadd.f32 %v14338_v11, %v8009_v0  ;;  %v8186_v62 = vadd.f32 %v14341_v35, %v8017_v20 }
0x13c4   :  { %v14429_v15 = vpop.eup %11081  ;;  %11107 = vtanh.f32 %v8181_v3  ;;  %v8188_v2 = vadd.f32 %v14356_v60, %v8002_v29  ;;  %v8020_v53 = vcombine.high %v8016_v55, %v8016_v55  ;;  %v8189_v37 = vadd.f32 %v14348_v43, %v8016_v55 }
0x13c5   :  { %v14434_v8 = vpop.eup %11083  ;;  %11109 = vtanh.f32 %v8182_v45  ;;  %v8187_v38 = vadd.f32 %v14352_v31, %v8019_v21  ;;  %v8190_v44 = vadd.f32 %v14338_v11, %v8018_v46  ;;  %v8035_v24 = vrot.slane %v8021_v49, %v13323_v13 }
0x13c6   :  { %v14438_v36 = vpop.eup %11085  ;;  %11111 = vtanh.f32 %v8183_v7  ;;  %v8036_v27 = vcombine.high %v8028_v48, %v8028_v48  ;;  %v8191_v26 = vadd.f32 %v14341_v35, %v8020_v53  ;;  %v8044_v52 = vrot.slane %v8028_v48, %v13323_v13 }
0x13c7   :  { %v11088_v30 = vpop.eup %11087  ;;  %11113 = vtanh.f32 %v8184_v19  ;;  %v8341_v61 = vcombine.low %v14393_v50, %v14399_v58  ;;  %v8037_v10 = vcombine.high %v8035_v24, %v8035_v24  ;;  %v8051_v39 = vrot.slane %v8035_v24, %v13323_v13 }
0x13c8   :  { %v11090_v41 = vpop.eup %11089  ;;  %11115 = vtanh.f32 %v8185_v63  ;;  %v8058_v12 = vrot.slane %v8036_v27, %v13323_v13  ;;  %v8066_v34 = vcombine.high %v8044_v52, %v8044_v52  ;;  %v8192_v54 = vadd.f32 %v14352_v31, %v8044_v52 }
0x13c9   :  { %v11092_v59 = vpop.eup %11091  ;;  %11117 = vtanh.f32 %v8186_v62  ;;  %v8342_v9 = vcombine.low %v14403_v42, %v14407_v47  ;;  %v8065_v33 = vrot.slane %v8037_v10, %v13323_v13  ;;  %v8067_v50 = vcombine.high %v8051_v39, %v8051_v39 }
0x13ca   :  { %v11094_v25 = vpop.eup %11093  ;;  %11119 = vtanh.f32 %v8187_v38  ;;  %v8068_v23 = vcombine.high %v8058_v12, %v8058_v12  ;;  %v8193_v58 = vadd.f32 %v14356_v60, %v8058_v12  ;;  %v8194_v22 = vadd.f32 %v14348_v43, %v8066_v34 }
0x13cb   :  { %v11096_v40 = vpop.eup %11095  ;;  %11121 = vtanh.f32 %v8188_v2  ;;  %v8196_v14 = vadd.f32 %v14341_v35, %v8051_v39  ;;  %v8069_v57 = vcombine.high %v8065_v33, %v8065_v33  ;;  %v8197_v42 = vadd.f32 %v14352_v31, %v8065_v33 }
0x13cc   :  { %v11098_v5 = vpop.eup %11097  ;;  %11123 = vtanh.f32 %v8189_v37  ;;  %v8195_v3 = vadd.f32 %v14338_v11, %v8068_v23  ;;  %v8198_v47 = vadd.f32 %v14356_v60, %v8067_v50  ;;  %v8343_v28 = vcombine.low %v14411_v56, %v14417_v18 }
0x13cd   :  { %v11100_v45 = vpop.eup %11099  ;;  %11125 = vtanh.f32 %v8190_v44  ;;  %v8344_v1 = vcombine.low %v14421_v16, %v14426_v4  ;;  %v8199_v35 = vadd.f32 %v14348_v43, %v8069_v57  ;;  %v8351_v7 = vrot.slane %v8341_v61, %v13323_v13 }
0x13ce   :  { %v11102_v51 = vpop.eup %11101  ;;  %11127 = vtanh.f32 %v8191_v26  ;;  %v8358_v11 = vrot.slane %v8342_v9, %v13323_v13  ;;  %v8365_v31 = vrot.slane %v8343_v28, %v13323_v13  ;;  %v8390_v56 = vcombine.low %v14429_v15, %v14434_v8 }
0x13cf   :  { %v11104_v32 = vpop.eup %11103  ;;  %11129 = vtanh.f32 %v8192_v54  ;;  %v8372_v60 = vrot.slane %v8344_v1, %v13323_v13  ;;  %v8391_v17 = vcombine.low %v14438_v36, %v11088_v30  ;;  %v8392_v29 = vcombine.low %v11090_v41, %v11092_v59 }
0x13d0   :  { %v11106_v49 = vpop.eup %11105  ;;  %11131 = vtanh.f32 %v8193_v58  ;;  %v8373_v18 = vcombine.low %v8351_v7, %v8358_v11  ;;  %v8393_v16 = vcombine.low %v11094_v25, %v11096_v40  ;;  %v8400_v20 = vrot.slane %v8390_v56, %v13323_v13 }
0x13d1   :  { %v11108_v43 = vpop.eup %11107  ;;  %11133 = vtanh.f32 %v8194_v22  ;;  %v8374_v0 = vcombine.low %v8365_v31, %v8372_v60  ;;  %v8407_v4 = vrot.slane %v8391_v17, %v13323_v13  ;;  %v8414_v55 = vrot.slane %v8392_v29, %v13323_v13 }
0x13d2   :  { %v11110_v19 = vpop.eup %11109  ;;  %11135 = vtanh.f32 %v8195_v3  ;;  %v8381_v48 = vrot.slane %v8373_v18, %v13323_v13  ;;  %v8421_v15 = vrot.slane %v8393_v16, %v13323_v13  ;;  %v8439_v63 = vcombine.low %v11098_v5, %v11100_v45 }
0x13d3   :  { %v11112_v46 = vpop.eup %11111  ;;  %11137 = vtanh.f32 %v8196_v14  ;;  %v8388_v21 = vrot.slane %v8374_v0, %v13323_v13  ;;  %v8422_v2 = vcombine.low %v8400_v20, %v8407_v4  ;;  %v8440_v8 = vcombine.low %v11102_v51, %v11104_v32 }
0x13d4   :  { %v11114_v62 = vpop.eup %11113  ;;  %11139 = vtanh.f32 %v8197_v42  ;;  %v8441_v53 = vcombine.low %v11106_v49, %v11108_v43  ;;  %v8423_v36 = vcombine.low %v8414_v55, %v8421_v15  ;;  %v8442_v44 = vcombine.low %v11110_v19, %v11112_v46  ;;  %v9420_v15 = vld [vmem:[%s14651_s18] ss:$0 sm:$0xff] }
0x13d5   :  { %v11116_v38 = vpop.eup %11115  ;;  %11141 = vtanh.f32 %v8198_v47  ;;  %v8389_v37 = vcombine.low %v8381_v48, %v8388_v21  ;;  %v8449_v27 = vrot.slane %v8439_v63, %v13323_v13  ;;  %v8456_v30 = vrot.slane %v8440_v8, %v13323_v13 }
0x13d6   :  { %v11118_v24 = vpop.eup %11117  ;;  %11143 = vtanh.f32 %v8199_v35  ;;  %v8430_v52 = vrot.slane %v8422_v2, %v13323_v13  ;;  %v8437_v61 = vrot.slane %v8423_v36, %v13323_v13  ;;  %v8463_v41 = vrot.slane %v8441_v53, %v13323_v13 }
0x13d7   :  { %v11120_v26 = vpop.eup %11119  ;;  %10806 = vmatmul.mubr.f32.vlgmr.msra.gmra.mxu0 %v8389_v37  ;;  %v8470_v10 = vrot.slane %v8442_v44, %v13323_v13  ;;  %v8471_v12 = vcombine.low %v8449_v27, %v8456_v30  ;;  %v8488_v59 = vcombine.low %v11114_v62, %v11116_v38  ;;  %v8269_v63 = vrot.slane %v9420_v15, %v13323_v13 }
0x13d8   :  { %v11122_v39 = vpop.eup %11121  ;;  %10808 = vmatprep.mubr.msk.f32.mxu0 %vm11369_vm0, %v14784_v6  ;;  %v8489_v34 = vcombine.low %v11118_v24, %v11120_v26  ;;  %v8438_v9 = vcombine.low %v8430_v52, %v8437_v61  ;;  %v8262_v62 = vcombine.high %v9420_v15, %v9420_v15 }
0x13d9   :  { %v11124_v54 = vpop.eup %11123  ;;  %v8472_v25 = vcombine.low %v8463_v41, %v8470_v10  ;;  %v8479_v58 = vrot.slane %v8471_v12, %v13323_v13  ;;  %v8498_v57 = vrot.slane %v8488_v59, %v13323_v13  ;;  %v8277_v2 = vcombine.high %v8269_v63, %v8269_v63 }
0x13da   :  { %v11126_v33 = vpop.eup %11125  ;;  %v8490_v50 = vcombine.low %v11122_v39, %v11124_v54  ;;  %v8505_v23 = vrot.slane %v8489_v34, %v13323_v13  ;;  %v8276_v8 = vrot.slane %v8262_v62, %v13323_v13  ;;  %v8284_v53 = vrot.slane %v8269_v63, %v13323_v13 }
0x13db   :  { %v11128_v40 = vpop.eup %11127  ;;  %10809 = vmatmul.mubr.f32.gmra.mxu0 %v8438_v9  ;;  %v8486_v22 = vrot.slane %v8472_v25, %v13323_v13 }
0x13dc   :  { %v11130_v14 = vpop.eup %11129  ;;  %10811 = vmatprep.mubr.msk.f32.mxu0 %vm11369_vm0, %v14784_v6  ;;  %v8491_v5 = vcombine.low %v11126_v33, %v11128_v40  ;;  %v8512_v47 = vrot.slane %v8490_v50, %v13323_v13  ;;  %v8520_v1 = vcombine.low %v8498_v57, %v8505_v23  ;;  %v8291_v38 = vrot.slane %v8276_v8, %v13323_v13 }
0x13dd   :  { %v11132_v3 = vpop.eup %11131  ;;  %v8487_v42 = vcombine.low %v8479_v58, %v8486_v22  ;;  %v8299_v37 = vcombine.high %v8284_v53, %v8284_v53 }
0x13de   :  { %v11134_v45 = vpop.eup %11133  ;;  %v8519_v28 = vrot.slane %v8491_v5, %v13323_v13  ;;  %v8537_v11 = vcombine.low %v11130_v14, %v11132_v3  ;;  %v8528_v56 = vrot.slane %v8520_v1, %v13323_v13  ;;  %v8593_v24 = vcombine.low %v8291_v38, %v8284_v53 }
0x13df   :  { %v11136_v51 = vpop.eup %11135  ;;  %10812 = vmatmul.mubr.f32.gmra.mxu0 %v8487_v42 }
0x13e0   :  { %v11138_v35 = vpop.eup %11137  ;;  %v8521_v7 = vcombine.low %v8512_v47, %v8519_v28  ;;  %v8538_v32 = vcombine.low %v11134_v45, %v11136_v51  ;;  %v8547_v16 = vrot.slane %v8537_v11, %v13323_v13  ;;  %v8615_v61 = vrot.slane %v8593_v24, %v13323_v13 }
0x13e1   :  { %v11140_v31 = vpop.eup %11139 }
0x13e2   :  { %v11142_v60 = vpop.eup %11141  ;;  %v8535_v49 = vrot.slane %v8521_v7, %v13323_v13  ;;  %v8539_v18 = vcombine.low %v11138_v35, %v11140_v31  ;;  %v8554_v17 = vrot.slane %v8538_v32, %v13323_v13 }
0x13e3   :  { %v11144_v29 = vpop.eup %11143 }
0x13e4   :  { %v8536_v43 = vcombine.low %v8528_v56, %v8535_v49  ;;  %v8540_v0 = vcombine.low %v11142_v60, %v11144_v29  ;;  %v8561_v20 = vrot.slane %v8539_v18, %v13323_v13  ;;  %v8569_v48 = vcombine.low %v8547_v16, %v8554_v17 }
0x13e6   :  { %10815 = vmatmul.mubr.f32.vlgmr.msra.gmra.mxu1 %v8536_v43  ;;  %v8568_v19 = vrot.slane %v8540_v0, %v13323_v13  ;;  %v8577_v55 = vrot.slane %v8569_v48, %v13323_v13 }
0x13e7   :  { %10817 = vmatprep.mubr.msk.f32.mxu1 %vm11369_vm0, %v14784_v6  ;;  %v8298_v6 = vrot.slane %v8277_v2, %v13323_v13 }
0x13e8   :  { %v8570_v4 = vcombine.low %v8561_v20, %v8568_v19 }
0x13e9   :  { %v8591_v36 = vcombine.low %v8284_v53, %v8298_v6  ;;  %v9421_v44 = vcombine.high %v8284_v53, %v8298_v6  ;;  %v8594_v27 = vcombine.low %v8298_v6, %v8299_v37  ;;  %v8300_v30 = vcombine.high %v8298_v6, %v8298_v6 }
0x13ea   :  { %v8584_v46 = vrot.slane %v8570_v4, %v13323_v13 }
0x13eb   :  { %v8601_v26 = vrot.slane %v8591_v36, %v13323_v13  ;;  %v8608_v52 = vrot.slane %v9421_v44, %v13323_v13  ;;  %v8622_v41 = vrot.slane %v8594_v27, %v13323_v13  ;;  %v8640_v10 = vcombine.low %v8300_v30, %v8291_v38 }
0x13ec   :  { %v8585_v21 = vcombine.low %v8577_v55, %v8584_v46 }
0x13ed   :  { %v8623_v39 = vcombine.low %v8601_v26, %v8608_v52  ;;  %v8624_v12 = vcombine.low %v8615_v61, %v8622_v41  ;;  %v8647_v59 = vrot.slane %v8640_v10, %v13323_v13  ;;  %v8649_v25 = vcombine.low %v8608_v52, %v8615_v61 }
0x13ee   :  { %10818 = vmatmul.mubr.f32.gmra.mxu1 %v8585_v21 }
0x13ef   :  { %v8631_v34 = vrot.slane %v8623_v39, %v13323_v13  ;;  %v14517_v54 = vrot.slane %v8624_v12, %v13323_v13  ;;  %v8648_v9 = vcombine.low %v8647_v59, %v8601_v26  ;;  %v14524_v23 = vrot.slane %v8649_v25, %v13323_v13 }
0x13f0   :  { %v8665_v58 = vcombine.low %v8622_v41, %v8647_v59 }
0x13f1   :  { %v8639_v33 = vcombine.low %v8631_v34, %v14517_v54  ;;  %v14521_v50 = vrot.slane %v8648_v9, %v13323_v13 }
0x13f2   :  { %v14530_v45 = vrot.slane %v8665_v58, %v13323_v13 }
0x13f3   :  { %v8664_v14 = vcombine.low %v14521_v50, %v14524_v23  ;;  %v8674_v18 = vcombine.low %v14517_v54, %v14521_v50 }
0x13f4   :  { %v8673_v56 = vcombine.low %v14530_v45, %v8631_v34  ;;  %v8675_v17 = vcombine.low %v14524_v23, %v14530_v45 }
0x1497   :  { %v8747_v40 = vpop.f32.mrf.mxu0 }
0x1498   :  { %v8748_v22 = vadd.f32 %v8747_v40, %v8639_v33 }
0x1499   :  { %v10807_v5 = vpop.f32.mrf.mxu0 }
0x149a   :  { %v8776_v57 = vcombine.high %v8748_v22, %v8748_v22  ;;  %v8783_v3 = vrot.slane %v8748_v22, %v13323_v13 }
0x149b   :  { %v8752_v42 = vpop.f32.mrf.mxu0 }
0x149c   :  { %v8790_v47 = vrot.slane %v8776_v57, %v13323_v13  ;;  %v8791_v28 = vcombine.high %v8783_v3, %v8783_v3  ;;  %v8753_v1 = vadd.f32 %v8752_v42, %v8664_v14  ;;  %v8799_v51 = vrot.slane %v8783_v3, %v13323_v13 }
0x149d   :  { %v10810_v35 = vpop.f32.mrf.mxu0 }
0x149e   :  { %v8792_v7 = vcombine.high %v8790_v47, %v8790_v47  ;;  %v8806_v11 = vrot.slane %v8790_v47, %v13323_v13  ;;  %v8813_v32 = vrot.slane %v8791_v28, %v13323_v13  ;;  %v8825_v31 = vcombine.high %v8753_v1, %v8753_v1 }
0x149f   :  { %v8832_v60 = vrot.slane %v8753_v1, %v13323_v13  ;;  %v8757_v49 = vpop.f32.mrf.mxu0 }
0x14a0   :  { %v8820_v29 = vrot.slane %v8792_v7, %v13323_v13  ;;  %v8822_v43 = vcombine.high %v8806_v11, %v8806_v11  ;;  %v9021_v0 = vcombine.low %v8799_v51, %v8813_v32  ;;  %v9422_v16 = vcombine.high %v8799_v51, %v8813_v32 }
0x14a1   :  { %v9043_v20 = vrot.slane %v8806_v11, %v13323_v13  ;;  %v8839_v19 = vrot.slane %v8825_v31, %v13323_v13  ;;  %v8840_v48 = vcombine.high %v8832_v60, %v8832_v60  ;;  %v8848_v4 = vrot.slane %v8832_v60, %v13323_v13  ;;  %v10813_v55 = vpop.f32.mrf.mxu0 }
0x14a2   :  { %v9029_v46 = vrot.slane %v9021_v0, %v13323_v13  ;;  %v9036_v21 = vrot.slane %v9422_v16, %v13323_v13  ;;  %v9060_v15 = vcombine.low %v8820_v29, %v8822_v43  ;;  %v8824_v63 = vcombine.high %v8820_v29, %v8820_v29 }
0x14a3   :  { %v9058_v62 = vrot.slane %v9043_v20, %v13323_v13  ;;  %v8841_v2 = vcombine.high %v8839_v19, %v8839_v19  ;;  %v8855_v8 = vrot.slane %v8839_v19, %v13323_v13  ;;  %v8862_v53 = vrot.slane %v8840_v48, %v13323_v13 }
0x14a4   :  { %v9044_v6 = vcombine.low %v9029_v46, %v9036_v21  ;;  %v9061_v38 = vcombine.low %v8824_v63, %v8848_v4  ;;  %v9068_v37 = vrot.slane %v9060_v15, %v13323_v13  ;;  %v8758_v36 = vadd.f32 %v8757_v49, %v8673_v56 }
0x14a5   :  { %v8869_v44 = vrot.slane %v8841_v2, %v13323_v13  ;;  %v8871_v24 = vcombine.high %v8855_v8, %v8855_v8  ;;  %v9082_v27 = vrot.slane %v8862_v53, %v13323_v13  ;;  %v9423_v30 = vcombine.high %v8848_v4, %v8862_v53 }
0x14a6   :  { %v9051_v26 = vrot.slane %v9044_v6, %v13323_v13  ;;  %v9075_v52 = vrot.slane %v9061_v38, %v13323_v13  ;;  %v8874_v61 = vcombine.high %v8758_v36, %v8758_v36  ;;  %v8881_v41 = vrot.slane %v8758_v36, %v13323_v13  ;;  %v8762_v10 = vpop.f32.mrf.mxu1 }
0x14a7   :  { %v9097_v39 = vrot.slane %v9082_v27, %v13323_v13  ;;  %v9100_v12 = vcombine.low %v8855_v8, %v8869_v44  ;;  %v9107_v59 = vrot.slane %v9423_v30, %v13323_v13  ;;  %v9121_v34 = vrot.slane %v8871_v24, %v13323_v13 }
0x14a8   :  { %v9059_v54 = vcombine.low %v9051_v26, %v9058_v62  ;;  %v9083_v9 = vcombine.low %v9068_v37, %v9075_v52  ;;  %v8873_v25 = vcombine.high %v8869_v44, %v8869_v44  ;;  %v8888_v33 = vrot.slane %v8874_v61, %v13323_v13  ;;  %v10816_v50 = vpop.f32.mrf.mxu1 }
0x14a9   :  { %v9114_v40 = vrot.slane %v9100_v12, %v13323_v13  ;;  %v9136_v58 = vrot.slane %v9121_v34, %v13323_v13  ;;  %v8889_v22 = vcombine.high %v8881_v41, %v8881_v41  ;;  %v8897_v14 = vrot.slane %v8881_v41, %v13323_v13 }
0x14aa   :  { %9341 = vst [vmem:[%s14652_s19] sm:$0x1f] %v9059_v54  ;;  %v9090_v5 = vrot.slane %v9083_v9, %v13323_v13  ;;  %v8890_v57 = vcombine.high %v8888_v33, %v8888_v33  ;;  %v8904_v3 = vrot.slane %v8888_v33, %v13323_v13  ;;  %v8763_v42 = vadd.f32 %v8762_v10, %v8674_v18 }
0x14ab   :  { %v9122_v47 = vcombine.low %v9107_v59, %v9114_v40  ;;  %v8911_v28 = vrot.slane %v8889_v22, %v13323_v13  ;;  %v8919_v1 = vcombine.high %v8897_v14, %v8897_v14  ;;  %v9138_v51 = vcombine.low %v8873_v25, %v8897_v14 }
0x14ac   :  { %v9098_v35 = vcombine.low %v9090_v5, %v9097_v39  ;;  %v8918_v7 = vrot.slane %v8890_v57, %v13323_v13  ;;  %v8923_v11 = vcombine.high %v8763_v42, %v8763_v42  ;;  %v8930_v32 = vrot.slane %v8763_v42, %v13323_v13 }
0x14ad   :  { %v9129_v31 = vrot.slane %v9122_v47, %v13323_v13  ;;  %v8921_v60 = vcombine.high %v8911_v28, %v8911_v28  ;;  %v9139_v56 = vcombine.low %v8911_v28, %v8919_v1  ;;  %v9146_v49 = vrot.slane %v9138_v51, %v13323_v13 }
0x14ae   :  { %9342 = vst [vmem:[%s14652_s19 + $0x8] sm:$0x1f] %v9098_v35  ;;  %v9177_v18 = vcombine.low %v8904_v3, %v8918_v7  ;;  %v9424_v29 = vcombine.high %v8904_v3, %v8918_v7  ;;  %v8937_v43 = vrot.slane %v8923_v11, %v13323_v13  ;;  %v8938_v0 = vcombine.high %v8930_v32, %v8930_v32  ;;  %v8767_v16 = vpop.f32.mrf.mxu1 }
0x14af   :  { %v9137_v20 = vcombine.low %v9129_v31, %v9136_v58  ;;  %v9153_v19 = vrot.slane %v9139_v56, %v13323_v13  ;;  %v9160_v48 = vrot.slane %v8921_v60, %v13323_v13  ;;  %v8946_v4 = vrot.slane %v8930_v32, %v13323_v13 }
0x14b0   :  { %v9185_v55 = vrot.slane %v9177_v18, %v13323_v13  ;;  %v9192_v46 = vrot.slane %v9424_v29, %v13323_v13  ;;  %v8939_v21 = vcombine.high %v8937_v43, %v8937_v43  ;;  %v10819_v15 = vpop.f32.mrf.mxu1  ;;  %v8953_v62 = vrot.slane %v8937_v43, %v13323_v13 }
0x14b1   :  { %9343 = vst [vmem:[%s14652_s19 + $0x10] sm:$0x1f] %v9137_v20  ;;  %v9161_v63 = vcombine.low %v9146_v49, %v9153_v19  ;;  %v8960_v2 = vrot.slane %v8938_v0, %v13323_v13  ;;  %v8968_v8 = vcombine.high %v8946_v4, %v8946_v4  ;;  %v9175_v53 = vrot.slane %v9160_v48, %v13323_v13 }
0x14b2   :  { %v9200_v6 = vcombine.low %v9185_v55, %v9192_v46  ;;  %v9199_v38 = vrot.slane %v8946_v4, %v13323_v13  ;;  %v8768_v37 = vadd.f32 %v8767_v16, %v8675_v17  ;;  %v8967_v44 = vrot.slane %v8939_v21, %v13323_v13 }
0x14b3   :  { %v9168_v36 = vrot.slane %v9161_v63, %v13323_v13  ;;  %v8970_v24 = vcombine.high %v8960_v2, %v8960_v2  ;;  %v9216_v27 = vcombine.low %v8960_v2, %v8968_v8 }
0x14b4   :  { %v9207_v30 = vrot.slane %v9200_v6, %v13323_v13  ;;  %v9214_v26 = vrot.slane %v9199_v38, %v13323_v13  ;;  %v8972_v41 = vcombine.high %v8768_v37, %v8768_v37  ;;  %v8979_v39 = vrot.slane %v8768_v37, %v13323_v13 }
0x14b5   :  { %v9176_v52 = vcombine.low %v9168_v36, %v9175_v53  ;;  %v9217_v61 = vcombine.low %v8970_v24, %v8953_v62  ;;  %v9224_v23 = vrot.slane %v9216_v27, %v13323_v13  ;;  %v9238_v17 = vrot.slane %v8967_v44, %v13323_v13 }
0x14b6   :  { %v9215_v10 = vcombine.low %v9207_v30, %v9214_v26  ;;  %v8986_v12 = vrot.slane %v8972_v41, %v13323_v13  ;;  %v8987_v59 = vcombine.high %v8979_v39, %v8979_v39  ;;  %v8995_v34 = vrot.slane %v8979_v39, %v13323_v13 }
0x14b7   :  { %9344 = vst [vmem:[%s14652_s19 + $0x18] sm:$0x1f] %v9176_v52  ;;  %v9231_v45 = vrot.slane %v9217_v61, %v13323_v13  ;;  %v9425_v33 = vcombine.high %v8953_v62, %v8967_v44  ;;  %v9253_v22 = vrot.slane %v9238_v17, %v13323_v13 }
0x14b8   :  { %9345 = vst [vmem:[%s14652_s19 + $0x20] sm:$0x1f] %v9215_v10  ;;  %v8988_v9 = vcombine.high %v8986_v12, %v8986_v12  ;;  %v9002_v25 = vrot.slane %v8986_v12, %v13323_v13  ;;  %v9009_v50 = vrot.slane %v8987_v59, %v13323_v13  ;;  %v9017_v40 = vcombine.high %v8995_v34, %v8995_v34 }
0x14b9   :  { %v9239_v54 = vcombine.low %v9224_v23, %v9231_v45  ;;  %v9263_v1 = vrot.slane %v9425_v33, %v13323_v13 }
0x14ba   :  { %v9016_v14 = vrot.slane %v8988_v9, %v13323_v13  ;;  %v9018_v5 = vcombine.high %v9002_v25, %v9002_v25  ;;  %v9019_v57 = vcombine.high %v9009_v50, %v9009_v50  ;;  %v9256_v3 = vcombine.low %v8995_v34, %v9009_v50 }
0x14bb   :  { %v9246_v58 = vrot.slane %v9239_v54, %v13323_v13  ;;  %v9277_v35 = vrot.slane %v9017_v40, %v13323_v13 }
0x14bc   :  { %v9020_v47 = vcombine.high %v9016_v14, %v9016_v14  ;;  %v9295_v28 = vcombine.low %v9016_v14, %v9018_v5  ;;  %v9270_v51 = vrot.slane %v9256_v3, %v13323_v13  ;;  %v9294_v7 = vcombine.low %v9019_v57, %v9002_v25 }
0x14bd   :  { %v9254_v42 = vcombine.low %v9246_v58, %v9253_v22  ;;  %v9292_v49 = vrot.slane %v9277_v35, %v13323_v13 }
0x14be   :  { %v9309_v11 = vrot.slane %v9295_v28, %v13323_v13  ;;  %v9278_v32 = vcombine.low %v9263_v1, %v9270_v51  ;;  %v9302_v31 = vrot.slane %v9294_v7, %v13323_v13  ;;  %v9316_v60 = vrot.slane %v9020_v47, %v13323_v13 }
0x14bf   :  { %9346 = vst [vmem:[%s14652_s19 + $0x28] sm:$0x1f] %v9254_v42 }
0x14c0   :  { %v9285_v56 = vrot.slane %v9278_v32, %v13323_v13  ;;  %v9317_v18 = vcombine.low %v9302_v31, %v9309_v11  ;;  %v9331_v0 = vrot.slane %v9316_v60, %v13323_v13 }
0x14c2   :  { %v9293_v29 = vcombine.low %v9285_v56, %v9292_v49  ;;  %v9324_v43 = vrot.slane %v9317_v18, %v13323_v13 }
0x14c4   :  { %v9332_v16 = vcombine.low %v9324_v43, %v9331_v0  ;;  %9347 = vst [vmem:[%s14652_s19 + $0x30] sm:$0x1f] %v9293_v29 }
0x14c6   :  { %9348 = vst [vmem:[%s14652_s19 + $0x38] sm:$0x1f] %v9332_v16 }
0x14c7   :  { %9357 = vsyncpa [#allocation3], 1 }
0x14c8   :  { %9358 = vsyncpa [#allocation5], 1 }
0x14c9   :  { %9359 = vsyncpa [#allocation8], 1 }
0x14ca   :  { %9360 = vsyncpa [#allocation11], 1 }

</bundles_post_ra>
